<compile_context>
chip_gen: v5e
topology: v5e:2x2
jax: 0.10.0
libtpu: 0.0.40
codegen_flags: <defaults>
</compile_context>

<pallas_src>
import functools

import jax
import jax.numpy as jnp
from jax import lax
from jax.experimental import pallas as pl
from jax.experimental.pallas import tpu as pltpu

EPS = 1e-5


# ---------------------------------------------------------------------------
# Kernels
# ---------------------------------------------------------------------------

def _linear_bn_relu_kernel(x_ref, w_ref, g_ref, be_ref, o_ref, acc_ref):
    """y = relu(batchnorm(x @ W)) for one [B, tn] output-feature tile.

    grid = (n_tiles, k_tiles); K is the reduction axis (axis 1).
    """
    k = pl.program_id(1)

    @pl.when(k == 0)
    def _():
        acc_ref[...] = jnp.zeros_like(acc_ref)

    acc_ref[...] += jnp.dot(x_ref[...], w_ref[...],
                            preferred_element_type=jnp.float32)

    @pl.when(k == pl.num_programs(1) - 1)
    def _():
        h = acc_ref[...]                                    # f32 [B, tn]
        # Training-mode BatchNorm1d: batch statistics, biased variance.
        mean = jnp.mean(h, axis=0, keepdims=True)
        var = jnp.mean((h - mean) * (h - mean), axis=0, keepdims=True)
        h = (h - mean) * lax.rsqrt(var + EPS)
        h = h * g_ref[...] + be_ref[...]
        o_ref[...] = jnp.maximum(h, 0.0).astype(o_ref.dtype)


def _linear_bias_kernel(x_ref, w_ref, b_ref, o_ref, acc_ref):
    """y = x @ W + b for one [B, tn] output-feature tile (final layer)."""
    k = pl.program_id(1)

    @pl.when(k == 0)
    def _():
        acc_ref[...] = jnp.zeros_like(acc_ref)

    acc_ref[...] += jnp.dot(x_ref[...], w_ref[...],
                            preferred_element_type=jnp.float32)

    @pl.when(k == pl.num_programs(1) - 1)
    def _():
        o_ref[...] = (acc_ref[...] + b_ref[...]).astype(o_ref.dtype)


# ---------------------------------------------------------------------------
# Layer wrapper
# ---------------------------------------------------------------------------

def _pick_tile(dim, cap):
    """Largest divisor of `dim` that is a multiple of 128 and <= cap, else dim."""
    if dim <= cap:
        return dim
    t = cap - cap % 128
    while t >= 128:
        if dim % t == 0:
            return t
        t -= 128
    return dim  # fall back to a single full-extent tile


def _linear_layer(x, w, *, gamma=None, beta=None, bias=None,
                  tn_cap=512, tk_cap=512, out_dtype=jnp.float32):
    """One projector layer as a tiled pallas_call.

    x: [B, K] bf16, w: [K, N] bf16.  gamma/beta (f32) -> BN+ReLU epilogue;
    bias (f32) -> plain linear epilogue.
    """
    B, K = x.shape
    K2, N = w.shape
    assert K == K2

    tn = _pick_tile(N, tn_cap)
    tk = _pick_tile(K, tk_cap)
    grid = (N // tn, K // tk)               # reduction axis last

    x_spec = pl.BlockSpec((B, tk), lambda j, k: (0, k))
    w_spec = pl.BlockSpec((tk, tn), lambda j, k: (k, j))
    vec_spec = pl.BlockSpec((1, tn), lambda j, k: (0, j))
    out_spec = pl.BlockSpec((B, tn), lambda j, k: (0, j))   # lane-dense, resident over k

    compiler_params = pltpu.CompilerParams(
        dimension_semantics=("parallel", "arbitrary"),
        vmem_limit_bytes=64 * 1024 * 1024,
    )
    scratch = [pltpu.VMEM((B, tn), jnp.float32)]            # f32 accumulator

    if gamma is not None:
        return pl.pallas_call(
            _linear_bn_relu_kernel,
            out_shape=jax.ShapeDtypeStruct((B, N), out_dtype),
            grid=grid,
            in_specs=[x_spec, w_spec, vec_spec, vec_spec],
            out_specs=out_spec,
            scratch_shapes=scratch,
            compiler_params=compiler_params,
        )(x, w, gamma, beta)
    else:
        return pl.pallas_call(
            _linear_bias_kernel,
            out_shape=jax.ShapeDtypeStruct((B, N), out_dtype),
            grid=grid,
            in_specs=[x_spec, w_spec, vec_spec],
            out_specs=out_spec,
            scratch_shapes=scratch,
            compiler_params=compiler_params,
        )(x, w, bias)


# ---------------------------------------------------------------------------
# Full projector forward
# ---------------------------------------------------------------------------

@jax.jit
def projector_forward(x, params):
    """x: [B, D] float32.  Returns [B, P] float32."""
    bf16 = jnp.bfloat16
    # Layer 1: Linear (bias dropped; cancelled by BN) + BN + ReLU
    h = _linear_layer(x.astype(bf16), params["w1"].astype(bf16),
                      gamma=params["g1"], beta=params["be1"])
    # Layer 2: Linear (bias dropped) + BN + ReLU
    h = _linear_layer(h.astype(bf16), params["w2"].astype(bf16),
                      gamma=params["g2"], beta=params["be2"])
    # Layer 3: Linear + bias
    return _linear_layer(h.astype(bf16), params["w3"].astype(bf16),
                         bias=params["b3"])


def init_params(key, D, proj_dim):
    """Deterministic synthetic init (PyTorch-style uniform fan-in bounds).

    Linear weights are stored pre-transposed as [in, out].  b1/b2 are not
    created: a bias immediately before BatchNorm is a mathematical no-op.
    """
    ks = jax.random.split(key, 6)

    def linear_w(kw, fan_in, fan_out):
        bound = 1.0 / jnp.sqrt(fan_in)
        return jax.random.uniform(kw, (fan_in, fan_out), jnp.float32,
                                  -bound, bound)

    w1 = linear_w(ks[0], D, proj_dim)
    w2 = linear_w(ks[2], proj_dim, proj_dim)
    w3 = linear_w(ks[4], proj_dim, proj_dim)
    b3 = jax.random.uniform(ks[5], (1, proj_dim), jnp.float32,
                            -1.0 / jnp.sqrt(proj_dim), 1.0 / jnp.sqrt(proj_dim))

    ones = jnp.ones((1, proj_dim), jnp.float32)
    zeros = jnp.zeros((1, proj_dim), jnp.float32)

    return {
        "w1": w1, "g1": ones, "be1": zeros,
        "w2": w2, "g2": ones, "be2": zeros,
        "w3": w3, "b3": b3,
    }


def projector_reference(x, params):
    """Plain-JAX reference mirroring the kernel's precision (bf16 matmul
    operands, f32 accumulation / BN math)."""
    def mm(a, w):
        return jnp.dot(a.astype(jnp.bfloat16), w.astype(jnp.bfloat16),
                       preferred_element_type=jnp.float32)

    def bn_relu(h, g, be):
        m = h.mean(0, keepdims=True)
        v = ((h - m) ** 2).mean(0, keepdims=True)
        return jnp.maximum((h - m) / jnp.sqrt(v + EPS) * g + be, 0.0)

    h = bn_relu(mm(x, params["w1"]), params["g1"], params["be1"])
    h = bn_relu(mm(h, params["w2"]), params["g2"], params["be2"])
    return mm(h, params["w3"]) + params["b3"]


if __name__ == "__main__":
    # MXU/tile-friendly shapes: batch and feature dims are multiples of 128,
    # proj_dim = 512 (the module's default).
    B, D, PROJ = 256, 128, 512

    key = jax.random.PRNGKey(0)
    kx, kp = jax.random.split(key)
    x = jax.random.normal(kx, (B, D), jnp.float32)
    params = init_params(kp, D, PROJ)

    out = projector_forward(x, params)
    out = jax.block_until_ready(out)

    ref = projector_reference(x, params)
    assert out.shape == (B, PROJ), out.shape
    assert jnp.allclose(out, ref, atol=1e-2, rtol=1e-2), (
        float(jnp.max(jnp.abs(out - ref)))
    )

    print("KERNEL_OK")
</pallas_src>

<mosaic_0001>
module attributes {stable_mosaic.version = 11 : i64} {
  func.func @_linear_bn_relu_kernel(%arg0: i32, %arg1: i32, %arg2: memref<256x128xbf16, #tpu.memory_space<vmem>>, %arg3: memref<128x512xbf16, #tpu.memory_space<vmem>>, %arg4: memref<1x512xf32, #tpu.memory_space<vmem>>, %arg5: memref<1x512xf32, #tpu.memory_space<vmem>>, %arg6: memref<256x512xf32, #tpu.memory_space<vmem>>, %arg7: memref<256x512xf32, #tpu.memory_space<vmem>>) attributes {dimension_semantics = [#tpu.dimension_semantics<parallel>, #tpu.dimension_semantics<arbitrary>], iteration_bounds = array<i64: 1, 1>, scalar_prefetch = 0 : i64, scratch_operands = 1 : i64, tpu.core_type = #tpu.core_type<tc>, window_params = [{transform_indices = @transform_0, window_bounds = array<i64: 256, 128>}, {transform_indices = @transform_1, window_bounds = array<i64: 128, 512>}, {transform_indices = @transform_2, window_bounds = array<i64: 1, 512>}, {transform_indices = @transform_3, window_bounds = array<i64: 1, 512>}, {transform_indices = @transform_4, window_bounds = array<i64: 256, 512>}]} {
    %c0_i32 = arith.constant 0 : i32
    %0 = arith.cmpi eq, %arg1, %c0_i32 : i32
    %1 = arith.extui %0 : i1 to i32
    %c0_i32_0 = arith.constant 0 : i32
    %2 = arith.cmpi ne, %1, %c0_i32_0 : i32
    scf.if %2 {
      %cst_10 = arith.constant 0.000000e+00 : f32
      %12 = vector.broadcast %cst_10 : f32 to vector<256x512xf32>
      %c0_11 = arith.constant 0 : index
      %c0_12 = arith.constant 0 : index
      %13 = vector.load %arg7[%c0_11, %c0_12] : memref<256x512xf32, #tpu.memory_space<vmem>>, vector<256x512xf32>
      tpu.vector_store %arg7[%c0_11, %c0_12], %12 {strides = array<i32>} : memref<256x512xf32, #tpu.memory_space<vmem>>, vector<256x512xf32>,
    } else {
    }
    %c0 = arith.constant 0 : index
    %c0_1 = arith.constant 0 : index
    %3 = vector.load %arg7[%c0, %c0_1] : memref<256x512xf32, #tpu.memory_space<vmem>>, vector<256x512xf32>
    %c0_2 = arith.constant 0 : index
    %c0_3 = arith.constant 0 : index
    %4 = vector.load %arg2[%c0_2, %c0_3] : memref<256x128xbf16, #tpu.memory_space<vmem>>, vector<256x128xbf16>
    %c0_4 = arith.constant 0 : index
    %c0_5 = arith.constant 0 : index
    %5 = vector.load %arg3[%c0_4, %c0_5] : memref<128x512xbf16, #tpu.memory_space<vmem>>, vector<128x512xbf16>
    %cst = arith.constant dense<0.000000e+00> : vector<256x512xf32>
    %6 = tpu.matmul %4, %5, %cst {dimension_numbers = #tpu.dot_dimension_numbers<[1], [0], [0], [1], [0, 0, 1, 1], [], []>} : vector<256x128xbf16>, vector<128x512xbf16>, vector<256x512xf32> -> vector<256x512xf32>
    %7 = arith.addf %3, %6 : vector<256x512xf32>
    %c0_6 = arith.constant 0 : index
    %c0_7 = arith.constant 0 : index
    %8 = vector.load %arg7[%c0_6, %c0_7] : memref<256x512xf32, #tpu.memory_space<vmem>>, vector<256x512xf32>
    tpu.vector_store %arg7[%c0_6, %c0_7], %7 {strides = array<i32>} : memref<256x512xf32, #tpu.memory_space<vmem>>, vector<256x512xf32>,
    %c0_i32_8 = arith.constant 0 : i32
    %9 = arith.cmpi eq, %arg1, %c0_i32_8 : i32
    %10 = arith.extui %9 : i1 to i32
    %c0_i32_9 = arith.constant 0 : i32
    %11 = arith.cmpi ne, %10, %c0_i32_9 : i32
    scf.if %11 {
      %c0_10 = arith.constant 0 : index
      %c0_11 = arith.constant 0 : index
      %12 = vector.load %arg7[%c0_10, %c0_11] : memref<256x512xf32, #tpu.memory_space<vmem>>, vector<256x512xf32>
      %cst_12 = arith.constant dense<0.000000e+00> : vector<512xf32>
      %13 = vector.multi_reduction <add>, %12, %cst_12 [0] : vector<256x512xf32> to vector<512xf32>
      %14 = vector.shape_cast %13 : vector<512xf32> to vector<1x512xf32>
      %cst_13 = arith.constant 2.560000e+02 : f32
      %15 = vector.broadcast %cst_13 : f32 to vector<1x512xf32>
      %16 = arith.divf %14, %15 : vector<1x512xf32>
      %17 = vector.broadcast %16 : vector<1x512xf32> to vector<256x512xf32>
      %18 = arith.subf %12, %17 : vector<256x512xf32>
      %19 = vector.broadcast %16 : vector<1x512xf32> to vector<256x512xf32>
      %20 = arith.subf %12, %19 : vector<256x512xf32>
      %21 = arith.mulf %18, %20 : vector<256x512xf32>
      %cst_14 = arith.constant dense<0.000000e+00> : vector<512xf32>
      %22 = vector.multi_reduction <add>, %21, %cst_14 [0] : vector<256x512xf32> to vector<512xf32>
      %23 = vector.shape_cast %22 : vector<512xf32> to vector<1x512xf32>
      %cst_15 = arith.constant 2.560000e+02 : f32
      %24 = vector.broadcast %cst_15 : f32 to vector<1x512xf32>
      %25 = arith.divf %23, %24 : vector<1x512xf32>
      %26 = vector.broadcast %16 : vector<1x512xf32> to vector<256x512xf32>
      %27 = arith.subf %12, %26 : vector<256x512xf32>
      %cst_16 = arith.constant 9.99999974E-6 : f32
      %28 = vector.broadcast %cst_16 : f32 to vector<1x512xf32>
      %29 = arith.addf %25, %28 : vector<1x512xf32>
      %30 = math.rsqrt %29 : vector<1x512xf32>
      %31 = vector.broadcast %30 : vector<1x512xf32> to vector<256x512xf32>
      %32 = arith.mulf %27, %31 : vector<256x512xf32>
      %c0_17 = arith.constant 0 : index
      %c0_18 = arith.constant 0 : index
      %33 = vector.load %arg4[%c0_17, %c0_18] : memref<1x512xf32, #tpu.memory_space<vmem>>, vector<1x512xf32>
      %34 = vector.broadcast %33 : vector<1x512xf32> to vector<256x512xf32>
      %35 = arith.mulf %32, %34 : vector<256x512xf32>
      %c0_19 = arith.constant 0 : index
      %c0_20 = arith.constant 0 : index
      %36 = vector.load %arg5[%c0_19, %c0_20] : memref<1x512xf32, #tpu.memory_space<vmem>>, vector<1x512xf32>
      %37 = vector.broadcast %36 : vector<1x512xf32> to vector<256x512xf32>
      %38 = arith.addf %35, %37 : vector<256x512xf32>
      %cst_21 = arith.constant 0.000000e+00 : f32
      %39 = vector.broadcast %cst_21 : f32 to vector<256x512xf32>
      %40 = arith.maximumf %38, %39 : vector<256x512xf32>
      %c0_22 = arith.constant 0 : index
      %c0_23 = arith.constant 0 : index
      %41 = vector.load %arg6[%c0_22, %c0_23] : memref<256x512xf32, #tpu.memory_space<vmem>>, vector<256x512xf32>
      tpu.vector_store %arg6[%c0_22, %c0_23], %40 {strides = array<i32>} : memref<256x512xf32, #tpu.memory_space<vmem>>, vector<256x512xf32>,
    } else {
    }
    return
  }
  func.func @transform_0(%arg0: i32, %arg1: i32) -> (i32, i32) {
    %c0_i32 = arith.constant 0 : i32
    %c0_i32_0 = arith.constant 0 : i32
    return %c0_i32, %arg1 : i32, i32
  }
  func.func @transform_1(%arg0: i32, %arg1: i32) -> (i32, i32) {
    %c0_i32 = arith.constant 0 : i32
    return %arg1, %arg0 : i32, i32
  }
  func.func @transform_2(%arg0: i32, %arg1: i32) -> (i32, i32) {
    %c0_i32 = arith.constant 0 : i32
    %c0_i32_0 = arith.constant 0 : i32
    return %c0_i32, %arg0 : i32, i32
  }
  func.func @transform_3(%arg0: i32, %arg1: i32) -> (i32, i32) {
    %c0_i32 = arith.constant 0 : i32
    %c0_i32_0 = arith.constant 0 : i32
    return %c0_i32, %arg0 : i32, i32
  }
  func.func @transform_4(%arg0: i32, %arg1: i32) -> (i32, i32) {
    %c0_i32 = arith.constant 0 : i32
    %c0_i32_0 = arith.constant 0 : i32
    return %c0_i32, %arg0 : i32, i32
  }
}

module attributes {stable_mosaic.version = 11 : i64} {
  func.func @_linear_bias_kernel(%arg0: i32, %arg1: i32, %arg2: memref<256x512xbf16, #tpu.memory_space<vmem>>, %arg3: memref<512x512xbf16, #tpu.memory_space<vmem>>, %arg4: memref<1x512xf32, #tpu.memory_space<vmem>>, %arg5: memref<256x512xf32, #tpu.memory_space<vmem>>, %arg6: memref<256x512xf32, #tpu.memory_space<vmem>>) attributes {dimension_semantics = [#tpu.dimension_semantics<parallel>, #tpu.dimension_semantics<arbitrary>], iteration_bounds = array<i64: 1, 1>, scalar_prefetch = 0 : i64, scratch_operands = 1 : i64, tpu.core_type = #tpu.core_type<tc>, window_params = [{transform_indices = @transform_0, window_bounds = array<i64: 256, 512>}, {transform_indices = @transform_1, window_bounds = array<i64: 512, 512>}, {transform_indices = @transform_2, window_bounds = array<i64: 1, 512>}, {transform_indices = @transform_3, window_bounds = array<i64: 256, 512>}]} {
    %c0_i32 = arith.constant 0 : i32
    %0 = arith.cmpi eq, %arg1, %c0_i32 : i32
    %1 = arith.extui %0 : i1 to i32
    %c0_i32_0 = arith.constant 0 : i32
    %2 = arith.cmpi ne, %1, %c0_i32_0 : i32
    scf.if %2 {
      %cst_10 = arith.constant 0.000000e+00 : f32
      %12 = vector.broadcast %cst_10 : f32 to vector<256x512xf32>
      %c0_11 = arith.constant 0 : index
      %c0_12 = arith.constant 0 : index
      %13 = vector.load %arg6[%c0_11, %c0_12] : memref<256x512xf32, #tpu.memory_space<vmem>>, vector<256x512xf32>
      tpu.vector_store %arg6[%c0_11, %c0_12], %12 {strides = array<i32>} : memref<256x512xf32, #tpu.memory_space<vmem>>, vector<256x512xf32>,
    } else {
    }
    %c0 = arith.constant 0 : index
    %c0_1 = arith.constant 0 : index
    %3 = vector.load %arg6[%c0, %c0_1] : memref<256x512xf32, #tpu.memory_space<vmem>>, vector<256x512xf32>
    %c0_2 = arith.constant 0 : index
    %c0_3 = arith.constant 0 : index
    %4 = vector.load %arg2[%c0_2, %c0_3] : memref<256x512xbf16, #tpu.memory_space<vmem>>, vector<256x512xbf16>
    %c0_4 = arith.constant 0 : index
    %c0_5 = arith.constant 0 : index
    %5 = vector.load %arg3[%c0_4, %c0_5] : memref<512x512xbf16, #tpu.memory_space<vmem>>, vector<512x512xbf16>
    %cst = arith.constant dense<0.000000e+00> : vector<256x512xf32>
    %6 = tpu.matmul %4, %5, %cst {dimension_numbers = #tpu.dot_dimension_numbers<[1], [0], [0], [1], [0, 0, 1, 1], [], []>} : vector<256x512xbf16>, vector<512x512xbf16>, vector<256x512xf32> -> vector<256x512xf32>
    %7 = arith.addf %3, %6 : vector<256x512xf32>
    %c0_6 = arith.constant 0 : index
    %c0_7 = arith.constant 0 : index
    %8 = vector.load %arg6[%c0_6, %c0_7] : memref<256x512xf32, #tpu.memory_space<vmem>>, vector<256x512xf32>
    tpu.vector_store %arg6[%c0_6, %c0_7], %7 {strides = array<i32>} : memref<256x512xf32, #tpu.memory_space<vmem>>, vector<256x512xf32>,
    %c0_i32_8 = arith.constant 0 : i32
    %9 = arith.cmpi eq, %arg1, %c0_i32_8 : i32
    %10 = arith.extui %9 : i1 to i32
    %c0_i32_9 = arith.constant 0 : i32
    %11 = arith.cmpi ne, %10, %c0_i32_9 : i32
    scf.if %11 {
      %c0_10 = arith.constant 0 : index
      %c0_11 = arith.constant 0 : index
      %12 = vector.load %arg6[%c0_10, %c0_11] : memref<256x512xf32, #tpu.memory_space<vmem>>, vector<256x512xf32>
      %c0_12 = arith.constant 0 : index
      %c0_13 = arith.constant 0 : index
      %13 = vector.load %arg4[%c0_12, %c0_13] : memref<1x512xf32, #tpu.memory_space<vmem>>, vector<1x512xf32>
      %14 = vector.broadcast %13 : vector<1x512xf32> to vector<256x512xf32>
      %15 = arith.addf %12, %14 : vector<256x512xf32>
      %c0_14 = arith.constant 0 : index
      %c0_15 = arith.constant 0 : index
      %16 = vector.load %arg5[%c0_14, %c0_15] : memref<256x512xf32, #tpu.memory_space<vmem>>, vector<256x512xf32>
      tpu.vector_store %arg5[%c0_14, %c0_15], %15 {strides = array<i32>} : memref<256x512xf32, #tpu.memory_space<vmem>>, vector<256x512xf32>,
    } else {
    }
    return
  }
  func.func @transform_0(%arg0: i32, %arg1: i32) -> (i32, i32) {
    %c0_i32 = arith.constant 0 : i32
    %c0_i32_0 = arith.constant 0 : i32
    return %c0_i32, %arg1 : i32, i32
  }
  func.func @transform_1(%arg0: i32, %arg1: i32) -> (i32, i32) {
    %c0_i32 = arith.constant 0 : i32
    return %arg1, %arg0 : i32, i32
  }
  func.func @transform_2(%arg0: i32, %arg1: i32) -> (i32, i32) {
    %c0_i32 = arith.constant 0 : i32
    %c0_i32_0 = arith.constant 0 : i32
    return %c0_i32, %arg0 : i32, i32
  }
  func.func @transform_3(%arg0: i32, %arg1: i32) -> (i32, i32) {
    %c0_i32 = arith.constant 0 : i32
    %c0_i32_0 = arith.constant 0 : i32
    return %c0_i32, %arg0 : i32, i32
  }
}

module attributes {stable_mosaic.version = 11 : i64} {
  func.func @_linear_bn_relu_kernel(%arg0: i32, %arg1: i32, %arg2: memref<256x512xbf16, #tpu.memory_space<vmem>>, %arg3: memref<512x512xbf16, #tpu.memory_space<vmem>>, %arg4: memref<1x512xf32, #tpu.memory_space<vmem>>, %arg5: memref<1x512xf32, #tpu.memory_space<vmem>>, %arg6: memref<256x512xf32, #tpu.memory_space<vmem>>, %arg7: memref<256x512xf32, #tpu.memory_space<vmem>>) attributes {dimension_semantics = [#tpu.dimension_semantics<parallel>, #tpu.dimension_semantics<arbitrary>], iteration_bounds = array<i64: 1, 1>, scalar_prefetch = 0 : i64, scratch_operands = 1 : i64, tpu.core_type = #tpu.core_type<tc>, window_params = [{transform_indices = @transform_0, window_bounds = array<i64: 256, 512>}, {transform_indices = @transform_1, window_bounds = array<i64: 512, 512>}, {transform_indices = @transform_2, window_bounds = array<i64: 1, 512>}, {transform_indices = @transform_3, window_bounds = array<i64: 1, 512>}, {transform_indices = @transform_4, window_bounds = array<i64: 256, 512>}]} {
    %c0_i32 = arith.constant 0 : i32
    %0 = arith.cmpi eq, %arg1, %c0_i32 : i32
    %1 = arith.extui %0 : i1 to i32
    %c0_i32_0 = arith.constant 0 : i32
    %2 = arith.cmpi ne, %1, %c0_i32_0 : i32
    scf.if %2 {
      %cst_10 = arith.constant 0.000000e+00 : f32
      %12 = vector.broadcast %cst_10 : f32 to vector<256x512xf32>
      %c0_11 = arith.constant 0 : index
      %c0_12 = arith.constant 0 : index
      %13 = vector.load %arg7[%c0_11, %c0_12] : memref<256x512xf32, #tpu.memory_space<vmem>>, vector<256x512xf32>
      tpu.vector_store %arg7[%c0_11, %c0_12], %12 {strides = array<i32>} : memref<256x512xf32, #tpu.memory_space<vmem>>, vector<256x512xf32>,
    } else {
    }
    %c0 = arith.constant 0 : index
    %c0_1 = arith.constant 0 : index
    %3 = vector.load %arg7[%c0, %c0_1] : memref<256x512xf32, #tpu.memory_space<vmem>>, vector<256x512xf32>
    %c0_2 = arith.constant 0 : index
    %c0_3 = arith.constant 0 : index
    %4 = vector.load %arg2[%c0_2, %c0_3] : memref<256x512xbf16, #tpu.memory_space<vmem>>, vector<256x512xbf16>
    %c0_4 = arith.constant 0 : index
    %c0_5 = arith.constant 0 : index
    %5 = vector.load %arg3[%c0_4, %c0_5] : memref<512x512xbf16, #tpu.memory_space<vmem>>, vector<512x512xbf16>
    %cst = arith.constant dense<0.000000e+00> : vector<256x512xf32>
    %6 = tpu.matmul %4, %5, %cst {dimension_numbers = #tpu.dot_dimension_numbers<[1], [0], [0], [1], [0, 0, 1, 1], [], []>} : vector<256x512xbf16>, vector<512x512xbf16>, vector<256x512xf32> -> vector<256x512xf32>
    %7 = arith.addf %3, %6 : vector<256x512xf32>
    %c0_6 = arith.constant 0 : index
    %c0_7 = arith.constant 0 : index
    %8 = vector.load %arg7[%c0_6, %c0_7] : memref<256x512xf32, #tpu.memory_space<vmem>>, vector<256x512xf32>
    tpu.vector_store %arg7[%c0_6, %c0_7], %7 {strides = array<i32>} : memref<256x512xf32, #tpu.memory_space<vmem>>, vector<256x512xf32>,
    %c0_i32_8 = arith.constant 0 : i32
    %9 = arith.cmpi eq, %arg1, %c0_i32_8 : i32
    %10 = arith.extui %9 : i1 to i32
    %c0_i32_9 = arith.constant 0 : i32
    %11 = arith.cmpi ne, %10, %c0_i32_9 : i32
    scf.if %11 {
      %c0_10 = arith.constant 0 : index
      %c0_11 = arith.constant 0 : index
      %12 = vector.load %arg7[%c0_10, %c0_11] : memref<256x512xf32, #tpu.memory_space<vmem>>, vector<256x512xf32>
      %cst_12 = arith.constant dense<0.000000e+00> : vector<512xf32>
      %13 = vector.multi_reduction <add>, %12, %cst_12 [0] : vector<256x512xf32> to vector<512xf32>
      %14 = vector.shape_cast %13 : vector<512xf32> to vector<1x512xf32>
      %cst_13 = arith.constant 2.560000e+02 : f32
      %15 = vector.broadcast %cst_13 : f32 to vector<1x512xf32>
      %16 = arith.divf %14, %15 : vector<1x512xf32>
      %17 = vector.broadcast %16 : vector<1x512xf32> to vector<256x512xf32>
      %18 = arith.subf %12, %17 : vector<256x512xf32>
      %19 = vector.broadcast %16 : vector<1x512xf32> to vector<256x512xf32>
      %20 = arith.subf %12, %19 : vector<256x512xf32>
      %21 = arith.mulf %18, %20 : vector<256x512xf32>
      %cst_14 = arith.constant dense<0.000000e+00> : vector<512xf32>
      %22 = vector.multi_reduction <add>, %21, %cst_14 [0] : vector<256x512xf32> to vector<512xf32>
      %23 = vector.shape_cast %22 : vector<512xf32> to vector<1x512xf32>
      %cst_15 = arith.constant 2.560000e+02 : f32
      %24 = vector.broadcast %cst_15 : f32 to vector<1x512xf32>
      %25 = arith.divf %23, %24 : vector<1x512xf32>
      %26 = vector.broadcast %16 : vector<1x512xf32> to vector<256x512xf32>
      %27 = arith.subf %12, %26 : vector<256x512xf32>
      %cst_16 = arith.constant 9.99999974E-6 : f32
      %28 = vector.broadcast %cst_16 : f32 to vector<1x512xf32>
      %29 = arith.addf %25, %28 : vector<1x512xf32>
      %30 = math.rsqrt %29 : vector<1x512xf32>
      %31 = vector.broadcast %30 : vector<1x512xf32> to vector<256x512xf32>
      %32 = arith.mulf %27, %31 : vector<256x512xf32>
      %c0_17 = arith.constant 0 : index
      %c0_18 = arith.constant 0 : index
      %33 = vector.load %arg4[%c0_17, %c0_18] : memref<1x512xf32, #tpu.memory_space<vmem>>, vector<1x512xf32>
      %34 = vector.broadcast %33 : vector<1x512xf32> to vector<256x512xf32>
      %35 = arith.mulf %32, %34 : vector<256x512xf32>
      %c0_19 = arith.constant 0 : index
      %c0_20 = arith.constant 0 : index
      %36 = vector.load %arg5[%c0_19, %c0_20] : memref<1x512xf32, #tpu.memory_space<vmem>>, vector<1x512xf32>
      %37 = vector.broadcast %36 : vector<1x512xf32> to vector<256x512xf32>
      %38 = arith.addf %35, %37 : vector<256x512xf32>
      %cst_21 = arith.constant 0.000000e+00 : f32
      %39 = vector.broadcast %cst_21 : f32 to vector<256x512xf32>
      %40 = arith.maximumf %38, %39 : vector<256x512xf32>
      %c0_22 = arith.constant 0 : index
      %c0_23 = arith.constant 0 : index
      %41 = vector.load %arg6[%c0_22, %c0_23] : memref<256x512xf32, #tpu.memory_space<vmem>>, vector<256x512xf32>
      tpu.vector_store %arg6[%c0_22, %c0_23], %40 {strides = array<i32>} : memref<256x512xf32, #tpu.memory_space<vmem>>, vector<256x512xf32>,
    } else {
    }
    return
  }
  func.func @transform_0(%arg0: i32, %arg1: i32) -> (i32, i32) {
    %c0_i32 = arith.constant 0 : i32
    %c0_i32_0 = arith.constant 0 : i32
    return %c0_i32, %arg1 : i32, i32
  }
  func.func @transform_1(%arg0: i32, %arg1: i32) -> (i32, i32) {
    %c0_i32 = arith.constant 0 : i32
    return %arg1, %arg0 : i32, i32
  }
  func.func @transform_2(%arg0: i32, %arg1: i32) -> (i32, i32) {
    %c0_i32 = arith.constant 0 : i32
    %c0_i32_0 = arith.constant 0 : i32
    return %c0_i32, %arg0 : i32, i32
  }
  func.func @transform_3(%arg0: i32, %arg1: i32) -> (i32, i32) {
    %c0_i32 = arith.constant 0 : i32
    %c0_i32_0 = arith.constant 0 : i32
    return %c0_i32, %arg0 : i32, i32
  }
  func.func @transform_4(%arg0: i32, %arg1: i32) -> (i32, i32) {
    %c0_i32 = arith.constant 0 : i32
    %c0_i32_0 = arith.constant 0 : i32
    return %c0_i32, %arg0 : i32, i32
  }
}

</mosaic_0001>

<bundles_post_ra>
// kernel: projector_forward.3
= control target key start
LH: loop header
LB: loop body
LE: loop exit
PB: predicated region body
PF: predicated region fallthrough
CT: control target
= control target key end

     0   :  { %9 = vsyncpa [#allocation4], 0  ;;  %s5443_s0 = inlined_call_operand.vmem [shape: bf16[256,128], index: 0, kind: input, shape index: {}]   ;;  %s5444_s1 = inlined_call_operand.vmem [shape: bf16[128,512], index: 1, kind: input, shape index: {}]   ;;  %s5445_s2 = inlined_call_operand.hbm [shape: f32[1,512], index: 2, kind: input, shape index: {}]   ;;  %s5446_s3 = inlined_call_operand.hbm [shape: f32[1,512], index: 3, kind: input, shape index: {}]   ;;  %s5447_s4 = inlined_call_operand.vmem [shape: f32[256,512], index: 4, kind: output, shape index: {}]  }
   0x1   :  { %s20_s17 = sshll.u32 %s5445_s2, 4  ;;  %s21_s17 = int_to_ptr.hbm [resolvable:$true] %s20_s17 }
   0x2   :  { %10 = vsyncpa [#allocation6], 0  ;;  %s2952_s18 = smov [#allocation3]   ;;  %s31_s22 = sshll.u32 %s5446_s3, 4  ;;  %s32_s22 = int_to_ptr.hbm [resolvable:$true] %s31_s22 }
   0x3   :  { %s22_s19 = sshll.u32 %s2952_s18, 4  ;;  %s2953_s23 = smov [#allocation5]   ;;  %s23_s19 = int_to_ptr.vmem [resolvable:$true] %s22_s19 }
   0x4   :  { %25 = dma.hbm_to_vmem [thread:$0]  %s21_s17, 64, %s23_s19, [#allocation4]  }
   0x5   :  { %s33_s24 = sshll.u32 %s2953_s23, 4  ;;  %s34_s24 = int_to_ptr.vmem [resolvable:$true] %s33_s24 }
   0x6   :  { %36 = dma.hbm_to_vmem [thread:$0]  %s32_s22, 64, %s34_s24, [#allocation6]  }
   0x7   :  { %2948 = dma.done.wait [#allocation4], 64  }
   0x8   :  { %2949 = vsyncadd [#allocation4], 4294967232 }
   0x9   :  { %2950 = dma.done.wait [#allocation6], 64  }
   0xa   :  { %2951 = vsyncadd [#allocation6], 4294967232  ;;  %v2823_v0 = vld [vmem:[%s5444_s1 + $0xe0] sm:$0xf]  ;;  %v2883_v1 = vld [vmem:[%s5444_s1 + $0xec] sm:$0xf0] }
   0xb   :  { %v2881_v2 = vld [vmem:[%s5444_s1 + $0xe4] sm:$0xf]  ;;  %v2824_v3 = vor.u32 %v2883_v1, %v2823_v0  ;;  %v2825_v4 = vld [vmem:[%s5444_s1 + $0xf0] sm:$0xf0]  ;;  %v2831_v5 = vld [vmem:[%s5444_s1 + $0xe8] sm:$0xf] }
   0xc   :  { %v2884_v6 = vld [vmem:[%s5444_s1 + $0xf4] sm:$0xf0]  ;;  %v2828_v7 = vor.u32 %v2881_v2, %v2825_v4  ;;  %v2882_v9 = vld [vmem:[%s5444_s1 + $0xec] sm:$0xf]  ;;  %v2833_v10 = vld [vmem:[%s5444_s1 + $0xf8] sm:$0xf0] }
   0xd   :  { %v2832_v8 = vor.u32 %v2884_v6, %v2831_v5  ;;  %v2807_v11 = vld [vmem:[%s5444_s1 + $0xc0] sm:$0xf]  ;;  %625 = vmatpush.bf16.msra.mxu0 %v2824_v3  ;;  %v2836_v12 = vor.u32 %v2882_v9, %v2833_v10  ;;  %v2879_v13 = vld [vmem:[%s5444_s1 + $0xcc] sm:$0xf0]  ;;  %v2877_v14 = vld [vmem:[%s5444_s1 + $0xc4] sm:$0xf] }
   0xe   :  { %v2809_v15 = vld [vmem:[%s5444_s1 + $0xd0] sm:$0xf0]  ;;  %714 = vmatpush.bf16.msra.mxu1 %v2828_v7  ;;  %v2808_v16 = vor.u32 %v2879_v13, %v2807_v11  ;;  %v2815_v18 = vld [vmem:[%s5444_s1 + $0xc8] sm:$0xf]  ;;  %v2880_v19 = vld [vmem:[%s5444_s1 + $0xd4] sm:$0xf0] }
   0xf   :  { %803 = vmatpush.bf16.msra.mxu2 %v2832_v8  ;;  %v2812_v17 = vor.u32 %v2877_v14, %v2809_v15  ;;  %v2878_v20 = vld [vmem:[%s5444_s1 + $0xcc] sm:$0xf]  ;;  %892 = vmatpush.bf16.msra.mxu3 %v2836_v12  ;;  %v2816_v21 = vor.u32 %v2880_v19, %v2815_v18  ;;  %v2817_v22 = vld [vmem:[%s5444_s1 + $0xd8] sm:$0xf0]  ;;  %v2791_v23 = vld [vmem:[%s5444_s1 + $0xa0] sm:$0xf] }
  0x10   :  { %v2875_v24 = vld [vmem:[%s5444_s1 + $0xac] sm:$0xf0]  ;;  %v2820_v25 = vor.u32 %v2878_v20, %v2817_v22  ;;  %v2873_v26 = vld [vmem:[%s5444_s1 + $0xa4] sm:$0xf]  ;;  %v2793_v27 = vld [vmem:[%s5444_s1 + $0xb0] sm:$0xf0] }
  0x11   :  { %v2799_v28 = vld [vmem:[%s5444_s1 + $0xa8] sm:$0xf]  ;;  %626 = vmatpush.bf16.msra.mxu0 %v2808_v16  ;;  %v2792_v29 = vor.u32 %v2875_v24, %v2791_v23  ;;  %v2876_v30 = vld [vmem:[%s5444_s1 + $0xb4] sm:$0xf0]  ;;  %v2874_v31 = vld [vmem:[%s5444_s1 + $0xac] sm:$0xf]  ;;  %v2796_v33 = vor.u32 %v2873_v26, %v2793_v27 }
  0x12   :  { %v2801_v32 = vld [vmem:[%s5444_s1 + $0xb8] sm:$0xf0]  ;;  %715 = vmatpush.bf16.msra.mxu1 %v2812_v17  ;;  %v2800_v34 = vor.u32 %v2876_v30, %v2799_v28  ;;  %v2775_v35 = vld [vmem:[%s5444_s1 + $0x80] sm:$0xf]  ;;  %v2871_v36 = vld [vmem:[%s5444_s1 + $0x8c] sm:$0xf0] }
  0x13   :  { %804 = vmatpush.bf16.msra.mxu2 %v2816_v21  ;;  %v2869_v37 = vld [vmem:[%s5444_s1 + $0x84] sm:$0xf]  ;;  %893 = vmatpush.bf16.msra.mxu3 %v2820_v25  ;;  %v2804_v38 = vor.u32 %v2874_v31, %v2801_v32  ;;  %v2777_v39 = vld [vmem:[%s5444_s1 + $0x90] sm:$0xf0]  ;;  %v2783_v40 = vld [vmem:[%s5444_s1 + $0x88] sm:$0xf]  ;;  %v2776_v44 = vor.u32 %v2871_v36, %v2775_v35 }
  0x14   :  { %v2872_v41 = vld [vmem:[%s5444_s1 + $0x94] sm:$0xf0]  ;;  %v2870_v42 = vld [vmem:[%s5444_s1 + $0x8c] sm:$0xf]  ;;  %v2785_v43 = vld [vmem:[%s5444_s1 + $0x98] sm:$0xf0]  ;;  %v2780_v45 = vor.u32 %v2869_v37, %v2777_v39 }
  0x15   :  { %627 = vmatpush.bf16.msra.mxu0 %v2792_v29  ;;  %v2784_v46 = vor.u32 %v2872_v41, %v2783_v40  ;;  %v2759_v47 = vld [vmem:[%s5444_s1 + $0x60] sm:$0xf]  ;;  %v2867_v48 = vld [vmem:[%s5444_s1 + $0x6c] sm:$0xf0]  ;;  %v2865_v49 = vld [vmem:[%s5444_s1 + $0x64] sm:$0xf]  ;;  %v2788_v50 = vor.u32 %v2870_v42, %v2785_v43 }
  0x16   :  { %716 = vmatpush.bf16.msra.mxu1 %v2796_v33  ;;  %v2761_v51 = vld [vmem:[%s5444_s1 + $0x70] sm:$0xf0]  ;;  %v2767_v52 = vld [vmem:[%s5444_s1 + $0x68] sm:$0xf]  ;;  %v2868_v53 = vld [vmem:[%s5444_s1 + $0x74] sm:$0xf0]  ;;  %v2760_v56 = vor.u32 %v2867_v48, %v2759_v47 }
  0x17   :  { %805 = vmatpush.bf16.msra.mxu2 %v2800_v34  ;;  %894 = vmatpush.bf16.msra.mxu3 %v2804_v38  ;;  %v2866_v54 = vld [vmem:[%s5444_s1 + $0x6c] sm:$0xf]  ;;  %v2769_v55 = vld [vmem:[%s5444_s1 + $0x78] sm:$0xf0]  ;;  %v2764_v57 = vor.u32 %v2865_v49, %v2761_v51  ;;  %v2768_v58 = vor.u32 %v2868_v53, %v2767_v52  ;;  %v2743_v59 = vld [vmem:[%s5444_s1 + $0x40] sm:$0xf] }
  0x18   :  { %v2863_v60 = vld [vmem:[%s5444_s1 + $0x4c] sm:$0xf0]  ;;  %v2861_v61 = vld [vmem:[%s5444_s1 + $0x44] sm:$0xf]  ;;  %v2772_v62 = vor.u32 %v2866_v54, %v2769_v55  ;;  %v2745_v63 = vld [vmem:[%s5444_s1 + $0x50] sm:$0xf0] }
  0x19   :  { %628 = vmatpush.bf16.msra.mxu0 %v2776_v44  ;;  %v2751_v0 = vld [vmem:[%s5444_s1 + $0x48] sm:$0xf]  ;;  %v2864_v1 = vld [vmem:[%s5444_s1 + $0x54] sm:$0xf0]  ;;  %v2862_v2 = vld [vmem:[%s5444_s1 + $0x4c] sm:$0xf]  ;;  %v2744_v4 = vor.u32 %v2863_v60, %v2743_v59  ;;  %v2748_v5 = vor.u32 %v2861_v61, %v2745_v63 }
  0x1a   :  { %717 = vmatpush.bf16.msra.mxu1 %v2780_v45  ;;  %v2753_v3 = vld [vmem:[%s5444_s1 + $0x58] sm:$0xf0]  ;;  %v2752_v6 = vor.u32 %v2864_v1, %v2751_v0  ;;  %v2727_v7 = vld [vmem:[%s5444_s1 + $0x20] sm:$0xf]  ;;  %v2859_v8 = vld [vmem:[%s5444_s1 + $0x2c] sm:$0xf0] }
  0x1b   :  { %806 = vmatpush.bf16.msra.mxu2 %v2784_v46  ;;  %895 = vmatpush.bf16.msra.mxu3 %v2788_v50  ;;  %v2857_v9 = vld [vmem:[%s5444_s1 + $0x24] sm:$0xf]  ;;  %v2756_v10 = vor.u32 %v2862_v2, %v2753_v3  ;;  %v2729_v11 = vld [vmem:[%s5444_s1 + $0x30] sm:$0xf0]  ;;  %v2735_v12 = vld [vmem:[%s5444_s1 + $0x28] sm:$0xf]  ;;  %v2728_v16 = vor.u32 %v2859_v8, %v2727_v7 }
  0x1c   :  { %v2860_v13 = vld [vmem:[%s5444_s1 + $0x34] sm:$0xf0]  ;;  %v2858_v14 = vld [vmem:[%s5444_s1 + $0x2c] sm:$0xf]  ;;  %v2737_v15 = vld [vmem:[%s5444_s1 + $0x38] sm:$0xf0]  ;;  %v2732_v17 = vor.u32 %v2857_v9, %v2729_v11 }
  0x1d   :  { %629 = vmatpush.bf16.msra.mxu0 %v2760_v56  ;;  %v2736_v18 = vor.u32 %v2860_v13, %v2735_v12  ;;  %v2711_v19 = vld [vmem:[%s5444_s1] sm:$0xf]  ;;  %v2855_v20 = vld [vmem:[%s5444_s1 + $0xc] sm:$0xf0]  ;;  %v2853_v21 = vld [vmem:[%s5444_s1 + $0x4] sm:$0xf]  ;;  %v2740_v22 = vor.u32 %v2858_v14, %v2737_v15 }
  0x1e   :  { %718 = vmatpush.bf16.msra.mxu1 %v2764_v57  ;;  %v2713_v23 = vld [vmem:[%s5444_s1 + $0x10] sm:$0xf0]  ;;  %v2719_v24 = vld [vmem:[%s5444_s1 + $0x8] sm:$0xf]  ;;  %v2856_v25 = vld [vmem:[%s5444_s1 + $0x14] sm:$0xf0]  ;;  %v2712_v28 = vor.u32 %v2855_v20, %v2711_v19 }
  0x1f   :  { %807 = vmatpush.bf16.msra.mxu2 %v2768_v58  ;;  %896 = vmatpush.bf16.msra.mxu3 %v2772_v62  ;;  %v2854_v26 = vld [vmem:[%s5444_s1 + $0xc] sm:$0xf]  ;;  %v2721_v27 = vld [vmem:[%s5444_s1 + $0x18] sm:$0xf0]  ;;  %v2716_v29 = vor.u32 %v2853_v21, %v2713_v23  ;;  %v2720_v30 = vor.u32 %v2856_v25, %v2719_v24  ;;  %v2837_v32 = vld [vmem:[%s5443_s0] sm:$0xff] }
  0x20   :  { %v2724_v31 = vor.u32 %v2854_v26, %v2721_v27  ;;  %v2838_v33 = vld [vmem:[%s5443_s0 + $0x8] sm:$0xff]  ;;  %v2839_v34 = vld [vmem:[%s5443_s0 + $0x10] sm:$0xff]  ;;  %v2840_v35 = vld [vmem:[%s5443_s0 + $0x18] sm:$0xff] }
  0x21   :  { %630 = vmatpush.bf16.msra.mxu0 %v2744_v4  ;;  %v2841_v36 = vld [vmem:[%s5443_s0 + $0x20] sm:$0xff]  ;;  %v2842_v37 = vld [vmem:[%s5443_s0 + $0x28] sm:$0xff]  ;;  %v2843_v38 = vld [vmem:[%s5443_s0 + $0x30] sm:$0xff] }
  0x22   :  { %719 = vmatpush.bf16.msra.mxu1 %v2748_v5  ;;  %v2844_v39 = vld [vmem:[%s5443_s0 + $0x38] sm:$0xff]  ;;  %v2845_v40 = vld [vmem:[%s5443_s0 + $0x40] sm:$0xff]  ;;  %v2846_v45 = vld [vmem:[%s5443_s0 + $0x48] sm:$0xff] }
  0x23   :  { %808 = vmatpush.bf16.msra.mxu2 %v2752_v6  ;;  %897 = vmatpush.bf16.msra.mxu3 %v2756_v10  ;;  %v2847_v50 = vld [vmem:[%s5443_s0 + $0x50] sm:$0xff]  ;;  %v2848_v57 = vld [vmem:[%s5443_s0 + $0x58] sm:$0xff]  ;;  %v2849_v1 = vld [vmem:[%s5443_s0 + $0x60] sm:$0xff] }
  0x24   :  { %v2850_v9 = vld [vmem:[%s5443_s0 + $0x68] sm:$0xff]  ;;  %v2852_v25 = vld [vmem:[%s5443_s0 + $0x78] sm:$0xff] }
  0x25   :  { %631 = vmatpush.bf16.msra.mxu0 %v2728_v16 }
  0x26   :  { %720 = vmatpush.bf16.msra.mxu1 %v2732_v17  ;;  %v2851_v17 = vld [vmem:[%s5443_s0 + $0x70] sm:$0xff] }
  0x27   :  { %809 = vmatpush.bf16.msra.mxu2 %v2736_v18  ;;  %898 = vmatpush.bf16.msra.mxu3 %v2740_v22 }
  0x29   :  { %632 = vmatpush.bf16.msra.mxu0 %v2712_v28 }
  0x2a   :  { %721 = vmatpush.bf16.msra.mxu1 %v2716_v29 }
  0x2b   :  { %810 = vmatpush.bf16.msra.mxu2 %v2720_v30  ;;  %899 = vmatpush.bf16.msra.mxu3 %v2724_v31 }
  0x2c   :  { %633 = vmatmul.bf16.vlgmr.msra.gmra.mxu0 %v2837_v32 }
  0x2d   :  { %722 = vmatmul.bf16.vlgmr.msra.gmra.mxu1 %v2837_v32 }
  0x2e   :  { %811 = vmatmul.bf16.vlgmr.msra.gmra.mxu2 %v2837_v32  ;;  %900 = vmatmul.bf16.vlgmr.msra.gmra.mxu3 %v2837_v32 }
  0x3c   :  { %638 = vmatmul.bf16.gmra.mxu0 %v2838_v33 }
  0x3d   :  { %727 = vmatmul.bf16.gmra.mxu1 %v2838_v33 }
  0x3e   :  { %816 = vmatmul.bf16.gmra.mxu2 %v2838_v33  ;;  %905 = vmatmul.bf16.gmra.mxu3 %v2838_v33 }
  0x4c   :  { %643 = vmatmul.bf16.gmra.mxu0 %v2839_v34 }
  0x4d   :  { %732 = vmatmul.bf16.gmra.mxu1 %v2839_v34 }
  0x4e   :  { %821 = vmatmul.bf16.gmra.mxu2 %v2839_v34  ;;  %910 = vmatmul.bf16.gmra.mxu3 %v2839_v34 }
  0x5c   :  { %648 = vmatmul.bf16.gmra.mxu0 %v2840_v35 }
  0x5d   :  { %737 = vmatmul.bf16.gmra.mxu1 %v2840_v35 }
  0x5e   :  { %826 = vmatmul.bf16.gmra.mxu2 %v2840_v35  ;;  %915 = vmatmul.bf16.gmra.mxu3 %v2840_v35 }
  0x6c   :  { %653 = vmatmul.bf16.gmra.mxu0 %v2841_v36 }
  0x6d   :  { %742 = vmatmul.bf16.gmra.mxu1 %v2841_v36 }
  0x6e   :  { %831 = vmatmul.bf16.gmra.mxu2 %v2841_v36  ;;  %920 = vmatmul.bf16.gmra.mxu3 %v2841_v36 }
  0x7c   :  { %658 = vmatmul.bf16.gmra.mxu0 %v2842_v37 }
  0x7d   :  { %747 = vmatmul.bf16.gmra.mxu1 %v2842_v37 }
  0x7e   :  { %836 = vmatmul.bf16.gmra.mxu2 %v2842_v37  ;;  %925 = vmatmul.bf16.gmra.mxu3 %v2842_v37 }
  0x8c   :  { %663 = vmatmul.bf16.gmra.mxu0 %v2843_v38 }
  0x8d   :  { %752 = vmatmul.bf16.gmra.mxu1 %v2843_v38 }
  0x8e   :  { %841 = vmatmul.bf16.gmra.mxu2 %v2843_v38  ;;  %930 = vmatmul.bf16.gmra.mxu3 %v2843_v38 }
  0x9c   :  { %668 = vmatmul.bf16.gmra.mxu0 %v2844_v39 }
  0x9d   :  { %757 = vmatmul.bf16.gmra.mxu1 %v2844_v39 }
  0x9e   :  { %846 = vmatmul.bf16.gmra.mxu2 %v2844_v39  ;;  %935 = vmatmul.bf16.gmra.mxu3 %v2844_v39 }
  0xa9   :  { %v3205_v41 = vpop.f32.mrf.mxu0 }
  0xaa   :  { %v3207_v42 = vpop.f32.mrf.mxu1 }
  0xab   :  { %5623 = vst [vmem:[#allocation9_spill] sm:$0xff] %v3207_v42 }
  0xac   :  { %673 = vmatmul.bf16.gmra.mxu0 %v2845_v40 }
  0xad   :  { %762 = vmatmul.bf16.gmra.mxu1 %v2845_v40 }
  0xae   :  { %851 = vmatmul.bf16.gmra.mxu2 %v2845_v40  ;;  %940 = vmatmul.bf16.gmra.mxu3 %v2845_v40 }
  0xb1   :  { %v3209_v43 = vpop.f32.mrf.mxu0  ;;  %v3235_v55 = vpop.f32.mrf.mxu2 }
  0xb2   :  { %v3211_v44 = vpop.f32.mrf.mxu1  ;;  %5627 = vst [vmem:[#allocation13_spill] sm:$0xff] %v3235_v55  ;;  %v3237_v56 = vpop.f32.mrf.mxu3 }
  0xb3   :  { %5624 = vst [vmem:[#allocation10_spill] sm:$0xff] %v3211_v44 }
  0xb4   :  { %5628 = vst [vmem:[#allocation14_spill] sm:$0xff] %v3237_v56 }
  0xb9   :  { %v3216_v46 = vpop.f32.mrf.mxu0  ;;  %v3246_v60 = vpop.f32.mrf.mxu2 }
  0xba   :  { %v3218_v47 = vpop.f32.mrf.mxu1  ;;  %5629 = vst [vmem:[#allocation15_spill] sm:$0xff] %v3246_v60  ;;  %v3250_v62 = vpop.f32.mrf.mxu3  ;;  %v1405_v60 = vadd.f32 %v3211_v44, %v3207_v42 }
  0xbb   :  { %5625 = vst [vmem:[#allocation11_spill] sm:$0xff] %v3218_v47 }
  0xbc   :  { %678 = vmatmul.bf16.gmra.mxu0 %v2846_v45  ;;  %5630 = vst [vmem:[#allocation16_spill] sm:$0xff] %v3250_v62  ;;  %v1368_v62 = vadd.f32 %v3209_v43, %v3205_v41 }
  0xbd   :  { %767 = vmatmul.bf16.gmra.mxu1 %v2846_v45 }
  0xbe   :  { %856 = vmatmul.bf16.gmra.mxu2 %v2846_v45  ;;  %945 = vmatmul.bf16.gmra.mxu3 %v2846_v45  ;;  %v1369_v56 = vadd.f32 %v1368_v62, %v3216_v46 }
  0xc1   :  { %v3220_v48 = vpop.f32.mrf.mxu0  ;;  %v3254_v0 = vpop.f32.mrf.mxu2 }
  0xc2   :  { %v3222_v49 = vpop.f32.mrf.mxu1  ;;  %5632 = vst [vmem:[#allocation18_spill] sm:$0xff] %v3254_v0  ;;  %v3263_v4 = vpop.f32.mrf.mxu3 }
  0xc3   :  { %5633 = vst [vmem:[#allocation19_spill] sm:$0xff] %v3263_v4 }
  0xc9   :  { %v3227_v51 = vpop.f32.mrf.mxu0  ;;  %v3267_v6 = vpop.f32.mrf.mxu2 }
  0xca   :  { %v3229_v52 = vpop.f32.mrf.mxu1  ;;  %5634 = vst [vmem:[#allocation20_spill] sm:$0xff] %v3267_v6  ;;  %v3271_v8 = vpop.f32.mrf.mxu3 }
  0xcb   :  { %5636 = vst [vmem:[#allocation22_spill] sm:$0xff] %v3271_v8 }
  0xcc   :  { %683 = vmatmul.bf16.gmra.mxu0 %v2847_v50 }
  0xcd   :  { %772 = vmatmul.bf16.gmra.mxu1 %v2847_v50 }
  0xce   :  { %861 = vmatmul.bf16.gmra.mxu2 %v2847_v50  ;;  %950 = vmatmul.bf16.gmra.mxu3 %v2847_v50 }
  0xd1   :  { %v3231_v53 = vpop.f32.mrf.mxu0  ;;  %v3280_v12 = vpop.f32.mrf.mxu2 }
  0xd2   :  { %v3233_v54 = vpop.f32.mrf.mxu1  ;;  %5638 = vst [vmem:[#allocation24_spill] sm:$0xff] %v3280_v12  ;;  %v3282_v13 = vpop.f32.mrf.mxu3 }
  0xd3   :  { %5626 = vst [vmem:[#allocation12_spill] sm:$0xff] %v3233_v54 }
  0xd4   :  { %5639 = vst [vmem:[#allocation25_spill] sm:$0xff] %v3282_v13 }
  0xd9   :  { %v3242_v58 = vpop.f32.mrf.mxu0  ;;  %v3288_v16 = vpop.f32.mrf.mxu2 }
  0xda   :  { %v3244_v59 = vpop.f32.mrf.mxu1  ;;  %5641 = vst [vmem:[#allocation27_spill] sm:$0xff] %v3288_v16  ;;  %v3295_v19 = vpop.f32.mrf.mxu3 }
  0xdb   :  { %5642 = vst [vmem:[#allocation28_spill] sm:$0xff] %v3295_v19 }
  0xdc   :  { %688 = vmatmul.bf16.gmra.mxu0 %v2848_v57 }
  0xdd   :  { %777 = vmatmul.bf16.gmra.mxu1 %v2848_v57 }
  0xde   :  { %866 = vmatmul.bf16.gmra.mxu2 %v2848_v57  ;;  %955 = vmatmul.bf16.gmra.mxu3 %v2848_v57 }
  0xe1   :  { %v3248_v61 = vpop.f32.mrf.mxu0  ;;  %v3299_v21 = vpop.f32.mrf.mxu2 }
  0xe2   :  { %v3252_v63 = vpop.f32.mrf.mxu1  ;;  %5644 = vst [vmem:[#allocation30_spill] sm:$0xff] %v3299_v21  ;;  %v3305_v24 = vpop.f32.mrf.mxu3 }
  0xe3   :  { %5631 = vst [vmem:[#allocation17_spill] sm:$0xff] %v3252_v63 }
  0xe4   :  { %5646 = vst [vmem:[#allocation32_spill] sm:$0xff] %v3305_v24 }
  0xe9   :  { %v3259_v2 = vpop.f32.mrf.mxu0  ;;  %v3312_v27 = vpop.f32.mrf.mxu2 }
  0xea   :  { %v3261_v3 = vpop.f32.mrf.mxu1  ;;  %5648 = vst [vmem:[#allocation34_spill] sm:$0xff] %v3312_v27  ;;  %v3316_v29 = vpop.f32.mrf.mxu3 }
  0xeb   :  { %5650 = vst [vmem:[#allocation36_spill] sm:$0xff] %v3316_v29 }
  0xec   :  { %693 = vmatmul.bf16.gmra.mxu0 %v2849_v1 }
  0xed   :  { %782 = vmatmul.bf16.gmra.mxu1 %v2849_v1 }
  0xee   :  { %871 = vmatmul.bf16.gmra.mxu2 %v2849_v1  ;;  %960 = vmatmul.bf16.gmra.mxu3 %v2849_v1 }
  0xf1   :  { %v3265_v5 = vpop.f32.mrf.mxu0  ;;  %v3322_v32 = vpop.f32.mrf.mxu2 }
  0xf2   :  { %v3269_v7 = vpop.f32.mrf.mxu1  ;;  %5652 = vst [vmem:[#allocation38_spill] sm:$0xff] %v3322_v32 }
  0xf3   :  { %5635 = vst [vmem:[#allocation21_spill] sm:$0xff] %v3269_v7 }
  0xf9   :  { %v3276_v10 = vpop.f32.mrf.mxu0  ;;  %v3328_v35 = vpop.f32.mrf.mxu2 }
  0xfa   :  { %v3278_v11 = vpop.f32.mrf.mxu1  ;;  %5654 = vst [vmem:[#allocation40_spill] sm:$0xff] %v3328_v35 }
  0xfb   :  { %5637 = vst [vmem:[#allocation23_spill] sm:$0xff] %v3278_v11 }
  0xfc   :  { %698 = vmatmul.bf16.gmra.mxu0 %v2850_v9 }
  0xfd   :  { %787 = vmatmul.bf16.gmra.mxu1 %v2850_v9 }
  0xfe   :  { %876 = vmatmul.bf16.gmra.mxu2 %v2850_v9  ;;  %965 = vmatmul.bf16.gmra.mxu3 %v2850_v9 }
 0x101   :  { %v3284_v14 = vpop.f32.mrf.mxu0  ;;  %v3334_v38 = vpop.f32.mrf.mxu2 }
 0x102   :  { %v3286_v15 = vpop.f32.mrf.mxu1  ;;  %5656 = vst [vmem:[#allocation42_spill] sm:$0xff] %v3334_v38 }
 0x103   :  { %5640 = vst [vmem:[#allocation26_spill] sm:$0xff] %v3286_v15 }
 0x109   :  { %v3293_v18 = vpop.f32.mrf.mxu0  ;;  %v3342_v50 = vpop.f32.mrf.mxu2 }
 0x10a   :  { %v3297_v20 = vpop.f32.mrf.mxu1  ;;  %5657 = vst [vmem:[#allocation43_spill] sm:$0xff] %v3342_v50  ;;  %v1370_v50 = vadd.f32 %v1369_v56, %v3220_v48 }
 0x10b   :  { %5643 = vst [vmem:[#allocation29_spill] sm:$0xff] %v3297_v20 }
 0x10c   :  { %703 = vmatmul.bf16.gmra.mxu0 %v2851_v17  ;;  %v1371_v38 = vadd.f32 %v1370_v50, %v3227_v51 }
 0x10d   :  { %792 = vmatmul.bf16.gmra.mxu1 %v2851_v17 }
 0x10e   :  { %881 = vmatmul.bf16.gmra.mxu2 %v2851_v17  ;;  %970 = vmatmul.bf16.gmra.mxu3 %v2851_v17  ;;  %v1372_v35 = vadd.f32 %v1371_v38, %v3231_v53 }
 0x110   :  { %v1373_v32 = vadd.f32 %v1372_v35, %v3242_v58 }
 0x111   :  { %v3301_v22 = vpop.f32.mrf.mxu0  ;;  %v3348_v9 = vpop.f32.mrf.mxu2 }
 0x112   :  { %v3303_v23 = vpop.f32.mrf.mxu1  ;;  %5658 = vst [vmem:[#allocation44_spill] sm:$0xff] %v3348_v9  ;;  %v1374_v21 = vadd.f32 %v1373_v32, %v3248_v61 }
 0x113   :  { %5645 = vst [vmem:[#allocation31_spill] sm:$0xff] %v3303_v23 }
 0x114   :  { %v1375_v62 = vadd.f32 %v1374_v21, %v3259_v2 }
 0x116   :  { %v1376_v56 = vadd.f32 %v1375_v62, %v3265_v5 }
 0x119   :  { %v3310_v26 = vpop.f32.mrf.mxu0  ;;  %v3354_v29 = vpop.f32.mrf.mxu2 }
 0x11a   :  { %5647 = vst [vmem:[#allocation33_spill] sm:$0xff] %v3310_v26  ;;  %v3314_v28 = vpop.f32.mrf.mxu1 }
 0x11b   :  { %5649 = vst [vmem:[#allocation35_spill] sm:$0xff] %v3314_v28 }
 0x11c   :  { %708 = vmatmul.bf16.gmra.mxu0 %v2852_v25  ;;  %5659 = vst [vmem:[#allocation45_spill] sm:$0xff] %v3354_v29 }
 0x11d   :  { %797 = vmatmul.bf16.gmra.mxu1 %v2852_v25 }
 0x11e   :  { %886 = vmatmul.bf16.gmra.mxu2 %v2852_v25  ;;  %975 = vmatmul.bf16.gmra.mxu3 %v2852_v25 }
 0x121   :  { %v3318_v30 = vpop.f32.mrf.mxu0  ;;  %v3360_v13 = vpop.f32.mrf.mxu2 }
 0x122   :  { %5651 = vst [vmem:[#allocation37_spill] sm:$0xff] %v3318_v30  ;;  %v3320_v31 = vpop.f32.mrf.mxu1 }
 0x123   :  { %5660 = vst [vmem:[#allocation46_spill] sm:$0xff] %v3360_v13 }
 0x129   :  { %v3324_v33 = vpop.f32.mrf.mxu0  ;;  %v3372_v29 = vpop.f32.mrf.mxu2 }
 0x12a   :  { %v3326_v34 = vpop.f32.mrf.mxu1  ;;  %5661 = vst [vmem:[#allocation47_spill] sm:$0xff] %v3372_v29  ;;  %v1377_v29 = vadd.f32 %v1376_v56, %v3276_v10 }
 0x12b   :  { %5653 = vst [vmem:[#allocation39_spill] sm:$0xff] %v3326_v34 }
 0x12c   :  { %v1378_v38 = vadd.f32 %v1377_v29, %v3284_v14 }
 0x12e   :  { %v1379_v35 = vadd.f32 %v1378_v38, %v3293_v18  ;;  %v1406_v38 = vadd.f32 %v1405_v60, %v3218_v47 }
 0x130   :  { %v1380_v6 = vadd.f32 %v1379_v35, %v3301_v22 }
 0x131   :  { %v3330_v36 = vpop.f32.mrf.mxu0  ;;  %v3383_v16 = vpop.f32.mrf.mxu2 }
 0x132   :  { %v3332_v37 = vpop.f32.mrf.mxu1  ;;  %5662 = vst [vmem:[#allocation48_spill] sm:$0xff] %v3383_v16  ;;  %v1381_v21 = vadd.f32 %v1380_v6, %v3310_v26  ;;  %v1407_v26 = vadd.f32 %v1406_v38, %v3222_v49 }
 0x133   :  { %5655 = vst [vmem:[#allocation41_spill] sm:$0xff] %v3332_v37 }
 0x134   :  { %v1382_v62 = vadd.f32 %v1381_v21, %v3318_v30  ;;  %v1408_v30 = vadd.f32 %v1407_v26, %v3229_v52 }
 0x136   :  { %v1383_v56 = vadd.f32 %v1382_v62, %v3324_v33  ;;  %v3415_v62 = vpop.f32.mrf.mxu3  ;;  %v1409_v60 = vadd.f32 %v1408_v30, %v3233_v54 }
 0x137   :  { %5665 = vst [vmem:[#allocation51_spill] sm:$0xff] %v3415_v62 }
 0x138   :  { %v1384_v29 = vadd.f32 %v1383_v56, %v3330_v36 }
 0x139   :  { %v3336_v39 = vpop.f32.mrf.mxu0  ;;  %v3394_v0 = vpop.f32.mrf.mxu2 }
 0x13a   :  { %v3338_v40 = vpop.f32.mrf.mxu1  ;;  %5663 = vst [vmem:[#allocation49_spill] sm:$0xff] %v3394_v0  ;;  %v1385_v35 = vadd.f32 %v1384_v29, %v3336_v39  ;;  %v1410_v29 = vadd.f32 %v1409_v60, %v3244_v59 }
 0x13c   :  { %v1411_v38 = vadd.f32 %v1410_v29, %v3252_v63 }
 0x13e   :  { %v3433_v54 = vpop.f32.mrf.mxu3 }
 0x13f   :  { %5668 = vst [vmem:[#allocation54_spill] sm:$0xff] %v3433_v54 }
 0x141   :  { %v3340_v45 = vpop.f32.mrf.mxu0  ;;  %v3408_v0 = vpop.f32.mrf.mxu2 }
 0x142   :  { %v3344_v57 = vpop.f32.mrf.mxu1  ;;  %5664 = vst [vmem:[#allocation50_spill] sm:$0xff] %v3408_v0  ;;  %v1386_v21 = vadd.f32 %v1385_v35, %v3340_v45 }
 0x149   :  { %v3346_v1 = vpop.f32.mrf.mxu0  ;;  %v3427_v35 = vpop.f32.mrf.mxu2 }
 0x14a   :  { %v3350_v17 = vpop.f32.mrf.mxu1  ;;  %v1387_v44 = vadd.f32 %v1386_v21, %v3346_v1  ;;  %5667 = vst [vmem:[#allocation53_spill] sm:$0xff] %v3427_v35  ;;  %v1412_v21 = vadd.f32 %v1411_v38, %v3261_v3  ;;  %v2954_v35 = vmov 256.0  }
 0x14b   :  { %2888 = vrcp.f32 %v2954_v35 }
 0x14c   :  { %v1413_v30 = vadd.f32 %v1412_v21, %v3269_v7 }
 0x151   :  { %v3352_v25 = vpop.f32.mrf.mxu0  ;;  %v3445_v21 = vpop.f32.mrf.mxu2 }
 0x152   :  { %v3358_v19 = vpop.f32.mrf.mxu1  ;;  %v1388_v56 = vadd.f32 %v1387_v44, %v3352_v25  ;;  %5670 = vst [vmem:[#allocation56_spill] sm:$0xff] %v3445_v21 }
 0x159   :  { %v3356_v24 = vpop.f32.mrf.mxu0 }
 0x15a   :  { %v3364_v4 = vpop.f32.mrf.mxu1  ;;  %v1389_v0 = vadd.f32 %v1388_v56, %v3356_v24  ;;  %v1414_v56 = vadd.f32 %v1413_v30, %v3278_v11  ;;  %v2889_v11 = vpop.eup %2888 }
 0x15b   :  { %vm1521_vm0 = vweird.f32 %v2889_v11 }
 0x161   :  { %v3362_v8 = vpop.f32.mrf.mxu0 }
 0x162   :  { %v3376_v13 = vpop.f32.mrf.mxu1  ;;  %v1390_v26 = vadd.f32 %v1389_v0, %v3362_v8  ;;  %v1415_v0 = vadd.f32 %v1414_v56, %v3286_v15 }
 0x169   :  { %v3369_v9 = vpop.f32.mrf.mxu0 }
 0x16a   :  { %v3387_v12 = vpop.f32.mrf.mxu1  ;;  %v1391_v62 = vadd.f32 %v1390_v26, %v3369_v9  ;;  %v1416_v26 = vadd.f32 %v1415_v0, %v3297_v20  ;;  %v3462_v20 = vpop.f32.mrf.mxu2 }
 0x16c   :  { %v1417_v54 = vadd.f32 %v1416_v26, %v3303_v23 }
 0x16e   :  { %v1418_v7 = vadd.f32 %v1417_v54, %v3314_v28 }
 0x170   :  { %v1419_v0 = vadd.f32 %v1418_v7, %v3320_v31 }
 0x171   :  { %v3379_v27 = vpop.f32.mrf.mxu0 }
 0x172   :  { %v3400_v16 = vpop.f32.mrf.mxu1  ;;  %v1392_v44 = vadd.f32 %v1391_v62, %v3379_v27  ;;  %v1420_v26 = vadd.f32 %v1419_v0, %v3326_v34 }
 0x179   :  { %v3389_v50 = vpop.f32.mrf.mxu0 }
 0x17a   :  { %v3418_v42 = vpop.f32.mrf.mxu1  ;;  %v1393_v29 = vadd.f32 %v1392_v44, %v3389_v50  ;;  %v3450_v44 = vpop.f32.mrf.mxu3 }
 0x17b   :  { %5671 = vst [vmem:[#allocation57_spill] sm:$0xff] %v3450_v44 }
 0x181   :  { %v3397_v32 = vpop.f32.mrf.mxu0 }
 0x182   :  { %v3436_v60 = vpop.f32.mrf.mxu1  ;;  %v1394_v38 = vadd.f32 %v1393_v29, %v3397_v32  ;;  %v3466_v15 = vpop.f32.mrf.mxu3 }
 0x183   :  { %5672 = vst [vmem:[#allocation58_spill] sm:$0xff] %v3466_v15 }
 0x189   :  { %v3410_v6 = vpop.f32.mrf.mxu0 }
 0x18a   :  { %v1395_v62 = vadd.f32 %v1394_v38, %v3410_v6  ;;  %v3454_v29 = vpop.f32.mrf.mxu1  ;;  %v1517_v38 = vmul.f32 256.0, %v2889_v11 }
 0x18c   :  { %v1518_v54 = vsub.f32 1.0, %v1517_v38 }
 0x191   :  { %v3424_v47 = vpop.f32.mrf.mxu0 }
 0x192   :  { %5666 = vst [vmem:[#allocation52_spill] sm:$0xff] %v3424_v47  ;;  %v1396_v30 = vadd.f32 %v1395_v62, %v3424_v47  ;;  %v1421_v62 = vadd.f32 %v1420_v26, %v3332_v37  ;;  %v3468_v7 = vpop.f32.mrf.mxu1 }
 0x199   :  { %v3440_v63 = vpop.f32.mrf.mxu0 }
 0x19a   :  { %5669 = vst [vmem:[#allocation55_spill] sm:$0xff] %v3440_v63  ;;  %v1397_v56 = vadd.f32 %v1396_v30, %v3440_v63  ;;  %v1422_v30 = vadd.f32 %v1421_v62, %v3338_v40 }
 0x19c   :  { %v1423_v63 = vadd.f32 %v1422_v30, %v3344_v57  ;;  %v3479_v30 = vpop.f32.mrf.mxu3 }
 0x19d   :  { %5674 = vst [vmem:[#allocation60_spill] sm:$0xff] %v3479_v30 }
 0x19e   :  { %v1424_v0 = vadd.f32 %v1423_v63, %v3350_v17 }
 0x1a0   :  { %v1425_v34 = vadd.f32 %v1424_v0, %v3358_v19 }
 0x1a1   :  { %v3456_v35 = vpop.f32.mrf.mxu0 }
 0x1a2   :  { %v1398_v21 = vadd.f32 %v1397_v56, %v3456_v35  ;;  %v1519_v56 = vmul.f32 %v2889_v11, %v1518_v54  ;;  %v3481_v54 = vpop.f32.mrf.mxu1 }
 0x1a3   :  { %5675 = vst [vmem:[#allocation61_spill] sm:$0xff] %v3481_v54 }
 0x1a4   :  { %v1399_v23 = vrot.slane %v1398_v21, 4  ;;  %v1520_v37 = vadd.f32 %v2889_v11, %v1519_v56 }
 0x1a6   :  { %v1400_v44 = vadd.f32 %v1399_v23, %v1398_v21  ;;  %v1426_v23 = vadd.f32 %v1425_v34, %v3364_v4  ;;  %v3473_v21 = vpop.f32.mrf.mxu2 }
 0x1a7   :  { %5673 = vst [vmem:[#allocation59_spill] sm:$0xff] %v3473_v21 }
 0x1a8   :  { %v1401_v28 = vrot.slane %v1400_v44, 2  ;;  %v1427_v38 = vadd.f32 %v1426_v23, %v3376_v13 }
 0x1aa   :  { %v1402_v47 = vadd.f32 %v1401_v28, %v1400_v44  ;;  %v3476_v28 = vsel %vm1521_vm0, %v2889_v11, %v1520_v37  ;;  %v1428_v44 = vadd.f32 %v1427_v38, %v3387_v12 }
 0x1ac   :  { %v1403_v26 = vrot.slane %v1402_v47, 1  ;;  %v1429_v63 = vadd.f32 %v1428_v44, %v3400_v16 }
 0x1ae   :  { %v1404_v62 = vadd.f32 %v1403_v26, %v1402_v47  ;;  %v1430_v34 = vadd.f32 %v1429_v63, %v3418_v42  ;;  %v3488_v0 = vpop.f32.mrf.mxu2  ;;  %v3511_v63 = vpop.f32.mrf.mxu1 }
 0x1af   :  { %5676 = vst [vmem:[#allocation62_spill] sm:$0xff] %v3488_v0 }
 0x1b0   :  { %v3485_v56 = vmul.f32 %v3476_v28, %v1404_v62  ;;  %v1431_v23 = vadd.f32 %v1430_v34, %v3436_v60  ;;  %5681 = vst [vmem:[#allocation67_spill] sm:$0xff] %v3511_v63 }
 0x1b2   :  { %v3493_v47 = vsub.f32 %v3205_v41, %v3485_v56  ;;  %v3497_v11 = vsub.f32 %v3209_v43, %v3485_v56  ;;  %v1432_v37 = vadd.f32 %v1431_v23, %v3454_v29  ;;  %v3503_v38 = vsub.f32 %v3216_v46, %v3485_v56  ;;  %v3509_v41 = vpop.f32.mrf.mxu3 }
 0x1b3   :  { %5680 = vst [vmem:[#allocation66_spill] sm:$0xff] %v3509_v41  ;;  %v3516_v34 = vsub.f32 %v3220_v48, %v3485_v56  ;;  %v3520_v46 = vsub.f32 %v3227_v51, %v3485_v56  ;;  %v3529_v41 = vsub.f32 %v3231_v53, %v3485_v56  ;;  %v3535_v51 = vsub.f32 %v3242_v58, %v3485_v56 }
 0x1b4   :  { %5677 = vst [vmem:[#allocation63_spill] sm:$0xff] %v3493_v47  ;;  %v1433_v26 = vadd.f32 %v1432_v37, %v3468_v7  ;;  %v1655_v62 = vmul.f32 %v3493_v47, %v3493_v47  ;;  %v1659_v44 = vmul.f32 %v3497_v11, %v3497_v11  ;;  %v1663_v23 = vmul.f32 %v3503_v38, %v3503_v38 }
 0x1b5   :  { %5678 = vst [vmem:[#allocation64_spill] sm:$0xff] %v3497_v11  ;;  %v1667_v48 = vmul.f32 %v3516_v34, %v3516_v34  ;;  %v1675_v53 = vmul.f32 %v3529_v41, %v3529_v41  ;;  %v3549_v58 = vsub.f32 %v3259_v2, %v3485_v56 }
 0x1b6   :  { %5679 = vst [vmem:[#allocation65_spill] sm:$0xff] %v3503_v38  ;;  %v1434_v43 = vadd.f32 %v1433_v26, %v3481_v54  ;;  %v1783_v37 = vadd.f32 %v1659_v44, %v1655_v62  ;;  %v3525_v47 = vpop.f32.mrf.mxu2  ;;  %v1671_v62 = vmul.f32 %v3520_v46, %v3520_v46  ;;  %v3541_v38 = vsub.f32 %v3248_v61, %v3485_v56 }
 0x1b7   :  { %5682 = vst [vmem:[#allocation68_spill] sm:$0xff] %v3516_v34  ;;  %v1687_v2 = vmul.f32 %v3549_v58, %v3549_v58 }
 0x1b8   :  { %5683 = vst [vmem:[#allocation69_spill] sm:$0xff] %v3520_v46  ;;  %v1435_v11 = vadd.f32 %v1434_v43, %v3511_v63  ;;  %v1784_v26 = vadd.f32 %v1783_v37, %v1663_v23  ;;  %v1679_v37 = vmul.f32 %v3535_v51, %v3535_v51  ;;  %v1683_v61 = vmul.f32 %v3541_v38, %v3541_v38  ;;  %v5699_v46 = vld [vmem:[#allocation33_spill] sm:$0xff] }
 0x1b9   :  { %5684 = vst [vmem:[#allocation70_spill] sm:$0xff] %v3525_v47 }
 0x1ba   :  { %5685 = vst [vmem:[#allocation71_spill] sm:$0xff] %v3529_v41  ;;  %v1436_v54 = vrot.slane %v1435_v11, 4  ;;  %v1785_v44 = vadd.f32 %v1784_v26, %v1667_v48  ;;  %v3545_v23 = vpop.f32.mrf.mxu3  ;;  %v5698_v41 = vld [vmem:[#allocation20_spill] sm:$0xff] }
 0x1bb   :  { %5686 = vst [vmem:[#allocation72_spill] sm:$0xff] %v3535_v51 }
 0x1bc   :  { %v1437_v43 = vadd.f32 %v1436_v54, %v1435_v11  ;;  %5687 = vst [vmem:[#allocation73_spill] sm:$0xff] %v3541_v38  ;;  %v1786_v63 = vadd.f32 %v1785_v44, %v1671_v62  ;;  %v3555_v54 = vsub.f32 %v3265_v5, %v3485_v56  ;;  %v3563_v44 = vsub.f32 %v3276_v10, %v3485_v56 }
 0x1bd   :  { %5688 = vst [vmem:[#allocation74_spill] sm:$0xff] %v3545_v23  ;;  %v3577_v10 = vsub.f32 %v3293_v18, %v3485_v56 }
 0x1be   :  { %v1438_v34 = vrot.slane %v1437_v43, 2  ;;  %5689 = vst [vmem:[#allocation75_spill] sm:$0xff] %v3549_v58  ;;  %v1787_v48 = vadd.f32 %v1786_v63, %v1675_v53  ;;  %v3559_v62 = vpop.f32.mrf.mxu2  ;;  %v3569_v63 = vsub.f32 %v3284_v14, %v3485_v56  ;;  %v1691_v5 = vmul.f32 %v3555_v54, %v3555_v54 }
 0x1bf   :  { %5690 = vst [vmem:[#allocation76_spill] sm:$0xff] %v3555_v54  ;;  %v3586_v54 = vsub.f32 %v3301_v22, %v3485_v56  ;;  %v5703_v22 = vld [vmem:[#allocation37_spill] sm:$0xff] }
 0x1c0   :  { %v1788_v11 = vadd.f32 %v1787_v48, %v1679_v37  ;;  %v1439_v26 = vadd.f32 %v1438_v34, %v1437_v43  ;;  %5691 = vst [vmem:[#allocation77_spill] sm:$0xff] %v3559_v62  ;;  %v5693_v34 = vld [vmem:[#allocation15_spill] sm:$0xff]  ;;  %v1695_v48 = vmul.f32 %v3563_v44, %v3563_v44 }
 0x1c1   :  { %5692 = vst [vmem:[#allocation78_spill] sm:$0xff] %v3563_v44  ;;  %v1442_v43 = vadd.f32 %v5693_v34, %v3235_v55  ;;  %v3593_v34 = vsub.f32 %v5699_v46, %v3485_v56  ;;  %v3602_v55 = vsub.f32 %v5703_v22, %v3485_v56  ;;  %v5705_v46 = vld [vmem:[#allocation27_spill] sm:$0xff] }
 0x1c2   :  { %v1789_v51 = vadd.f32 %v1788_v11, %v1683_v61  ;;  %v1440_v37 = vrot.slane %v1439_v26, 1  ;;  %5694 = vst [vmem:[#allocation79_spill] sm:$0xff] %v3577_v10  ;;  %v5695_v11 = vld [vmem:[#allocation18_spill] sm:$0xff]  ;;  %v3582_v14 = vpop.f32.mrf.mxu3 }
 0x1c3   :  { %v1443_v58 = vadd.f32 %v1442_v43, %v5695_v11  ;;  %5696 = vst [vmem:[#allocation80_spill] sm:$0xff] %v3582_v14  ;;  %v5701_v43 = vld [vmem:[#allocation24_spill] sm:$0xff] }
 0x1c4   :  { %v1790_v53 = vadd.f32 %v1789_v51, %v1687_v2  ;;  %5697 = vst [vmem:[#allocation81_spill] sm:$0xff] %v3586_v54  ;;  %v1699_v51 = vmul.f32 %v3569_v63, %v3569_v63  ;;  %v1441_v38 = vadd.f32 %v1440_v37, %v1439_v26  ;;  %v1707_v26 = vmul.f32 %v3586_v54, %v3586_v54 }
 0x1c5   :  { %v1444_v18 = vadd.f32 %v1443_v58, %v5698_v41  ;;  %5700 = vst [vmem:[#allocation20_spill] sm:$0xff] %v3593_v34 }
 0x1c6   :  { %v1791_v61 = vadd.f32 %v1790_v53, %v1691_v5  ;;  %v1703_v5 = vmul.f32 %v3577_v10, %v3577_v10  ;;  %v3598_v11 = vpop.f32.mrf.mxu2  ;;  %5704 = vst [vmem:[#allocation24_spill] sm:$0xff] %v3602_v55  ;;  %v3607_v37 = vmul.f32 %v3476_v28, %v1441_v38  ;;  %v3619_v10 = vsub.f32 %v3330_v36, %v3485_v56 }
 0x1c7   :  { %v1445_v44 = vadd.f32 %v1444_v18, %v5701_v43  ;;  %5702 = vst [vmem:[#allocation33_spill] sm:$0xff] %v3598_v11  ;;  %v5706_v18 = vld [vmem:[#allocation30_spill] sm:$0xff]  ;;  %v1715_v38 = vmul.f32 %v3602_v55, %v3602_v55  ;;  %v3636_v36 = vsub.f32 %v3336_v39, %v3485_v56 }
 0x1c8   :  { %v1792_v2 = vadd.f32 %v1791_v61, %v1695_v48  ;;  %v3612_v61 = vsub.f32 %v3324_v33, %v3485_v56  ;;  %5707 = vst [vmem:[#allocation37_spill] sm:$0xff] %v3619_v10  ;;  %v5710_v33 = vld [vmem:[#allocation10_spill] sm:$0xff] }
 0x1c9   :  { %v1446_v48 = vadd.f32 %v1445_v44, %v5705_v46  ;;  %v5708_v44 = vld [vmem:[#allocation9_spill] sm:$0xff]  ;;  %v3629_v54 = vsub.f32 %v5710_v33, %v3607_v37  ;;  %5714 = vst [vmem:[#allocation82_spill] sm:$0xff] %v3636_v36  ;;  %v1723_v33 = vmul.f32 %v3619_v10, %v3619_v10 }
 0x1ca   :  { %v1793_v53 = vadd.f32 %v1792_v2, %v1699_v51  ;;  %v1711_v51 = vmul.f32 %v3593_v34, %v3593_v34  ;;  %v5712_v34 = vld [vmem:[#allocation34_spill] sm:$0xff] }
 0x1cb   :  { %v1447_v22 = vadd.f32 %v1446_v48, %v5706_v18  ;;  %5711 = vst [vmem:[#allocation9_spill] sm:$0xff] %v3629_v54  ;;  %v1719_v48 = vmul.f32 %v3612_v61, %v3612_v61 }
 0x1cc   :  { %v1794_v58 = vadd.f32 %v1793_v53, %v1703_v5  ;;  %v3625_v53 = vsub.f32 %v5708_v44, %v3607_v37  ;;  %v3643_v44 = vsub.f32 %v3340_v45, %v3485_v56  ;;  %v3658_v45 = vsub.f32 %v3346_v1, %v3485_v56 }
 0x1ce   :  { %v1795_v2 = vadd.f32 %v1794_v58, %v1707_v26  ;;  %5709 = vst [vmem:[#allocation27_spill] sm:$0xff] %v3625_v53  ;;  %v1448_v26 = vadd.f32 %v1447_v22, %v5712_v34  ;;  %v3632_v58 = vpop.f32.mrf.mxu3  ;;  %v5717_v34 = vld [vmem:[#allocation11_spill] sm:$0xff]  ;;  %v1656_v39 = vmul.f32 %v3625_v53, %v3625_v53  ;;  %v5722_v53 = vld [vmem:[#allocation42_spill] sm:$0xff]  ;;  %v1731_v1 = vmul.f32 %v3643_v44, %v3643_v44 }
 0x1cf   :  { %5713 = vst [vmem:[#allocation10_spill] sm:$0xff] %v3632_v58  ;;  %v3649_v55 = vsub.f32 %v5717_v34, %v3607_v37  ;;  %v3666_v34 = vsub.f32 %v3222_v49, %v3607_v37  ;;  %v5724_v49 = vld [vmem:[#allocation43_spill] sm:$0xff] }
 0x1d0   :  { %v1796_v5 = vadd.f32 %v1795_v2, %v1711_v51  ;;  %v5715_v2 = vld [vmem:[#allocation38_spill] sm:$0xff]  ;;  %5716 = vst [vmem:[#allocation83_spill] sm:$0xff] %v3643_v44 }
 0x1d1   :  { %v1449_v18 = vadd.f32 %v1448_v26, %v5715_v2  ;;  %5718 = vst [vmem:[#allocation11_spill] sm:$0xff] %v3649_v55  ;;  %v3660_v2 = vpop.f32.mrf.mxu2 }
 0x1d2   :  { %v1797_v51 = vadd.f32 %v1796_v5, %v1715_v38  ;;  %v1660_v38 = vmul.f32 %v3629_v54, %v3629_v54  ;;  %v5719_v5 = vld [vmem:[#allocation40_spill] sm:$0xff]  ;;  %5720 = vst [vmem:[#allocation84_spill] sm:$0xff] %v3660_v2  ;;  %v3671_v54 = vsub.f32 %v3352_v25, %v3485_v56  ;;  %v1735_v25 = vmul.f32 %v3658_v45, %v3658_v45 }
 0x1d3   :  { %v1450_v26 = vadd.f32 %v1449_v18, %v5719_v5  ;;  %5721 = vst [vmem:[#allocation85_spill] sm:$0xff] %v3666_v34  ;;  %v3677_v5 = vsub.f32 %v3229_v52, %v3607_v37  ;;  %v1668_v52 = vmul.f32 %v3666_v34, %v3666_v34  ;;  %v3712_v34 = vsub.f32 %v3369_v9, %v3485_v56 }
 0x1d4   :  { %v1798_v22 = vadd.f32 %v1797_v51, %v1719_v48  ;;  %v1727_v48 = vmul.f32 %v3636_v36, %v3636_v36 }
 0x1d5   :  { %v1451_v10 = vadd.f32 %v1450_v26, %v5722_v53  ;;  %5723 = vst [vmem:[#allocation86_spill] sm:$0xff] %v3677_v5  ;;  %v3684_v26 = vsub.f32 %v3356_v24, %v3485_v56  ;;  %v3699_v24 = vsub.f32 %v3362_v8, %v3485_v56 }
 0x1d6   :  { %v1799_v51 = vadd.f32 %v1798_v22, %v1723_v33  ;;  %v1664_v33 = vmul.f32 %v3649_v55, %v3649_v55  ;;  %v1820_v22 = vadd.f32 %v1660_v38, %v1656_v39  ;;  %v5727_v55 = vld [vmem:[#allocation44_spill] sm:$0xff]  ;;  %v3695_v38 = vpop.f32.mrf.mxu3 }
 0x1d7   :  { %v1452_v36 = vadd.f32 %v1451_v10, %v5724_v49  ;;  %5728 = vst [vmem:[#allocation87_spill] sm:$0xff] %v3695_v38  ;;  %v1739_v10 = vmul.f32 %v3671_v54, %v3671_v54  ;;  %v1743_v8 = vmul.f32 %v3684_v26, %v3684_v26  ;;  %v1747_v9 = vmul.f32 %v3699_v24, %v3699_v24 }
 0x1d8   :  { %v1800_v18 = vadd.f32 %v1799_v51, %v1727_v48  ;;  %v5725_v48 = vld [vmem:[#allocation12_spill] sm:$0xff]  ;;  %v1821_v44 = vadd.f32 %v1820_v22, %v1664_v33  ;;  %v5730_v22 = vld [vmem:[#allocation45_spill] sm:$0xff] }
 0x1d9   :  { %v3690_v51 = vsub.f32 %v5725_v48, %v3607_v37  ;;  %v1453_v39 = vadd.f32 %v1452_v36, %v5727_v55  ;;  %v1672_v48 = vmul.f32 %v3677_v5, %v3677_v5  ;;  %v5733_v5 = vld [vmem:[#allocation46_spill] sm:$0xff] }
 0x1da   :  { %v1801_v53 = vadd.f32 %v1800_v18, %v1731_v1  ;;  %v3705_v18 = vsub.f32 %v3244_v59, %v3607_v37  ;;  %v1822_v33 = vadd.f32 %v1821_v44, %v1668_v52  ;;  %v3725_v52 = vsub.f32 %v3379_v27, %v3485_v56 }
 0x1db   :  { %5726 = vst [vmem:[#allocation12_spill] sm:$0xff] %v3690_v51  ;;  %v1454_v36 = vadd.f32 %v1453_v39, %v5730_v22  ;;  %v1676_v59 = vmul.f32 %v3690_v51, %v3690_v51  ;;  %v3729_v39 = vpop.f32.mrf.mxu2  ;;  %v3740_v27 = vsub.f32 %v3389_v50, %v3485_v56  ;;  %v1751_v51 = vmul.f32 %v3712_v34, %v3712_v34 }
 0x1dc   :  { %v1802_v1 = vadd.f32 %v1801_v53, %v1735_v25  ;;  %5729 = vst [vmem:[#allocation88_spill] sm:$0xff] %v3705_v18  ;;  %v5731_v53 = vld [vmem:[#allocation17_spill] sm:$0xff]  ;;  %v1823_v49 = vadd.f32 %v1822_v33, %v1672_v48  ;;  %v5736_v33 = vld [vmem:[#allocation47_spill] sm:$0xff]  ;;  %v1755_v50 = vmul.f32 %v3725_v52, %v3725_v52 }
 0x1dd   :  { %v3718_v25 = vsub.f32 %v5731_v53, %v3607_v37  ;;  %v1455_v44 = vadd.f32 %v1454_v36, %v5733_v5  ;;  %5734 = vst [vmem:[#allocation89_spill] sm:$0xff] %v3729_v39  ;;  %v1680_v53 = vmul.f32 %v3705_v18, %v3705_v18  ;;  %v5739_v18 = vld [vmem:[#allocation48_spill] sm:$0xff] }
 0x1de   :  { %v1803_v55 = vadd.f32 %v1802_v1, %v1739_v10  ;;  %v3733_v1 = vsub.f32 %v3261_v3, %v3607_v37  ;;  %v1824_v48 = vadd.f32 %v1823_v49, %v1676_v59  ;;  %v3753_v59 = vsub.f32 %v3397_v32, %v3485_v56 }
 0x1df   :  { %5732 = vst [vmem:[#allocation17_spill] sm:$0xff] %v3718_v25  ;;  %v1456_v36 = vadd.f32 %v1455_v44, %v5736_v33  ;;  %v1684_v3 = vmul.f32 %v3718_v25, %v3718_v25  ;;  %v5743_v25 = vld [vmem:[#allocation49_spill] sm:$0xff]  ;;  %v3768_v32 = vsub.f32 %v3410_v6, %v3485_v56 }
 0x1e0   :  { %v1804_v10 = vadd.f32 %v1803_v55, %v1743_v8  ;;  %5735 = vst [vmem:[#allocation90_spill] sm:$0xff] %v3733_v1  ;;  %v5737_v55 = vld [vmem:[#allocation21_spill] sm:$0xff]  ;;  %v1825_v22 = vadd.f32 %v1824_v48, %v1680_v53  ;;  %v3764_v48 = vpop.f32.mrf.mxu3  ;;  %v1763_v6 = vmul.f32 %v3753_v59, %v3753_v59 }
 0x1e1   :  { %v3746_v8 = vsub.f32 %v5737_v55, %v3607_v37  ;;  %v1457_v49 = vadd.f32 %v1456_v36, %v5739_v18  ;;  %5740 = vst [vmem:[#allocation91_spill] sm:$0xff] %v3753_v59  ;;  %v1688_v55 = vmul.f32 %v3733_v1, %v3733_v1  ;;  %v1759_v36 = vmul.f32 %v3740_v27, %v3740_v27 }
 0x1e2   :  { %v1805_v5 = vadd.f32 %v1804_v10, %v1747_v9  ;;  %v5741_v9 = vld [vmem:[#allocation23_spill] sm:$0xff]  ;;  %v1826_v33 = vadd.f32 %v1825_v22, %v1684_v3  ;;  %5744 = vst [vmem:[#allocation92_spill] sm:$0xff] %v3764_v48  ;;  %v5748_v3 = vld [vmem:[#allocation50_spill] sm:$0xff] }
 0x1e3   :  { %5738 = vst [vmem:[#allocation21_spill] sm:$0xff] %v3746_v8  ;;  %v3759_v10 = vsub.f32 %v5741_v9, %v3607_v37  ;;  %v1458_v53 = vadd.f32 %v1457_v49, %v5743_v25  ;;  %v1692_v1 = vmul.f32 %v3746_v8, %v3746_v8  ;;  %v5749_v25 = vld [vmem:[#allocation52_spill] sm:$0xff]  ;;  %v5752_v8 = vld [vmem:[#allocation53_spill] sm:$0xff] }
 0x1e4   :  { %v1806_v44 = vadd.f32 %v1805_v5, %v1751_v51  ;;  %5745 = vst [vmem:[#allocation93_spill] sm:$0xff] %v3768_v32  ;;  %v5746_v51 = vld [vmem:[#allocation26_spill] sm:$0xff]  ;;  %v1827_v22 = vadd.f32 %v1826_v33, %v1688_v55  ;;  %v3781_v18 = vsub.f32 %v5749_v25, %v3485_v56  ;;  %v5753_v55 = vld [vmem:[#allocation55_spill] sm:$0xff]  ;;  %v1767_v25 = vmul.f32 %v3768_v32, %v3768_v32 }
 0x1e5   :  { %5742 = vst [vmem:[#allocation23_spill] sm:$0xff] %v3759_v10  ;;  %v3774_v9 = vsub.f32 %v5746_v51, %v3607_v37  ;;  %v1459_v49 = vadd.f32 %v1458_v53, %v5748_v3  ;;  %v1696_v51 = vmul.f32 %v3759_v10, %v3759_v10  ;;  %v3794_v53 = vsub.f32 %v5753_v55, %v3485_v56  ;;  %v3798_v3 = vpop.f32.mrf.mxu2 }
 0x1e6   :  { %v1807_v5 = vadd.f32 %v1806_v44, %v1755_v50  ;;  %v5750_v50 = vld [vmem:[#allocation29_spill] sm:$0xff]  ;;  %v1828_v38 = vadd.f32 %v1827_v22, %v1692_v1  ;;  %v5757_v22 = vld [vmem:[#allocation56_spill] sm:$0xff]  ;;  %v3809_v55 = vsub.f32 %v3456_v35, %v3485_v56  ;;  %v3824_v35 = vsub.f32 %v3320_v31, %v3607_v37 }
 0x1e7   :  { %5747 = vst [vmem:[#allocation26_spill] sm:$0xff] %v3774_v9  ;;  %v3787_v44 = vsub.f32 %v5750_v50, %v3607_v37  ;;  %v1460_v33 = vadd.f32 %v1459_v49, %v5752_v8  ;;  %v1700_v10 = vmul.f32 %v3774_v9, %v3774_v9  ;;  %v1771_v8 = vmul.f32 %v3781_v18, %v3781_v18 }
 0x1e8   :  { %v1808_v48 = vadd.f32 %v1807_v5, %v1759_v36  ;;  %5754 = vst [vmem:[#allocation29_spill] sm:$0xff] %v3798_v3  ;;  %v5755_v5 = vld [vmem:[#allocation31_spill] sm:$0xff]  ;;  %v1829_v1 = vadd.f32 %v1828_v38, %v1696_v51  ;;  %v1775_v51 = vmul.f32 %v3794_v53, %v3794_v53 }
 0x1e9   :  { %5751 = vst [vmem:[#allocation52_spill] sm:$0xff] %v3787_v44  ;;  %v3802_v50 = vsub.f32 %v5755_v5, %v3607_v37  ;;  %v1461_v49 = vadd.f32 %v1460_v33, %v5757_v22  ;;  %v1704_v5 = vmul.f32 %v3787_v44, %v3787_v44 }
 0x1ea   :  { %v1809_v36 = vadd.f32 %v1808_v48, %v1763_v6  ;;  %v5758_v48 = vld [vmem:[#allocation35_spill] sm:$0xff]  ;;  %v1830_v59 = vadd.f32 %v1829_v1, %v1700_v10  ;;  %5760 = vst [vmem:[#allocation56_spill] sm:$0xff] %v3824_v35  ;;  %v1779_v10 = vmul.f32 %v3809_v55, %v3809_v55 }
 0x1eb   :  { %5756 = vst [vmem:[#allocation55_spill] sm:$0xff] %v3802_v50  ;;  %v3815_v6 = vsub.f32 %v5758_v48, %v3607_v37  ;;  %v1462_v38 = vadd.f32 %v1461_v49, %v3462_v20  ;;  %v1708_v56 = vmul.f32 %v3802_v50, %v3802_v50  ;;  %v5761_v49 = vld [vmem:[#allocation39_spill] sm:$0xff] }
 0x1ec   :  { %v1810_v32 = vadd.f32 %v1809_v36, %v1767_v25  ;;  %v1831_v25 = vadd.f32 %v1830_v59, %v1704_v5  ;;  %v3828_v36 = vpop.f32.mrf.mxu3  ;;  %v3835_v44 = vsub.f32 %v5761_v49, %v3607_v37  ;;  %v5763_v59 = vld [vmem:[#allocation41_spill] sm:$0xff] }
 0x1ed   :  { %5759 = vst [vmem:[#allocation31_spill] sm:$0xff] %v3815_v6  ;;  %v1463_v48 = vadd.f32 %v1462_v38, %v3473_v21  ;;  %v1712_v31 = vmul.f32 %v3815_v6, %v3815_v6  ;;  %v3842_v5 = vsub.f32 %v5763_v59, %v3607_v37  ;;  %v1716_v38 = vmul.f32 %v3824_v35, %v3824_v35  ;;  %v5825_v21 = vld [vmem:[#allocation91_spill] sm:$0xff] }
 0x1ee   :  { %v1811_v33 = vadd.f32 %v1810_v32, %v1771_v8  ;;  %5762 = vst [vmem:[#allocation35_spill] sm:$0xff] %v3835_v44  ;;  %v1832_v8 = vadd.f32 %v1831_v25, %v1708_v56  ;;  %v3851_v6 = vsub.f32 %v3338_v40, %v3607_v37  ;;  %v1720_v56 = vmul.f32 %v3835_v44, %v3835_v44 }
 0x1ef   :  { %v1464_v32 = vadd.f32 %v1463_v48, %v3488_v0  ;;  %5764 = vst [vmem:[#allocation39_spill] sm:$0xff] %v3842_v5  ;;  %v3865_v40 = vsub.f32 %v3350_v17, %v3607_v37 }
 0x1f0   :  { %v1812_v1 = vadd.f32 %v1811_v33, %v1775_v51  ;;  %v1833_v9 = vadd.f32 %v1832_v8, %v1712_v31  ;;  %v3847_v33 = vpop.f32.mrf.mxu2  ;;  %5766 = vst [vmem:[#allocation94_spill] sm:$0xff] %v3851_v6  ;;  %v1724_v31 = vmul.f32 %v3842_v5, %v3842_v5 }
 0x1f1   :  { %v1465_v51 = vadd.f32 %v1464_v32, %v3525_v47  ;;  %5765 = vst [vmem:[#allocation41_spill] sm:$0xff] %v3847_v33 }
 0x1f2   :  { %v1813_v50 = vadd.f32 %v1812_v1, %v1779_v10  ;;  %v1834_v25 = vadd.f32 %v1833_v9, %v1716_v38  ;;  %v3858_v1 = vsub.f32 %v3344_v57, %v3607_v37  ;;  %5768 = vst [vmem:[#allocation96_spill] sm:$0xff] %v3865_v40  ;;  %v1728_v9 = vmul.f32 %v3851_v6, %v3851_v6  ;;  %v5820_v6 = vld [vmem:[#allocation24_spill] sm:$0xff] }
 0x1f3   :  { %v1466_v48 = vadd.f32 %v1465_v51, %v3559_v62  ;;  %v5780_v62 = vld [vmem:[#allocation28_spill] sm:$0xff] }
 0x1f4   :  { %v1814_v49 = vrot.slane %v1813_v50, 4  ;;  %5767 = vst [vmem:[#allocation95_spill] sm:$0xff] %v3858_v1  ;;  %v1835_v8 = vadd.f32 %v1834_v25, %v1720_v56  ;;  %v1732_v56 = vmul.f32 %v3858_v1, %v3858_v1  ;;  %v5819_v1 = vld [vmem:[#allocation20_spill] sm:$0xff] }
 0x1f5   :  { %v1467_v32 = vadd.f32 %v1466_v48, %v3598_v11  ;;  %v3881_v11 = vsub.f32 %v3364_v4, %v3607_v37 }
 0x1f6   :  { %v1815_v10 = vadd.f32 %v1814_v49, %v1813_v50  ;;  %v1836_v38 = vadd.f32 %v1835_v8, %v1724_v31  ;;  %v3869_v50 = vpop.f32.mrf.mxu3  ;;  %v3874_v49 = vsub.f32 %v3358_v19, %v3607_v37  ;;  %v1736_v31 = vmul.f32 %v3865_v40, %v3865_v40  ;;  %v5818_v40 = vld [vmem:[#allocation81_spill] sm:$0xff] }
 0x1f7   :  { %v1468_v57 = vadd.f32 %v1467_v32, %v3660_v2  ;;  %5770 = vst [vmem:[#allocation98_spill] sm:$0xff] %v3881_v11  ;;  %v3888_v19 = vsub.f32 %v3376_v13, %v3607_v37  ;;  %v5777_v2 = vld [vmem:[#allocation22_spill] sm:$0xff] }
 0x1f8   :  { %v1816_v59 = vrot.slane %v1815_v10, 2  ;;  %5769 = vst [vmem:[#allocation97_spill] sm:$0xff] %v3874_v49  ;;  %v1837_v25 = vadd.f32 %v1836_v38, %v1728_v9  ;;  %v3892_v38 = vpop.f32.mrf.mxu2 }
 0x1f9   :  { %v1469_v17 = vadd.f32 %v1468_v57, %v3729_v39  ;;  %5771 = vst [vmem:[#allocation99_spill] sm:$0xff] %v3888_v19  ;;  %v3903_v39 = vsub.f32 %v3387_v12, %v3607_v37 }
 0x1fa   :  { %v1817_v51 = vadd.f32 %v1816_v59, %v1815_v10  ;;  %v1838_v8 = vadd.f32 %v1837_v25, %v1732_v56  ;;  %v1740_v59 = vmul.f32 %v3874_v49, %v3874_v49  ;;  %5772 = vst [vmem:[#allocation100_spill] sm:$0xff] %v3892_v38  ;;  %v1744_v56 = vmul.f32 %v3881_v11, %v3881_v11 }
 0x1fb   :  { %v1470_v10 = vadd.f32 %v1469_v17, %v3798_v3  ;;  %v5773_v17 = vld [vmem:[#allocation14_spill] sm:$0xff]  ;;  %5775 = vst [vmem:[#allocation101_spill] sm:$0xff] %v3903_v39  ;;  %v1752_v12 = vmul.f32 %v3903_v39, %v3903_v39 }
 0x1fc   :  { %v1818_v48 = vrot.slane %v1817_v51, 1  ;;  %v1839_v9 = vadd.f32 %v1838_v8, %v1736_v31  ;;  %v1748_v31 = vmul.f32 %v3888_v19, %v3888_v19 }
 0x1fd   :  { %v1471_v4 = vadd.f32 %v1470_v10, %v3847_v33 }
 0x1fe   :  { %v1819_v32 = vadd.f32 %v1818_v48, %v1817_v51  ;;  %v1840_v25 = vadd.f32 %v1839_v9, %v1740_v59  ;;  %v5774_v51 = vld [vmem:[#allocation16_spill] sm:$0xff]  ;;  %v3907_v10 = vpop.f32.mrf.mxu3 }
 0x1ff   :  { %v1479_v48 = vadd.f32 %v5774_v51, %v5773_v17  ;;  %v1472_v13 = vadd.f32 %v1471_v4, %v3892_v38  ;;  %v3913_v4 = vsub.f32 %v3400_v16, %v3607_v37  ;;  %v5782_v16 = vld [vmem:[#allocation32_spill] sm:$0xff] }
 0x200   :  { %v1931_v57 = vmul.f32 %v1819_v32, %v3476_v28  ;;  %v1841_v8 = vadd.f32 %v1840_v25, %v1744_v56  ;;  %v5776_v32 = vld [vmem:[#allocation19_spill] sm:$0xff] }
 0x201   :  { %v1480_v33 = vadd.f32 %v1479_v48, %v5776_v32  ;;  %v1473_v9 = vrot.slane %v1472_v13, 4  ;;  %5778 = vst [vmem:[#allocation102_spill] sm:$0xff] %v3913_v4  ;;  %v3921_v48 = vsub.f32 %v3418_v42, %v3607_v37 }
 0x202   :  { %v1935_v3 = vadd.f32 1e-05, %v1931_v57  ;;  %v1842_v59 = vadd.f32 %v1841_v8, %v1748_v31  ;;  %v5779_v57 = vld [vmem:[#allocation25_spill] sm:$0xff] }
 0x203   :  { %v1481_v51 = vadd.f32 %v1480_v33, %v5777_v2  ;;  %v1474_v56 = vadd.f32 %v1473_v9, %v1472_v13  ;;  %5781 = vst [vmem:[#allocation103_spill] sm:$0xff] %v3921_v48  ;;  %v1756_v33 = vmul.f32 %v3913_v4, %v3913_v4  ;;  %v3931_v13 = vsub.f32 %v3436_v60, %v3607_v37  ;;  %v5785_v9 = vld [vmem:[#allocation51_spill] sm:$0xff]  ;;  %v5786_v4 = vld [vmem:[#allocation54_spill] sm:$0xff]  ;;  %v5788_v60 = vld [vmem:[#allocation57_spill] sm:$0xff] }
 0x204   :  { %2890 = vrsqrt.f32 %v1935_v3  ;;  %v1843_v17 = vadd.f32 %v1842_v59, %v1752_v12  ;;  %v1760_v42 = vmul.f32 %v3921_v48, %v3921_v48  ;;  %vm1945_vm2 = vweird.f32 %v1935_v3  ;;  %v5816_v48 = vld [vmem:[#allocation78_spill] sm:$0xff] }
 0x205   :  { %v1482_v38 = vadd.f32 %v1481_v51, %v5779_v57  ;;  %v1475_v39 = vrot.slane %v1474_v56, 2  ;;  %v5783_v51 = vld [vmem:[#allocation36_spill] sm:$0xff]  ;;  %5784 = vst [vmem:[#allocation104_spill] sm:$0xff] %v3931_v13 }
 0x206   :  { %v1844_v2 = vadd.f32 %v1843_v17, %v1756_v33  ;;  %v3926_v32 = vpop.f32.mrf.mxu3  ;;  %v3939_v17 = vsub.f32 %v3454_v29, %v3607_v37  ;;  %v1764_v33 = vmul.f32 %v3931_v13, %v3931_v13  ;;  %v5815_v13 = vld [vmem:[#allocation76_spill] sm:$0xff] }
 0x207   :  { %v1483_v19 = vadd.f32 %v1482_v38, %v5780_v62  ;;  %v1476_v57 = vadd.f32 %v1475_v39, %v1474_v56 }
 0x208   :  { %v1845_v62 = vadd.f32 %v1844_v2, %v1760_v42  ;;  %5787 = vst [vmem:[#allocation105_spill] sm:$0xff] %v3939_v17  ;;  %v3947_v2 = vsub.f32 %v3468_v7, %v3607_v37  ;;  %v1768_v39 = vmul.f32 %v3939_v17, %v3939_v17 }
 0x209   :  { %v1484_v8 = vadd.f32 %v1483_v19, %v5782_v16  ;;  %v1477_v11 = vrot.slane %v1476_v57, 1 }
 0x20a   :  { %v2891_v25 = vpop.eup %2890  ;;  %v1846_v16 = vadd.f32 %v1845_v62, %v1764_v33  ;;  %5789 = vst [vmem:[#allocation106_spill] sm:$0xff] %v3947_v2  ;;  %v5791_v62 = vld [vmem:[#allocation61_spill] sm:$0xff]  ;;  %v1772_v7 = vmul.f32 %v3947_v2, %v3947_v2 }
 0x20b   :  { %v1940_v31 = vmul.f32 %v2891_v25, %v1935_v3  ;;  %v1485_v59 = vadd.f32 %v1484_v8, %v5783_v51  ;;  %v3957_v33 = vsub.f32 %v5791_v62, %v3607_v37  ;;  %vm1946_vm1 = vweird.f32 %v2891_v25 }
 0x20c   :  { %v1847_v42 = vadd.f32 %v1846_v16, %v1768_v39  ;;  %vm1947_vm3 = vmor %vm1945_vm2, %vm1946_vm1  ;;  %v3970_v16 = vld [vmem:[#allocation3] sm:$0xf]  ;;  %v3972_v39 = vld [vmem:[#allocation5] sm:$0xf] }
 0x20d   :  { %v1941_v38 = vmul.f32 %v2891_v25, %v1940_v31  ;;  %v1486_v12 = vadd.f32 %v1485_v59, %v5785_v9  ;;  %5792 = vst [vmem:[#allocation61_spill] sm:$0xff] %v3957_v33 }
 0x20e   :  { %v3951_v56 = vpop.f32.mrf.mxu3  ;;  %5795 = vst [vmem:[#allocation107_spill] sm:$0xff] %v3970_v16 }
 0x20f   :  { %v1487_v19 = vadd.f32 %v1486_v12, %v5786_v4  ;;  %v1942_v8 = vmul.f32 0.5, %v1941_v38  ;;  %v1478_v38 = vadd.f32 %v1477_v11, %v1476_v57  ;;  %v5790_v12 = vld [vmem:[#allocation66_spill] sm:$0xff]  ;;  %5796 = vst [vmem:[#allocation108_spill] sm:$0xff] %v3972_v39 }
 0x211   :  { %v1488_v51 = vadd.f32 %v1487_v19, %v5788_v60  ;;  %v1943_v29 = vsub.f32 1.5, %v1942_v8  ;;  %v5793_v60 = vld [vmem:[#allocation67_spill] sm:$0xff]  ;;  %v3967_v11 = vmul.f32 %v3476_v28, %v1478_v38  ;;  %v3989_v38 = vperm.slane %v3972_v39, 0 }
 0x212   :  { %v3964_v8 = vsub.f32 %v5793_v60, %v3607_v37 }
 0x213   :  { %v1489_v31 = vadd.f32 %v1488_v51, %v3466_v15  ;;  %v1944_v51 = vmul.f32 %v2891_v25, %v1943_v29  ;;  %v1776_v29 = vmul.f32 %v3957_v33, %v3957_v33 }
 0x214   :  { %5794 = vst [vmem:[#allocation67_spill] sm:$0xff] %v3964_v8  ;;  %v1780_v3 = vmul.f32 %v3964_v8, %v3964_v8  ;;  %v5812_v8 = vld [vmem:[#allocation72_spill] sm:$0xff] }
 0x215   :  { %v1490_v59 = vadd.f32 %v1489_v31, %v3479_v30  ;;  %v1848_v31 = vadd.f32 %v1847_v42, %v1772_v7  ;;  %v5806_v30 = vld [vmem:[#allocation68_spill] sm:$0xff] }
 0x216   :  { %v3983_v42 = vpop.f32.mrf.mxu3 }
 0x217   :  { %v1491_v19 = vadd.f32 %v1490_v59, %v5790_v12  ;;  %v3976_v59 = vsel %vm1947_vm3, %v2891_v25, %v1944_v51  ;;  %v1849_v60 = vadd.f32 %v1848_v31, %v1776_v29  ;;  %v5799_v25 = vld [vmem:[#allocation15_spill] sm:$0xff]  ;;  %v5802_v31 = vld [vmem:[#allocation64_spill] sm:$0xff] }
 0x218   :  { %v3997_v7 = vsub.f32 %v5799_v25, %v3967_v11  ;;  %v5801_v51 = vld [vmem:[#allocation63_spill] sm:$0xff]  ;;  %v1983_v29 = vmul.f32 %v3976_v59, %v5802_v31  ;;  %v4013_v25 = vsub.f32 %v5698_v41, %v3967_v11  ;;  %v4021_v31 = vsub.f32 %v5705_v46, %v3967_v11  ;;  %v5813_v41 = vld [vmem:[#allocation73_spill] sm:$0xff] }
 0x219   :  { %v1492_v15 = vadd.f32 %v1491_v19, %v3545_v23  ;;  %v5797_v19 = vld [vmem:[#allocation13_spill] sm:$0xff]  ;;  %v5804_v23 = vld [vmem:[#allocation18_spill] sm:$0xff]  ;;  %v4029_v33 = vadd.f32 %v1849_v60, %v1780_v3  ;;  %v2007_v2 = vmul.f32 %v3976_v59, %v5813_v41  ;;  %v2015_v46 = vmul.f32 %v3976_v59, %v5815_v13  ;;  %v5817_v60 = vld [vmem:[#allocation79_spill] sm:$0xff] }
 0x21a   :  { %v3993_v62 = vsub.f32 %v5797_v19, %v3967_v11  ;;  %5800 = vst [vmem:[#allocation15_spill] sm:$0xff] %v3997_v7  ;;  %v4007_v12 = vsub.f32 %v5804_v23, %v3967_v11  ;;  %v1991_v19 = vmul.f32 %v3976_v59, %v5806_v30  ;;  %v5811_v23 = vld [vmem:[#allocation71_spill] sm:$0xff]  ;;  %v2003_v30 = vmul.f32 %v3976_v59, %v5812_v8 }
 0x21b   :  { %v1493_v57 = vadd.f32 %v1492_v15, %v3582_v14  ;;  %v3986_v15 = vperm.slane %v3970_v16, 0  ;;  %5807 = vst [vmem:[#allocation64_spill] sm:$0xff] %v4013_v25  ;;  %v1999_v9 = vmul.f32 %v3976_v59, %v5811_v23  ;;  %v2023_v23 = vmul.f32 %v3976_v59, %v3569_v63 }
 0x21c   :  { %5798 = vst [vmem:[#allocation13_spill] sm:$0xff] %v3993_v62  ;;  %v2027_v41 = vmul.f32 %v3976_v59, %v5817_v60  ;;  %v2035_v13 = vmul.f32 %v3976_v59, %v5819_v1  ;;  %v2039_v63 = vmul.f32 %v3976_v59, %v5820_v6  ;;  %v5822_v60 = vld [vmem:[#allocation82_spill] sm:$0xff]  ;;  %v4064_v1 = vmul.f32 %v3976_v59, %v3658_v45 }
 0x21d   :  { %v3979_v37 = vadd.f32 %v1493_v57, %v3632_v58  ;;  %v1979_v57 = vmul.f32 %v3976_v59, %v5801_v51  ;;  %v5803_v58 = vld [vmem:[#allocation65_spill] sm:$0xff]  ;;  %5805 = vst [vmem:[#allocation63_spill] sm:$0xff] %v4007_v12  ;;  %v4017_v51 = vsub.f32 %v5701_v43, %v3967_v11  ;;  %v5814_v43 = vld [vmem:[#allocation75_spill] sm:$0xff]  ;;  %v2121_v8 = vmul.f32 %v3986_v15, %v1983_v29 }
 0x21e   :  { %v1987_v14 = vmul.f32 %v3976_v59, %v5803_v58  ;;  %5809 = vst [vmem:[#allocation18_spill] sm:$0xff] %v4021_v31  ;;  %v5810_v58 = vld [vmem:[#allocation69_spill] sm:$0xff]  ;;  %v2011_v17 = vmul.f32 %v3976_v59, %v5814_v43  ;;  %v2031_v43 = vmul.f32 %v3976_v59, %v5818_v40  ;;  %v2051_v44 = vmul.f32 %v3976_v59, %v5822_v60  ;;  %v5823_v40 = vld [vmem:[#allocation83_spill] sm:$0xff]  ;;  %v4071_v39 = vpop.f32.mrf.mxu3 }
 0x21f   :  { %5808 = vst [vmem:[#allocation65_spill] sm:$0xff] %v4017_v51  ;;  %v1995_v4 = vmul.f32 %v3976_v59, %v5810_v58  ;;  %v2019_v58 = vmul.f32 %v3976_v59, %v5816_v48  ;;  %v2117_v49 = vmul.f32 %v3986_v15, %v1979_v57  ;;  %v2129_v48 = vmul.f32 %v3986_v15, %v1991_v19  ;;  %v5821_v29 = vld [vmem:[#allocation37_spill] sm:$0xff] }
 0x220   :  { %v2125_v3 = vmul.f32 %v3986_v15, %v1987_v14  ;;  %v2043_v57 = vmul.f32 %v3976_v59, %v3612_v61  ;;  %v2047_v14 = vmul.f32 %v3976_v59, %v5821_v29  ;;  %v2055_v35 = vmul.f32 %v3976_v59, %v5823_v40  ;;  %5824 = vst [vmem:[#allocation68_spill] sm:$0xff] %v4071_v39 }
 0x221   :  { %v2133_v5 = vmul.f32 %v3986_v15, %v1995_v4  ;;  %v2137_v6 = vmul.f32 %v3986_v15, %v1999_v9  ;;  %v2141_v19 = vmul.f32 %v3986_v15, %v2003_v30  ;;  %v2255_v61 = vadd.f32 %v3989_v38, %v2117_v49 }
 0x222   :  { %v2259_v29 = vadd.f32 %v3989_v38, %v2121_v8  ;;  %v2263_v4 = vadd.f32 %v3989_v38, %v2125_v3  ;;  %v2063_v60 = vmul.f32 %v3976_v59, %v3671_v54  ;;  %v2067_v40 = vmul.f32 %v3976_v59, %v3684_v26 }
 0x223   :  { %v2145_v45 = vmul.f32 %v3986_v15, %v2007_v2  ;;  %v2267_v9 = vadd.f32 %v3989_v38, %v2129_v48  ;;  %v2071_v30 = vmul.f32 %v3976_v59, %v3699_v24  ;;  %v2075_v49 = vmul.f32 %v3976_v59, %v3712_v34 }
 0x224   :  { %v2149_v8 = vmul.f32 %v3986_v15, %v2011_v17  ;;  %v2271_v3 = vadd.f32 %v3989_v38, %v2133_v5  ;;  %v4087_v54 = vmul.f32 %v3976_v59, %v3725_v52  ;;  %v2153_v26 = vmul.f32 %v3986_v15, %v2015_v46 }
 0x225   :  { %v2157_v2 = vmul.f32 %v3986_v15, %v2019_v58  ;;  %v2275_v48 = vadd.f32 %v3989_v38, %v2137_v6  ;;  %v2279_v16 = vadd.f32 %v3989_v38, %v2141_v19  ;;  %v2383_v24 = vmax.f32 %v2255_v61, 0.0 }
 0x226   :  { %v2387_v47 = vmax.f32 %v2259_v29, 0.0  ;;  %v2391_v0 = vmax.f32 %v2263_v4, 0.0  ;;  %v4095_v34 = vmul.f32 %v3976_v59, %v3740_v27  ;;  %v2161_v5 = vmul.f32 %v3986_v15, %v2023_v23  ;;  %v5826_v27 = vld [vmem:[#allocation93_spill] sm:$0xff] }
 0x227   :  { %v2283_v52 = vadd.f32 %v3989_v38, %v2145_v45  ;;  %v2395_v17 = vmax.f32 %v2267_v9, 0.0  ;;  %v4101_v46 = vmul.f32 %v3976_v59, %v5825_v21  ;;  %v2165_v58 = vmul.f32 %v3986_v15, %v2027_v41  ;;  %2511 = vst [vmem:[%s5447_s4] sm:$0xff] %v2383_v24 }
 0x228   :  { %v2287_v6 = vadd.f32 %v3989_v38, %v2149_v8  ;;  %v2399_v19 = vmax.f32 %v2271_v3, 0.0  ;;  %v2091_v61 = vmul.f32 %v3976_v59, %v5826_v27  ;;  %v2169_v23 = vmul.f32 %v3986_v15, %v2031_v43  ;;  %2515 = vst [vmem:[%s5447_s4 + $0x20] sm:$0xff] %v2387_v47 }
 0x229   :  { %v2291_v29 = vadd.f32 %v3989_v38, %v2153_v26  ;;  %v2403_v4 = vmax.f32 %v2275_v48, 0.0  ;;  %v2095_v21 = vmul.f32 %v3976_v59, %v3781_v18  ;;  %v2173_v41 = vmul.f32 %v3986_v15, %v2035_v13  ;;  %2519 = vst [vmem:[%s5447_s4 + $0x40] sm:$0xff] %v2391_v0 }
 0x22a   :  { %v2295_v45 = vadd.f32 %v3989_v38, %v2157_v2  ;;  %v2407_v9 = vmax.f32 %v2279_v16, 0.0  ;;  %v4124_v43 = vmul.f32 %v3976_v59, %v3794_v53  ;;  %v2177_v8 = vmul.f32 %v3986_v15, %v2039_v63  ;;  %2523 = vst [vmem:[%s5447_s4 + $0x60] sm:$0xff] %v2395_v17  ;;  %v4140_v53 = vpop.f32.mrf.mxu3 }
 0x22b   :  { %v2299_v47 = vadd.f32 %v3989_v38, %v2161_v5  ;;  %v2411_v3 = vmax.f32 %v2283_v52, 0.0  ;;  %v4133_v18 = vmul.f32 %v3976_v59, %v3809_v55  ;;  %v2181_v16 = vmul.f32 %v3986_v15, %v2043_v57  ;;  %2527 = vst [vmem:[%s5447_s4 + $0x80] sm:$0xff] %v2399_v19 }
 0x22c   :  { %v2303_v0 = vadd.f32 %v3989_v38, %v2165_v58  ;;  %v2415_v13 = vmax.f32 %v2287_v6, 0.0  ;;  %5827 = vst [vmem:[#allocation69_spill] sm:$0xff] %v4140_v53  ;;  %v2185_v63 = vmul.f32 %v3986_v15, %v2047_v14  ;;  %v2189_v26 = vmul.f32 %v3986_v15, %v2051_v44 }
 0x22d   :  { %v2307_v2 = vadd.f32 %v3989_v38, %v2169_v23  ;;  %v2419_v48 = vmax.f32 %v2291_v29, 0.0  ;;  %2531 = vst [vmem:[%s5447_s4 + $0xa0] sm:$0xff] %v2403_v4  ;;  %v2193_v55 = vmul.f32 %v3986_v15, %v2055_v35  ;;  %v2311_v59 = vadd.f32 %v3989_v38, %v2173_v41 }
 0x22e   :  { %v2423_v57 = vmax.f32 %v2295_v45, 0.0  ;;  %2535 = vst [vmem:[%s5447_s4 + $0xc0] sm:$0xff] %v2407_v9  ;;  %v1851_v14 = vrot.slane %v4029_v33, 4  ;;  %v2197_v44 = vmul.f32 %v3986_v15, %v4064_v1  ;;  %v2201_v24 = vmul.f32 %v3986_v15, %v2063_v60 }
 0x22f   :  { %v2315_v5 = vadd.f32 %v3989_v38, %v2177_v8  ;;  %v2427_v52 = vmax.f32 %v2299_v47, 0.0  ;;  %2539 = vst [vmem:[%s5447_s4 + $0xe0] sm:$0xff] %v2411_v3  ;;  %v2205_v35 = vmul.f32 %v3986_v15, %v2067_v40  ;;  %v2319_v17 = vadd.f32 %v3989_v38, %v2181_v16 }
 0x230   :  { %v2431_v58 = vmax.f32 %v2303_v0, 0.0  ;;  %2543 = vst [vmem:[%s5447_s4 + $0x100] sm:$0xff] %v2415_v13  ;;  %v1852_v1 = vadd.f32 %v1851_v14, %v4029_v33  ;;  %v2209_v60 = vmul.f32 %v3986_v15, %v2071_v30  ;;  %v2213_v6 = vmul.f32 %v3986_v15, %v2075_v49 }
 0x231   :  { %v2323_v19 = vadd.f32 %v3989_v38, %v2185_v63  ;;  %v2435_v27 = vmax.f32 %v2307_v2, 0.0  ;;  %2547 = vst [vmem:[%s5447_s4 + $0x120] sm:$0xff] %v2419_v48  ;;  %v2217_v40 = vmul.f32 %v3986_v15, %v4087_v54  ;;  %v2327_v23 = vadd.f32 %v3989_v38, %v2189_v26 }
 0x232   :  { %v2439_v29 = vmax.f32 %v2311_v59, 0.0  ;;  %2551 = vst [vmem:[%s5447_s4 + $0x140] sm:$0xff] %v2423_v57  ;;  %v1853_v33 = vrot.slane %v1852_v1, 2  ;;  %v2331_v30 = vadd.f32 %v3989_v38, %v2193_v55  ;;  %v2443_v49 = vmax.f32 %v2315_v5, 0.0 }
 0x233   :  { %2555 = vst [vmem:[%s5447_s4 + $0x160] sm:$0xff] %v2427_v52  ;;  %v1657_v4 = vmul.f32 %v3993_v62, %v3993_v62  ;;  %v1661_v54 = vmul.f32 %v3997_v7, %v3997_v7  ;;  %v2221_v41 = vmul.f32 %v3986_v15, %v4095_v34  ;;  %v2335_v45 = vadd.f32 %v3989_v38, %v2197_v44 }
 0x234   :  { %v2447_v9 = vmax.f32 %v2319_v17, 0.0  ;;  %2559 = vst [vmem:[%s5447_s4 + $0x180] sm:$0xff] %v2431_v58  ;;  %v1854_v8 = vadd.f32 %v1853_v33, %v1852_v1  ;;  %v2225_v47 = vmul.f32 %v3986_v15, %v4101_v46  ;;  %v2229_v3 = vmul.f32 %v3986_v15, %v2091_v61  ;;  %v4205_v46 = vpop.f32.mrf.mxu3 }
 0x235   :  { %v2339_v16 = vadd.f32 %v3989_v38, %v2201_v24  ;;  %v2451_v0 = vmax.f32 %v2323_v19, 0.0  ;;  %2563 = vst [vmem:[%s5447_s4 + $0x1a0] sm:$0xff] %v2435_v27  ;;  %v2233_v34 = vmul.f32 %v3986_v15, %v2095_v21  ;;  %v2343_v13 = vadd.f32 %v3989_v38, %v2205_v35 }
 0x236   :  { %v2455_v63 = vmax.f32 %v2327_v23, 0.0  ;;  %2567 = vst [vmem:[%s5447_s4 + $0x1c0] sm:$0xff] %v2439_v29  ;;  %v1855_v26 = vrot.slane %v1854_v8, 1  ;;  %v2347_v61 = vadd.f32 %v3989_v38, %v2209_v60  ;;  %v2459_v2 = vmax.f32 %v2331_v30, 0.0 }
 0x237   :  { %5828 = vst [vmem:[#allocation71_spill] sm:$0xff] %v4205_v46  ;;  %v1665_v21 = vmul.f32 %v4007_v12, %v4007_v12  ;;  %v1857_v48 = vadd.f32 %v1661_v54, %v1657_v4  ;;  %v2237_v55 = vmul.f32 %v3986_v15, %v4124_v43  ;;  %v2351_v59 = vadd.f32 %v3989_v38, %v2213_v6  ;;  %v5831_v4 = vld [vmem:[#allocation87_spill] sm:$0xff]  ;;  %v5892_v12 = vld [vmem:[#allocation101_spill] sm:$0xff] }
 0x238   :  { %2571 = vst [vmem:[%s5447_s4 + $0x1e0] sm:$0xff] %v2443_v49  ;;  %v2463_v57 = vmax.f32 %v2335_v45, 0.0  ;;  %v1856_v14 = vadd.f32 %v1855_v26, %v1854_v8  ;;  %v2355_v44 = vadd.f32 %v3989_v38, %v2217_v40  ;;  %v2467_v24 = vmax.f32 %v2339_v16, 0.0  ;;  %v5829_v40 = vld [vmem:[#allocation30_spill] sm:$0xff] }
 0x239   :  { %2575 = vst [vmem:[%s5447_s4 + $0x200] sm:$0xff] %v2447_v9  ;;  %v1669_v5 = vmul.f32 %v4013_v25, %v4013_v25  ;;  %v1858_v52 = vadd.f32 %v1857_v48, %v1665_v21  ;;  %v2241_v43 = vmul.f32 %v3986_v15, %v4133_v18  ;;  %v2359_v35 = vadd.f32 %v3989_v38, %v2221_v41 }
 0x23a   :  { %2579 = vst [vmem:[%s5447_s4 + $0x220] sm:$0xff] %v2451_v0  ;;  %v2471_v17 = vmax.f32 %v2343_v13, 0.0  ;;  %v1932_v58 = vmul.f32 %v1856_v14, %v3476_v28  ;;  %v2363_v1 = vadd.f32 %v3989_v38, %v2225_v47  ;;  %v2475_v60 = vmax.f32 %v2347_v61, 0.0  ;;  %v5833_v0 = vld [vmem:[#allocation34_spill] sm:$0xff] }
 0x23b   :  { %2583 = vst [vmem:[%s5447_s4 + $0x240] sm:$0xff] %v2455_v63  ;;  %v1673_v6 = vmul.f32 %v4017_v51, %v4017_v51  ;;  %v1859_v15 = vadd.f32 %v1858_v52, %v1669_v5  ;;  %v2367_v18 = vadd.f32 %v3989_v38, %v2229_v3  ;;  %v2479_v19 = vmax.f32 %v2351_v59, 0.0  ;;  %v5832_v3 = vld [vmem:[#allocation92_spill] sm:$0xff]  ;;  %v5836_v59 = vld [vmem:[#allocation38_spill] sm:$0xff] }
 0x23c   :  { %2587 = vst [vmem:[%s5447_s4 + $0x260] sm:$0xff] %v2459_v2  ;;  %v4242_v27 = vadd.f32 1e-05, %v1932_v58  ;;  %v4246_v23 = vsub.f32 %v5829_v40, %v3967_v11  ;;  %v2371_v29 = vadd.f32 %v3989_v38, %v2233_v34  ;;  %v2483_v33 = vmax.f32 %v2355_v44, 0.0  ;;  %v4275_v13 = vpop.f32.mrf.mxu3 }
 0x23d   :  { %2591 = vst [vmem:[%s5447_s4 + $0x280] sm:$0xff] %v2463_v57  ;;  %v1677_v30 = vmul.f32 %v4021_v31, %v4021_v31  ;;  %v1860_v49 = vadd.f32 %v1859_v15, %v1673_v6  ;;  %v1495_v54 = vadd.f32 %v3979_v37, %v5831_v4  ;;  %v2375_v41 = vadd.f32 %v3989_v38, %v2237_v55 }
 0x23e   :  { %5830 = vst [vmem:[#allocation72_spill] sm:$0xff] %v4246_v23  ;;  %v2487_v45 = vmax.f32 %v2359_v35, 0.0  ;;  %2892 = vrsqrt.f32 %v4242_v27  ;;  %v2379_v9 = vadd.f32 %v3989_v38, %v2241_v43  ;;  %v2491_v8 = vmax.f32 %v2363_v1, 0.0  ;;  %v5838_v43 = vld [vmem:[#allocation40_spill] sm:$0xff] }
 0x23f   :  { %2595 = vst [vmem:[%s5447_s4 + $0x2a0] sm:$0xff] %v2467_v24  ;;  %v1861_v47 = vadd.f32 %v1860_v49, %v1677_v30  ;;  %v1496_v16 = vadd.f32 %v1495_v54, %v5832_v3  ;;  %v2495_v37 = vmax.f32 %v2367_v18, 0.0  ;;  %v4271_v34 = vsub.f32 %v5833_v0, %v3967_v11  ;;  %v5841_v18 = vld [vmem:[#allocation42_spill] sm:$0xff]  ;;  %v5843_v54 = vld [vmem:[#allocation43_spill] sm:$0xff] }
 0x240   :  { %2599 = vst [vmem:[%s5447_s4 + $0x2c0] sm:$0xff] %v2471_v17  ;;  %v1681_v38 = vmul.f32 %v4246_v23, %v4246_v23  ;;  %v2499_v63 = vmax.f32 %v2371_v29, 0.0  ;;  %v2503_v61 = vmax.f32 %v2375_v41, 0.0  ;;  %v2507_v21 = vmax.f32 %v2379_v9, 0.0 }
 0x241   :  { %2603 = vst [vmem:[%s5447_s4 + $0x2e0] sm:$0xff] %v2475_v60  ;;  %v1497_v26 = vadd.f32 %v1496_v16, %v3828_v36  ;;  %v4293_v57 = vsub.f32 %v5836_v59, %v3967_v11  ;;  %v1685_v14 = vmul.f32 %v4271_v34, %v4271_v34  ;;  %v4311_v35 = vsub.f32 %v5838_v43, %v3967_v11  ;;  %v5856_v43 = vld [vmem:[#allocation49_spill] sm:$0xff] }
 0x242   :  { %2607 = vst [vmem:[%s5447_s4 + $0x300] sm:$0xff] %v2479_v19  ;;  %v1862_v2 = vadd.f32 %v1861_v47, %v1681_v38  ;;  %v4321_v19 = vsub.f32 %v5841_v18, %v3967_v11  ;;  %v4329_v41 = vsub.f32 %v5843_v54, %v3967_v11  ;;  %vm1955_vm5 = vweird.f32 %v4242_v27  ;;  %v5864_v54 = vld [vmem:[#allocation62_spill] sm:$0xff] }
 0x243   :  { %5834 = vst [vmem:[#allocation73_spill] sm:$0xff] %v4271_v34  ;;  %v1498_v55 = vadd.f32 %v1497_v26, %v3869_v50  ;;  %v1689_v17 = vmul.f32 %v4293_v57, %v4293_v57  ;;  %v1693_v40 = vmul.f32 %v4311_v35, %v4311_v35 }
 0x244   :  { %5835 = vst [vmem:[#allocation75_spill] sm:$0xff] %v4275_v13  ;;  %v2893_v48 = vpop.eup %2892  ;;  %v1863_v5 = vadd.f32 %v1862_v2, %v1685_v14  ;;  %v4316_v6 = vpop.f32.mrf.mxu3  ;;  %v1701_v38 = vmul.f32 %v4329_v41, %v4329_v41  ;;  %v5848_v2 = vld [vmem:[#allocation45_spill] sm:$0xff] }
 0x245   :  { %2611 = vst [vmem:[%s5447_s4 + $0x320] sm:$0xff] %v2483_v33  ;;  %v1950_v44 = vmul.f32 %v2893_v48, %v4242_v27  ;;  %v1499_v24 = vadd.f32 %v1498_v55, %v3907_v10  ;;  %vm1956_vm4 = vweird.f32 %v2893_v48  ;;  %v5850_v55 = vld [vmem:[#allocation46_spill] sm:$0xff]  ;;  %v5860_v27 = vld [vmem:[#allocation53_spill] sm:$0xff] }
 0x246   :  { %2615 = vst [vmem:[%s5447_s4 + $0x340] sm:$0xff] %v2487_v45  ;;  %v1864_v60 = vadd.f32 %v1863_v5, %v1689_v17  ;;  %v1697_v45 = vmul.f32 %v4321_v19, %v4321_v19  ;;  %v4350_v59 = vsub.f32 %v5850_v55, %v3967_v11  ;;  %v5854_v5 = vld [vmem:[#allocation48_spill] sm:$0xff]  ;;  %v4363_v17 = vsub.f32 %v5856_v43, %v3967_v11  ;;  %vm1957_vm6 = vmor %vm1955_vm5, %vm1956_vm4  ;;  %v5868_v55 = vld [vmem:[#allocation11_spill] sm:$0xff] }
 0x247   :  { %2619 = vst [vmem:[%s5447_s4 + $0x360] sm:$0xff] %v2491_v8  ;;  %v1500_v52 = vadd.f32 %v1499_v24, %v3926_v32  ;;  %v1951_v58 = vmul.f32 %v2893_v48, %v1950_v44  ;;  %v5852_v44 = vld [vmem:[#allocation47_spill] sm:$0xff]  ;;  %v5870_v43 = vld [vmem:[#allocation85_spill] sm:$0xff] }
 0x248   :  { %2623 = vst [vmem:[%s5447_s4 + $0x380] sm:$0xff] %v2495_v37  ;;  %v1865_v30 = vadd.f32 %v1864_v60, %v1693_v40  ;;  %v5845_v37 = vld [vmem:[#allocation44_spill] sm:$0xff]  ;;  %v4355_v24 = vsub.f32 %v5852_v44, %v3967_v11  ;;  %v5869_v44 = vld [vmem:[#allocation107_spill] sm:$0xff] }
 0x249   :  { %5837 = vst [vmem:[#allocation76_spill] sm:$0xff] %v4293_v57  ;;  %v1501_v1 = vadd.f32 %v1500_v52, %v3951_v56  ;;  %v1952_v29 = vmul.f32 0.5, %v1951_v58  ;;  %v4337_v0 = vsub.f32 %v5845_v37, %v3967_v11  ;;  %v4359_v52 = vsub.f32 %v5854_v5, %v3967_v11 }
 0x24a   :  { %2627 = vst [vmem:[%s5447_s4 + $0x3a0] sm:$0xff] %v2499_v63  ;;  %v1866_v47 = vadd.f32 %v1865_v30, %v1697_v45  ;;  %v5863_v30 = vld [vmem:[#allocation59_spill] sm:$0xff]  ;;  %v4394_v45 = vsub.f32 %v5864_v54, %v3967_v11  ;;  %v4416_v37 = vmul.f32 %v4363_v17, %v4363_v17  ;;  %v4425_v5 = vperm.slane %v5869_v44, 1  ;;  %v5871_v54 = vld [vmem:[#allocation86_spill] sm:$0xff] }
 0x24b   :  { %2631 = vst [vmem:[%s5447_s4 + $0x3c0] sm:$0xff] %v2503_v61  ;;  %v1502_v15 = vadd.f32 %v1501_v1, %v3983_v42  ;;  %v1953_v9 = vsub.f32 1.5, %v1952_v29  ;;  %v5858_v1 = vld [vmem:[#allocation50_spill] sm:$0xff]  ;;  %v1705_v18 = vmul.f32 %v4337_v0, %v4337_v0  ;;  %v4382_v29 = vsub.f32 %v5757_v22, %v3967_v11 }
 0x24c   :  { %2635 = vst [vmem:[%s5447_s4 + $0x3e0] sm:$0xff] %v2507_v21  ;;  %v4341_v63 = vpop.f32.mrf.mxu3  ;;  %v4346_v21 = vsub.f32 %v5848_v2, %v3967_v11  ;;  %v1867_v14 = vadd.f32 %v1866_v47, %v1701_v38  ;;  %v4370_v60 = vsub.f32 %v5858_v1, %v3967_v11  ;;  %v4408_v47 = vmul.f32 %v4355_v24, %v4355_v24  ;;  %v5866_v38 = vld [vmem:[#allocation27_spill] sm:$0xff] }
 0x24d   :  { %5839 = vst [vmem:[#allocation78_spill] sm:$0xff] %v4311_v35  ;;  %v1503_v33 = vadd.f32 %v1502_v15, %v4071_v39  ;;  %v1954_v26 = vmul.f32 %v2893_v48, %v1953_v9  ;;  %v4374_v15 = vsub.f32 %v5860_v27, %v3967_v11  ;;  %v5865_v9 = vld [vmem:[#allocation70_spill] sm:$0xff]  ;;  %v5894_v39 = vld [vmem:[#allocation103_spill] sm:$0xff] }
 0x24e   :  { %5840 = vst [vmem:[#allocation79_spill] sm:$0xff] %v4316_v6  ;;  %v1709_v22 = vmul.f32 %v4346_v21, %v4346_v21  ;;  %v4431_v27 = vmul.f32 %v4370_v60, %v4370_v60 }
 0x24f   :  { %5842 = vst [vmem:[#allocation81_spill] sm:$0xff] %v4321_v19  ;;  %v1504_v49 = vadd.f32 %v1503_v33, %v4140_v53  ;;  %v4378_v40 = vsel %vm1957_vm6, %v2893_v48, %v1954_v26  ;;  %v4386_v33 = vsub.f32 %v3462_v20, %v3967_v11  ;;  %v4398_v48 = vsub.f32 %v5865_v9, %v3967_v11  ;;  %v5883_v19 = vld [vmem:[#allocation56_spill] sm:$0xff] }
 0x250   :  { %5844 = vst [vmem:[#allocation20_spill] sm:$0xff] %v4329_v41  ;;  %v4404_v20 = vmul.f32 %v4350_v59, %v4350_v59  ;;  %v1980_v26 = vmul.f32 %v4378_v40, %v5866_v38  ;;  %v1992_v1 = vmul.f32 %v4378_v40, %v5870_v43  ;;  %v1996_v9 = vmul.f32 %v4378_v40, %v5871_v54  ;;  %v5872_v38 = vld [vmem:[#allocation12_spill] sm:$0xff]  ;;  %v5882_v41 = vld [vmem:[#allocation31_spill] sm:$0xff] }
 0x251   :  { %v1505_v8 = vadd.f32 %v1504_v49, %v4205_v46  ;;  %5846 = vst [vmem:[#allocation24_spill] sm:$0xff] %v4337_v0  ;;  %v4390_v49 = vsub.f32 %v5863_v30, %v3967_v11  ;;  %v4439_v30 = vmul.f32 %v4382_v29, %v4382_v29  ;;  %v5881_v0 = vld [vmem:[#allocation55_spill] sm:$0xff]  ;;  %v5893_v46 = vld [vmem:[#allocation102_spill] sm:$0xff] }
 0x252   :  { %5847 = vst [vmem:[#allocation37_spill] sm:$0xff] %v4341_v63  ;;  %v2134_v35 = vmul.f32 %v4425_v5, %v1996_v9  ;;  %v5888_v9 = vld [vmem:[#allocation96_spill] sm:$0xff] }
 0x253   :  { %v1506_v16 = vadd.f32 %v1505_v8, %v4275_v13  ;;  %5849 = vst [vmem:[#allocation82_spill] sm:$0xff] %v4346_v21  ;;  %v1868_v8 = vadd.f32 %v1867_v14, %v1705_v18  ;;  %v1988_v14 = vmul.f32 %v4378_v40, %v5868_v55  ;;  %v4435_v18 = vmul.f32 %v4374_v15, %v4374_v15  ;;  %v5873_v55 = vld [vmem:[#allocation108_spill] sm:$0xff] }
 0x254   :  { %5851 = vst [vmem:[#allocation83_spill] sm:$0xff] %v4350_v59  ;;  %v4446_v44 = vperm.slane %v5873_v55, 1  ;;  %v2118_v55 = vmul.f32 %v4425_v5, %v1980_v26  ;;  %v5879_v59 = vld [vmem:[#allocation26_spill] sm:$0xff]  ;;  %v5880_v21 = vld [vmem:[#allocation52_spill] sm:$0xff]  ;;  %v2040_v26 = vmul.f32 %v4378_v40, %v5883_v19  ;;  %v2060_v51 = vmul.f32 %v4378_v40, %v5888_v9 }
 0x255   :  { %v1507_v61 = vadd.f32 %v1506_v16, %v4316_v6  ;;  %5853 = vst [vmem:[#allocation91_spill] sm:$0xff] %v4355_v24  ;;  %v4412_v16 = vmul.f32 %v4359_v52, %v4359_v52  ;;  %v4448_v43 = vadd.f32 %v1868_v8, %v1709_v22  ;;  %v5878_v24 = vld [vmem:[#allocation23_spill] sm:$0xff]  ;;  %v2126_v8 = vmul.f32 %v4425_v5, %v1988_v14 }
 0x256   :  { %5855 = vst [vmem:[#allocation93_spill] sm:$0xff] %v4359_v52  ;;  %v5877_v52 = vld [vmem:[#allocation21_spill] sm:$0xff]  ;;  %v2256_v19 = vadd.f32 %v4446_v44, %v2118_v55  ;;  %v5891_v55 = vld [vmem:[#allocation99_spill] sm:$0xff]  ;;  %v2272_v9 = vadd.f32 %v4446_v44, %v2134_v35 }
 0x257   :  { %5857 = vst [vmem:[#allocation30_spill] sm:$0xff] %v4363_v17  ;;  %v4366_v58 = vadd.f32 %v1507_v61, %v4341_v63  ;;  %v5867_v61 = vld [vmem:[#allocation9_spill] sm:$0xff]  ;;  %v5874_v63 = vld [vmem:[#allocation88_spill] sm:$0xff]  ;;  %v5876_v17 = vld [vmem:[#allocation90_spill] sm:$0xff]  ;;  %v2016_v54 = vmul.f32 %v4378_v40, %v5877_v52  ;;  %v2130_v52 = vmul.f32 %v4425_v5, %v1992_v1 }
 0x258   :  { %5859 = vst [vmem:[#allocation87_spill] sm:$0xff] %v4370_v60  ;;  %v1984_v2 = vmul.f32 %v4378_v40, %v5867_v61  ;;  %v2000_v61 = vmul.f32 %v4378_v40, %v5872_v38  ;;  %v2004_v6 = vmul.f32 %v4378_v40, %v5874_v63  ;;  %v2020_v38 = vmul.f32 %v4378_v40, %v5878_v24 }
 0x259   :  { %5861 = vst [vmem:[#allocation92_spill] sm:$0xff] %v4374_v15  ;;  %v5875_v15 = vld [vmem:[#allocation17_spill] sm:$0xff]  ;;  %v2024_v63 = vmul.f32 %v4378_v40, %v5879_v59  ;;  %v2036_v24 = vmul.f32 %v4378_v40, %v5882_v41  ;;  %v5885_v59 = vld [vmem:[#allocation39_spill] sm:$0xff]  ;;  %v2384_v62 = vmax.f32 %v2256_v19, 0.0 }
 0x25a   :  { %5862 = vst [vmem:[#allocation34_spill] sm:$0xff] %v4382_v29  ;;  %v2008_v60 = vmul.f32 %v4378_v40, %v5875_v15  ;;  %v2012_v29 = vmul.f32 %v4378_v40, %v5876_v17  ;;  %v2122_v22 = vmul.f32 %v4425_v5, %v1984_v2  ;;  %v2028_v15 = vmul.f32 %v4378_v40, %v5880_v21  ;;  %v5884_v2 = vld [vmem:[#allocation35_spill] sm:$0xff]  ;;  %v5886_v21 = vld [vmem:[#allocation94_spill] sm:$0xff] }
 0x25b   :  { %v2032_v17 = vmul.f32 %v4378_v40, %v5881_v0  ;;  %v2044_v14 = vmul.f32 %v4378_v40, %v5884_v2  ;;  %v2048_v57 = vmul.f32 %v4378_v40, %v5885_v59  ;;  %v2052_v34 = vmul.f32 %v4378_v40, %v5886_v21  ;;  %v5887_v0 = vld [vmem:[#allocation95_spill] sm:$0xff]  ;;  %v5889_v59 = vld [vmem:[#allocation97_spill] sm:$0xff]  ;;  %2512 = vst [vmem:[%s5447_s4 + $0x8] sm:$0xff] %v2384_v62 }
 0x25c   :  { %v2056_v1 = vmul.f32 %v4378_v40, %v5887_v0  ;;  %v2138_v23 = vmul.f32 %v4425_v5, %v2000_v61  ;;  %v2142_v41 = vmul.f32 %v4425_v5, %v2004_v6  ;;  %v2260_v31 = vadd.f32 %v4446_v44, %v2122_v22  ;;  %v5890_v61 = vld [vmem:[#allocation98_spill] sm:$0xff] }
 0x25d   :  { %v2264_v2 = vadd.f32 %v4446_v44, %v2126_v8  ;;  %v4492_v25 = vmul.f32 %v4378_v40, %v5889_v59  ;;  %v2146_v21 = vmul.f32 %v4425_v5, %v2008_v60  ;;  %v2268_v0 = vadd.f32 %v4446_v44, %v2130_v52 }
 0x25e   :  { %v4498_v6 = vmul.f32 %v4378_v40, %v5890_v61  ;;  %v4502_v22 = vmul.f32 %v4378_v40, %v5891_v55  ;;  %v2150_v8 = vmul.f32 %v4425_v5, %v2012_v29  ;;  %v4508_v59 = vmul.f32 %v4378_v40, %v5892_v12 }
 0x25f   :  { %v2154_v60 = vmul.f32 %v4425_v5, %v2016_v54  ;;  %v2158_v52 = vmul.f32 %v4425_v5, %v2020_v38  ;;  %v2276_v7 = vadd.f32 %v4446_v44, %v2138_v23  ;;  %v2280_v61 = vadd.f32 %v4446_v44, %v2142_v41 }
 0x260   :  { %v2388_v13 = vmax.f32 %v2260_v31, 0.0  ;;  %v2392_v55 = vmax.f32 %v2264_v2, 0.0  ;;  %v4516_v29 = vmul.f32 %v4378_v40, %v5893_v46  ;;  %v2162_v35 = vmul.f32 %v4425_v5, %v2024_v63  ;;  %v5895_v31 = vld [vmem:[#allocation104_spill] sm:$0xff] }
 0x261   :  { %v2284_v12 = vadd.f32 %v4446_v44, %v2146_v21  ;;  %v2396_v53 = vmax.f32 %v2268_v0, 0.0  ;;  %v4522_v54 = vmul.f32 %v4378_v40, %v5894_v39  ;;  %v2166_v23 = vmul.f32 %v4425_v5, %v2028_v15  ;;  %v5896_v39 = vld [vmem:[#allocation105_spill] sm:$0xff] }
 0x262   :  { %v2288_v38 = vadd.f32 %v4446_v44, %v2150_v8  ;;  %v2400_v41 = vmax.f32 %v2272_v9, 0.0  ;;  %v4531_v46 = vmul.f32 %v4378_v40, %v5895_v31  ;;  %v2170_v63 = vmul.f32 %v4425_v5, %v2032_v17  ;;  %2516 = vst [vmem:[%s5447_s4 + $0x28] sm:$0xff] %v2388_v13  ;;  %v5897_v17 = vld [vmem:[#allocation106_spill] sm:$0xff] }
 0x263   :  { %v2292_v19 = vadd.f32 %v4446_v44, %v2154_v60  ;;  %v2404_v2 = vmax.f32 %v2276_v7, 0.0  ;;  %v4540_v15 = vmul.f32 %v4378_v40, %v5896_v39  ;;  %v2174_v21 = vmul.f32 %v4425_v5, %v2036_v24  ;;  %2520 = vst [vmem:[%s5447_s4 + $0x48] sm:$0xff] %v2392_v55  ;;  %v4556_v24 = vpop.f32.mrf.mxu3  ;;  %v5898_v60 = vld [vmem:[#allocation61_spill] sm:$0xff] }
 0x264   :  { %v2296_v62 = vadd.f32 %v4446_v44, %v2158_v52  ;;  %v2408_v0 = vmax.f32 %v2280_v61, 0.0  ;;  %v4549_v7 = vmul.f32 %v4378_v40, %v5897_v17  ;;  %v2178_v8 = vmul.f32 %v4425_v5, %v2040_v26  ;;  %2524 = vst [vmem:[%s5447_s4 + $0x68] sm:$0xff] %v2396_v53 }
 0x265   :  { %v2300_v13 = vadd.f32 %v4446_v44, %v2162_v35  ;;  %v2412_v9 = vmax.f32 %v2284_v12, 0.0  ;;  %v4560_v52 = vmul.f32 %v4378_v40, %v5898_v60  ;;  %v2182_v61 = vmul.f32 %v4425_v5, %v2044_v14  ;;  %2528 = vst [vmem:[%s5447_s4 + $0x88] sm:$0xff] %v2400_v41 }
 0x266   :  { %v2304_v55 = vadd.f32 %v4446_v44, %v2166_v23  ;;  %v2416_v31 = vmax.f32 %v2288_v38, 0.0  ;;  %v2186_v26 = vmul.f32 %v4425_v5, %v2048_v57  ;;  %v2190_v35 = vmul.f32 %v4425_v5, %v2052_v34  ;;  %2532 = vst [vmem:[%s5447_s4 + $0xa8] sm:$0xff] %v2404_v2 }
 0x267   :  { %v2308_v53 = vadd.f32 %v4446_v44, %v2170_v63  ;;  %v2420_v12 = vmax.f32 %v2292_v19, 0.0  ;;  %v2312_v14 = vadd.f32 %v4446_v44, %v2174_v21  ;;  %v2424_v39 = vmax.f32 %v2296_v62, 0.0  ;;  %2536 = vst [vmem:[%s5447_s4 + $0xc8] sm:$0xff] %v2408_v0 }
 0x268   :  { %v1870_v23 = vadd.f32 %v4448_v43, %v4404_v20  ;;  %v1509_v34 = vadd.f32 %v4366_v58, %v4556_v24  ;;  %v2194_v57 = vmul.f32 %v4425_v5, %v2056_v1  ;;  %v2198_v38 = vmul.f32 %v4425_v5, %v2060_v51  ;;  %2540 = vst [vmem:[%s5447_s4 + $0xe8] sm:$0xff] %v2412_v9 }
 0x269   :  { %v2316_v41 = vadd.f32 %v4446_v44, %v2178_v8  ;;  %v2428_v63 = vmax.f32 %v2300_v13, 0.0  ;;  %v2320_v19 = vadd.f32 %v4446_v44, %v2182_v61  ;;  %v2432_v2 = vmax.f32 %v2304_v55, 0.0  ;;  %2544 = vst [vmem:[%s5447_s4 + $0x108] sm:$0xff] %v2416_v31  ;;  %v5899_v61 = vld [vmem:[#allocation67_spill] sm:$0xff] }
 0x26a   :  { %v1871_v58 = vadd.f32 %v1870_v23, %v4408_v47  ;;  %v1510_v20 = vrot.slane %v1509_v34, 4  ;;  %v2202_v51 = vmul.f32 %v4425_v5, %v4492_v25  ;;  %v2206_v43 = vmul.f32 %v4425_v5, %v4498_v6  ;;  %2548 = vst [vmem:[%s5447_s4 + $0x128] sm:$0xff] %v2420_v12 }
 0x26b   :  { %v2324_v1 = vadd.f32 %v4446_v44, %v2186_v26  ;;  %v2436_v21 = vmax.f32 %v2308_v53, 0.0  ;;  %v2328_v62 = vadd.f32 %v4446_v44, %v2190_v35  ;;  %v2440_v0 = vmax.f32 %v2312_v14, 0.0  ;;  %2552 = vst [vmem:[%s5447_s4 + $0x148] sm:$0xff] %v2424_v39 }
 0x26c   :  { %v1872_v47 = vadd.f32 %v1871_v58, %v4412_v16  ;;  %v1511_v25 = vadd.f32 %v1510_v20, %v1509_v34  ;;  %v2210_v6 = vmul.f32 %v4425_v5, %v4502_v22  ;;  %v2214_v17 = vmul.f32 %v4425_v5, %v4508_v59  ;;  %2556 = vst [vmem:[%s5447_s4 + $0x168] sm:$0xff] %v2428_v63 }
 0x26d   :  { %v2332_v8 = vadd.f32 %v4446_v44, %v2194_v57  ;;  %v2444_v13 = vmax.f32 %v2316_v41, 0.0  ;;  %v2336_v9 = vadd.f32 %v4446_v44, %v2198_v38  ;;  %v2448_v60 = vmax.f32 %v2320_v19, 0.0  ;;  %2560 = vst [vmem:[%s5447_s4 + $0x188] sm:$0xff] %v2432_v2 }
 0x26e   :  { %v1873_v16 = vadd.f32 %v1872_v47, %v4416_v37  ;;  %v1512_v22 = vrot.slane %v1511_v25, 2  ;;  %v2104_v59 = vmul.f32 %v4378_v40, %v5899_v61  ;;  %v2218_v55 = vmul.f32 %v4425_v5, %v4516_v29  ;;  %2564 = vst [vmem:[%s5447_s4 + $0x1a8] sm:$0xff] %v2436_v21  ;;  %v5900_v21 = vld [vmem:[#allocation77_spill] sm:$0xff] }
 0x26f   :  { %v2340_v31 = vadd.f32 %v4446_v44, %v2202_v51  ;;  %v2452_v26 = vmax.f32 %v2324_v1, 0.0  ;;  %v2222_v35 = vmul.f32 %v4425_v5, %v4522_v54  ;;  %v2344_v53 = vadd.f32 %v4446_v44, %v2206_v43  ;;  %2568 = vst [vmem:[%s5447_s4 + $0x1c8] sm:$0xff] %v2440_v0 }
 0x270   :  { %v2456_v37 = vmax.f32 %v2328_v62, 0.0  ;;  %v1874_v40 = vadd.f32 %v1873_v16, %v4431_v27  ;;  %v2226_v29 = vmul.f32 %v4425_v5, %v4531_v46  ;;  %v2230_v12 = vmul.f32 %v4425_v5, %v4540_v15  ;;  %2572 = vst [vmem:[%s5447_s4 + $0x1e8] sm:$0xff] %v2444_v13  ;;  %v5901_v13 = vld [vmem:[#allocation33_spill] sm:$0xff] }
 0x271   :  { %v2348_v14 = vadd.f32 %v4446_v44, %v2210_v6  ;;  %v2460_v39 = vmax.f32 %v2332_v8, 0.0  ;;  %v2352_v54 = vadd.f32 %v4446_v44, %v2214_v17  ;;  %v2464_v23 = vmax.f32 %v2336_v9, 0.0  ;;  %2576 = vst [vmem:[%s5447_s4 + $0x208] sm:$0xff] %v2448_v60 }
 0x272   :  { %v1875_v27 = vadd.f32 %v1874_v40, %v4435_v18  ;;  %v1513_v46 = vadd.f32 %v1512_v22, %v1511_v25  ;;  %v2234_v15 = vmul.f32 %v4425_v5, %v4549_v7  ;;  %v2356_v34 = vadd.f32 %v4446_v44, %v2218_v55  ;;  %2580 = vst [vmem:[%s5447_s4 + $0x228] sm:$0xff] %v2452_v26  ;;  %v5902_v55 = vld [vmem:[#allocation84_spill] sm:$0xff] }
 0x273   :  { %v2468_v57 = vmax.f32 %v2340_v31, 0.0  ;;  %v1741_v38 = vmul.f32 %v4386_v33, %v4386_v33  ;;  %v2238_v41 = vmul.f32 %v4425_v5, %v4560_v52  ;;  %v2360_v63 = vadd.f32 %v4446_v44, %v2222_v35  ;;  %2584 = vst [vmem:[%s5447_s4 + $0x248] sm:$0xff] %v2456_v37  ;;  %v5903_v37 = vld [vmem:[#allocation89_spill] sm:$0xff] }
 0x274   :  { %v2472_v18 = vmax.f32 %v2344_v53, 0.0  ;;  %v1876_v7 = vadd.f32 %v1875_v27, %v4439_v30  ;;  %v2242_v19 = vmul.f32 %v4425_v5, %v2104_v59  ;;  %v2364_v2 = vadd.f32 %v4446_v44, %v2226_v29  ;;  %2588 = vst [vmem:[%s5447_s4 + $0x268] sm:$0xff] %v2460_v39  ;;  %v5904_v39 = vld [vmem:[#allocation29_spill] sm:$0xff] }
 0x275   :  { %v2476_v58 = vmax.f32 %v2348_v14, 0.0  ;;  %v1745_v52 = vmul.f32 %v4390_v49, %v4390_v49  ;;  %v2368_v20 = vadd.f32 %v4446_v44, %v2230_v12  ;;  %v2480_v51 = vmax.f32 %v2352_v54, 0.0  ;;  %2592 = vst [vmem:[%s5447_s4 + $0x288] sm:$0xff] %v2464_v23 }
 0x276   :  { %v1877_v30 = vadd.f32 %v1876_v7, %v1741_v38  ;;  %v1514_v43 = vrot.slane %v1513_v46, 1  ;;  %v2372_v5 = vadd.f32 %v4446_v44, %v2234_v15  ;;  %v2484_v1 = vmax.f32 %v2356_v34, 0.0  ;;  %2596 = vst [vmem:[%s5447_s4 + $0x2a8] sm:$0xff] %v2468_v57  ;;  %v5906_v38 = vld [vmem:[#allocation14_spill] sm:$0xff]  ;;  %v5908_v7 = vld [vmem:[#allocation100_spill] sm:$0xff] }
 0x277   :  { %v4678_v62 = vsub.f32 %v5900_v21, %v3967_v11  ;;  %v2376_v0 = vadd.f32 %v4446_v44, %v2238_v41  ;;  %v2488_v47 = vmax.f32 %v2360_v63, 0.0  ;;  %2600 = vst [vmem:[%s5447_s4 + $0x2c8] sm:$0xff] %v2472_v18  ;;  %v1749_v25 = vmul.f32 %v4394_v45, %v4394_v45  ;;  %v5907_v63 = vld [vmem:[#allocation16_spill] sm:$0xff]  ;;  %v5910_v21 = vld [vmem:[#allocation22_spill] sm:$0xff] }
 0x278   :  { %v1878_v6 = vadd.f32 %v1877_v30, %v1745_v52  ;;  %v2380_v17 = vadd.f32 %v4446_v44, %v2242_v19  ;;  %v2492_v8 = vmax.f32 %v2364_v2, 0.0  ;;  %2604 = vst [vmem:[%s5447_s4 + $0x2e8] sm:$0xff] %v2476_v58  ;;  %v4692_v9 = vsub.f32 %v5901_v13, %v3967_v11 }
 0x279   :  { %v2496_v60 = vmax.f32 %v2368_v20, 0.0  ;;  %2608 = vst [vmem:[%s5447_s4 + $0x308] sm:$0xff] %v2480_v51  ;;  %v1753_v16 = vmul.f32 %v4398_v48, %v4398_v48  ;;  %v1515_v61 = vadd.f32 %v1514_v43, %v1513_v46  ;;  %v2500_v44 = vmax.f32 %v2372_v5, 0.0  ;;  %v5905_v46 = vld [vmem:[#allocation41_spill] sm:$0xff]  ;;  %v5909_v51 = vld [vmem:[#allocation19_spill] sm:$0xff] }
 0x27a   :  { %v1879_v22 = vadd.f32 %v1878_v6, %v1749_v25  ;;  %2612 = vst [vmem:[%s5447_s4 + $0x328] sm:$0xff] %v2484_v1  ;;  %v2504_v59 = vmax.f32 %v2376_v0, 0.0  ;;  %v4707_v31 = vsub.f32 %v5902_v55, %v3967_v11  ;;  %v1757_v26 = vmul.f32 %v4678_v62, %v4678_v62  ;;  %v5912_v25 = vld [vmem:[#allocation25_spill] sm:$0xff] }
 0x27b   :  { %2616 = vst [vmem:[%s5447_s4 + $0x348] sm:$0xff] %v2488_v47  ;;  %v2508_v53 = vmax.f32 %v2380_v17, 0.0  ;;  %v4719_v40 = vsub.f32 %v5903_v37, %v3967_v11  ;;  %v1761_v29 = vmul.f32 %v4692_v9, %v4692_v9  ;;  %v4724_v14 = vmul.f32 %v3476_v28, %v1515_v61  ;;  %v5918_v37 = vld [vmem:[#allocation36_spill] sm:$0xff] }
 0x27c   :  { %v1880_v35 = vadd.f32 %v1879_v22, %v1753_v16  ;;  %2620 = vst [vmem:[%s5447_s4 + $0x368] sm:$0xff] %v2492_v8  ;;  %v4734_v54 = vsub.f32 %v5904_v39, %v3967_v11  ;;  %v1765_v23 = vmul.f32 %v4707_v31, %v4707_v31  ;;  %v4743_v15 = vsub.f32 %v5905_v46, %v3967_v11 }
 0x27d   :  { %2624 = vst [vmem:[%s5447_s4 + $0x388] sm:$0xff] %v2496_v60  ;;  %v1769_v34 = vmul.f32 %v4719_v40, %v4719_v40  ;;  %v4749_v41 = vsub.f32 %v5906_v38, %v4724_v14  ;;  %v4753_v18 = vsub.f32 %v5907_v63, %v4724_v14  ;;  %v4757_v19 = vsub.f32 %v5908_v7, %v3967_v11  ;;  %v5914_v60 = vld [vmem:[#allocation28_spill] sm:$0xff] }
 0x27e   :  { %v1881_v12 = vadd.f32 %v1880_v35, %v1757_v26  ;;  %2628 = vst [vmem:[%s5447_s4 + $0x3a8] sm:$0xff] %v2500_v44  ;;  %v1773_v2 = vmul.f32 %v4734_v54, %v4734_v54  ;;  %v1777_v52 = vmul.f32 %v4743_v15, %v4743_v15  ;;  %v4765_v30 = vsub.f32 %v5909_v51, %v4724_v14 }
 0x27f   :  { %2632 = vst [vmem:[%s5447_s4 + $0x3c8] sm:$0xff] %v2504_v59  ;;  %v1658_v43 = vmul.f32 %v4749_v41, %v4749_v41  ;;  %v1662_v5 = vmul.f32 %v4753_v18, %v4753_v18  ;;  %v1781_v11 = vmul.f32 %v4757_v19, %v4757_v19  ;;  %v4775_v0 = vsub.f32 %v5910_v21, %v4724_v14  ;;  %v5916_v59 = vld [vmem:[#allocation32_spill] sm:$0xff] }
 0x280   :  { %v1882_v27 = vadd.f32 %v1881_v12, %v1761_v29  ;;  %2636 = vst [vmem:[%s5447_s4 + $0x3e8] sm:$0xff] %v2508_v53  ;;  %v4779_v6 = vsub.f32 %v5912_v25, %v4724_v14  ;;  %v1666_v17 = vmul.f32 %v4765_v30, %v4765_v30  ;;  %v4785_v16 = vsub.f32 %v5914_v60, %v4724_v14 }
 0x281   :  { %5911 = vst [vmem:[#allocation38_spill] sm:$0xff] %v4775_v0  ;;  %v1894_v8 = vadd.f32 %v1662_v5, %v1658_v43  ;;  %v1670_v22 = vmul.f32 %v4775_v0, %v4775_v0  ;;  %v4791_v55 = vsub.f32 %v5916_v59, %v4724_v14  ;;  %v4797_v29 = vsub.f32 %v5918_v37, %v4724_v14  ;;  %v5973_v0 = vld [vmem:[#allocation34_spill] sm:$0xff] }
 0x282   :  { %v1883_v57 = vadd.f32 %v1882_v27, %v1765_v23  ;;  %5913 = vst [vmem:[#allocation40_spill] sm:$0xff] %v4779_v6  ;;  %v1674_v26 = vmul.f32 %v4779_v6, %v4779_v6  ;;  %v1678_v12 = vmul.f32 %v4785_v16, %v4785_v16  ;;  %v5920_v27 = vld [vmem:[#allocation51_spill] sm:$0xff] }
 0x283   :  { %5915 = vst [vmem:[#allocation42_spill] sm:$0xff] %v4785_v16  ;;  %v1895_v61 = vadd.f32 %v1894_v8, %v1666_v17  ;;  %v4803_v46 = vsub.f32 %v5920_v27, %v4724_v14  ;;  %v1686_v63 = vmul.f32 %v4797_v29, %v4797_v29  ;;  %v5926_v17 = vld [vmem:[#allocation58_spill] sm:$0xff] }
 0x284   :  { %v1884_v58 = vadd.f32 %v1883_v57, %v1769_v34  ;;  %5917 = vst [vmem:[#allocation43_spill] sm:$0xff] %v4791_v55  ;;  %v1682_v34 = vmul.f32 %v4791_v55, %v4791_v55  ;;  %v4824_v8 = vsub.f32 %v5926_v17, %v4724_v14  ;;  %v5932_v27 = vld [vmem:[#allocation74_spill] sm:$0xff]  ;;  %v4860_v17 = vsub.f32 %v5831_v4, %v4724_v14  ;;  %v5972_v55 = vld [vmem:[#allocation92_spill] sm:$0xff] }
 0x285   :  { %v1896_v35 = vadd.f32 %v1895_v61, %v1670_v22  ;;  %5919 = vst [vmem:[#allocation44_spill] sm:$0xff] %v4797_v29  ;;  %v5928_v22 = vld [vmem:[#allocation60_spill] sm:$0xff]  ;;  %v4880_v4 = vsub.f32 %v3907_v10, %v4724_v14  ;;  %v5948_v10 = vld [vmem:[#allocation69_spill] sm:$0xff]  ;;  %v5970_v29 = vld [vmem:[#allocation30_spill] sm:$0xff] }
 0x286   :  { %v1885_v20 = vadd.f32 %v1884_v58, %v1773_v2  ;;  %5921 = vst [vmem:[#allocation45_spill] sm:$0xff] %v4803_v46  ;;  %v5922_v2 = vld [vmem:[#allocation54_spill] sm:$0xff]  ;;  %v4830_v61 = vsub.f32 %v5928_v22, %v4724_v14  ;;  %v4870_v22 = vsub.f32 %v3828_v36, %v4724_v14  ;;  %v4892_v36 = vsub.f32 %v3983_v42, %v4724_v14 }
 0x287   :  { %v1897_v39 = vadd.f32 %v1896_v35, %v1674_v26  ;;  %v4811_v58 = vsub.f32 %v5922_v2, %v4724_v14  ;;  %5927 = vst [vmem:[#allocation48_spill] sm:$0xff] %v4824_v8  ;;  %v1726_v42 = vmul.f32 %v4860_v17, %v4860_v17 }
 0x288   :  { %v1886_v1 = vadd.f32 %v1885_v20, %v1777_v52  ;;  %v1690_v20 = vmul.f32 %v4803_v46, %v4803_v46  ;;  %5929 = vst [vmem:[#allocation49_spill] sm:$0xff] %v4830_v61 }
 0x289   :  { %v1898_v57 = vadd.f32 %v1897_v39, %v1678_v12  ;;  %5923 = vst [vmem:[#allocation46_spill] sm:$0xff] %v4811_v58  ;;  %v1694_v21 = vmul.f32 %v4811_v58, %v4811_v58  ;;  %v1706_v12 = vmul.f32 %v4830_v61, %v4830_v61  ;;  %v5965_v61 = vld [vmem:[#allocation24_spill] sm:$0xff] }
 0x28a   :  { %v1887_v47 = vadd.f32 %v1886_v1, %v1781_v11  ;;  %v5924_v11 = vld [vmem:[#allocation57_spill] sm:$0xff]  ;;  %5938 = vst [vmem:[#allocation70_spill] sm:$0xff] %v4860_v17  ;;  %v5961_v17 = vld [vmem:[#allocation76_spill] sm:$0xff] }
 0x28b   :  { %v1899_v7 = vadd.f32 %v1898_v57, %v1682_v34  ;;  %v4818_v1 = vsub.f32 %v5924_v11, %v4724_v14  ;;  %v4842_v34 = vsub.f32 %v5932_v27, %v4724_v14  ;;  %5940 = vst [vmem:[#allocation9_spill] sm:$0xff] %v4870_v22  ;;  %v5951_v27 = vld [vmem:[#allocation13_spill] sm:$0xff] }
 0x28c   :  { %v1888_v13 = vrot.slane %v1887_v47, 4  ;;  %5942 = vst [vmem:[#allocation107_spill] sm:$0xff] %v4880_v4 }
 0x28d   :  { %v1900_v51 = vadd.f32 %v1899_v7, %v1686_v63  ;;  %5925 = vst [vmem:[#allocation47_spill] sm:$0xff] %v4818_v1  ;;  %v5934_v7 = vld [vmem:[#allocation80_spill] sm:$0xff] }
 0x28e   :  { %v1889_v44 = vadd.f32 %v1888_v13, %v1887_v47  ;;  %v1698_v13 = vmul.f32 %v4818_v1, %v4818_v1  ;;  %5933 = vst [vmem:[#allocation53_spill] sm:$0xff] %v4842_v34  ;;  %v4848_v2 = vsub.f32 %v5934_v7, %v4724_v14  ;;  %v5953_v7 = vld [vmem:[#allocation63_spill] sm:$0xff] }
 0x28f   :  { %v1901_v5 = vadd.f32 %v1900_v51, %v1690_v20  ;;  %5945 = vst [vmem:[#allocation12_spill] sm:$0xff] %v4892_v36 }
 0x290   :  { %v1890_v53 = vrot.slane %v1889_v44, 2  ;;  %5935 = vst [vmem:[#allocation59_spill] sm:$0xff] %v4848_v2  ;;  %v1718_v11 = vmul.f32 %v4848_v2, %v4848_v2 }
 0x291   :  { %v1902_v25 = vadd.f32 %v1901_v5, %v1694_v21 }
 0x292   :  { %v1891_v23 = vadd.f32 %v1890_v53, %v1889_v44  ;;  %v1702_v44 = vmul.f32 %v4824_v8, %v4824_v8  ;;  %v5930_v53 = vld [vmem:[#allocation66_spill] sm:$0xff] }
 0x293   :  { %v1903_v60 = vadd.f32 %v1902_v25, %v1698_v13  ;;  %v4836_v37 = vsub.f32 %v5930_v53, %v4724_v14  ;;  %v4864_v13 = vsub.f32 %v5832_v3, %v4724_v14  ;;  %v4884_v3 = vsub.f32 %v3926_v32, %v4724_v14  ;;  %v5949_v32 = vld [vmem:[#allocation71_spill] sm:$0xff]  ;;  %v5966_v8 = vld [vmem:[#allocation82_spill] sm:$0xff] }
 0x294   :  { %v1892_v38 = vrot.slane %v1891_v23, 1  ;;  %v4900_v53 = vsub.f32 %v5948_v10, %v4724_v14 }
 0x295   :  { %v1904_v35 = vadd.f32 %v1903_v60, %v1702_v44  ;;  %5931 = vst [vmem:[#allocation50_spill] sm:$0xff] %v4836_v37  ;;  %v1710_v57 = vmul.f32 %v4836_v37, %v4836_v37  ;;  %v4874_v44 = vsub.f32 %v3869_v50, %v4724_v14  ;;  %v5946_v50 = vld [vmem:[#allocation68_spill] sm:$0xff] }
 0x296   :  { %v1893_v52 = vadd.f32 %v1892_v38, %v1891_v23  ;;  %5939 = vst [vmem:[#allocation27_spill] sm:$0xff] %v4864_v13  ;;  %v5964_v37 = vld [vmem:[#allocation20_spill] sm:$0xff] }
 0x297   :  { %v1905_v23 = vadd.f32 %v1904_v35, %v1706_v12  ;;  %5941 = vst [vmem:[#allocation11_spill] sm:$0xff] %v4874_v44  ;;  %v4888_v35 = vsub.f32 %v3951_v56, %v4724_v14  ;;  %v4904_v12 = vsub.f32 %v5949_v32, %v4724_v14  ;;  %v4939_v32 = vmul.f32 %v4880_v4, %v4880_v4 }
 0x298   :  { %v1933_v43 = vmul.f32 %v1893_v52, %v3476_v28  ;;  %v1714_v52 = vmul.f32 %v4842_v34, %v4842_v34  ;;  %5943 = vst [vmem:[#allocation85_spill] sm:$0xff] %v4884_v3 }
 0x299   :  { %v1906_v63 = vadd.f32 %v1905_v23, %v1710_v57  ;;  %5944 = vst [vmem:[#allocation86_spill] sm:$0xff] %v4888_v35  ;;  %v1730_v23 = vmul.f32 %v4864_v13, %v4864_v13 }
 0x29a   :  { %v1937_v47 = vadd.f32 1e-05, %v1933_v43  ;;  %v5936_v43 = vld [vmem:[#allocation10_spill] sm:$0xff] }
 0x29b   :  { %v1907_v51 = vadd.f32 %v1906_v63, %v1714_v52  ;;  %v4854_v5 = vsub.f32 %v5936_v43, %v4724_v14  ;;  %v5955_v43 = vld [vmem:[#allocation64_spill] sm:$0xff] }
 0x29c   :  { %2894 = vrsqrt.f32 %v1937_v47  ;;  %vm1965_vm8 = vweird.f32 %v1937_v47 }
 0x29d   :  { %5937 = vst [vmem:[#allocation62_spill] sm:$0xff] %v4854_v5  ;;  %v1908_v25 = vadd.f32 %v1907_v51, %v1718_v11  ;;  %v1722_v60 = vmul.f32 %v4854_v5, %v4854_v5 }
 0x2a2   :  { %v2895_v59 = vpop.eup %2894 }
 0x2a3   :  { %v1960_v26 = vmul.f32 %v2895_v59, %v1937_v47  ;;  %vm1966_vm7 = vweird.f32 %v2895_v59 }
 0x2a4   :  { %vm1967_vm9 = vmor %vm1965_vm8, %vm1966_vm7 }
 0x2a5   :  { %v1961_v39 = vmul.f32 %v2895_v59, %v1960_v26  ;;  %v1909_v26 = vadd.f32 %v1908_v25, %v1722_v60  ;;  %v4933_v25 = vmul.f32 %v4874_v44, %v4874_v44 }
 0x2a7   :  { %v1962_v38 = vmul.f32 0.5, %v1961_v39  ;;  %v5950_v39 = vld [vmem:[#allocation75_spill] sm:$0xff]  ;;  %v1910_v60 = vadd.f32 %v1909_v26, %v1726_v42  ;;  %v4958_v42 = vmul.f32 %v4892_v36, %v4892_v36 }
 0x2a8   :  { %v4908_v56 = vsub.f32 %v5950_v39, %v4724_v14  ;;  %v4943_v39 = vmul.f32 %v4884_v3, %v4884_v3  ;;  %v5959_v3 = vld [vmem:[#allocation72_spill] sm:$0xff] }
 0x2a9   :  { %v1963_v20 = vsub.f32 1.5, %v1962_v38  ;;  %v5952_v38 = vld [vmem:[#allocation15_spill] sm:$0xff]  ;;  %v4974_v2 = vadd.f32 %v1910_v60, %v1730_v23 }
 0x2ab   :  { %v1964_v21 = vmul.f32 %v2895_v59, %v1963_v20  ;;  %v4920_v20 = vld [vmem:[#allocation3] sm:$0xf] }
 0x2ac   :  { %5954 = vst [vmem:[#allocation88_spill] sm:$0xff] %v4920_v20  ;;  %v4923_v51 = vperm.slane %v4920_v20, 2 }
 0x2ad   :  { %v4876_v47 = vsel %vm1967_vm9, %v2895_v59, %v1964_v21  ;;  %v4896_v59 = vsub.f32 %v5946_v50, %v4724_v14  ;;  %v4929_v21 = vmul.f32 %v4870_v22, %v4870_v22  ;;  %v5956_v50 = vld [vmem:[#allocation65_spill] sm:$0xff] }
 0x2ae   :  { %v1981_v57 = vmul.f32 %v4876_v47, %v5951_v27  ;;  %v1985_v63 = vmul.f32 %v4876_v47, %v5952_v38  ;;  %v1989_v52 = vmul.f32 %v4876_v47, %v5953_v7  ;;  %v1993_v11 = vmul.f32 %v4876_v47, %v5955_v43  ;;  %v5957_v38 = vld [vmem:[#allocation18_spill] sm:$0xff]  ;;  %v4951_v43 = vld [vmem:[#allocation5] sm:$0xf]  ;;  %v5960_v22 = vld [vmem:[#allocation73_spill] sm:$0xff] }
 0x2af   :  { %5947 = vst [vmem:[#allocation108_spill] sm:$0xff] %v4896_v59  ;;  %v1997_v10 = vmul.f32 %v4876_v47, %v5956_v50  ;;  %v4947_v27 = vmul.f32 %v4888_v35, %v4888_v35  ;;  %v2001_v7 = vmul.f32 %v4876_v47, %v5957_v38  ;;  %v4954_v26 = vperm.slane %v4951_v43, 2 }
 0x2b0   :  { %5958 = vst [vmem:[#allocation17_spill] sm:$0xff] %v4951_v43  ;;  %v4962_v50 = vmul.f32 %v4896_v59, %v4896_v59  ;;  %v2005_v35 = vmul.f32 %v4876_v47, %v5959_v3  ;;  %v2119_v4 = vmul.f32 %v4923_v51, %v1981_v57  ;;  %v2123_v38 = vmul.f32 %v4923_v51, %v1985_v63  ;;  %v5962_v59 = vld [vmem:[#allocation78_spill] sm:$0xff]  ;;  %v5963_v3 = vld [vmem:[#allocation81_spill] sm:$0xff] }
 0x2b1   :  { %v2127_v44 = vmul.f32 %v4923_v51, %v1989_v52  ;;  %v2009_v13 = vmul.f32 %v4876_v47, %v5960_v22  ;;  %v2013_v36 = vmul.f32 %v4876_v47, %v5961_v17  ;;  %v2131_v5 = vmul.f32 %v4923_v51, %v1993_v11  ;;  %v5967_v11 = vld [vmem:[#allocation83_spill] sm:$0xff] }
 0x2b2   :  { %v2017_v34 = vmul.f32 %v4876_v47, %v5962_v59  ;;  %v2021_v57 = vmul.f32 %v4876_v47, %v5963_v3  ;;  %v2025_v63 = vmul.f32 %v4876_v47, %v5964_v37  ;;  %v2135_v52 = vmul.f32 %v4923_v51, %v1997_v10  ;;  %v5968_v10 = vld [vmem:[#allocation91_spill] sm:$0xff] }
 0x2b3   :  { %v2029_v22 = vmul.f32 %v4876_v47, %v5965_v61  ;;  %v2033_v17 = vmul.f32 %v4876_v47, %v5966_v8  ;;  %v2037_v23 = vmul.f32 %v4876_v47, %v5967_v11  ;;  %v2139_v60 = vmul.f32 %v4923_v51, %v2001_v7  ;;  %v5969_v61 = vld [vmem:[#allocation93_spill] sm:$0xff] }
 0x2b4   :  { %v2143_v59 = vmul.f32 %v4923_v51, %v2005_v35  ;;  %v2257_v3 = vadd.f32 %v4954_v26, %v2119_v4  ;;  %v2261_v1 = vadd.f32 %v4954_v26, %v2123_v38  ;;  %v2265_v37 = vadd.f32 %v4954_v26, %v2127_v44  ;;  %v5971_v35 = vld [vmem:[#allocation87_spill] sm:$0xff] }
 0x2b5   :  { %v2041_v58 = vmul.f32 %v4876_v47, %v5968_v10  ;;  %v2045_v46 = vmul.f32 %v4876_v47, %v5969_v61  ;;  %v2147_v8 = vmul.f32 %v4923_v51, %v2009_v13  ;;  %v2269_v11 = vadd.f32 %v4954_v26, %v2131_v5 }
 0x2b6   :  { %v2049_v7 = vmul.f32 %v4876_v47, %v5970_v29  ;;  %v2053_v4 = vmul.f32 %v4876_v47, %v5971_v35  ;;  %v2151_v38 = vmul.f32 %v4923_v51, %v2013_v36  ;;  %v2273_v44 = vadd.f32 %v4954_v26, %v2135_v52 }
 0x2b7   :  { %v2057_v10 = vmul.f32 %v4876_v47, %v5972_v55  ;;  %v2155_v43 = vmul.f32 %v4923_v51, %v2017_v34  ;;  %v2159_v61 = vmul.f32 %v4923_v51, %v2021_v57  ;;  %v2277_v13 = vadd.f32 %v4954_v26, %v2139_v60 }
 0x2b8   :  { %v2281_v5 = vadd.f32 %v4954_v26, %v2143_v59  ;;  %v2385_v16 = vmax.f32 %v2257_v3, 0.0  ;;  %v2389_v29 = vmax.f32 %v2261_v1, 0.0  ;;  %v2393_v6 = vmax.f32 %v2265_v37, 0.0 }
 0x2b9   :  { %v2061_v35 = vmul.f32 %v4876_v47, %v5973_v0  ;;  %v2163_v36 = vmul.f32 %v4923_v51, %v2025_v63  ;;  %v2285_v52 = vadd.f32 %v4954_v26, %v2147_v8  ;;  %v2397_v20 = vmax.f32 %v2269_v11, 0.0 }
 0x2ba   :  { %v2065_v55 = vmul.f32 %v4876_v47, %v4386_v33  ;;  %v2167_v34 = vmul.f32 %v4923_v51, %v2029_v22  ;;  %v2289_v57 = vadd.f32 %v4954_v26, %v2151_v38  ;;  %v2401_v60 = vmax.f32 %v2273_v44, 0.0  ;;  %2513 = vst [vmem:[%s5447_s4 + $0x10] sm:$0xff] %v2385_v16 }
 0x2bb   :  { %v2069_v0 = vmul.f32 %v4876_v47, %v4390_v49  ;;  %v2171_v1 = vmul.f32 %v4923_v51, %v2033_v17  ;;  %v2293_v63 = vadd.f32 %v4954_v26, %v2155_v43  ;;  %v2405_v59 = vmax.f32 %v2277_v13, 0.0  ;;  %2517 = vst [vmem:[%s5447_s4 + $0x30] sm:$0xff] %v2389_v29 }
 0x2bc   :  { %v2073_v33 = vmul.f32 %v4876_v47, %v4394_v45  ;;  %v2175_v22 = vmul.f32 %v4923_v51, %v2037_v23  ;;  %v2297_v3 = vadd.f32 %v4954_v26, %v2159_v61  ;;  %v2409_v16 = vmax.f32 %v2281_v5, 0.0  ;;  %2521 = vst [vmem:[%s5447_s4 + $0x50] sm:$0xff] %v2393_v6 }
 0x2bd   :  { %v2077_v49 = vmul.f32 %v4876_v47, %v4398_v48  ;;  %v2179_v43 = vmul.f32 %v4923_v51, %v2041_v58  ;;  %v2301_v17 = vadd.f32 %v4954_v26, %v2163_v36  ;;  %v2413_v37 = vmax.f32 %v2285_v52, 0.0  ;;  %2525 = vst [vmem:[%s5447_s4 + $0x70] sm:$0xff] %v2397_v20 }
 0x2be   :  { %v2081_v45 = vmul.f32 %v4876_v47, %v4678_v62  ;;  %v2183_v23 = vmul.f32 %v4923_v51, %v2045_v46  ;;  %v2305_v8 = vadd.f32 %v4954_v26, %v2167_v34  ;;  %v2417_v6 = vmax.f32 %v2289_v57, 0.0  ;;  %2529 = vst [vmem:[%s5447_s4 + $0x90] sm:$0xff] %v2401_v60 }
 0x2bf   :  { %v2085_v48 = vmul.f32 %v4876_v47, %v4692_v9  ;;  %v2187_v58 = vmul.f32 %v4923_v51, %v2049_v7  ;;  %v2309_v11 = vadd.f32 %v4954_v26, %v2171_v1  ;;  %v2421_v20 = vmax.f32 %v2293_v63, 0.0  ;;  %2533 = vst [vmem:[%s5447_s4 + $0xb0] sm:$0xff] %v2405_v59 }
 0x2c0   :  { %v2191_v62 = vmul.f32 %v4923_v51, %v2053_v4  ;;  %v2313_v46 = vadd.f32 %v4954_v26, %v2175_v22  ;;  %v2425_v38 = vmax.f32 %v2297_v3, 0.0  ;;  %2537 = vst [vmem:[%s5447_s4 + $0xd0] sm:$0xff] %v2409_v16  ;;  %v1912_v9 = vadd.f32 %v4974_v2, %v4929_v21 }
 0x2c1   :  { %v2089_v7 = vmul.f32 %v4876_v47, %v4707_v31  ;;  %v2195_v44 = vmul.f32 %v4923_v51, %v2057_v10  ;;  %v2317_v61 = vadd.f32 %v4954_v26, %v2179_v43  ;;  %v2429_v13 = vmax.f32 %v2301_v17, 0.0  ;;  %2541 = vst [vmem:[%s5447_s4 + $0xf0] sm:$0xff] %v2413_v37 }
 0x2c2   :  { %v2199_v4 = vmul.f32 %v4923_v51, %v2061_v35  ;;  %v2321_v5 = vadd.f32 %v4954_v26, %v2183_v23  ;;  %v2433_v29 = vmax.f32 %v2305_v8, 0.0  ;;  %2545 = vst [vmem:[%s5447_s4 + $0x110] sm:$0xff] %v2417_v6  ;;  %v1913_v31 = vadd.f32 %v1912_v9, %v4933_v25  ;;  %v5974_v9 = vld [vmem:[#allocation79_spill] sm:$0xff] }
 0x2c3   :  { %v2093_v2 = vmul.f32 %v4876_v47, %v4719_v40  ;;  %v2203_v21 = vmul.f32 %v4923_v51, %v2065_v55  ;;  %v2325_v10 = vadd.f32 %v4954_v26, %v2187_v58  ;;  %v2437_v36 = vmax.f32 %v2309_v11, 0.0  ;;  %2549 = vst [vmem:[%s5447_s4 + $0x130] sm:$0xff] %v2421_v20 }
 0x2c4   :  { %v2207_v35 = vmul.f32 %v4923_v51, %v2069_v0  ;;  %v2329_v52 = vadd.f32 %v4954_v26, %v2191_v62  ;;  %v2441_v34 = vmax.f32 %v2313_v46, 0.0  ;;  %2553 = vst [vmem:[%s5447_s4 + $0x150] sm:$0xff] %v2425_v38  ;;  %v1914_v40 = vadd.f32 %v1913_v31, %v4939_v32 }
 0x2c5   :  { %v2097_v25 = vmul.f32 %v4876_v47, %v4734_v54  ;;  %v2211_v55 = vmul.f32 %v4923_v51, %v2073_v33  ;;  %v2333_v57 = vadd.f32 %v4954_v26, %v2195_v44  ;;  %v2445_v60 = vmax.f32 %v2317_v61, 0.0  ;;  %2557 = vst [vmem:[%s5447_s4 + $0x170] sm:$0xff] %v2429_v13 }
 0x2c6   :  { %v2215_v0 = vmul.f32 %v4923_v51, %v2077_v49  ;;  %v2337_v1 = vadd.f32 %v4954_v26, %v2199_v4  ;;  %v2449_v63 = vmax.f32 %v2321_v5, 0.0  ;;  %2561 = vst [vmem:[%s5447_s4 + $0x190] sm:$0xff] %v2433_v29  ;;  %v1915_v54 = vadd.f32 %v1914_v40, %v4943_v39  ;;  %v5975_v5 = vld [vmem:[#allocation37_spill] sm:$0xff] }
 0x2c7   :  { %v2101_v32 = vmul.f32 %v4876_v47, %v4743_v15  ;;  %v2219_v59 = vmul.f32 %v4923_v51, %v2081_v45  ;;  %v2341_v33 = vadd.f32 %v4954_v26, %v2203_v21  ;;  %v2453_v22 = vmax.f32 %v2325_v10, 0.0  ;;  %2565 = vst [vmem:[%s5447_s4 + $0x1b0] sm:$0xff] %v2437_v36 }
 0x2c8   :  { %v2223_v3 = vmul.f32 %v4923_v51, %v2085_v48  ;;  %v2345_v16 = vadd.f32 %v4954_v26, %v2207_v35  ;;  %v2457_v49 = vmax.f32 %v2329_v52, 0.0  ;;  %2569 = vst [vmem:[%s5447_s4 + $0x1d0] sm:$0xff] %v2441_v34  ;;  %v1916_v15 = vadd.f32 %v1915_v54, %v4947_v27 }
 0x2c9   :  { %v2105_v39 = vmul.f32 %v4876_v47, %v4757_v19  ;;  %v2227_v43 = vmul.f32 %v4923_v51, %v2089_v7  ;;  %v2349_v17 = vadd.f32 %v4954_v26, %v2211_v55  ;;  %v2461_v37 = vmax.f32 %v2333_v57, 0.0  ;;  %2573 = vst [vmem:[%s5447_s4 + $0x1f0] sm:$0xff] %v2445_v60 }
 0x2ca   :  { %v2231_v45 = vmul.f32 %v4923_v51, %v2093_v2  ;;  %v2353_v23 = vadd.f32 %v4954_v26, %v2215_v0  ;;  %v2465_v8 = vmax.f32 %v2337_v1, 0.0  ;;  %2577 = vst [vmem:[%s5447_s4 + $0x210] sm:$0xff] %v2449_v63  ;;  %v1917_v19 = vadd.f32 %v1916_v15, %v4958_v42 }
 0x2cb   :  { %v2235_v47 = vmul.f32 %v4923_v51, %v2097_v25  ;;  %v2357_v27 = vadd.f32 %v4954_v26, %v2219_v59  ;;  %v2469_v6 = vmax.f32 %v2341_v33, 0.0  ;;  %2581 = vst [vmem:[%s5447_s4 + $0x230] sm:$0xff] %v2453_v22  ;;  %v1762_v48 = vmul.f32 %v4900_v53, %v4900_v53 }
 0x2cc   :  { %v2239_v58 = vmul.f32 %v4923_v51, %v2101_v32  ;;  %v2361_v11 = vadd.f32 %v4954_v26, %v2223_v3  ;;  %v2473_v20 = vmax.f32 %v2345_v16, 0.0  ;;  %2585 = vst [vmem:[%s5447_s4 + $0x250] sm:$0xff] %v2457_v49  ;;  %v1918_v42 = vadd.f32 %v1917_v19, %v4962_v50  ;;  %v5976_v19 = vld [vmem:[#allocation88_spill] sm:$0xff] }
 0x2cd   :  { %v2243_v62 = vmul.f32 %v4923_v51, %v2105_v39  ;;  %v2365_v46 = vadd.f32 %v4954_v26, %v2227_v43  ;;  %v2477_v38 = vmax.f32 %v2349_v17, 0.0  ;;  %2589 = vst [vmem:[%s5447_s4 + $0x270] sm:$0xff] %v2461_v37  ;;  %v5150_v7 = vsub.f32 %v5974_v9, %v4724_v14  ;;  %v5982_v9 = vld [vmem:[#allocation44_spill] sm:$0xff] }
 0x2ce   :  { %v2369_v44 = vadd.f32 %v4954_v26, %v2231_v45  ;;  %v2481_v61 = vmax.f32 %v2353_v23, 0.0  ;;  %2593 = vst [vmem:[%s5447_s4 + $0x290] sm:$0xff] %v2465_v8  ;;  %v1766_v51 = vmul.f32 %v4904_v12, %v4904_v12  ;;  %v1919_v50 = vadd.f32 %v1918_v42, %v1762_v48  ;;  %v5978_v48 = vld [vmem:[#allocation40_spill] sm:$0xff]  ;;  %v5980_v42 = vld [vmem:[#allocation17_spill] sm:$0xff] }
 0x2cf   :  { %v2373_v13 = vadd.f32 %v4954_v26, %v2235_v47  ;;  %v2485_v4 = vmax.f32 %v2357_v27, 0.0  ;;  %2597 = vst [vmem:[%s5447_s4 + $0x2b0] sm:$0xff] %v2469_v6  ;;  %v5164_v29 = vsub.f32 %v5975_v5, %v4724_v14  ;;  %v2377_v31 = vadd.f32 %v4954_v26, %v2239_v58  ;;  %v5977_v27 = vld [vmem:[#allocation38_spill] sm:$0xff] }
 0x2d0   :  { %v2489_v2 = vmax.f32 %v2361_v11, 0.0  ;;  %2601 = vst [vmem:[%s5447_s4 + $0x2d0] sm:$0xff] %v2473_v20  ;;  %v1770_v21 = vmul.f32 %v4908_v56, %v4908_v56  ;;  %v1920_v10 = vadd.f32 %v1919_v50, %v1766_v51  ;;  %v2381_v36 = vadd.f32 %v4954_v26, %v2243_v62  ;;  %v5979_v11 = vld [vmem:[#allocation42_spill] sm:$0xff]  ;;  %v5981_v62 = vld [vmem:[#allocation43_spill] sm:$0xff]  ;;  %v5983_v51 = vld [vmem:[#allocation45_spill] sm:$0xff] }
 0x2d1   :  { %v2493_v35 = vmax.f32 %v2365_v46, 0.0  ;;  %2605 = vst [vmem:[%s5447_s4 + $0x2f0] sm:$0xff] %v2477_v38  ;;  %v2497_v52 = vmax.f32 %v2369_v44, 0.0  ;;  %v5181_v34 = vsub.f32 %v4556_v24, %v4724_v14  ;;  %v1774_v40 = vmul.f32 %v5150_v7, %v5150_v7 }
 0x2d2   :  { %2609 = vst [vmem:[%s5447_s4 + $0x310] sm:$0xff] %v2481_v61  ;;  %v1921_v25 = vadd.f32 %v1920_v10, %v1770_v21  ;;  %v2501_v55 = vmax.f32 %v2373_v13, 0.0  ;;  %v2505_v26 = vmax.f32 %v2377_v31, 0.0  ;;  %v1778_v57 = vmul.f32 %v5164_v29, %v5164_v29  ;;  %v5985_v31 = vld [vmem:[#allocation47_spill] sm:$0xff] }
 0x2d3   :  { %2613 = vst [vmem:[%s5447_s4 + $0x330] sm:$0xff] %v2485_v4  ;;  %v2509_v24 = vmax.f32 %v2381_v36, 0.0  ;;  %v1782_v14 = vmul.f32 %v5181_v34, %v5181_v34  ;;  %v5220_v47 = vperm.slane %v5976_v19, 3  ;;  %v5984_v4 = vld [vmem:[#allocation46_spill] sm:$0xff] }
 0x2d4   :  { %2617 = vst [vmem:[%s5447_s4 + $0x350] sm:$0xff] %v2489_v2  ;;  %v1922_v60 = vadd.f32 %v1921_v25, %v1774_v40  ;;  %v5986_v40 = vld [vmem:[#allocation48_spill] sm:$0xff] }
 0x2d5   :  { %2621 = vst [vmem:[%s5447_s4 + $0x370] sm:$0xff] %v2493_v35 }
 0x2d6   :  { %2625 = vst [vmem:[%s5447_s4 + $0x390] sm:$0xff] %v2497_v52  ;;  %v1923_v0 = vadd.f32 %v1922_v60, %v1778_v57  ;;  %v5987_v57 = vld [vmem:[#allocation49_spill] sm:$0xff] }
 0x2d7   :  { %2629 = vst [vmem:[%s5447_s4 + $0x3b0] sm:$0xff] %v2501_v55 }
 0x2d8   :  { %2633 = vst [vmem:[%s5447_s4 + $0x3d0] sm:$0xff] %v2505_v26  ;;  %v1924_v1 = vadd.f32 %v1923_v0, %v1782_v14 }
 0x2d9   :  { %2637 = vst [vmem:[%s5447_s4 + $0x3f0] sm:$0xff] %v2509_v24  ;;  %v5988_v24 = vld [vmem:[#allocation50_spill] sm:$0xff] }
 0x2da   :  { %v1925_v63 = vrot.slane %v1924_v1, 4 }
 0x2dc   :  { %v1926_v54 = vadd.f32 %v1925_v63, %v1924_v1  ;;  %v5989_v63 = vld [vmem:[#allocation53_spill] sm:$0xff] }
 0x2de   :  { %v1927_v32 = vrot.slane %v1926_v54, 2 }
 0x2e0   :  { %v1928_v59 = vadd.f32 %v1927_v32, %v1926_v54 }
 0x2e2   :  { %v1929_v33 = vrot.slane %v1928_v59, 1 }
 0x2e4   :  { %v1930_v22 = vadd.f32 %v1929_v33, %v1928_v59 }
 0x2e6   :  { %v1934_v3 = vmul.f32 %v1930_v22, %v3476_v28 }
 0x2e8   :  { %v1938_v16 = vadd.f32 1e-05, %v1934_v3 }
 0x2ea   :  { %2896 = vrsqrt.f32 %v1938_v16  ;;  %vm1975_vm11 = vweird.f32 %v1938_v16 }
 0x2f0   :  { %v2897_v49 = vpop.eup %2896 }
 0x2f1   :  { %v1970_v15 = vmul.f32 %v2897_v49, %v1938_v16  ;;  %vm1976_vm10 = vweird.f32 %v2897_v49 }
 0x2f2   :  { %vm1977_vm12 = vmor %vm1975_vm11, %vm1976_vm10 }
 0x2f3   :  { %v1971_v39 = vmul.f32 %v2897_v49, %v1970_v15  ;;  %v5990_v15 = vld [vmem:[#allocation59_spill] sm:$0xff] }
 0x2f5   :  { %v1972_v43 = vmul.f32 0.5, %v1971_v39 }
 0x2f7   :  { %v1973_v17 = vsub.f32 1.5, %v1972_v43 }
 0x2f9   :  { %v1974_v37 = vmul.f32 %v2897_v49, %v1973_v17 }
 0x2fb   :  { %v5211_v45 = vsel %vm1977_vm12, %v2897_v49, %v1974_v37 }
 0x2fc   :  { %v1982_v23 = vmul.f32 %v5211_v45, %v4749_v41  ;;  %v1986_v8 = vmul.f32 %v5211_v45, %v4753_v18  ;;  %v1990_v28 = vmul.f32 %v5211_v45, %v4765_v30  ;;  %v1994_v6 = vmul.f32 %v5211_v45, %v5977_v27 }
 0x2fd   :  { %v1998_v58 = vmul.f32 %v5211_v45, %v5978_v48  ;;  %v2002_v20 = vmul.f32 %v5211_v45, %v5979_v11  ;;  %v5229_v41 = vperm.slane %v5980_v42, 3  ;;  %v2006_v18 = vmul.f32 %v5211_v45, %v5981_v62  ;;  %v5993_v42 = vld [vmem:[#allocation27_spill] sm:$0xff] }
 0x2fe   :  { %v2120_v30 = vmul.f32 %v5220_v47, %v1982_v23  ;;  %v2124_v46 = vmul.f32 %v5220_v47, %v1986_v8  ;;  %v2128_v38 = vmul.f32 %v5220_v47, %v1990_v28  ;;  %v2010_v44 = vmul.f32 %v5211_v45, %v5982_v9  ;;  %v5991_v23 = vld [vmem:[#allocation62_spill] sm:$0xff] }
 0x2ff   :  { %v2132_v61 = vmul.f32 %v5220_v47, %v1994_v6  ;;  %v2014_v50 = vmul.f32 %v5211_v45, %v5983_v51  ;;  %v2136_v13 = vmul.f32 %v5220_v47, %v1998_v58  ;;  %v2018_v5 = vmul.f32 %v5211_v45, %v5984_v4  ;;  %v5992_v6 = vld [vmem:[#allocation70_spill] sm:$0xff] }
 0x300   :  { %v2022_v2 = vmul.f32 %v5211_v45, %v5985_v31  ;;  %v2140_v21 = vmul.f32 %v5220_v47, %v2002_v20  ;;  %v2144_v10 = vmul.f32 %v5220_v47, %v2006_v18  ;;  %v2258_v36 = vadd.f32 %v5229_v41, %v2120_v30 }
 0x301   :  { %v2262_v35 = vadd.f32 %v5229_v41, %v2124_v46  ;;  %v2266_v52 = vadd.f32 %v5229_v41, %v2128_v38  ;;  %v2026_v25 = vmul.f32 %v5211_v45, %v5986_v40  ;;  %v2148_v55 = vmul.f32 %v5220_v47, %v2010_v44  ;;  %v5994_v38 = vld [vmem:[#allocation9_spill] sm:$0xff] }
 0x302   :  { %v2270_v26 = vadd.f32 %v5229_v41, %v2132_v61  ;;  %v2030_v60 = vmul.f32 %v5211_v45, %v5987_v57  ;;  %v2034_v14 = vmul.f32 %v5211_v45, %v5988_v24  ;;  %v2152_v0 = vmul.f32 %v5220_v47, %v2014_v50  ;;  %v5995_v50 = vld [vmem:[#allocation11_spill] sm:$0xff]  ;;  %v5998_v57 = vld [vmem:[#allocation86_spill] sm:$0xff] }
 0x303   :  { %v2274_v1 = vadd.f32 %v5229_v41, %v2136_v13  ;;  %v2038_v54 = vmul.f32 %v5211_v45, %v5989_v63  ;;  %v2156_v32 = vmul.f32 %v5220_v47, %v2018_v5  ;;  %v2160_v59 = vmul.f32 %v5220_v47, %v2022_v2  ;;  %v5996_v2 = vld [vmem:[#allocation107_spill] sm:$0xff] }
 0x304   :  { %v2278_v33 = vadd.f32 %v5229_v41, %v2140_v21  ;;  %v2282_v22 = vadd.f32 %v5229_v41, %v2144_v10  ;;  %v2386_v3 = vmax.f32 %v2258_v36, 0.0  ;;  %v2390_v16 = vmax.f32 %v2262_v35, 0.0 }
 0x305   :  { %v2394_v49 = vmax.f32 %v2266_v52, 0.0  ;;  %v2042_v39 = vmul.f32 %v5211_v45, %v5990_v15  ;;  %v2164_v43 = vmul.f32 %v5220_v47, %v2026_v25  ;;  %v2286_v17 = vadd.f32 %v5229_v41, %v2148_v55  ;;  %v5997_v52 = vld [vmem:[#allocation85_spill] sm:$0xff] }
 0x306   :  { %v2398_v37 = vmax.f32 %v2270_v26, 0.0  ;;  %v2046_v8 = vmul.f32 %v5211_v45, %v5991_v23  ;;  %v2168_v28 = vmul.f32 %v5220_v47, %v2030_v60  ;;  %v2290_v19 = vadd.f32 %v5229_v41, %v2152_v0  ;;  %2514 = vst [vmem:[%s5447_s4 + $0x18] sm:$0xff] %v2386_v3 }
 0x307   :  { %v2402_v27 = vmax.f32 %v2274_v1, 0.0  ;;  %v2050_v48 = vmul.f32 %v5211_v45, %v5992_v6  ;;  %v2172_v58 = vmul.f32 %v5220_v47, %v2034_v14  ;;  %v2294_v11 = vadd.f32 %v5229_v41, %v2156_v32  ;;  %2518 = vst [vmem:[%s5447_s4 + $0x38] sm:$0xff] %v2390_v16  ;;  %v5999_v1 = vld [vmem:[#allocation12_spill] sm:$0xff] }
 0x308   :  { %v2406_v20 = vmax.f32 %v2278_v33, 0.0  ;;  %v2054_v62 = vmul.f32 %v5211_v45, %v5993_v42  ;;  %v2176_v18 = vmul.f32 %v5220_v47, %v2038_v54  ;;  %v2298_v30 = vadd.f32 %v5229_v41, %v2160_v59  ;;  %2522 = vst [vmem:[%s5447_s4 + $0x58] sm:$0xff] %v2394_v49  ;;  %v6000_v33 = vld [vmem:[#allocation108_spill] sm:$0xff] }
 0x309   :  { %v2410_v46 = vmax.f32 %v2282_v22, 0.0  ;;  %v2058_v9 = vmul.f32 %v5211_v45, %v5994_v38  ;;  %v2180_v44 = vmul.f32 %v5220_v47, %v2042_v39  ;;  %v2302_v61 = vadd.f32 %v5229_v41, %v2164_v43  ;;  %2526 = vst [vmem:[%s5447_s4 + $0x78] sm:$0xff] %v2398_v37 }
 0x30a   :  { %v2414_v51 = vmax.f32 %v2286_v17, 0.0  ;;  %v2062_v13 = vmul.f32 %v5211_v45, %v5995_v50  ;;  %v2184_v4 = vmul.f32 %v5220_v47, %v2046_v8  ;;  %v2306_v5 = vadd.f32 %v5229_v41, %v2168_v28  ;;  %2530 = vst [vmem:[%s5447_s4 + $0x98] sm:$0xff] %v2402_v27 }
 0x30b   :  { %v2418_v31 = vmax.f32 %v2290_v19, 0.0  ;;  %v2066_v21 = vmul.f32 %v5211_v45, %v5996_v2  ;;  %v2188_v10 = vmul.f32 %v5220_v47, %v2050_v48  ;;  %v2310_v36 = vadd.f32 %v5229_v41, %v2172_v58  ;;  %2534 = vst [vmem:[%s5447_s4 + $0xb8] sm:$0xff] %v2406_v20 }
 0x30c   :  { %v2422_v35 = vmax.f32 %v2294_v11, 0.0  ;;  %v2070_v40 = vmul.f32 %v5211_v45, %v5997_v52  ;;  %v2192_v25 = vmul.f32 %v5220_v47, %v2054_v62  ;;  %v2314_v55 = vadd.f32 %v5229_v41, %v2176_v18  ;;  %2538 = vst [vmem:[%s5447_s4 + $0xd8] sm:$0xff] %v2410_v46 }
 0x30d   :  { %v2426_v26 = vmax.f32 %v2298_v30, 0.0  ;;  %v2074_v60 = vmul.f32 %v5211_v45, %v5998_v57  ;;  %v2196_v24 = vmul.f32 %v5220_v47, %v2058_v9  ;;  %v2318_v14 = vadd.f32 %v5229_v41, %v2180_v44  ;;  %2542 = vst [vmem:[%s5447_s4 + $0xf8] sm:$0xff] %v2414_v51 }
 0x30e   :  { %v2430_v0 = vmax.f32 %v2302_v61, 0.0  ;;  %v2078_v63 = vmul.f32 %v5211_v45, %v5999_v1  ;;  %v2200_v54 = vmul.f32 %v5220_v47, %v2062_v13  ;;  %v2322_v32 = vadd.f32 %v5229_v41, %v2184_v4  ;;  %2546 = vst [vmem:[%s5447_s4 + $0x118] sm:$0xff] %v2418_v31 }
 0x30f   :  { %v2434_v59 = vmax.f32 %v2306_v5, 0.0  ;;  %v2082_v22 = vmul.f32 %v5211_v45, %v6000_v33  ;;  %v2204_v3 = vmul.f32 %v5220_v47, %v2066_v21  ;;  %v2326_v16 = vadd.f32 %v5229_v41, %v2188_v10  ;;  %2550 = vst [vmem:[%s5447_s4 + $0x138] sm:$0xff] %v2422_v35 }
 0x310   :  { %v2438_v49 = vmax.f32 %v2310_v36, 0.0  ;;  %v2086_v15 = vmul.f32 %v5211_v45, %v4900_v53  ;;  %v2208_v39 = vmul.f32 %v5220_v47, %v2070_v40  ;;  %v2330_v43 = vadd.f32 %v5229_v41, %v2192_v25  ;;  %2554 = vst [vmem:[%s5447_s4 + $0x158] sm:$0xff] %v2426_v26 }
 0x311   :  { %v2442_v17 = vmax.f32 %v2314_v55, 0.0  ;;  %v2090_v37 = vmul.f32 %v5211_v45, %v4904_v12  ;;  %v2212_v23 = vmul.f32 %v5220_v47, %v2074_v60  ;;  %v2334_v8 = vadd.f32 %v5229_v41, %v2196_v24  ;;  %2558 = vst [vmem:[%s5447_s4 + $0x178] sm:$0xff] %v2430_v0 }
 0x312   :  { %v2446_v28 = vmax.f32 %v2318_v14, 0.0  ;;  %v2094_v53 = vmul.f32 %v5211_v45, %v4908_v56  ;;  %v2216_v19 = vmul.f32 %v5220_v47, %v2078_v63  ;;  %v2338_v27 = vadd.f32 %v5229_v41, %v2200_v54  ;;  %2562 = vst [vmem:[%s5447_s4 + $0x198] sm:$0xff] %v2434_v59 }
 0x313   :  { %v2450_v6 = vmax.f32 %v2322_v32, 0.0  ;;  %v2098_v12 = vmul.f32 %v5211_v45, %v5150_v7  ;;  %v2220_v48 = vmul.f32 %v5220_v47, %v2082_v22  ;;  %v2342_v58 = vadd.f32 %v5229_v41, %v2204_v3  ;;  %2566 = vst [vmem:[%s5447_s4 + $0x1b8] sm:$0xff] %v2438_v49 }
 0x314   :  { %v2454_v11 = vmax.f32 %v2326_v16, 0.0  ;;  %v2102_v56 = vmul.f32 %v5211_v45, %v5164_v29  ;;  %v2224_v20 = vmul.f32 %v5220_v47, %v2086_v15  ;;  %v2346_v42 = vadd.f32 %v5229_v41, %v2208_v39  ;;  %2570 = vst [vmem:[%s5447_s4 + $0x1d8] sm:$0xff] %v2442_v17 }
 0x315   :  { %v2458_v62 = vmax.f32 %v2330_v43, 0.0  ;;  %v2106_v7 = vmul.f32 %v5211_v45, %v5181_v34  ;;  %v2228_v18 = vmul.f32 %v5220_v47, %v2090_v37  ;;  %v2350_v30 = vadd.f32 %v5229_v41, %v2212_v23  ;;  %2574 = vst [vmem:[%s5447_s4 + $0x1f8] sm:$0xff] %v2446_v28 }
 0x316   :  { %v2462_v46 = vmax.f32 %v2334_v8, 0.0  ;;  %v2232_v29 = vmul.f32 %v5220_v47, %v2094_v53  ;;  %v2354_v38 = vadd.f32 %v5229_v41, %v2216_v19  ;;  %v2466_v9 = vmax.f32 %v2338_v27, 0.0  ;;  %2578 = vst [vmem:[%s5447_s4 + $0x218] sm:$0xff] %v2450_v6 }
 0x317   :  { %v2236_v34 = vmul.f32 %v5220_v47, %v2098_v12  ;;  %v2358_v45 = vadd.f32 %v5229_v41, %v2220_v48  ;;  %v2470_v44 = vmax.f32 %v2342_v58, 0.0  ;;  %2582 = vst [vmem:[%s5447_s4 + $0x238] sm:$0xff] %v2454_v11  ;;  %v2240_v61 = vmul.f32 %v5220_v47, %v2102_v56 }
 0x318   :  { %v2362_v51 = vadd.f32 %v5229_v41, %v2224_v20  ;;  %v2474_v50 = vmax.f32 %v2346_v42, 0.0  ;;  %2586 = vst [vmem:[%s5447_s4 + $0x258] sm:$0xff] %v2458_v62  ;;  %v2244_v13 = vmul.f32 %v5220_v47, %v2106_v7  ;;  %v2366_v4 = vadd.f32 %v5229_v41, %v2228_v18 }
 0x319   :  { %v2478_v5 = vmax.f32 %v2350_v30, 0.0  ;;  %2590 = vst [vmem:[%s5447_s4 + $0x278] sm:$0xff] %v2462_v46  ;;  %v2370_v31 = vadd.f32 %v5229_v41, %v2232_v29  ;;  %v2482_v2 = vmax.f32 %v2354_v38, 0.0  ;;  %v2374_v21 = vadd.f32 %v5229_v41, %v2236_v34 }
 0x31a   :  { %2594 = vst [vmem:[%s5447_s4 + $0x298] sm:$0xff] %v2466_v9  ;;  %v2486_v10 = vmax.f32 %v2358_v45, 0.0  ;;  %v2378_v47 = vadd.f32 %v5229_v41, %v2240_v61  ;;  %v2490_v36 = vmax.f32 %v2362_v51, 0.0  ;;  %v2382_v35 = vadd.f32 %v5229_v41, %v2244_v13 }
 0x31b   :  { %2598 = vst [vmem:[%s5447_s4 + $0x2b8] sm:$0xff] %v2470_v44  ;;  %v2494_v52 = vmax.f32 %v2366_v4, 0.0  ;;  %v2498_v40 = vmax.f32 %v2370_v31, 0.0  ;;  %v2502_v25 = vmax.f32 %v2374_v21, 0.0 }
 0x31c   :  { %2602 = vst [vmem:[%s5447_s4 + $0x2d8] sm:$0xff] %v2474_v50  ;;  %v2506_v55 = vmax.f32 %v2378_v47, 0.0  ;;  %v2510_v41 = vmax.f32 %v2382_v35, 0.0 }
 0x31d   :  { %2606 = vst [vmem:[%s5447_s4 + $0x2f8] sm:$0xff] %v2478_v5 }
 0x31e   :  { %2610 = vst [vmem:[%s5447_s4 + $0x318] sm:$0xff] %v2482_v2 }
 0x31f   :  { %2614 = vst [vmem:[%s5447_s4 + $0x338] sm:$0xff] %v2486_v10 }
 0x320   :  { %2618 = vst [vmem:[%s5447_s4 + $0x358] sm:$0xff] %v2490_v36 }
 0x321   :  { %2622 = vst [vmem:[%s5447_s4 + $0x378] sm:$0xff] %v2494_v52 }
 0x322   :  { %2626 = vst [vmem:[%s5447_s4 + $0x398] sm:$0xff] %v2498_v40 }
 0x323   :  { %2630 = vst [vmem:[%s5447_s4 + $0x3b8] sm:$0xff] %v2502_v25 }
 0x324   :  { %2634 = vst [vmem:[%s5447_s4 + $0x3d8] sm:$0xff] %v2506_v55 }
 0x325   :  { %2638 = vst [vmem:[%s5447_s4 + $0x3f8] sm:$0xff] %v2510_v41 }
 0x326   :  { %2643 = vsyncpa [#allocation4], 1 }
 0x327   :  { %2644 = vsyncpa [#allocation6], 1 }

// kernel: projector_forward.5
= control target key start
LH: loop header
LB: loop body
LE: loop exit
PB: predicated region body
PF: predicated region fallthrough
CT: control target
= control target key end

     0   :  { %s6224_s0 = inlined_call_operand.vmem [shape: bf16[256,512], index: 0, kind: input, shape index: {}]   ;;  %s6225_s1 = inlined_call_operand.vmem [shape: bf16[512,512], index: 1, kind: input, shape index: {}]   ;;  %s6226_s2 = inlined_call_operand.vmem [shape: f32[1,512], index: 2, kind: input, shape index: {}]   ;;  %s6227_s3 = inlined_call_operand.hbm [shape: f32[256,512], index: 3, kind: output, shape index: {}]  }
   0x1   :  { %v3892_v0 = vld [vmem:[%s6225_s1 + $0xe0] sm:$0xf]  ;;  %v4384_v1 = vld [vmem:[%s6225_s1 + $0xec] sm:$0xf0] }
   0x2   :  { %v4020_v2 = vld [vmem:[%s6225_s1 + $0x1e0] sm:$0xf]  ;;  %v3893_v3 = vor.u32 %v4384_v1, %v3892_v0  ;;  %v4416_v4 = vld [vmem:[%s6225_s1 + $0x1ec] sm:$0xf0] }
   0x3   :  { %v4148_v5 = vld [vmem:[%s6225_s1 + $0x2e0] sm:$0xf]  ;;  %v4448_v6 = vld [vmem:[%s6225_s1 + $0x2ec] sm:$0xf0]  ;;  %v4021_v7 = vor.u32 %v4416_v4, %v4020_v2 }
   0x4   :  { %v4149_v8 = vor.u32 %v4448_v6, %v4148_v5  ;;  %v4276_v9 = vld [vmem:[%s6225_s1 + $0x3e0] sm:$0xf]  ;;  %v4480_v10 = vld [vmem:[%s6225_s1 + $0x3ec] sm:$0xf0]  ;;  %1427 = vmatpush.bf16.msra.mxu0 %v3893_v3 }
   0x5   :  { %v3876_v11 = vld [vmem:[%s6225_s1 + $0xc0] sm:$0xf]  ;;  %v4277_v12 = vor.u32 %v4480_v10, %v4276_v9  ;;  %v4380_v13 = vld [vmem:[%s6225_s1 + $0xcc] sm:$0xf0]  ;;  %1516 = vmatpush.bf16.msra.mxu1 %v4021_v7 }
   0x6   :  { %v4004_v14 = vld [vmem:[%s6225_s1 + $0x1c0] sm:$0xf]  ;;  %v4412_v15 = vld [vmem:[%s6225_s1 + $0x1cc] sm:$0xf0]  ;;  %1605 = vmatpush.bf16.msra.mxu2 %v4149_v8  ;;  %v3877_v16 = vor.u32 %v4380_v13, %v3876_v11 }
   0x7   :  { %v4005_v17 = vor.u32 %v4412_v15, %v4004_v14  ;;  %v4132_v18 = vld [vmem:[%s6225_s1 + $0x2c0] sm:$0xf]  ;;  %v4444_v19 = vld [vmem:[%s6225_s1 + $0x2cc] sm:$0xf0]  ;;  %1694 = vmatpush.bf16.msra.mxu3 %v4277_v12 }
   0x8   :  { %v4260_v20 = vld [vmem:[%s6225_s1 + $0x3c0] sm:$0xf]  ;;  %v4133_v21 = vor.u32 %v4444_v19, %v4132_v18  ;;  %v4476_v22 = vld [vmem:[%s6225_s1 + $0x3cc] sm:$0xf0]  ;;  %1428 = vmatpush.bf16.msra.mxu0 %v3877_v16 }
   0x9   :  { %v3860_v23 = vld [vmem:[%s6225_s1 + $0xa0] sm:$0xf]  ;;  %v4376_v24 = vld [vmem:[%s6225_s1 + $0xac] sm:$0xf0]  ;;  %v4261_v25 = vor.u32 %v4476_v22, %v4260_v20  ;;  %1517 = vmatpush.bf16.msra.mxu1 %v4005_v17 }
   0xa   :  { %v3988_v26 = vld [vmem:[%s6225_s1 + $0x1a0] sm:$0xf]  ;;  %v4408_v27 = vld [vmem:[%s6225_s1 + $0x1ac] sm:$0xf0]  ;;  %v3861_v29 = vor.u32 %v4376_v24, %v3860_v23  ;;  %1606 = vmatpush.bf16.msra.mxu2 %v4133_v21 }
   0xb   :  { %v4116_v28 = vld [vmem:[%s6225_s1 + $0x2a0] sm:$0xf]  ;;  %v4440_v30 = vld [vmem:[%s6225_s1 + $0x2ac] sm:$0xf0]  ;;  %v3989_v33 = vor.u32 %v4408_v27, %v3988_v26  ;;  %1695 = vmatpush.bf16.msra.mxu3 %v4261_v25 }
   0xc   :  { %v4244_v31 = vld [vmem:[%s6225_s1 + $0x3a0] sm:$0xf]  ;;  %v4472_v32 = vld [vmem:[%s6225_s1 + $0x3ac] sm:$0xf0]  ;;  %v4117_v34 = vor.u32 %v4440_v30, %v4116_v28  ;;  %1429 = vmatpush.bf16.msra.mxu0 %v3861_v29  ;;  %v4290_v30 = vld [vmem:[%s6224_s0 + $0x4] sm:$0xf] }
   0xd   :  { %v3844_v35 = vld [vmem:[%s6225_s1 + $0x80] sm:$0xf]  ;;  %v4372_v36 = vld [vmem:[%s6225_s1 + $0x8c] sm:$0xf0]  ;;  %v4245_v38 = vor.u32 %v4472_v32, %v4244_v31  ;;  %1518 = vmatpush.bf16.msra.mxu1 %v3989_v33  ;;  %v4446_v31 = vld [vmem:[%s6225_s1 + $0x2e4] sm:$0xf] }
   0xe   :  { %v3972_v37 = vld [vmem:[%s6225_s1 + $0x180] sm:$0xf]  ;;  %v4404_v39 = vld [vmem:[%s6225_s1 + $0x18c] sm:$0xf0]  ;;  %v3845_v44 = vor.u32 %v4372_v36, %v3844_v35  ;;  %1607 = vmatpush.bf16.msra.mxu2 %v4117_v34  ;;  %v4150_v32 = vld [vmem:[%s6225_s1 + $0x2f0] sm:$0xf0] }
   0xf   :  { %v4100_v40 = vld [vmem:[%s6225_s1 + $0x280] sm:$0xf]  ;;  %v4436_v41 = vld [vmem:[%s6225_s1 + $0x28c] sm:$0xf0]  ;;  %v3973_v45 = vor.u32 %v4404_v39, %v3972_v37  ;;  %1696 = vmatpush.bf16.msra.mxu3 %v4245_v38  ;;  %v3526_v34 = vld [vmem:[%s6224_s0 + $0x10] sm:$0xf0] }
  0x10   :  { %v4228_v42 = vld [vmem:[%s6225_s1 + $0x380] sm:$0xf]  ;;  %v4468_v43 = vld [vmem:[%s6225_s1 + $0x38c] sm:$0xf0]  ;;  %v4101_v46 = vor.u32 %v4436_v41, %v4100_v40  ;;  %1430 = vmatpush.bf16.msra.mxu0 %v3845_v44  ;;  %v4478_v35 = vld [vmem:[%s6225_s1 + $0x3e4] sm:$0xf]  ;;  %v4153_v44 = vor.u32 %v4446_v31, %v4150_v32 }
  0x11   :  { %v3828_v47 = vld [vmem:[%s6225_s1 + $0x60] sm:$0xf]  ;;  %v4368_v48 = vld [vmem:[%s6225_s1 + $0x6c] sm:$0xf0]  ;;  %v4229_v50 = vor.u32 %v4468_v43, %v4228_v42  ;;  %1519 = vmatpush.bf16.msra.mxu1 %v3973_v45  ;;  %v4278_v36 = vld [vmem:[%s6225_s1 + $0x3f0] sm:$0xf0] }
  0x12   :  { %v3956_v49 = vld [vmem:[%s6225_s1 + $0x160] sm:$0xf]  ;;  %v4400_v51 = vld [vmem:[%s6225_s1 + $0x16c] sm:$0xf0]  ;;  %v3829_v56 = vor.u32 %v4368_v48, %v3828_v47  ;;  %1608 = vmatpush.bf16.msra.mxu2 %v4101_v46  ;;  %v3532_v39 = vld [vmem:[%s6224_s0 + $0x8] sm:$0xf]  ;;  %v4281_v48 = vor.u32 %v4478_v35, %v4278_v36 }
  0x13   :  { %v4084_v52 = vld [vmem:[%s6225_s1 + $0x260] sm:$0xf]  ;;  %v4432_v53 = vld [vmem:[%s6225_s1 + $0x26c] sm:$0xf0]  ;;  %v3957_v57 = vor.u32 %v4400_v51, %v3956_v49  ;;  %1697 = vmatpush.bf16.msra.mxu3 %v4229_v50  ;;  %v4293_v40 = vld [vmem:[%s6224_s0 + $0x14] sm:$0xf0] }
  0x14   :  { %v4212_v54 = vld [vmem:[%s6225_s1 + $0x360] sm:$0xf]  ;;  %v4464_v55 = vld [vmem:[%s6225_s1 + $0x36c] sm:$0xf0]  ;;  %v4085_v58 = vor.u32 %v4432_v53, %v4084_v52  ;;  %1431 = vmatpush.bf16.msra.mxu0 %v3829_v56  ;;  %v4291_v41 = vld [vmem:[%s6224_s0 + $0xc] sm:$0xf] }
  0x15   :  { %v3812_v59 = vld [vmem:[%s6225_s1 + $0x40] sm:$0xf]  ;;  %v4364_v60 = vld [vmem:[%s6225_s1 + $0x4c] sm:$0xf0]  ;;  %v4213_v62 = vor.u32 %v4464_v55, %v4212_v54  ;;  %1520 = vmatpush.bf16.msra.mxu1 %v3957_v57  ;;  %v3534_v43 = vld [vmem:[%s6224_s0 + $0x18] sm:$0xf0] }
  0x16   :  { %v3940_v61 = vld [vmem:[%s6225_s1 + $0x140] sm:$0xf]  ;;  %v4396_v63 = vld [vmem:[%s6225_s1 + $0x14c] sm:$0xf0]  ;;  %v3813_v4 = vor.u32 %v4364_v60, %v3812_v59  ;;  %1609 = vmatpush.bf16.msra.mxu2 %v4085_v58  ;;  %v4382_v45 = vld [vmem:[%s6225_s1 + $0xe4] sm:$0xf] }
  0x17   :  { %v4068_v0 = vld [vmem:[%s6225_s1 + $0x240] sm:$0xf]  ;;  %v4428_v1 = vld [vmem:[%s6225_s1 + $0x24c] sm:$0xf0]  ;;  %v3941_v5 = vor.u32 %v4396_v63, %v3940_v61  ;;  %1698 = vmatpush.bf16.msra.mxu3 %v4213_v62  ;;  %v3894_v46 = vld [vmem:[%s6225_s1 + $0xf0] sm:$0xf0] }
  0x18   :  { %v4196_v2 = vld [vmem:[%s6225_s1 + $0x340] sm:$0xf]  ;;  %v4460_v3 = vld [vmem:[%s6225_s1 + $0x34c] sm:$0xf0]  ;;  %v4069_v6 = vor.u32 %v4428_v1, %v4068_v0  ;;  %1432 = vmatpush.bf16.msra.mxu0 %v3813_v4  ;;  %v4414_v49 = vld [vmem:[%s6225_s1 + $0x1e4] sm:$0xf] }
  0x19   :  { %v3796_v7 = vld [vmem:[%s6225_s1 + $0x20] sm:$0xf]  ;;  %v4360_v8 = vld [vmem:[%s6225_s1 + $0x2c] sm:$0xf0]  ;;  %v4197_v10 = vor.u32 %v4460_v3, %v4196_v2  ;;  %1521 = vmatpush.bf16.msra.mxu1 %v3941_v5  ;;  %v4022_v50 = vld [vmem:[%s6225_s1 + $0x1f0] sm:$0xf0] }
  0x1a   :  { %v3924_v9 = vld [vmem:[%s6225_s1 + $0x120] sm:$0xf]  ;;  %v4392_v11 = vld [vmem:[%s6225_s1 + $0x12c] sm:$0xf0]  ;;  %v3797_v17 = vor.u32 %v4360_v8, %v3796_v7  ;;  %1610 = vmatpush.bf16.msra.mxu2 %v4069_v6 }
  0x1b   :  { %v4052_v12 = vld [vmem:[%s6225_s1 + $0x220] sm:$0xf]  ;;  %v4424_v13 = vld [vmem:[%s6225_s1 + $0x22c] sm:$0xf0]  ;;  %v3925_v21 = vor.u32 %v4392_v11, %v3924_v9  ;;  %1699 = vmatpush.bf16.msra.mxu3 %v4197_v10 }
  0x1c   :  { %v4180_v14 = vld [vmem:[%s6225_s1 + $0x320] sm:$0xf]  ;;  %v4456_v15 = vld [vmem:[%s6225_s1 + $0x32c] sm:$0xf0]  ;;  %v4053_v22 = vor.u32 %v4424_v13, %v4052_v12  ;;  %1433 = vmatpush.bf16.msra.mxu0 %v3797_v17 }
  0x1d   :  { %v3780_v16 = vld [vmem:[%s6225_s1] sm:$0xf]  ;;  %v4356_v18 = vld [vmem:[%s6225_s1 + $0xc] sm:$0xf0]  ;;  %v4181_v26 = vor.u32 %v4456_v15, %v4180_v14  ;;  %1522 = vmatpush.bf16.msra.mxu1 %v3925_v21 }
  0x1e   :  { %v3908_v19 = vld [vmem:[%s6225_s1 + $0x100] sm:$0xf]  ;;  %v4388_v20 = vld [vmem:[%s6225_s1 + $0x10c] sm:$0xf0]  ;;  %v3781_v33 = vor.u32 %v4356_v18, %v3780_v16  ;;  %1611 = vmatpush.bf16.msra.mxu2 %v4053_v22 }
  0x1f   :  { %v4036_v23 = vld [vmem:[%s6225_s1 + $0x200] sm:$0xf]  ;;  %v4420_v24 = vld [vmem:[%s6225_s1 + $0x20c] sm:$0xf0]  ;;  %v3909_v37 = vor.u32 %v4388_v20, %v3908_v19  ;;  %1700 = vmatpush.bf16.msra.mxu3 %v4181_v26 }
  0x20   :  { %v4164_v25 = vld [vmem:[%s6225_s1 + $0x300] sm:$0xf]  ;;  %v4452_v27 = vld [vmem:[%s6225_s1 + $0x30c] sm:$0xf0]  ;;  %v4037_v38 = vor.u32 %v4420_v24, %v4036_v23 }
  0x21   :  { %v3524_v28 = vld [vmem:[%s6224_s0] sm:$0xf]  ;;  %v4292_v29 = vld [vmem:[%s6224_s0 + $0xc] sm:$0xf0]  ;;  %v4165_v42 = vor.u32 %v4452_v27, %v4164_v25 }
  0x22   :  { %v4770_v47 = vor.u32 %v4292_v29, %v3524_v28 }
  0x23   :  { %8 = vsyncpa [#allocation4], 0  ;;  %1434 = vmatpush.bf16.msra.mxu0 %v3781_v33  ;;  %v4778_v51 = vor.u32 %v4290_v30, %v3526_v34  ;;  %v4780_v52 = vor.u32 %v4293_v40, %v3532_v39  ;;  %1523 = vmatpush.bf16.msra.mxu1 %v3909_v37  ;;  %v4782_v53 = vor.u32 %v4291_v41, %v3534_v43  ;;  %v4442_v56 = vld [vmem:[%s6225_s1 + $0x2c4] sm:$0xf]  ;;  %v4134_v57 = vld [vmem:[%s6225_s1 + $0x2d0] sm:$0xf0] }
  0x24   :  { %1612 = vmatpush.bf16.msra.mxu2 %v4037_v38  ;;  %v3897_v54 = vor.u32 %v4382_v45, %v3894_v46  ;;  %1701 = vmatpush.bf16.msra.mxu3 %v4165_v42  ;;  %v4025_v55 = vor.u32 %v4414_v49, %v4022_v50  ;;  %v4474_v58 = vld [vmem:[%s6225_s1 + $0x3c4] sm:$0xf]  ;;  %v4137_v59 = vor.u32 %v4442_v56, %v4134_v57  ;;  %v4262_v60 = vld [vmem:[%s6225_s1 + $0x3d0] sm:$0xf0]  ;;  %v3540_v4 = vld [vmem:[%s6224_s0 + $0x20] sm:$0xf] }
  0x25   :  { %v4378_v61 = vld [vmem:[%s6225_s1 + $0xc4] sm:$0xf]  ;;  %v3878_v62 = vld [vmem:[%s6225_s1 + $0xd0] sm:$0xf0]  ;;  %v4265_v63 = vor.u32 %v4474_v58, %v4262_v60  ;;  %v4296_v5 = vld [vmem:[%s6224_s0 + $0x2c] sm:$0xf0] }
  0x26   :  { %1435 = vmatmul.bf16.vlgmr.msra.gmra.mxu0 %v4770_v47  ;;  %1524 = vmatmul.bf16.vlgmr.msra.gmra.mxu1 %v4778_v51  ;;  %v3881_v0 = vor.u32 %v4378_v61, %v3878_v62  ;;  %v4410_v1 = vld [vmem:[%s6225_s1 + $0x1c4] sm:$0xf]  ;;  %v4006_v2 = vld [vmem:[%s6225_s1 + $0x1d0] sm:$0xf0]  ;;  %v3548_v8 = vld [vmem:[%s6224_s0 + $0x28] sm:$0xf]  ;;  %v4836_v12 = vor.u32 %v4296_v5, %v3540_v4 }
  0x27   :  { %1613 = vmatmul.bf16.vlgmr.msra.gmra.mxu2 %v4780_v52  ;;  %1702 = vmatmul.bf16.vlgmr.msra.gmra.mxu3 %v4782_v53  ;;  %v4009_v3 = vor.u32 %v4410_v1, %v4006_v2  ;;  %v4294_v6 = vld [vmem:[%s6224_s0 + $0x24] sm:$0xf]  ;;  %v3542_v7 = vld [vmem:[%s6224_s0 + $0x30] sm:$0xf0]  ;;  %v4297_v9 = vld [vmem:[%s6224_s0 + $0x34] sm:$0xf0] }
  0x28   :  { %1961 = vmatpush.bf16.msrb.mxu2 %v4153_v44  ;;  %2050 = vmatpush.bf16.msrb.mxu3 %v4281_v48  ;;  %v4295_v10 = vld [vmem:[%s6224_s0 + $0x2c] sm:$0xf]  ;;  %v3550_v11 = vld [vmem:[%s6224_s0 + $0x38] sm:$0xf0]  ;;  %v4838_v13 = vor.u32 %v4294_v6, %v3542_v7  ;;  %v4840_v14 = vor.u32 %v4297_v9, %v3548_v8  ;;  %v3556_v16 = vld [vmem:[%s6224_s0 + $0x40] sm:$0xf] }
  0x29   :  { %1783 = vmatpush.bf16.msrb.mxu0 %v3897_v54  ;;  %1872 = vmatpush.bf16.msrb.mxu1 %v4025_v55  ;;  %v4842_v15 = vor.u32 %v4295_v10, %v3550_v11  ;;  %v4300_v17 = vld [vmem:[%s6224_s0 + $0x4c] sm:$0xf0]  ;;  %v4298_v18 = vld [vmem:[%s6224_s0 + $0x44] sm:$0xf]  ;;  %v3558_v19 = vld [vmem:[%s6224_s0 + $0x50] sm:$0xf0] }
  0x2a   :  { %v3564_v20 = vld [vmem:[%s6224_s0 + $0x48] sm:$0xf]  ;;  %v4301_v21 = vld [vmem:[%s6224_s0 + $0x54] sm:$0xf0]  ;;  %v4299_v22 = vld [vmem:[%s6224_s0 + $0x4c] sm:$0xf]  ;;  %v4872_v24 = vor.u32 %v4300_v17, %v3556_v16  ;;  %v4874_v25 = vor.u32 %v4298_v18, %v3558_v19 }
  0x2b   :  { %v3566_v23 = vld [vmem:[%s6224_s0 + $0x58] sm:$0xf0]  ;;  %v4876_v26 = vor.u32 %v4301_v21, %v3564_v20  ;;  %v4438_v28 = vld [vmem:[%s6225_s1 + $0x2a4] sm:$0xf]  ;;  %v4118_v29 = vld [vmem:[%s6225_s1 + $0x2b0] sm:$0xf0] }
  0x2c   :  { %1962 = vmatpush.bf16.msrb.mxu2 %v4137_v59  ;;  %2051 = vmatpush.bf16.msrb.mxu3 %v4265_v63  ;;  %v4878_v27 = vor.u32 %v4299_v22, %v3566_v23  ;;  %v4470_v30 = vld [vmem:[%s6225_s1 + $0x3a4] sm:$0xf]  ;;  %v4121_v31 = vor.u32 %v4438_v28, %v4118_v29  ;;  %v4246_v32 = vld [vmem:[%s6225_s1 + $0x3b0] sm:$0xf0]  ;;  %v3572_v40 = vld [vmem:[%s6224_s0 + $0x60] sm:$0xf] }
  0x2d   :  { %1784 = vmatpush.bf16.msrb.mxu0 %v3881_v0  ;;  %1873 = vmatpush.bf16.msrb.mxu1 %v4009_v3  ;;  %v4374_v33 = vld [vmem:[%s6225_s1 + $0xa4] sm:$0xf]  ;;  %v3862_v34 = vld [vmem:[%s6225_s1 + $0xb0] sm:$0xf0]  ;;  %v4249_v35 = vor.u32 %v4470_v30, %v4246_v32  ;;  %v4304_v41 = vld [vmem:[%s6224_s0 + $0x6c] sm:$0xf0] }
  0x2e   :  { %v3865_v36 = vor.u32 %v4374_v33, %v3862_v34  ;;  %v4406_v37 = vld [vmem:[%s6225_s1 + $0x1a4] sm:$0xf]  ;;  %v3990_v38 = vld [vmem:[%s6225_s1 + $0x1b0] sm:$0xf0]  ;;  %v3580_v44 = vld [vmem:[%s6224_s0 + $0x68] sm:$0xf]  ;;  %v4932_v49 = vor.u32 %v4304_v41, %v3572_v40 }
  0x2f   :  { %v3993_v39 = vor.u32 %v4406_v37, %v3990_v38  ;;  %v4302_v42 = vld [vmem:[%s6224_s0 + $0x64] sm:$0xf]  ;;  %v3574_v43 = vld [vmem:[%s6224_s0 + $0x70] sm:$0xf0]  ;;  %v4305_v45 = vld [vmem:[%s6224_s0 + $0x74] sm:$0xf0] }
  0x30   :  { %1963 = vmatpush.bf16.msrb.mxu2 %v4121_v31  ;;  %2052 = vmatpush.bf16.msrb.mxu3 %v4249_v35  ;;  %v4303_v46 = vld [vmem:[%s6224_s0 + $0x6c] sm:$0xf]  ;;  %v3582_v48 = vld [vmem:[%s6224_s0 + $0x78] sm:$0xf0]  ;;  %v4934_v50 = vor.u32 %v4302_v42, %v3574_v43  ;;  %v4936_v54 = vor.u32 %v4305_v45, %v3580_v44  ;;  %v3588_v56 = vld [vmem:[%s6224_s0 + $0x80] sm:$0xf] }
  0x31   :  { %1785 = vmatpush.bf16.msrb.mxu0 %v3865_v36  ;;  %1874 = vmatpush.bf16.msrb.mxu1 %v3993_v39  ;;  %v4938_v55 = vor.u32 %v4303_v46, %v3582_v48  ;;  %v4308_v57 = vld [vmem:[%s6224_s0 + $0x8c] sm:$0xf0]  ;;  %v4306_v58 = vld [vmem:[%s6224_s0 + $0x84] sm:$0xf]  ;;  %v3590_v59 = vld [vmem:[%s6224_s0 + $0x90] sm:$0xf0] }
  0x32   :  { %v3596_v60 = vld [vmem:[%s6224_s0 + $0x88] sm:$0xf]  ;;  %v4309_v61 = vld [vmem:[%s6224_s0 + $0x94] sm:$0xf0]  ;;  %v4307_v62 = vld [vmem:[%s6224_s0 + $0x8c] sm:$0xf]  ;;  %v4968_v0 = vor.u32 %v4308_v57, %v3588_v56  ;;  %v4970_v1 = vor.u32 %v4306_v58, %v3590_v59 }
  0x33   :  { %v3598_v63 = vld [vmem:[%s6224_s0 + $0x98] sm:$0xf0]  ;;  %v4972_v2 = vor.u32 %v4309_v61, %v3596_v60  ;;  %v4434_v4 = vld [vmem:[%s6225_s1 + $0x284] sm:$0xf]  ;;  %v4102_v5 = vld [vmem:[%s6225_s1 + $0x290] sm:$0xf0] }
  0x34   :  { %v4974_v3 = vor.u32 %v4307_v62, %v3598_v63  ;;  %v4466_v6 = vld [vmem:[%s6225_s1 + $0x384] sm:$0xf]  ;;  %v4105_v7 = vor.u32 %v4434_v4, %v4102_v5  ;;  %v4230_v8 = vld [vmem:[%s6225_s1 + $0x390] sm:$0xf0]  ;;  %v3604_v20 = vld [vmem:[%s6224_s0 + $0xa0] sm:$0xf] }
  0x35   :  { %v4370_v9 = vld [vmem:[%s6225_s1 + $0x84] sm:$0xf]  ;;  %v3846_v10 = vld [vmem:[%s6225_s1 + $0x90] sm:$0xf0]  ;;  %v4233_v11 = vor.u32 %v4466_v6, %v4230_v8  ;;  %v4312_v21 = vld [vmem:[%s6224_s0 + $0xac] sm:$0xf0] }
  0x36   :  { %1440 = vmatmul.bf16.gmra.mxu0 %v4836_v12  ;;  %1529 = vmatmul.bf16.gmra.mxu1 %v4838_v13  ;;  %v3849_v16 = vor.u32 %v4370_v9, %v3846_v10  ;;  %v4402_v17 = vld [vmem:[%s6225_s1 + $0x184] sm:$0xf]  ;;  %v3974_v18 = vld [vmem:[%s6225_s1 + $0x190] sm:$0xf0]  ;;  %v3612_v28 = vld [vmem:[%s6224_s0 + $0xa8] sm:$0xf]  ;;  %v5028_v32 = vor.u32 %v4312_v21, %v3604_v20 }
  0x37   :  { %1618 = vmatmul.bf16.gmra.mxu2 %v4840_v14  ;;  %1707 = vmatmul.bf16.gmra.mxu3 %v4842_v15  ;;  %v3977_v19 = vor.u32 %v4402_v17, %v3974_v18  ;;  %v4310_v22 = vld [vmem:[%s6224_s0 + $0xa4] sm:$0xf]  ;;  %v3606_v23 = vld [vmem:[%s6224_s0 + $0xb0] sm:$0xf0]  ;;  %v4313_v29 = vld [vmem:[%s6224_s0 + $0xb4] sm:$0xf0] }
  0x38   :  { %1964 = vmatpush.bf16.msrb.mxu2 %v4105_v7  ;;  %2053 = vmatpush.bf16.msrb.mxu3 %v4233_v11  ;;  %v4311_v30 = vld [vmem:[%s6224_s0 + $0xac] sm:$0xf]  ;;  %v3614_v31 = vld [vmem:[%s6224_s0 + $0xb8] sm:$0xf0]  ;;  %v5030_v33 = vor.u32 %v4310_v22, %v3606_v23  ;;  %v5032_v34 = vor.u32 %v4313_v29, %v3612_v28  ;;  %v3620_v36 = vld [vmem:[%s6224_s0 + $0xc0] sm:$0xf] }
  0x39   :  { %1786 = vmatpush.bf16.msrb.mxu0 %v3849_v16  ;;  %1875 = vmatpush.bf16.msrb.mxu1 %v3977_v19  ;;  %v5034_v35 = vor.u32 %v4311_v30, %v3614_v31  ;;  %v4316_v37 = vld [vmem:[%s6224_s0 + $0xcc] sm:$0xf0]  ;;  %v4314_v38 = vld [vmem:[%s6224_s0 + $0xc4] sm:$0xf]  ;;  %v3622_v39 = vld [vmem:[%s6224_s0 + $0xd0] sm:$0xf0] }
  0x3a   :  { %v3628_v40 = vld [vmem:[%s6224_s0 + $0xc8] sm:$0xf]  ;;  %v4317_v41 = vld [vmem:[%s6224_s0 + $0xd4] sm:$0xf0]  ;;  %v4315_v42 = vld [vmem:[%s6224_s0 + $0xcc] sm:$0xf]  ;;  %v5064_v44 = vor.u32 %v4316_v37, %v3620_v36  ;;  %v5066_v45 = vor.u32 %v4314_v38, %v3622_v39 }
  0x3b   :  { %v3630_v43 = vld [vmem:[%s6224_s0 + $0xd8] sm:$0xf0]  ;;  %v5068_v46 = vor.u32 %v4317_v41, %v3628_v40  ;;  %v4430_v56 = vld [vmem:[%s6225_s1 + $0x264] sm:$0xf]  ;;  %v4086_v57 = vld [vmem:[%s6225_s1 + $0x270] sm:$0xf0] }
  0x3c   :  { %v5070_v48 = vor.u32 %v4315_v42, %v3630_v43  ;;  %v4462_v58 = vld [vmem:[%s6225_s1 + $0x364] sm:$0xf]  ;;  %v4089_v59 = vor.u32 %v4430_v56, %v4086_v57  ;;  %v4214_v60 = vld [vmem:[%s6225_s1 + $0x370] sm:$0xf0]  ;;  %v3636_v62 = vld [vmem:[%s6224_s0 + $0xe0] sm:$0xf] }
  0x3d   :  { %v4217_v61 = vor.u32 %v4462_v58, %v4214_v60  ;;  %v4320_v63 = vld [vmem:[%s6224_s0 + $0xec] sm:$0xf0]  ;;  %v4318_v4 = vld [vmem:[%s6224_s0 + $0xe4] sm:$0xf]  ;;  %v3638_v5 = vld [vmem:[%s6224_s0 + $0xf0] sm:$0xf0] }
  0x3e   :  { %1965 = vmatpush.bf16.msrb.mxu2 %v4089_v59  ;;  %v3644_v6 = vld [vmem:[%s6224_s0 + $0xe8] sm:$0xf]  ;;  %v4321_v7 = vld [vmem:[%s6224_s0 + $0xf4] sm:$0xf0]  ;;  %v4319_v8 = vld [vmem:[%s6224_s0 + $0xec] sm:$0xf]  ;;  %v5121_v17 = vor.u32 %v4320_v63, %v3636_v62  ;;  %v5126_v20 = vor.u32 %v4318_v4, %v3638_v5 }
  0x3f   :  { %2054 = vmatpush.bf16.msrb.mxu3 %v4217_v61  ;;  %v3646_v9 = vld [vmem:[%s6224_s0 + $0xf8] sm:$0xf0]  ;;  %v4366_v10 = vld [vmem:[%s6225_s1 + $0x64] sm:$0xf]  ;;  %v3830_v11 = vld [vmem:[%s6225_s1 + $0x70] sm:$0xf0]  ;;  %v5128_v21 = vor.u32 %v4321_v7, %v3644_v6 }
  0x40   :  { %v4398_v16 = vld [vmem:[%s6225_s1 + $0x164] sm:$0xf]  ;;  %v3833_v18 = vor.u32 %v4366_v10, %v3830_v11  ;;  %v3958_v19 = vld [vmem:[%s6225_s1 + $0x170] sm:$0xf0]  ;;  %v5130_v23 = vor.u32 %v4319_v8, %v3646_v9  ;;  %v3652_v28 = vld [vmem:[%s6224_s0 + $0x100] sm:$0xf] }
  0x41   :  { %v3961_v22 = vor.u32 %v4398_v16, %v3958_v19  ;;  %v4324_v29 = vld [vmem:[%s6224_s0 + $0x10c] sm:$0xf0]  ;;  %v4322_v30 = vld [vmem:[%s6224_s0 + $0x104] sm:$0xf]  ;;  %v3654_v31 = vld [vmem:[%s6224_s0 + $0x110] sm:$0xf0] }
  0x42   :  { %1787 = vmatpush.bf16.msrb.mxu0 %v3833_v18  ;;  %v3660_v36 = vld [vmem:[%s6224_s0 + $0x108] sm:$0xf]  ;;  %v4325_v37 = vld [vmem:[%s6224_s0 + $0x114] sm:$0xf0]  ;;  %v4323_v38 = vld [vmem:[%s6224_s0 + $0x10c] sm:$0xf]  ;;  %v5160_v40 = vor.u32 %v4324_v29, %v3652_v28  ;;  %v5162_v42 = vor.u32 %v4322_v30, %v3654_v31 }
  0x43   :  { %1876 = vmatpush.bf16.msrb.mxu1 %v3961_v22  ;;  %v3662_v39 = vld [vmem:[%s6224_s0 + $0x118] sm:$0xf0]  ;;  %v5164_v43 = vor.u32 %v4325_v37, %v3660_v36  ;;  %v3238_v59 = vld [vmem:[%s6226_s2] sm:$0xf]  ;;  %v4426_v60 = vld [vmem:[%s6225_s1 + $0x244] sm:$0xf] }
  0x44   :  { %v5166_v57 = vor.u32 %v4323_v38, %v3662_v39  ;;  %v4070_v61 = vld [vmem:[%s6225_s1 + $0x250] sm:$0xf0]  ;;  %v4458_v62 = vld [vmem:[%s6225_s1 + $0x344] sm:$0xf]  ;;  %v5187_v8 = vperm.slane %v3238_v59, 0  ;;  %s3510_s23 = sshll.u32 %s6227_s3, 4  ;;  %s3511_s23 = int_to_ptr.hbm [resolvable:$true] %s3510_s23 }
  0x45   :  { %v4073_v4 = vor.u32 %v4426_v60, %v4070_v61  ;;  %v4198_v5 = vld [vmem:[%s6225_s1 + $0x350] sm:$0xf0]  ;;  %v3668_v18 = vld [vmem:[%s6224_s0 + $0x120] sm:$0xf]  ;;  %v4328_v19 = vld [vmem:[%s6224_s0 + $0x12c] sm:$0xf0] }
  0x46   :  { %1445 = vmatmul.bf16.gmra.mxu0 %v4872_v24  ;;  %1534 = vmatmul.bf16.gmra.mxu1 %v4874_v25  ;;  %v4201_v10 = vor.u32 %v4458_v62, %v4198_v5  ;;  %v4326_v28 = vld [vmem:[%s6224_s0 + $0x124] sm:$0xf]  ;;  %v3670_v29 = vld [vmem:[%s6224_s0 + $0x130] sm:$0xf0]  ;;  %v3676_v30 = vld [vmem:[%s6224_s0 + $0x128] sm:$0xf] }
  0x47   :  { %1623 = vmatmul.bf16.gmra.mxu2 %v4876_v26  ;;  %1712 = vmatmul.bf16.gmra.mxu3 %v4878_v27  ;;  %v4329_v31 = vld [vmem:[%s6224_s0 + $0x134] sm:$0xf0]  ;;  %v4327_v36 = vld [vmem:[%s6224_s0 + $0x12c] sm:$0xf]  ;;  %v3678_v37 = vld [vmem:[%s6224_s0 + $0x138] sm:$0xf0]  ;;  %v5228_v5 = vor.u32 %v4326_v28, %v3670_v29 }
  0x48   :  { %1966 = vmatpush.bf16.msrb.mxu2 %v4073_v4  ;;  %2055 = vmatpush.bf16.msrb.mxu3 %v4201_v10  ;;  %v4362_v39 = vld [vmem:[%s6225_s1 + $0x44] sm:$0xf]  ;;  %v3942_v61 = vld [vmem:[%s6225_s1 + $0x150] sm:$0xf0]  ;;  %v5232_v10 = vor.u32 %v4327_v36, %v3678_v37  ;;  %v3684_v37 = vld [vmem:[%s6224_s0 + $0x140] sm:$0xf] }
  0x49   :  { %v4394_v60 = vld [vmem:[%s6225_s1 + $0x144] sm:$0xf]  ;;  %s4514_s24 = smov 512   ;;  %s4515_s25 = smov 32  }
  0x56   :  { %1450 = vmatmul.bf16.gmra.mxu0 %v4932_v49  ;;  %1539 = vmatmul.bf16.gmra.mxu1 %v4934_v50 }
  0x57   :  { %1628 = vmatmul.bf16.gmra.mxu2 %v4936_v54  ;;  %1717 = vmatmul.bf16.gmra.mxu3 %v4938_v55 }
  0x66   :  { %1455 = vmatmul.bf16.gmra.mxu0 %v4968_v0  ;;  %1544 = vmatmul.bf16.gmra.mxu1 %v4970_v1 }
  0x67   :  { %1633 = vmatmul.bf16.gmra.mxu2 %v4972_v2  ;;  %1722 = vmatmul.bf16.gmra.mxu3 %v4974_v3 }
  0x76   :  { %1460 = vmatmul.bf16.gmra.mxu0 %v5028_v32  ;;  %1549 = vmatmul.bf16.gmra.mxu1 %v5030_v33 }
  0x77   :  { %1638 = vmatmul.bf16.gmra.mxu2 %v5032_v34  ;;  %1727 = vmatmul.bf16.gmra.mxu3 %v5034_v35 }
  0x86   :  { %1465 = vmatmul.bf16.gmra.mxu0 %v5064_v44  ;;  %1554 = vmatmul.bf16.gmra.mxu1 %v5066_v45 }
  0x87   :  { %1643 = vmatmul.bf16.gmra.mxu2 %v5068_v46  ;;  %1732 = vmatmul.bf16.gmra.mxu3 %v5070_v48 }
  0x96   :  { %1470 = vmatmul.bf16.gmra.mxu0 %v5121_v17  ;;  %1559 = vmatmul.bf16.gmra.mxu1 %v5126_v20 }
  0x97   :  { %1648 = vmatmul.bf16.gmra.mxu2 %v5128_v21  ;;  %1737 = vmatmul.bf16.gmra.mxu3 %v5130_v23 }
  0xa3   :  { %v1436_v41 = vpop.f32.mrf.mxu0  ;;  %v1525_v56 = vpop.f32.mrf.mxu1 }
  0xa4   :  { %v1526_v58 = vadd.f32 %v1525_v56, %v1436_v41  ;;  %v3814_v41 = vld [vmem:[%s6225_s1 + $0x50] sm:$0xf0] }
  0xa5   :  { %v3817_v59 = vor.u32 %v4362_v39, %v3814_v41  ;;  %v4330_v39 = vld [vmem:[%s6224_s0 + $0x144] sm:$0xf]  ;;  %v3686_v41 = vld [vmem:[%s6224_s0 + $0x150] sm:$0xf0] }
  0xa6   :  { %1475 = vmatmul.bf16.gmra.mxu0 %v5160_v40  ;;  %1564 = vmatmul.bf16.gmra.mxu1 %v5162_v42 }
  0xa7   :  { %1653 = vmatmul.bf16.gmra.mxu2 %v5164_v43  ;;  %1742 = vmatmul.bf16.gmra.mxu3 %v5166_v57 }
  0xa8   :  { %1788 = vmatpush.bf16.msrb.mxu0 %v3817_v59  ;;  %v4333_v59 = vld [vmem:[%s6224_s0 + $0x154] sm:$0xf0] }
  0xaa   :  { %v1614_v63 = vpop.f32.mrf.mxu2  ;;  %v1703_v7 = vpop.f32.mrf.mxu3 }
  0xab   :  { %v1615_v6 = vadd.f32 %v1614_v63, %v1526_v58  ;;  %v1438_v9 = vpop.f32.mrf.mxu0  ;;  %v1527_v11 = vpop.f32.mrf.mxu1  ;;  %v5220_v58 = vor.u32 %v4328_v19, %v3668_v18 }
  0xac   :  { %v1528_v38 = vadd.f32 %v1527_v11, %v1438_v9 }
  0xad   :  { %v1704_v16 = vadd.f32 %v1703_v7, %v1615_v6  ;;  %v5230_v6 = vor.u32 %v4329_v31, %v3676_v30  ;;  %v3945_v7 = vor.u32 %v4394_v60, %v3942_v61  ;;  %v4331_v61 = vld [vmem:[%s6224_s0 + $0x14c] sm:$0xf] }
  0xaf   :  { %v3248_v22 = vadd.f32 %v5187_v8, %v1704_v16  ;;  %1877 = vmatpush.bf16.msrb.mxu1 %v3945_v7 }
  0xb1   :  { %3376 = vst [vmem:[#allocation3] sm:$0xff] %v3248_v22 }
  0xb2   :  { %v1616_v56 = vpop.f32.mrf.mxu2  ;;  %v1705_v63 = vpop.f32.mrf.mxu3 }
  0xb3   :  { %v1617_v62 = vadd.f32 %v1616_v56, %v1528_v38  ;;  %v1441_v4 = vpop.f32.mrf.mxu0  ;;  %v1530_v9 = vpop.f32.mrf.mxu1  ;;  %v4332_v38 = vld [vmem:[%s6224_s0 + $0x14c] sm:$0xf0]  ;;  %v3692_v56 = vld [vmem:[%s6224_s0 + $0x148] sm:$0xf] }
  0xb4   :  { %v1531_v18 = vadd.f32 %v1530_v9, %v1441_v4  ;;  %v5264_v4 = vor.u32 %v4332_v38, %v3684_v37 }
  0xb5   :  { %v1706_v11 = vadd.f32 %v1705_v63, %v1617_v62  ;;  %v3694_v62 = vld [vmem:[%s6224_s0 + $0x158] sm:$0xf0] }
  0xb6   :  { %1480 = vmatmul.bf16.gmra.mxu0 %v5220_v58  ;;  %1569 = vmatmul.bf16.gmra.mxu1 %v5228_v5  ;;  %6272 = vst [vmem:[#allocation6_spill] sm:$0xff] %v5264_v4 }
  0xb7   :  { %v3252_v16 = vadd.f32 %v5187_v8, %v1706_v11  ;;  %1658 = vmatmul.bf16.gmra.mxu2 %v5230_v6  ;;  %1747 = vmatmul.bf16.gmra.mxu3 %v5232_v10 }
  0xb9   :  { %3380 = vst [vmem:[#allocation3 + $0x20] sm:$0xff] %v3252_v16  ;;  %v5266_v16 = vor.u32 %v4330_v39, %v3686_v41  ;;  %v4454_v39 = vld [vmem:[%s6225_s1 + $0x324] sm:$0xf]  ;;  %v4182_v41 = vld [vmem:[%s6225_s1 + $0x330] sm:$0xf0] }
  0xba   :  { %v1619_v19 = vpop.f32.mrf.mxu2  ;;  %v1708_v28 = vpop.f32.mrf.mxu3 }
  0xbb   :  { %v1620_v22 = vadd.f32 %v1619_v19, %v1531_v18  ;;  %v1443_v29 = vpop.f32.mrf.mxu0  ;;  %v1532_v30 = vpop.f32.mrf.mxu1  ;;  %6273 = vst [vmem:[#allocation7_spill] sm:$0xff] %v5266_v16  ;;  %v5268_v18 = vor.u32 %v4333_v59, %v3692_v56 }
  0xbc   :  { %v1533_v60 = vadd.f32 %v1532_v30, %v1443_v29 }
  0xbd   :  { %v1709_v31 = vadd.f32 %v1708_v28, %v1620_v22  ;;  %6274 = vst [vmem:[#allocation8_spill] sm:$0xff] %v5268_v18  ;;  %v5270_v22 = vor.u32 %v4331_v61, %v3694_v62  ;;  %v4185_v61 = vor.u32 %v4454_v39, %v4182_v41  ;;  %v3798_v39 = vld [vmem:[%s6225_s1 + $0x30] sm:$0xf0] }
  0xbf   :  { %v3256_v36 = vadd.f32 %v5187_v8, %v1709_v31  ;;  %6275 = vst [vmem:[#allocation9_spill] sm:$0xff] %v5270_v22  ;;  %v4422_v31 = vld [vmem:[%s6225_s1 + $0x224] sm:$0xf]  ;;  %2056 = vmatpush.bf16.msrb.mxu3 %v4185_v61 }
  0xc0   :  { %v4390_v61 = vld [vmem:[%s6225_s1 + $0x124] sm:$0xf] }
  0xc1   :  { %3384 = vst [vmem:[#allocation3 + $0x40] sm:$0xff] %v3256_v36  ;;  %v4054_v36 = vld [vmem:[%s6225_s1 + $0x230] sm:$0xf0] }
  0xc2   :  { %v1621_v63 = vpop.f32.mrf.mxu2  ;;  %v1710_v9 = vpop.f32.mrf.mxu3  ;;  %v4057_v38 = vor.u32 %v4422_v31, %v4054_v36  ;;  %v4335_v31 = vld [vmem:[%s6224_s0 + $0x16c] sm:$0xf]  ;;  %v3710_v36 = vld [vmem:[%s6224_s0 + $0x178] sm:$0xf0] }
  0xc3   :  { %v1622_v7 = vadd.f32 %v1621_v63, %v1533_v60  ;;  %v1446_v11 = vpop.f32.mrf.mxu0  ;;  %v1535_v19 = vpop.f32.mrf.mxu1 }
  0xc4   :  { %v1536_v30 = vadd.f32 %v1535_v19, %v1446_v11  ;;  %1967 = vmatpush.bf16.msrb.mxu2 %v4057_v38  ;;  %v4334_v19 = vld [vmem:[%s6224_s0 + $0x164] sm:$0xf] }
  0xc5   :  { %v1711_v28 = vadd.f32 %v1710_v9, %v1622_v7  ;;  %v3700_v7 = vld [vmem:[%s6224_s0 + $0x160] sm:$0xf]  ;;  %v4336_v9 = vld [vmem:[%s6224_s0 + $0x16c] sm:$0xf0]  ;;  %v4358_v38 = vld [vmem:[%s6225_s1 + $0x24] sm:$0xf] }
  0xc6   :  { %1485 = vmatmul.bf16.gmra.mxu0 %v5264_v4  ;;  %1574 = vmatmul.bf16.gmra.mxu1 %v5266_v16 }
  0xc7   :  { %v3260_v29 = vadd.f32 %v5187_v8, %v1711_v28  ;;  %1663 = vmatmul.bf16.gmra.mxu2 %v5268_v18  ;;  %1752 = vmatmul.bf16.gmra.mxu3 %v5270_v22  ;;  %v3702_v28 = vld [vmem:[%s6224_s0 + $0x170] sm:$0xf0] }
  0xc8   :  { %v5328_v22 = vor.u32 %v4334_v19, %v3702_v28 }
  0xc9   :  { %3388 = vst [vmem:[#allocation3 + $0x60] sm:$0xff] %v3260_v29  ;;  %v3708_v29 = vld [vmem:[%s6224_s0 + $0x168] sm:$0xf] }
  0xca   :  { %v1624_v37 = vpop.f32.mrf.mxu2  ;;  %v1713_v59 = vpop.f32.mrf.mxu3  ;;  %6277 = vst [vmem:[#allocation11_spill] sm:$0xff] %v5328_v22 }
  0xcb   :  { %v1625_v56 = vadd.f32 %v1624_v37, %v1536_v30  ;;  %v1448_v60 = vpop.f32.mrf.mxu0  ;;  %v1537_v62 = vpop.f32.mrf.mxu1  ;;  %v4337_v30 = vld [vmem:[%s6224_s0 + $0x174] sm:$0xf0] }
  0xcc   :  { %v1538_v37 = vadd.f32 %v1537_v62, %v1448_v60  ;;  %v3926_v60 = vld [vmem:[%s6225_s1 + $0x130] sm:$0xf0]  ;;  %v5330_v18 = vor.u32 %v4337_v30, %v3708_v29 }
  0xcd   :  { %v1714_v63 = vadd.f32 %v1713_v59, %v1625_v56  ;;  %v5320_v56 = vor.u32 %v4336_v9, %v3700_v7  ;;  %v3801_v59 = vor.u32 %v4358_v38, %v3798_v39  ;;  %v3929_v16 = vor.u32 %v4390_v61, %v3926_v60  ;;  %v3724_v61 = vld [vmem:[%s6224_s0 + $0x188] sm:$0xf]  ;;  %v4341_v60 = vld [vmem:[%s6224_s0 + $0x194] sm:$0xf0] }
  0xce   :  { %6278 = vst [vmem:[#allocation12_spill] sm:$0xff] %v5330_v18  ;;  %v5332_v7 = vor.u32 %v4335_v31, %v3710_v36 }
  0xcf   :  { %v3264_v11 = vadd.f32 %v5187_v8, %v1714_v63  ;;  %6276 = vst [vmem:[#allocation10_spill] sm:$0xff] %v5320_v56  ;;  %1789 = vmatpush.bf16.msrb.mxu0 %v3801_v59  ;;  %1878 = vmatpush.bf16.msrb.mxu1 %v3929_v16  ;;  %v3718_v59 = vld [vmem:[%s6224_s0 + $0x190] sm:$0xf0] }
  0xd0   :  { %6279 = vst [vmem:[#allocation13_spill] sm:$0xff] %v5332_v7 }
  0xd1   :  { %3392 = vst [vmem:[#allocation3 + $0x80] sm:$0xff] %v3264_v11 }
  0xd2   :  { %v1626_v41 = vpop.f32.mrf.mxu2  ;;  %v1715_v63 = vpop.f32.mrf.mxu3 }
  0xd3   :  { %v1627_v62 = vadd.f32 %v1626_v41, %v1538_v37  ;;  %v1451_v11 = vpop.f32.mrf.mxu0  ;;  %v1540_v4 = vpop.f32.mrf.mxu1  ;;  %v3716_v37 = vld [vmem:[%s6224_s0 + $0x180] sm:$0xf]  ;;  %v4338_v41 = vld [vmem:[%s6224_s0 + $0x184] sm:$0xf] }
  0xd4   :  { %v1541_v39 = vadd.f32 %v1540_v4, %v1451_v11  ;;  %v4340_v4 = vld [vmem:[%s6224_s0 + $0x18c] sm:$0xf0]  ;;  %v3726_v11 = vld [vmem:[%s6224_s0 + $0x198] sm:$0xf0] }
  0xd5   :  { %v1716_v9 = vadd.f32 %v1715_v63, %v1627_v62  ;;  %v4339_v63 = vld [vmem:[%s6224_s0 + $0x18c] sm:$0xf] }
  0xd6   :  { %1490 = vmatmul.bf16.gmra.mxu0 %v5320_v56  ;;  %1579 = vmatmul.bf16.gmra.mxu1 %v5328_v22 }
  0xd7   :  { %v3268_v38 = vadd.f32 %v5187_v8, %v1716_v9  ;;  %1668 = vmatmul.bf16.gmra.mxu2 %v5330_v18  ;;  %1757 = vmatmul.bf16.gmra.mxu3 %v5332_v7 }
  0xd9   :  { %3396 = vst [vmem:[#allocation3 + $0xa0] sm:$0xff] %v3268_v38  ;;  %v5364_v38 = vor.u32 %v4340_v4, %v3716_v37  ;;  %v4418_v37 = vld [vmem:[%s6225_s1 + $0x204] sm:$0xf]  ;;  %v4038_v4 = vld [vmem:[%s6225_s1 + $0x210] sm:$0xf0] }
  0xda   :  { %v1629_v19 = vpop.f32.mrf.mxu2  ;;  %v1718_v29 = vpop.f32.mrf.mxu3 }
  0xdb   :  { %v1630_v28 = vadd.f32 %v1629_v19, %v1541_v39  ;;  %v1453_v30 = vpop.f32.mrf.mxu0  ;;  %v1542_v31 = vpop.f32.mrf.mxu1  ;;  %6280 = vst [vmem:[#allocation14_spill] sm:$0xff] %v5364_v38 }
  0xdc   :  { %v1543_v62 = vadd.f32 %v1542_v31, %v1453_v30  ;;  %v5370_v30 = vor.u32 %v4339_v63, %v3726_v11 }
  0xdd   :  { %v1719_v36 = vadd.f32 %v1718_v29, %v1630_v28  ;;  %v5366_v29 = vor.u32 %v4338_v41, %v3718_v59  ;;  %v4041_v59 = vor.u32 %v4418_v37, %v4038_v4  ;;  %v3740_v37 = vld [vmem:[%s6224_s0 + $0x1a8] sm:$0xf]  ;;  %v4345_v4 = vld [vmem:[%s6224_s0 + $0x1b4] sm:$0xf0] }
  0xde   :  { %6283 = vst [vmem:[#allocation17_spill] sm:$0xff] %v5370_v30 }
  0xdf   :  { %v3272_v16 = vadd.f32 %v5187_v8, %v1719_v36  ;;  %6281 = vst [vmem:[#allocation15_spill] sm:$0xff] %v5366_v29  ;;  %v5368_v36 = vor.u32 %v4341_v60, %v3724_v61  ;;  %v4450_v61 = vld [vmem:[%s6225_s1 + $0x304] sm:$0xf]  ;;  %v4166_v60 = vld [vmem:[%s6225_s1 + $0x310] sm:$0xf0]  ;;  %1968 = vmatpush.bf16.msrb.mxu2 %v4041_v59 }
  0xe0   :  { %v4169_v11 = vor.u32 %v4450_v61, %v4166_v60  ;;  %v3742_v59 = vld [vmem:[%s6224_s0 + $0x1b8] sm:$0xf0]  ;;  %v4354_v60 = vld [vmem:[%s6225_s1 + $0x4] sm:$0xf] }
  0xe1   :  { %3400 = vst [vmem:[#allocation3 + $0xc0] sm:$0xff] %v3272_v16 }
  0xe2   :  { %v1631_v9 = vpop.f32.mrf.mxu2  ;;  %v1720_v19 = vpop.f32.mrf.mxu3  ;;  %6282 = vst [vmem:[#allocation16_spill] sm:$0xff] %v5368_v36  ;;  %2057 = vmatpush.bf16.msrb.mxu3 %v4169_v11 }
  0xe3   :  { %v1632_v39 = vadd.f32 %v1631_v9, %v1543_v62  ;;  %v1456_v28 = vpop.f32.mrf.mxu0  ;;  %v1545_v16 = vpop.f32.mrf.mxu1 }
  0xe4   :  { %v1546_v18 = vadd.f32 %v1545_v16, %v1456_v28  ;;  %v4344_v28 = vld [vmem:[%s6224_s0 + $0x1ac] sm:$0xf0] }
  0xe5   :  { %v1721_v31 = vadd.f32 %v1720_v19, %v1632_v39  ;;  %v3732_v19 = vld [vmem:[%s6224_s0 + $0x1a0] sm:$0xf] }
  0xe6   :  { %1495 = vmatmul.bf16.gmra.mxu0 %v5364_v38  ;;  %1584 = vmatmul.bf16.gmra.mxu1 %v5366_v29  ;;  %v5420_v11 = vor.u32 %v4344_v28, %v3732_v19  ;;  %v5430_v38 = vor.u32 %v4345_v4, %v3740_v37 }
  0xe7   :  { %v3276_v7 = vadd.f32 %v5187_v8, %v1721_v31  ;;  %1673 = vmatmul.bf16.gmra.mxu2 %v5368_v36  ;;  %1762 = vmatmul.bf16.gmra.mxu3 %v5370_v30  ;;  %v3734_v31 = vld [vmem:[%s6224_s0 + $0x1b0] sm:$0xf0]  ;;  %v4386_v30 = vld [vmem:[%s6225_s1 + $0x104] sm:$0xf] }
  0xe8   :  { %6284 = vst [vmem:[#allocation18_spill] sm:$0xff] %v5420_v11 }
  0xe9   :  { %3404 = vst [vmem:[#allocation3 + $0xe0] sm:$0xff] %v3276_v7 }
  0xea   :  { %v1634_v41 = vpop.f32.mrf.mxu2  ;;  %v1723_v7 = vpop.f32.mrf.mxu3  ;;  %6286 = vst [vmem:[#allocation20_spill] sm:$0xff] %v5430_v38 }
  0xeb   :  { %v1635_v62 = vadd.f32 %v1634_v41, %v1546_v18  ;;  %v1458_v63 = vpop.f32.mrf.mxu0  ;;  %v1547_v9 = vpop.f32.mrf.mxu1  ;;  %v4342_v18 = vld [vmem:[%s6224_s0 + $0x1a4] sm:$0xf]  ;;  %v4343_v41 = vld [vmem:[%s6224_s0 + $0x1ac] sm:$0xf] }
  0xec   :  { %v1548_v61 = vadd.f32 %v1547_v9, %v1458_v63  ;;  %v3910_v63 = vld [vmem:[%s6225_s1 + $0x110] sm:$0xf0]  ;;  %v5428_v29 = vor.u32 %v4342_v18, %v3734_v31  ;;  %v5432_v19 = vor.u32 %v4343_v41, %v3742_v59  ;;  %v3748_v59 = vld [vmem:[%s6224_s0 + $0x1c0] sm:$0xf] }
  0xed   :  { %v1724_v39 = vadd.f32 %v1723_v7, %v1635_v62  ;;  %v3782_v62 = vld [vmem:[%s6225_s1 + $0x10] sm:$0xf0]  ;;  %v3913_v22 = vor.u32 %v4386_v30, %v3910_v63 }
  0xee   :  { %6285 = vst [vmem:[#allocation19_spill] sm:$0xff] %v5428_v29 }
  0xef   :  { %v3280_v16 = vadd.f32 %v5187_v8, %v1724_v39  ;;  %v3785_v39 = vor.u32 %v4354_v60, %v3782_v62  ;;  %6287 = vst [vmem:[#allocation21_spill] sm:$0xff] %v5432_v19  ;;  %1879 = vmatpush.bf16.msrb.mxu1 %v3913_v22 }
  0xf1   :  { %3408 = vst [vmem:[#allocation3 + $0x100] sm:$0xff] %v3280_v16  ;;  %1790 = vmatpush.bf16.msrb.mxu0 %v3785_v39  ;;  %v4349_v39 = vld [vmem:[%s6224_s0 + $0x1d4] sm:$0xf0] }
  0xf2   :  { %v1636_v7 = vpop.f32.mrf.mxu2  ;;  %v1725_v16 = vpop.f32.mrf.mxu3 }
  0xf3   :  { %v1637_v9 = vadd.f32 %v1636_v7, %v1548_v61  ;;  %v1461_v36 = vpop.f32.mrf.mxu0  ;;  %v1550_v56 = vpop.f32.mrf.mxu1  ;;  %v3750_v61 = vld [vmem:[%s6224_s0 + $0x1d0] sm:$0xf0]  ;;  %v3756_v7 = vld [vmem:[%s6224_s0 + $0x1c8] sm:$0xf] }
  0xf4   :  { %v1551_v62 = vadd.f32 %v1550_v56, %v1461_v36  ;;  %v4348_v56 = vld [vmem:[%s6224_s0 + $0x1cc] sm:$0xf0]  ;;  %v4346_v36 = vld [vmem:[%s6224_s0 + $0x1c4] sm:$0xf] }
  0xf5   :  { %v1726_v28 = vadd.f32 %v1725_v16, %v1637_v9  ;;  %v4347_v9 = vld [vmem:[%s6224_s0 + $0x1cc] sm:$0xf]  ;;  %v3758_v16 = vld [vmem:[%s6224_s0 + $0x1d8] sm:$0xf0] }
  0xf6   :  { %1500 = vmatmul.bf16.gmra.mxu0 %v5420_v11  ;;  %1589 = vmatmul.bf16.gmra.mxu1 %v5428_v29 }
  0xf7   :  { %v3284_v60 = vadd.f32 %v5187_v8, %v1726_v28  ;;  %1678 = vmatmul.bf16.gmra.mxu2 %v5430_v38  ;;  %1767 = vmatmul.bf16.gmra.mxu3 %v5432_v19 }
  0xf9   :  { %3412 = vst [vmem:[#allocation3 + $0x120] sm:$0xff] %v3284_v60  ;;  %v5464_v60 = vor.u32 %v4348_v56, %v3748_v59  ;;  %v4156_v59 = vld [vmem:[%s6225_s1 + $0x2e8] sm:$0xf]  ;;  %v4449_v56 = vld [vmem:[%s6225_s1 + $0x2f4] sm:$0xf0] }
  0xfa   :  { %v1639_v18 = vpop.f32.mrf.mxu2  ;;  %v1728_v31 = vpop.f32.mrf.mxu3 }
  0xfb   :  { %v1640_v30 = vadd.f32 %v1639_v18, %v1551_v62  ;;  %v1463_v37 = vpop.f32.mrf.mxu0  ;;  %v1552_v4 = vpop.f32.mrf.mxu1  ;;  %6288 = vst [vmem:[#allocation22_spill] sm:$0xff] %v5464_v60 }
  0xfc   :  { %v1553_v63 = vadd.f32 %v1552_v4, %v1463_v37  ;;  %v5470_v37 = vor.u32 %v4347_v9, %v3758_v16 }
  0xfd   :  { %v1729_v41 = vadd.f32 %v1728_v31, %v1640_v30  ;;  %v5466_v31 = vor.u32 %v4346_v36, %v3750_v61  ;;  %v4157_v61 = vor.u32 %v4449_v56, %v4156_v59  ;;  %v3772_v59 = vld [vmem:[%s6224_s0 + $0x1e8] sm:$0xf]  ;;  %v4353_v56 = vld [vmem:[%s6224_s0 + $0x1f4] sm:$0xf0] }
  0xfe   :  { %6291 = vst [vmem:[#allocation25_spill] sm:$0xff] %v5470_v37 }
  0xff   :  { %v3288_v22 = vadd.f32 %v5187_v8, %v1729_v41  ;;  %6289 = vst [vmem:[#allocation23_spill] sm:$0xff] %v5466_v31  ;;  %v5468_v41 = vor.u32 %v4349_v39, %v3756_v7  ;;  %v4284_v7 = vld [vmem:[%s6225_s1 + $0x3e8] sm:$0xf]  ;;  %v4481_v39 = vld [vmem:[%s6225_s1 + $0x3f4] sm:$0xf0]  ;;  %2317 = vmatpush.bf16.msra.mxu2 %v4157_v61 }
 0x100   :  { %v4285_v16 = vor.u32 %v4481_v39, %v4284_v7  ;;  %v3774_v61 = vld [vmem:[%s6224_s0 + $0x1f8] sm:$0xf0]  ;;  %v3900_v39 = vld [vmem:[%s6225_s1 + $0xe8] sm:$0xf] }
 0x101   :  { %3416 = vst [vmem:[#allocation3 + $0x140] sm:$0xff] %v3288_v22 }
 0x102   :  { %v1641_v28 = vpop.f32.mrf.mxu2  ;;  %v1730_v18 = vpop.f32.mrf.mxu3  ;;  %6290 = vst [vmem:[#allocation24_spill] sm:$0xff] %v5468_v41  ;;  %2406 = vmatpush.bf16.msra.mxu3 %v4285_v16 }
 0x103   :  { %v1642_v62 = vadd.f32 %v1641_v28, %v1553_v63  ;;  %v1466_v30 = vpop.f32.mrf.mxu0  ;;  %v1555_v22 = vpop.f32.mrf.mxu1 }
 0x104   :  { %v1556_v38 = vadd.f32 %v1555_v22, %v1466_v30  ;;  %v4352_v30 = vld [vmem:[%s6224_s0 + $0x1ec] sm:$0xf0] }
 0x105   :  { %v1731_v4 = vadd.f32 %v1730_v18, %v1642_v62  ;;  %v3764_v18 = vld [vmem:[%s6224_s0 + $0x1e0] sm:$0xf] }
 0x106   :  { %1505 = vmatmul.bf16.gmra.mxu0 %v5464_v60  ;;  %1594 = vmatmul.bf16.gmra.mxu1 %v5466_v31  ;;  %v5520_v16 = vor.u32 %v4352_v30, %v3764_v18  ;;  %v5530_v60 = vor.u32 %v4353_v56, %v3772_v59 }
 0x107   :  { %v3292_v19 = vadd.f32 %v5187_v8, %v1731_v4  ;;  %1683 = vmatmul.bf16.gmra.mxu2 %v5468_v41  ;;  %1772 = vmatmul.bf16.gmra.mxu3 %v5470_v37  ;;  %v3766_v4 = vld [vmem:[%s6224_s0 + $0x1f0] sm:$0xf0]  ;;  %v4028_v37 = vld [vmem:[%s6225_s1 + $0x1e8] sm:$0xf] }
 0x109   :  { %3420 = vst [vmem:[#allocation3 + $0x160] sm:$0xff] %v3292_v19 }
 0x10a   :  { %v1644_v36 = vpop.f32.mrf.mxu2  ;;  %v1733_v19 = vpop.f32.mrf.mxu3 }
 0x10b   :  { %v1645_v63 = vadd.f32 %v1644_v36, %v1556_v38  ;;  %v1468_v9 = vpop.f32.mrf.mxu0  ;;  %v1557_v28 = vpop.f32.mrf.mxu1  ;;  %v4350_v38 = vld [vmem:[%s6224_s0 + $0x1e4] sm:$0xf]  ;;  %v4351_v36 = vld [vmem:[%s6224_s0 + $0x1ec] sm:$0xf] }
 0x10c   :  { %v1558_v7 = vadd.f32 %v1557_v28, %v1468_v9  ;;  %v4417_v9 = vld [vmem:[%s6225_s1 + $0x1f4] sm:$0xf0]  ;;  %v5528_v31 = vor.u32 %v4350_v38, %v3766_v4  ;;  %v5532_v18 = vor.u32 %v4351_v36, %v3774_v61 }
 0x10d   :  { %v1734_v62 = vadd.f32 %v1733_v19, %v1645_v63  ;;  %v4385_v63 = vld [vmem:[%s6225_s1 + $0xf4] sm:$0xf0]  ;;  %v4029_v29 = vor.u32 %v4417_v9, %v4028_v37 }
 0x10e   :  { %6292 = vst [vmem:[#allocation26_spill] sm:$0xff] %v5528_v31 }
 0x10f   :  { %v3296_v22 = vadd.f32 %v5187_v8, %v1734_v62  ;;  %v3901_v62 = vor.u32 %v4385_v63, %v3900_v39  ;;  %6293 = vst [vmem:[#allocation27_spill] sm:$0xff] %v5532_v18  ;;  %2228 = vmatpush.bf16.msra.mxu1 %v4029_v29 }
 0x111   :  { %3424 = vst [vmem:[#allocation3 + $0x180] sm:$0xff] %v3296_v22  ;;  %2139 = vmatpush.bf16.msra.mxu0 %v3901_v62 }
 0x112   :  { %v1646_v19 = vpop.f32.mrf.mxu2  ;;  %v1735_v22 = vpop.f32.mrf.mxu3 }
 0x113   :  { %v1647_v28 = vadd.f32 %v1646_v19, %v1558_v7  ;;  %v1471_v41 = vpop.f32.mrf.mxu0  ;;  %v1560_v11 = vpop.f32.mrf.mxu1 }
 0x114   :  { %v1561_v63 = vadd.f32 %v1560_v11, %v1471_v41 }
 0x115   :  { %v1736_v30 = vadd.f32 %v1735_v22, %v1647_v28 }
 0x116   :  { %1510 = vmatmul.bf16.gmra.mxu0 %v5520_v16  ;;  %1599 = vmatmul.bf16.gmra.mxu1 %v5528_v31 }
 0x117   :  { %v3300_v39 = vadd.f32 %v5187_v8, %v1736_v30  ;;  %1688 = vmatmul.bf16.gmra.mxu2 %v5530_v60  ;;  %1777 = vmatmul.bf16.gmra.mxu3 %v5532_v18  ;;  %v4140_v30 = vld [vmem:[%s6225_s1 + $0x2c8] sm:$0xf] }
 0x119   :  { %3428 = vst [vmem:[#allocation3 + $0x1a0] sm:$0xff] %v3300_v39  ;;  %v4445_v39 = vld [vmem:[%s6225_s1 + $0x2d4] sm:$0xf0] }
 0x11a   :  { %v1649_v38 = vpop.f32.mrf.mxu2  ;;  %v1738_v4 = vpop.f32.mrf.mxu3 }
 0x11b   :  { %v1650_v37 = vadd.f32 %v1649_v38, %v1561_v63  ;;  %v1473_v59 = vpop.f32.mrf.mxu0  ;;  %v1562_v56 = vpop.f32.mrf.mxu1  ;;  %v4141_v38 = vor.u32 %v4445_v39, %v4140_v30  ;;  %v4413_v30 = vld [vmem:[%s6225_s1 + $0x1d4] sm:$0xf0] }
 0x11c   :  { %v1563_v61 = vadd.f32 %v1562_v56, %v1473_v59 }
 0x11d   :  { %v1739_v36 = vadd.f32 %v1738_v4, %v1650_v37  ;;  %v4268_v37 = vld [vmem:[%s6225_s1 + $0x3c8] sm:$0xf]  ;;  %v4477_v4 = vld [vmem:[%s6225_s1 + $0x3d4] sm:$0xf0]  ;;  %2318 = vmatpush.bf16.msra.mxu2 %v4141_v38 }
 0x11f   :  { %v3304_v29 = vadd.f32 %v5187_v8, %v1739_v36 }
 0x121   :  { %3432 = vst [vmem:[#allocation3 + $0x1c0] sm:$0xff] %v3304_v29  ;;  %v4269_v29 = vor.u32 %v4477_v4, %v4268_v37 }
 0x122   :  { %v1651_v7 = vpop.f32.mrf.mxu2  ;;  %v1740_v11 = vpop.f32.mrf.mxu3 }
 0x123   :  { %v1652_v19 = vadd.f32 %v1651_v7, %v1563_v61  ;;  %v1476_v41 = vpop.f32.mrf.mxu0  ;;  %v1565_v62 = vpop.f32.mrf.mxu1  ;;  %2407 = vmatpush.bf16.msra.mxu3 %v4269_v29 }
 0x124   :  { %v1566_v22 = vadd.f32 %v1565_v62, %v1476_v41  ;;  %v3884_v41 = vld [vmem:[%s6225_s1 + $0xc8] sm:$0xf]  ;;  %v4381_v62 = vld [vmem:[%s6225_s1 + $0xd4] sm:$0xf0] }
 0x125   :  { %v1741_v9 = vadd.f32 %v1740_v11, %v1652_v19 }
 0x126   :  { %1791 = vmatmul.bf16.vlgmr.msrb.gmra.mxu0 %v4770_v47  ;;  %1880 = vmatmul.bf16.vlgmr.msrb.gmra.mxu1 %v4778_v51 }
 0x127   :  { %v3308_v28 = vadd.f32 %v5187_v8, %v1741_v9  ;;  %1969 = vmatmul.bf16.vlgmr.msrb.gmra.mxu2 %v4780_v52  ;;  %2058 = vmatmul.bf16.vlgmr.msrb.gmra.mxu3 %v4782_v53 }
 0x129   :  { %3436 = vst [vmem:[#allocation3 + $0x1e0] sm:$0xff] %v3308_v28  ;;  %v3885_v28 = vor.u32 %v4381_v62, %v3884_v41 }
 0x12a   :  { %v1654_v63 = vpop.f32.mrf.mxu2  ;;  %v1743_v56 = vpop.f32.mrf.mxu3 }
 0x12b   :  { %v1655_v59 = vadd.f32 %v1654_v63, %v1566_v22  ;;  %v1478_v36 = vpop.f32.mrf.mxu0  ;;  %v1567_v61 = vpop.f32.mrf.mxu1  ;;  %v4012_v22 = vld [vmem:[%s6225_s1 + $0x1c8] sm:$0xf]  ;;  %2140 = vmatpush.bf16.msra.mxu0 %v3885_v28 }
 0x12c   :  { %v1568_v11 = vadd.f32 %v1567_v61, %v1478_v36  ;;  %v4013_v37 = vor.u32 %v4413_v30, %v4012_v22 }
 0x12d   :  { %v1744_v7 = vadd.f32 %v1743_v56, %v1655_v59 }
 0x12e   :  { %2229 = vmatpush.bf16.msra.mxu1 %v4013_v37 }
 0x12f   :  { %v3312_v19 = vadd.f32 %v5187_v8, %v1744_v7 }
 0x131   :  { %3440 = vst [vmem:[#allocation3 + $0x200] sm:$0xff] %v3312_v19 }
 0x132   :  { %v1656_v9 = vpop.f32.mrf.mxu2  ;;  %v1745_v63 = vpop.f32.mrf.mxu3 }
 0x133   :  { %v1657_v39 = vadd.f32 %v1656_v9, %v1568_v11  ;;  %v1481_v38 = vpop.f32.mrf.mxu0  ;;  %v1570_v4 = vpop.f32.mrf.mxu1 }
 0x134   :  { %v1571_v36 = vadd.f32 %v1570_v4, %v1481_v38 }
 0x135   :  { %v1746_v59 = vadd.f32 %v1745_v63, %v1657_v39 }
 0x136   :  { %1796 = vmatmul.bf16.gmra.mxu0 %v4836_v12  ;;  %1885 = vmatmul.bf16.gmra.mxu1 %v4838_v13 }
 0x137   :  { %v3316_v56 = vadd.f32 %v5187_v8, %v1746_v59  ;;  %1974 = vmatmul.bf16.gmra.mxu2 %v4840_v14  ;;  %2063 = vmatmul.bf16.gmra.mxu3 %v4842_v15  ;;  %v4124_v59 = vld [vmem:[%s6225_s1 + $0x2a8] sm:$0xf] }
 0x139   :  { %3444 = vst [vmem:[#allocation3 + $0x220] sm:$0xff] %v3316_v56  ;;  %v4441_v56 = vld [vmem:[%s6225_s1 + $0x2b4] sm:$0xf0] }
 0x13a   :  { %v1659_v29 = vpop.f32.mrf.mxu2  ;;  %v1748_v7 = vpop.f32.mrf.mxu3 }
 0x13b   :  { %v1660_v61 = vadd.f32 %v1659_v29, %v1571_v36  ;;  %v1483_v19 = vpop.f32.mrf.mxu0  ;;  %v1572_v11 = vpop.f32.mrf.mxu1  ;;  %v4125_v29 = vor.u32 %v4441_v56, %v4124_v59  ;;  %v4409_v59 = vld [vmem:[%s6225_s1 + $0x1b4] sm:$0xf0] }
 0x13c   :  { %v1573_v9 = vadd.f32 %v1572_v11, %v1483_v19 }
 0x13d   :  { %v1749_v41 = vadd.f32 %v1748_v7, %v1660_v61  ;;  %v4252_v61 = vld [vmem:[%s6225_s1 + $0x3a8] sm:$0xf]  ;;  %v4473_v7 = vld [vmem:[%s6225_s1 + $0x3b4] sm:$0xf0]  ;;  %2319 = vmatpush.bf16.msra.mxu2 %v4125_v29 }
 0x13f   :  { %v3320_v62 = vadd.f32 %v5187_v8, %v1749_v41 }
 0x141   :  { %3448 = vst [vmem:[#allocation3 + $0x240] sm:$0xff] %v3320_v62  ;;  %v4253_v62 = vor.u32 %v4473_v7, %v4252_v61 }
 0x142   :  { %v1661_v28 = vpop.f32.mrf.mxu2  ;;  %v1750_v30 = vpop.f32.mrf.mxu3 }
 0x143   :  { %v1662_v22 = vadd.f32 %v1661_v28, %v1573_v9  ;;  %v1486_v39 = vpop.f32.mrf.mxu0  ;;  %v1575_v63 = vpop.f32.mrf.mxu1  ;;  %2408 = vmatpush.bf16.msra.mxu3 %v4253_v62 }
 0x144   :  { %v1576_v4 = vadd.f32 %v1575_v63, %v1486_v39  ;;  %v3868_v39 = vld [vmem:[%s6225_s1 + $0xa8] sm:$0xf]  ;;  %v4377_v63 = vld [vmem:[%s6225_s1 + $0xb4] sm:$0xf0] }
 0x145   :  { %v1751_v38 = vadd.f32 %v1750_v30, %v1662_v22 }
 0x146   :  { %1801 = vmatmul.bf16.gmra.mxu0 %v4872_v24  ;;  %1890 = vmatmul.bf16.gmra.mxu1 %v4874_v25 }
 0x147   :  { %v3324_v37 = vadd.f32 %v5187_v8, %v1751_v38  ;;  %1979 = vmatmul.bf16.gmra.mxu2 %v4876_v26  ;;  %2068 = vmatmul.bf16.gmra.mxu3 %v4878_v27 }
 0x149   :  { %3452 = vst [vmem:[#allocation3 + $0x260] sm:$0xff] %v3324_v37  ;;  %v3869_v37 = vor.u32 %v4377_v63, %v3868_v39 }
 0x14a   :  { %v1664_v36 = vpop.f32.mrf.mxu2  ;;  %v1753_v11 = vpop.f32.mrf.mxu3 }
 0x14b   :  { %v1665_v19 = vadd.f32 %v1664_v36, %v1576_v4  ;;  %v1488_v41 = vpop.f32.mrf.mxu0  ;;  %v1577_v9 = vpop.f32.mrf.mxu1  ;;  %v3996_v4 = vld [vmem:[%s6225_s1 + $0x1a8] sm:$0xf]  ;;  %2141 = vmatpush.bf16.msra.mxu0 %v3869_v37 }
 0x14c   :  { %v1578_v30 = vadd.f32 %v1577_v9, %v1488_v41  ;;  %v3997_v61 = vor.u32 %v4409_v59, %v3996_v4 }
 0x14d   :  { %v1754_v28 = vadd.f32 %v1753_v11, %v1665_v19 }
 0x14e   :  { %2230 = vmatpush.bf16.msra.mxu1 %v3997_v61 }
 0x14f   :  { %v3328_v22 = vadd.f32 %v5187_v8, %v1754_v28 }
 0x151   :  { %3456 = vst [vmem:[#allocation3 + $0x280] sm:$0xff] %v3328_v22 }
 0x152   :  { %v1666_v38 = vpop.f32.mrf.mxu2  ;;  %v1755_v36 = vpop.f32.mrf.mxu3 }
 0x153   :  { %v1667_v56 = vadd.f32 %v1666_v38, %v1578_v30  ;;  %v1491_v29 = vpop.f32.mrf.mxu0  ;;  %v1580_v7 = vpop.f32.mrf.mxu1 }
 0x154   :  { %v1581_v41 = vadd.f32 %v1580_v7, %v1491_v29 }
 0x155   :  { %v1756_v19 = vadd.f32 %v1755_v36, %v1667_v56 }
 0x156   :  { %1806 = vmatmul.bf16.gmra.mxu0 %v4932_v49  ;;  %1895 = vmatmul.bf16.gmra.mxu1 %v4934_v50 }
 0x157   :  { %v3332_v11 = vadd.f32 %v5187_v8, %v1756_v19  ;;  %1984 = vmatmul.bf16.gmra.mxu2 %v4936_v54  ;;  %2073 = vmatmul.bf16.gmra.mxu3 %v4938_v55  ;;  %v4108_v19 = vld [vmem:[%s6225_s1 + $0x288] sm:$0xf] }
 0x159   :  { %3460 = vst [vmem:[#allocation3 + $0x2a0] sm:$0xff] %v3332_v11  ;;  %v4437_v11 = vld [vmem:[%s6225_s1 + $0x294] sm:$0xf0] }
 0x15a   :  { %v1669_v62 = vpop.f32.mrf.mxu2  ;;  %v1758_v28 = vpop.f32.mrf.mxu3 }
 0x15b   :  { %v1670_v9 = vadd.f32 %v1669_v62, %v1581_v41  ;;  %v1493_v22 = vpop.f32.mrf.mxu0  ;;  %v1582_v30 = vpop.f32.mrf.mxu1  ;;  %v4109_v62 = vor.u32 %v4437_v11, %v4108_v19  ;;  %v4405_v19 = vld [vmem:[%s6225_s1 + $0x194] sm:$0xf0] }
 0x15c   :  { %v1583_v38 = vadd.f32 %v1582_v30, %v1493_v22 }
 0x15d   :  { %v1759_v39 = vadd.f32 %v1758_v28, %v1670_v9  ;;  %v4236_v9 = vld [vmem:[%s6225_s1 + $0x388] sm:$0xf]  ;;  %v4469_v28 = vld [vmem:[%s6225_s1 + $0x394] sm:$0xf0]  ;;  %2320 = vmatpush.bf16.msra.mxu2 %v4109_v62 }
 0x15f   :  { %v3336_v63 = vadd.f32 %v5187_v8, %v1759_v39 }
 0x161   :  { %3464 = vst [vmem:[#allocation3 + $0x2c0] sm:$0xff] %v3336_v63  ;;  %v4237_v63 = vor.u32 %v4469_v28, %v4236_v9 }
 0x162   :  { %v1671_v37 = vpop.f32.mrf.mxu2  ;;  %v1760_v59 = vpop.f32.mrf.mxu3 }
 0x163   :  { %v1672_v4 = vadd.f32 %v1671_v37, %v1583_v38  ;;  %v1496_v56 = vpop.f32.mrf.mxu0  ;;  %v1585_v36 = vpop.f32.mrf.mxu1  ;;  %2409 = vmatpush.bf16.msra.mxu3 %v4237_v63 }
 0x164   :  { %v1586_v7 = vadd.f32 %v1585_v36, %v1496_v56  ;;  %v3852_v56 = vld [vmem:[%s6225_s1 + $0x88] sm:$0xf]  ;;  %v4373_v36 = vld [vmem:[%s6225_s1 + $0x94] sm:$0xf0] }
 0x165   :  { %v1761_v29 = vadd.f32 %v1760_v59, %v1672_v4 }
 0x166   :  { %1811 = vmatmul.bf16.gmra.mxu0 %v4968_v0  ;;  %1900 = vmatmul.bf16.gmra.mxu1 %v4970_v1 }
 0x167   :  { %v3340_v61 = vadd.f32 %v5187_v8, %v1761_v29  ;;  %1989 = vmatmul.bf16.gmra.mxu2 %v4972_v2  ;;  %2078 = vmatmul.bf16.gmra.mxu3 %v4974_v3 }
 0x169   :  { %3468 = vst [vmem:[#allocation3 + $0x2e0] sm:$0xff] %v3340_v61  ;;  %v3853_v61 = vor.u32 %v4373_v36, %v3852_v56 }
 0x16a   :  { %v1674_v41 = vpop.f32.mrf.mxu2  ;;  %v1763_v30 = vpop.f32.mrf.mxu3 }
 0x16b   :  { %v1675_v22 = vadd.f32 %v1674_v41, %v1586_v7  ;;  %v1498_v39 = vpop.f32.mrf.mxu0  ;;  %v1587_v38 = vpop.f32.mrf.mxu1  ;;  %v3980_v7 = vld [vmem:[%s6225_s1 + $0x188] sm:$0xf]  ;;  %2142 = vmatpush.bf16.msra.mxu0 %v3853_v61 }
 0x16c   :  { %v1588_v59 = vadd.f32 %v1587_v38, %v1498_v39  ;;  %v3981_v9 = vor.u32 %v4405_v19, %v3980_v7 }
 0x16d   :  { %v1764_v37 = vadd.f32 %v1763_v30, %v1675_v22 }
 0x16e   :  { %2231 = vmatpush.bf16.msra.mxu1 %v3981_v9 }
 0x16f   :  { %v3344_v4 = vadd.f32 %v5187_v8, %v1764_v37 }
 0x171   :  { %3472 = vst [vmem:[#allocation3 + $0x300] sm:$0xff] %v3344_v4 }
 0x172   :  { %v1676_v29 = vpop.f32.mrf.mxu2  ;;  %v1765_v41 = vpop.f32.mrf.mxu3 }
 0x173   :  { %v1677_v11 = vadd.f32 %v1676_v29, %v1588_v59  ;;  %v1501_v62 = vpop.f32.mrf.mxu0  ;;  %v1590_v28 = vpop.f32.mrf.mxu1 }
 0x174   :  { %v1591_v39 = vadd.f32 %v1590_v28, %v1501_v62 }
 0x175   :  { %v1766_v22 = vadd.f32 %v1765_v41, %v1677_v11 }
 0x176   :  { %1816 = vmatmul.bf16.gmra.mxu0 %v5028_v32  ;;  %1905 = vmatmul.bf16.gmra.mxu1 %v5030_v33 }
 0x177   :  { %v3348_v30 = vadd.f32 %v5187_v8, %v1766_v22  ;;  %1994 = vmatmul.bf16.gmra.mxu2 %v5032_v34  ;;  %2083 = vmatmul.bf16.gmra.mxu3 %v5034_v35  ;;  %v4092_v22 = vld [vmem:[%s6225_s1 + $0x268] sm:$0xf] }
 0x179   :  { %3476 = vst [vmem:[#allocation3 + $0x320] sm:$0xff] %v3348_v30  ;;  %v4433_v30 = vld [vmem:[%s6225_s1 + $0x274] sm:$0xf0] }
 0x17a   :  { %v1679_v63 = vpop.f32.mrf.mxu2  ;;  %v1768_v37 = vpop.f32.mrf.mxu3 }
 0x17b   :  { %v1680_v38 = vadd.f32 %v1679_v63, %v1591_v39  ;;  %v1503_v4 = vpop.f32.mrf.mxu0  ;;  %v1592_v59 = vpop.f32.mrf.mxu1  ;;  %v4093_v63 = vor.u32 %v4433_v30, %v4092_v22  ;;  %v4401_v22 = vld [vmem:[%s6225_s1 + $0x174] sm:$0xf0] }
 0x17c   :  { %v1593_v29 = vadd.f32 %v1592_v59, %v1503_v4 }
 0x17d   :  { %v1769_v56 = vadd.f32 %v1768_v37, %v1680_v38  ;;  %v4220_v38 = vld [vmem:[%s6225_s1 + $0x368] sm:$0xf]  ;;  %v4465_v37 = vld [vmem:[%s6225_s1 + $0x374] sm:$0xf0]  ;;  %2321 = vmatpush.bf16.msra.mxu2 %v4093_v63 }
 0x17f   :  { %v3352_v36 = vadd.f32 %v5187_v8, %v1769_v56 }
 0x181   :  { %3480 = vst [vmem:[#allocation3 + $0x340] sm:$0xff] %v3352_v36  ;;  %v4221_v36 = vor.u32 %v4465_v37, %v4220_v38 }
 0x182   :  { %v1681_v61 = vpop.f32.mrf.mxu2  ;;  %v1770_v19 = vpop.f32.mrf.mxu3 }
 0x183   :  { %v1682_v7 = vadd.f32 %v1681_v61, %v1593_v29  ;;  %v1506_v11 = vpop.f32.mrf.mxu0  ;;  %v1595_v41 = vpop.f32.mrf.mxu1  ;;  %2410 = vmatpush.bf16.msra.mxu3 %v4221_v36 }
 0x184   :  { %v1596_v28 = vadd.f32 %v1595_v41, %v1506_v11  ;;  %v3836_v11 = vld [vmem:[%s6225_s1 + $0x68] sm:$0xf]  ;;  %v4369_v41 = vld [vmem:[%s6225_s1 + $0x74] sm:$0xf0] }
 0x185   :  { %v1771_v62 = vadd.f32 %v1770_v19, %v1682_v7 }
 0x186   :  { %1821 = vmatmul.bf16.gmra.mxu0 %v5064_v44  ;;  %1910 = vmatmul.bf16.gmra.mxu1 %v5066_v45 }
 0x187   :  { %v3356_v9 = vadd.f32 %v5187_v8, %v1771_v62  ;;  %1999 = vmatmul.bf16.gmra.mxu2 %v5068_v46  ;;  %2088 = vmatmul.bf16.gmra.mxu3 %v5070_v48 }
 0x189   :  { %3484 = vst [vmem:[#allocation3 + $0x360] sm:$0xff] %v3356_v9  ;;  %v3837_v9 = vor.u32 %v4369_v41, %v3836_v11 }
 0x18a   :  { %v1684_v39 = vpop.f32.mrf.mxu2  ;;  %v1773_v59 = vpop.f32.mrf.mxu3 }
 0x18b   :  { %v1685_v4 = vadd.f32 %v1684_v39, %v1596_v28  ;;  %v1508_v56 = vpop.f32.mrf.mxu0  ;;  %v1597_v29 = vpop.f32.mrf.mxu1  ;;  %v3964_v28 = vld [vmem:[%s6225_s1 + $0x168] sm:$0xf]  ;;  %2143 = vmatpush.bf16.msra.mxu0 %v3837_v9 }
 0x18c   :  { %v1598_v19 = vadd.f32 %v1597_v29, %v1508_v56  ;;  %v3965_v38 = vor.u32 %v4401_v22, %v3964_v28 }
 0x18d   :  { %v1774_v61 = vadd.f32 %v1773_v59, %v1685_v4 }
 0x18e   :  { %2232 = vmatpush.bf16.msra.mxu1 %v3965_v38 }
 0x18f   :  { %v3360_v7 = vadd.f32 %v5187_v8, %v1774_v61 }
 0x191   :  { %3488 = vst [vmem:[#allocation3 + $0x380] sm:$0xff] %v3360_v7 }
 0x192   :  { %v1686_v62 = vpop.f32.mrf.mxu2  ;;  %v1775_v39 = vpop.f32.mrf.mxu3 }
 0x193   :  { %v1687_v30 = vadd.f32 %v1686_v62, %v1598_v19  ;;  %v1511_v63 = vpop.f32.mrf.mxu0  ;;  %v1600_v37 = vpop.f32.mrf.mxu1 }
 0x194   :  { %v1601_v56 = vadd.f32 %v1600_v37, %v1511_v63 }
 0x195   :  { %v1776_v4 = vadd.f32 %v1775_v39, %v1687_v30 }
 0x196   :  { %1826 = vmatmul.bf16.gmra.mxu0 %v5121_v17  ;;  %1915 = vmatmul.bf16.gmra.mxu1 %v5126_v20 }
 0x197   :  { %v3364_v59 = vadd.f32 %v5187_v8, %v1776_v4  ;;  %2004 = vmatmul.bf16.gmra.mxu2 %v5128_v21  ;;  %2093 = vmatmul.bf16.gmra.mxu3 %v5130_v23  ;;  %v4076_v4 = vld [vmem:[%s6225_s1 + $0x248] sm:$0xf] }
 0x199   :  { %3492 = vst [vmem:[#allocation3 + $0x3a0] sm:$0xff] %v3364_v59  ;;  %v4429_v59 = vld [vmem:[%s6225_s1 + $0x254] sm:$0xf0] }
 0x19a   :  { %v1689_v36 = vpop.f32.mrf.mxu2  ;;  %v1778_v61 = vpop.f32.mrf.mxu3 }
 0x19b   :  { %v1690_v29 = vadd.f32 %v1689_v36, %v1601_v56  ;;  %v1513_v7 = vpop.f32.mrf.mxu0  ;;  %v1602_v19 = vpop.f32.mrf.mxu1  ;;  %v4077_v36 = vor.u32 %v4429_v59, %v4076_v4  ;;  %v3948_v4 = vld [vmem:[%s6225_s1 + $0x148] sm:$0xf]  ;;  %v4397_v59 = vld [vmem:[%s6225_s1 + $0x154] sm:$0xf0] }
 0x19c   :  { %v1603_v62 = vadd.f32 %v1602_v19, %v1513_v7  ;;  %v5704_v19 = vld [vmem:[%s6226_s2] sm:$0xf] }
 0x19d   :  { %v1779_v11 = vadd.f32 %v1778_v61, %v1690_v29  ;;  %v4461_v29 = vld [vmem:[%s6225_s1 + $0x354] sm:$0xf0]  ;;  %2322 = vmatpush.bf16.msra.mxu2 %v4077_v36 }
 0x19f   :  { %v3368_v41 = vadd.f32 %v5187_v8, %v1779_v11  ;;  %v5707_v11 = vperm.slane %v5704_v19, 1 }
 0x1a1   :  { %3496 = vst [vmem:[#allocation3 + $0x3c0] sm:$0xff] %v3368_v41 }
 0x1a2   :  { %v1691_v9 = vpop.f32.mrf.mxu2  ;;  %v1780_v22 = vpop.f32.mrf.mxu3 }
 0x1a3   :  { %v1692_v28 = vadd.f32 %v1691_v9, %v1603_v62  ;;  %v1792_v30 = vpop.f32.mrf.mxu0  ;;  %v1881_v39 = vpop.f32.mrf.mxu1 }
 0x1a4   :  { %v1882_v37 = vadd.f32 %v1881_v39, %v1792_v30  ;;  %v3820_v39 = vld [vmem:[%s6225_s1 + $0x48] sm:$0xf] }
 0x1a5   :  { %v1781_v63 = vadd.f32 %v1780_v22, %v1692_v28 }
 0x1a6   :  { %1831 = vmatmul.bf16.gmra.mxu0 %v5160_v40  ;;  %1920 = vmatmul.bf16.gmra.mxu1 %v5162_v42 }
 0x1a7   :  { %v3372_v38 = vadd.f32 %v5187_v8, %v1781_v63  ;;  %2009 = vmatmul.bf16.gmra.mxu2 %v5164_v43  ;;  %2098 = vmatmul.bf16.gmra.mxu3 %v5166_v57  ;;  %v4204_v8 = vld [vmem:[%s6225_s1 + $0x348] sm:$0xf]  ;;  %v4365_v63 = vld [vmem:[%s6225_s1 + $0x54] sm:$0xf0] }
 0x1a8   :  { %v4205_v62 = vor.u32 %v4461_v29, %v4204_v8  ;;  %v3949_v29 = vor.u32 %v4397_v59, %v3948_v4 }
 0x1a9   :  { %3500 = vst [vmem:[#allocation3 + $0x3e0] sm:$0xff] %v3372_v38 }
 0x1aa   :  { %v1970_v56 = vpop.f32.mrf.mxu2  ;;  %v2059_v7 = vpop.f32.mrf.mxu3  ;;  %2411 = vmatpush.bf16.msra.mxu3 %v4205_v62  ;;  %2233 = vmatpush.bf16.msra.mxu1 %v3949_v29 }
 0x1ab   :  { %v1971_v61 = vadd.f32 %v1970_v56, %v1882_v37  ;;  %v1794_v41 = vpop.f32.mrf.mxu0  ;;  %v1883_v9 = vpop.f32.mrf.mxu1  ;;  %v3821_v37 = vor.u32 %v4365_v63, %v3820_v39 }
 0x1ac   :  { %v1884_v30 = vadd.f32 %v1883_v9, %v1794_v41 }
 0x1ad   :  { %v2060_v28 = vadd.f32 %v2059_v7, %v1971_v61  ;;  %2144 = vmatpush.bf16.msra.mxu0 %v3821_v37 }
 0x1af   :  { %v3249_v22 = vadd.f32 %v5707_v11, %v2060_v28 }
 0x1b1   :  { %3377 = vst [vmem:[#allocation3 + $0x8] sm:$0xff] %v3249_v22 }
 0x1b2   :  { %v1972_v38 = vpop.f32.mrf.mxu2  ;;  %v2061_v36 = vpop.f32.mrf.mxu3 }
 0x1b3   :  { %v1973_v56 = vadd.f32 %v1972_v38, %v1884_v30  ;;  %v1797_v8 = vpop.f32.mrf.mxu0  ;;  %v1886_v61 = vpop.f32.mrf.mxu1 }
 0x1b4   :  { %v1887_v62 = vadd.f32 %v1886_v61, %v1797_v8  ;;  %v6294_v61 = vld [vmem:[#allocation6_spill] sm:$0xff] }
 0x1b5   :  { %v2062_v7 = vadd.f32 %v2061_v36, %v1973_v56 }
 0x1b6   :  { %1836 = vmatmul.bf16.gmra.mxu0 %v5220_v58  ;;  %1925 = vmatmul.bf16.gmra.mxu1 %v5228_v5 }
 0x1b7   :  { %v3253_v41 = vadd.f32 %v5707_v11, %v2062_v7  ;;  %2014 = vmatmul.bf16.gmra.mxu2 %v5230_v6  ;;  %2103 = vmatmul.bf16.gmra.mxu3 %v5232_v10 }
 0x1b9   :  { %3381 = vst [vmem:[#allocation3 + $0x28] sm:$0xff] %v3253_v41 }
 0x1ba   :  { %v1975_v9 = vpop.f32.mrf.mxu2  ;;  %v2064_v22 = vpop.f32.mrf.mxu3 }
 0x1bb   :  { %v1976_v28 = vadd.f32 %v1975_v9, %v1887_v62  ;;  %v1799_v30 = vpop.f32.mrf.mxu0  ;;  %v1888_v39 = vpop.f32.mrf.mxu1  ;;  %v6295_v62 = vld [vmem:[#allocation7_spill] sm:$0xff]  ;;  %v6296_v9 = vld [vmem:[#allocation8_spill] sm:$0xff] }
 0x1bc   :  { %v1889_v37 = vadd.f32 %v1888_v39, %v1799_v30  ;;  %v4425_v30 = vld [vmem:[%s6225_s1 + $0x234] sm:$0xf0] }
 0x1bd   :  { %v2065_v63 = vadd.f32 %v2064_v22, %v1976_v28  ;;  %v6297_v28 = vld [vmem:[#allocation9_spill] sm:$0xff]  ;;  %v4060_v22 = vld [vmem:[%s6225_s1 + $0x228] sm:$0xf] }
 0x1bf   :  { %v3257_v38 = vadd.f32 %v5707_v11, %v2065_v63  ;;  %v4061_v63 = vor.u32 %v4425_v30, %v4060_v22  ;;  %v3804_v30 = vld [vmem:[%s6225_s1 + $0x28] sm:$0xf] }
 0x1c1   :  { %3385 = vst [vmem:[#allocation3 + $0x48] sm:$0xff] %v3257_v38  ;;  %v4188_v38 = vld [vmem:[%s6225_s1 + $0x328] sm:$0xf]  ;;  %2323 = vmatpush.bf16.msra.mxu2 %v4061_v63 }
 0x1c2   :  { %v1977_v4 = vpop.f32.mrf.mxu2  ;;  %v2066_v56 = vpop.f32.mrf.mxu3  ;;  %v3932_v63 = vld [vmem:[%s6225_s1 + $0x128] sm:$0xf] }
 0x1c3   :  { %v1978_v59 = vadd.f32 %v1977_v4, %v1889_v37  ;;  %v1802_v36 = vpop.f32.mrf.mxu0  ;;  %v1891_v8 = vpop.f32.mrf.mxu1  ;;  %v4457_v37 = vld [vmem:[%s6225_s1 + $0x334] sm:$0xf0] }
 0x1c4   :  { %v1892_v41 = vadd.f32 %v1891_v8, %v1802_v36  ;;  %v4189_v36 = vor.u32 %v4457_v37, %v4188_v38  ;;  %v4393_v38 = vld [vmem:[%s6225_s1 + $0x134] sm:$0xf0] }
 0x1c5   :  { %v2067_v29 = vadd.f32 %v2066_v56, %v1978_v59 }
 0x1c6   :  { %1841 = vmatmul.bf16.gmra.mxu0 %v6294_v61  ;;  %1930 = vmatmul.bf16.gmra.mxu1 %v6295_v62  ;;  %v6301_v62 = vld [vmem:[#allocation13_spill] sm:$0xff] }
 0x1c7   :  { %v3261_v7 = vadd.f32 %v5707_v11, %v2067_v29  ;;  %2019 = vmatmul.bf16.gmra.mxu2 %v6296_v9  ;;  %2108 = vmatmul.bf16.gmra.mxu3 %v6297_v28  ;;  %v4361_v28 = vld [vmem:[%s6225_s1 + $0x34] sm:$0xf0]  ;;  %v6300_v9 = vld [vmem:[#allocation12_spill] sm:$0xff] }
 0x1c8   :  { %2412 = vmatpush.bf16.msra.mxu3 %v4189_v36 }
 0x1c9   :  { %3389 = vst [vmem:[#allocation3 + $0x68] sm:$0xff] %v3261_v7 }
 0x1ca   :  { %v1980_v39 = vpop.f32.mrf.mxu2  ;;  %v2069_v59 = vpop.f32.mrf.mxu3 }
 0x1cb   :  { %v1981_v4 = vadd.f32 %v1980_v39, %v1892_v41  ;;  %v1804_v56 = vpop.f32.mrf.mxu0  ;;  %v1893_v8 = vpop.f32.mrf.mxu1  ;;  %v3805_v39 = vor.u32 %v4361_v28, %v3804_v30  ;;  %v6299_v30 = vld [vmem:[#allocation11_spill] sm:$0xff] }
 0x1cc   :  { %v1894_v22 = vadd.f32 %v1893_v8, %v1804_v56  ;;  %v3933_v56 = vor.u32 %v4393_v38, %v3932_v63 }
 0x1cd   :  { %v2070_v29 = vadd.f32 %v2069_v59, %v1981_v4  ;;  %2145 = vmatpush.bf16.msra.mxu0 %v3805_v39 }
 0x1ce   :  { %2234 = vmatpush.bf16.msra.mxu1 %v3933_v56 }
 0x1cf   :  { %v3265_v7 = vadd.f32 %v5707_v11, %v2070_v29  ;;  %v6298_v29 = vld [vmem:[#allocation10_spill] sm:$0xff] }
 0x1d1   :  { %3393 = vst [vmem:[#allocation3 + $0x88] sm:$0xff] %v3265_v7 }
 0x1d2   :  { %v1982_v41 = vpop.f32.mrf.mxu2  ;;  %v2071_v4 = vpop.f32.mrf.mxu3 }
 0x1d3   :  { %v1983_v37 = vadd.f32 %v1982_v41, %v1894_v22  ;;  %v1807_v59 = vpop.f32.mrf.mxu0  ;;  %v1896_v36 = vpop.f32.mrf.mxu1 }
 0x1d4   :  { %v1897_v7 = vadd.f32 %v1896_v36, %v1807_v59 }
 0x1d5   :  { %v2072_v8 = vadd.f32 %v2071_v4, %v1983_v37 }
 0x1d6   :  { %1846 = vmatmul.bf16.gmra.mxu0 %v6298_v29  ;;  %1935 = vmatmul.bf16.gmra.mxu1 %v6299_v30 }
 0x1d7   :  { %v3269_v28 = vadd.f32 %v5707_v11, %v2072_v8  ;;  %2024 = vmatmul.bf16.gmra.mxu2 %v6300_v9  ;;  %2113 = vmatmul.bf16.gmra.mxu3 %v6301_v62  ;;  %v6302_v9 = vld [vmem:[#allocation14_spill] sm:$0xff] }
 0x1d9   :  { %3397 = vst [vmem:[#allocation3 + $0xa8] sm:$0xff] %v3269_v28 }
 0x1da   :  { %v1985_v22 = vpop.f32.mrf.mxu2  ;;  %v2074_v61 = vpop.f32.mrf.mxu3 }
 0x1db   :  { %v1986_v41 = vadd.f32 %v1985_v22, %v1897_v7  ;;  %v1809_v63 = vpop.f32.mrf.mxu0  ;;  %v1898_v38 = vpop.f32.mrf.mxu1  ;;  %v6303_v7 = vld [vmem:[#allocation15_spill] sm:$0xff]  ;;  %v6304_v22 = vld [vmem:[#allocation16_spill] sm:$0xff] }
 0x1dc   :  { %v1899_v4 = vadd.f32 %v1898_v38, %v1809_v63  ;;  %v4421_v63 = vld [vmem:[%s6225_s1 + $0x214] sm:$0xf0] }
 0x1dd   :  { %v2075_v39 = vadd.f32 %v2074_v61, %v1986_v41  ;;  %v6305_v61 = vld [vmem:[#allocation17_spill] sm:$0xff]  ;;  %v4044_v41 = vld [vmem:[%s6225_s1 + $0x208] sm:$0xf] }
 0x1df   :  { %v3273_v37 = vadd.f32 %v5707_v11, %v2075_v39  ;;  %v4045_v39 = vor.u32 %v4421_v63, %v4044_v41  ;;  %v3788_v63 = vld [vmem:[%s6225_s1 + $0x8] sm:$0xf] }
 0x1e1   :  { %3401 = vst [vmem:[#allocation3 + $0xc8] sm:$0xff] %v3273_v37  ;;  %2324 = vmatpush.bf16.msra.mxu2 %v4045_v39  ;;  %v3916_v39 = vld [vmem:[%s6225_s1 + $0x108] sm:$0xf] }
 0x1e2   :  { %v1987_v56 = vpop.f32.mrf.mxu2  ;;  %v2076_v59 = vpop.f32.mrf.mxu3 }
 0x1e3   :  { %v1988_v8 = vadd.f32 %v1987_v56, %v1899_v4  ;;  %v1812_v36 = vpop.f32.mrf.mxu0  ;;  %v1901_v30 = vpop.f32.mrf.mxu1 }
 0x1e4   :  { %v1902_v62 = vadd.f32 %v1901_v30, %v1812_v36  ;;  %v4453_v30 = vld [vmem:[%s6225_s1 + $0x314] sm:$0xf0] }
 0x1e5   :  { %v2077_v29 = vadd.f32 %v2076_v59, %v1988_v8 }
 0x1e6   :  { %1851 = vmatmul.bf16.gmra.mxu0 %v6302_v9  ;;  %1940 = vmatmul.bf16.gmra.mxu1 %v6303_v7  ;;  %v6309_v7 = vld [vmem:[#allocation21_spill] sm:$0xff] }
 0x1e7   :  { %v3277_v28 = vadd.f32 %v5707_v11, %v2077_v29  ;;  %2029 = vmatmul.bf16.gmra.mxu2 %v6304_v22  ;;  %2118 = vmatmul.bf16.gmra.mxu3 %v6305_v61  ;;  %v4172_v29 = vld [vmem:[%s6225_s1 + $0x308] sm:$0xf]  ;;  %v4357_v61 = vld [vmem:[%s6225_s1 + $0x14] sm:$0xf0]  ;;  %v6308_v22 = vld [vmem:[#allocation20_spill] sm:$0xff] }
 0x1e8   :  { %v4173_v8 = vor.u32 %v4453_v30, %v4172_v29  ;;  %v4389_v29 = vld [vmem:[%s6225_s1 + $0x114] sm:$0xf0] }
 0x1e9   :  { %3405 = vst [vmem:[#allocation3 + $0xe8] sm:$0xff] %v3277_v28 }
 0x1ea   :  { %v1990_v38 = vpop.f32.mrf.mxu2  ;;  %v2079_v4 = vpop.f32.mrf.mxu3  ;;  %2413 = vmatpush.bf16.msra.mxu3 %v4173_v8 }
 0x1eb   :  { %v1991_v37 = vadd.f32 %v1990_v38, %v1902_v62  ;;  %v1814_v56 = vpop.f32.mrf.mxu0  ;;  %v1903_v59 = vpop.f32.mrf.mxu1  ;;  %v3789_v38 = vor.u32 %v4357_v61, %v3788_v63  ;;  %v6307_v63 = vld [vmem:[#allocation19_spill] sm:$0xff] }
 0x1ec   :  { %v1904_v41 = vadd.f32 %v1903_v59, %v1814_v56  ;;  %v3917_v56 = vor.u32 %v4389_v29, %v3916_v39 }
 0x1ed   :  { %v2080_v36 = vadd.f32 %v2079_v4, %v1991_v37  ;;  %2146 = vmatpush.bf16.msra.mxu0 %v3789_v38 }
 0x1ee   :  { %2235 = vmatpush.bf16.msra.mxu1 %v3917_v56 }
 0x1ef   :  { %v3281_v28 = vadd.f32 %v5707_v11, %v2080_v36  ;;  %v6306_v36 = vld [vmem:[#allocation18_spill] sm:$0xff] }
 0x1f1   :  { %3409 = vst [vmem:[#allocation3 + $0x108] sm:$0xff] %v3281_v28 }
 0x1f2   :  { %v1992_v62 = vpop.f32.mrf.mxu2  ;;  %v2081_v37 = vpop.f32.mrf.mxu3 }
 0x1f3   :  { %v1993_v30 = vadd.f32 %v1992_v62, %v1904_v41  ;;  %v1817_v4 = vpop.f32.mrf.mxu0  ;;  %v1906_v8 = vpop.f32.mrf.mxu1 }
 0x1f4   :  { %v1907_v28 = vadd.f32 %v1906_v8, %v1817_v4 }
 0x1f5   :  { %v2082_v59 = vadd.f32 %v2081_v37, %v1993_v30 }
 0x1f6   :  { %1856 = vmatmul.bf16.gmra.mxu0 %v6306_v36  ;;  %1945 = vmatmul.bf16.gmra.mxu1 %v6307_v63 }
 0x1f7   :  { %v3285_v61 = vadd.f32 %v5707_v11, %v2082_v59  ;;  %2034 = vmatmul.bf16.gmra.mxu2 %v6308_v22  ;;  %2123 = vmatmul.bf16.gmra.mxu3 %v6309_v7  ;;  %v6310_v22 = vld [vmem:[#allocation22_spill] sm:$0xff] }
 0x1f9   :  { %3413 = vst [vmem:[#allocation3 + $0x128] sm:$0xff] %v3285_v61 }
 0x1fa   :  { %v1995_v41 = vpop.f32.mrf.mxu2  ;;  %v2084_v9 = vpop.f32.mrf.mxu3 }
 0x1fb   :  { %v1996_v62 = vadd.f32 %v1995_v41, %v1907_v28  ;;  %v1819_v39 = vpop.f32.mrf.mxu0  ;;  %v1908_v29 = vpop.f32.mrf.mxu1  ;;  %v6311_v28 = vld [vmem:[#allocation23_spill] sm:$0xff]  ;;  %v6312_v41 = vld [vmem:[#allocation24_spill] sm:$0xff] }
 0x1fc   :  { %v1909_v37 = vadd.f32 %v1908_v29, %v1819_v39  ;;  %v4158_v39 = vld [vmem:[%s6225_s1 + $0x2f8] sm:$0xf0] }
 0x1fd   :  { %v2085_v38 = vadd.f32 %v2084_v9, %v1996_v62  ;;  %v6313_v9 = vld [vmem:[#allocation25_spill] sm:$0xff]  ;;  %v4447_v62 = vld [vmem:[%s6225_s1 + $0x2ec] sm:$0xf] }
 0x1ff   :  { %v3289_v30 = vadd.f32 %v5707_v11, %v2085_v38  ;;  %v4161_v38 = vor.u32 %v4447_v62, %v4158_v39  ;;  %v4383_v39 = vld [vmem:[%s6225_s1 + $0xec] sm:$0xf] }
 0x201   :  { %3417 = vst [vmem:[#allocation3 + $0x148] sm:$0xff] %v3289_v30  ;;  %2673 = vmatpush.bf16.msrb.mxu2 %v4161_v38  ;;  %v4415_v38 = vld [vmem:[%s6225_s1 + $0x1ec] sm:$0xf] }
 0x202   :  { %v1997_v56 = vpop.f32.mrf.mxu2  ;;  %v2086_v4 = vpop.f32.mrf.mxu3 }
 0x203   :  { %v1998_v59 = vadd.f32 %v1997_v56, %v1909_v37  ;;  %v1822_v8 = vpop.f32.mrf.mxu0  ;;  %v1911_v63 = vpop.f32.mrf.mxu1 }
 0x204   :  { %v1912_v7 = vadd.f32 %v1911_v63, %v1822_v8  ;;  %v4286_v63 = vld [vmem:[%s6225_s1 + $0x3f8] sm:$0xf0] }
 0x205   :  { %v2087_v36 = vadd.f32 %v2086_v4, %v1998_v59 }
 0x206   :  { %1861 = vmatmul.bf16.gmra.mxu0 %v6310_v22  ;;  %1950 = vmatmul.bf16.gmra.mxu1 %v6311_v28 }
 0x207   :  { %v3293_v61 = vadd.f32 %v5707_v11, %v2087_v36  ;;  %2039 = vmatmul.bf16.gmra.mxu2 %v6312_v41  ;;  %2128 = vmatmul.bf16.gmra.mxu3 %v6313_v9  ;;  %v4479_v36 = vld [vmem:[%s6225_s1 + $0x3ec] sm:$0xf]  ;;  %v3902_v9 = vld [vmem:[%s6225_s1 + $0xf8] sm:$0xf0] }
 0x208   :  { %v4289_v59 = vor.u32 %v4479_v36, %v4286_v63  ;;  %v4030_v36 = vld [vmem:[%s6225_s1 + $0x1f8] sm:$0xf0] }
 0x209   :  { %3421 = vst [vmem:[#allocation3 + $0x168] sm:$0xff] %v3293_v61 }
 0x20a   :  { %v2000_v29 = vpop.f32.mrf.mxu2  ;;  %v2089_v37 = vpop.f32.mrf.mxu3  ;;  %2762 = vmatpush.bf16.msrb.mxu3 %v4289_v59 }
 0x20b   :  { %v2001_v30 = vadd.f32 %v2000_v29, %v1912_v7  ;;  %v1824_v56 = vpop.f32.mrf.mxu0  ;;  %v1913_v4 = vpop.f32.mrf.mxu1  ;;  %v3905_v29 = vor.u32 %v4383_v39, %v3902_v9 }
 0x20c   :  { %v1914_v62 = vadd.f32 %v1913_v4, %v1824_v56  ;;  %v4033_v56 = vor.u32 %v4415_v38, %v4030_v36 }
 0x20d   :  { %v2090_v8 = vadd.f32 %v2089_v37, %v2001_v30  ;;  %2495 = vmatpush.bf16.msrb.mxu0 %v3905_v29 }
 0x20e   :  { %2584 = vmatpush.bf16.msrb.mxu1 %v4033_v56 }
 0x20f   :  { %v3297_v61 = vadd.f32 %v5707_v11, %v2090_v8 }
 0x211   :  { %3425 = vst [vmem:[#allocation3 + $0x188] sm:$0xff] %v3297_v61 }
 0x212   :  { %v2002_v7 = vpop.f32.mrf.mxu2  ;;  %v2091_v30 = vpop.f32.mrf.mxu3 }
 0x213   :  { %v2003_v63 = vadd.f32 %v2002_v7, %v1914_v62  ;;  %v1827_v37 = vpop.f32.mrf.mxu0  ;;  %v1916_v59 = vpop.f32.mrf.mxu1 }
 0x214   :  { %v1917_v8 = vadd.f32 %v1916_v59, %v1827_v37 }
 0x215   :  { %v2092_v4 = vadd.f32 %v2091_v30, %v2003_v63 }
 0x216   :  { %1866 = vmatmul.bf16.gmra.mxu0 %v5520_v16  ;;  %1955 = vmatmul.bf16.gmra.mxu1 %v5528_v31 }
 0x217   :  { %v3301_v9 = vadd.f32 %v5707_v11, %v2092_v4  ;;  %2044 = vmatmul.bf16.gmra.mxu2 %v5530_v60  ;;  %2133 = vmatmul.bf16.gmra.mxu3 %v5532_v18 }
 0x219   :  { %3429 = vst [vmem:[#allocation3 + $0x1a8] sm:$0xff] %v3301_v9 }
 0x21a   :  { %v2005_v61 = vpop.f32.mrf.mxu2  ;;  %v2094_v39 = vpop.f32.mrf.mxu3 }
 0x21b   :  { %v2006_v62 = vadd.f32 %v2005_v61, %v1917_v8  ;;  %v1829_v7 = vpop.f32.mrf.mxu0  ;;  %v1918_v38 = vpop.f32.mrf.mxu1  ;;  %v4443_v8 = vld [vmem:[%s6225_s1 + $0x2cc] sm:$0xf]  ;;  %v4142_v61 = vld [vmem:[%s6225_s1 + $0x2d8] sm:$0xf0] }
 0x21c   :  { %v1919_v63 = vadd.f32 %v1918_v38, %v1829_v7  ;;  %v4270_v7 = vld [vmem:[%s6225_s1 + $0x3d8] sm:$0xf0] }
 0x21d   :  { %v2095_v29 = vadd.f32 %v2094_v39, %v2006_v62  ;;  %v4145_v39 = vor.u32 %v4443_v8, %v4142_v61  ;;  %v4411_v61 = vld [vmem:[%s6225_s1 + $0x1cc] sm:$0xf] }
 0x21f   :  { %v3305_v36 = vadd.f32 %v5707_v11, %v2095_v29  ;;  %2674 = vmatpush.bf16.msrb.mxu2 %v4145_v39 }
 0x221   :  { %3433 = vst [vmem:[#allocation3 + $0x1c8] sm:$0xff] %v3305_v36 }
 0x222   :  { %v2007_v30 = vpop.f32.mrf.mxu2  ;;  %v2096_v37 = vpop.f32.mrf.mxu3 }
 0x223   :  { %v2008_v56 = vadd.f32 %v2007_v30, %v1919_v63  ;;  %v1832_v59 = vpop.f32.mrf.mxu0  ;;  %v1921_v4 = vpop.f32.mrf.mxu1 }
 0x224   :  { %v1922_v18 = vadd.f32 %v1921_v4, %v1832_v59  ;;  %v4379_v4 = vld [vmem:[%s6225_s1 + $0xcc] sm:$0xf] }
 0x225   :  { %v2097_v31 = vadd.f32 %v2096_v37, %v2008_v56 }
 0x226   :  { %2147 = vmatmul.bf16.vlgmr.msra.gmra.mxu0 %v4770_v47  ;;  %2236 = vmatmul.bf16.vlgmr.msra.gmra.mxu1 %v4778_v51 }
 0x227   :  { %v3309_v9 = vadd.f32 %v5707_v11, %v2097_v31  ;;  %2325 = vmatmul.bf16.vlgmr.msra.gmra.mxu2 %v4780_v52  ;;  %2414 = vmatmul.bf16.vlgmr.msra.gmra.mxu3 %v4782_v53  ;;  %v4475_v31 = vld [vmem:[%s6225_s1 + $0x3cc] sm:$0xf] }
 0x228   :  { %v4273_v63 = vor.u32 %v4475_v31, %v4270_v7 }
 0x229   :  { %3437 = vst [vmem:[#allocation3 + $0x1e8] sm:$0xff] %v3309_v9  ;;  %v3886_v9 = vld [vmem:[%s6225_s1 + $0xd8] sm:$0xf0] }
 0x22a   :  { %v2010_v62 = vpop.f32.mrf.mxu2  ;;  %v2099_v29 = vpop.f32.mrf.mxu3  ;;  %2763 = vmatpush.bf16.msrb.mxu3 %v4273_v63  ;;  %v3889_v8 = vor.u32 %v4379_v4, %v3886_v9 }
 0x22b   :  { %v2011_v38 = vadd.f32 %v2010_v62, %v1922_v18  ;;  %v1834_v36 = vpop.f32.mrf.mxu0  ;;  %v1923_v30 = vpop.f32.mrf.mxu1  ;;  %v4014_v62 = vld [vmem:[%s6225_s1 + $0x1d8] sm:$0xf0] }
 0x22c   :  { %v1924_v59 = vadd.f32 %v1923_v30, %v1834_v36  ;;  %2496 = vmatpush.bf16.msrb.mxu0 %v3889_v8 }
 0x22d   :  { %v2100_v56 = vadd.f32 %v2099_v29, %v2011_v38  ;;  %v4017_v38 = vor.u32 %v4411_v61, %v4014_v62 }
 0x22f   :  { %v3313_v37 = vadd.f32 %v5707_v11, %v2100_v56  ;;  %2585 = vmatpush.bf16.msrb.mxu1 %v4017_v38 }
 0x231   :  { %3441 = vst [vmem:[#allocation3 + $0x208] sm:$0xff] %v3313_v37 }
 0x232   :  { %v2012_v18 = vpop.f32.mrf.mxu2  ;;  %v2101_v31 = vpop.f32.mrf.mxu3 }
 0x233   :  { %v2013_v39 = vadd.f32 %v2012_v18, %v1924_v59  ;;  %v1837_v7 = vpop.f32.mrf.mxu0  ;;  %v1926_v29 = vpop.f32.mrf.mxu1 }
 0x234   :  { %v1927_v30 = vadd.f32 %v1926_v29, %v1837_v7 }
 0x235   :  { %v2102_v36 = vadd.f32 %v2101_v31, %v2013_v39 }
 0x236   :  { %2152 = vmatmul.bf16.gmra.mxu0 %v4836_v12  ;;  %2241 = vmatmul.bf16.gmra.mxu1 %v4838_v13 }
 0x237   :  { %v3317_v63 = vadd.f32 %v5707_v11, %v2102_v36  ;;  %2330 = vmatmul.bf16.gmra.mxu2 %v4840_v14  ;;  %2419 = vmatmul.bf16.gmra.mxu3 %v4842_v15 }
 0x239   :  { %3445 = vst [vmem:[#allocation3 + $0x228] sm:$0xff] %v3317_v63 }
 0x23a   :  { %v2015_v56 = vpop.f32.mrf.mxu2  ;;  %v2104_v59 = vpop.f32.mrf.mxu3 }
 0x23b   :  { %v2016_v37 = vadd.f32 %v2015_v56, %v1927_v30  ;;  %v1839_v4 = vpop.f32.mrf.mxu0  ;;  %v1928_v9 = vpop.f32.mrf.mxu1  ;;  %v4439_v30 = vld [vmem:[%s6225_s1 + $0x2ac] sm:$0xf]  ;;  %v4126_v56 = vld [vmem:[%s6225_s1 + $0x2b8] sm:$0xf0] }
 0x23c   :  { %v1929_v61 = vadd.f32 %v1928_v9, %v1839_v4  ;;  %v4471_v4 = vld [vmem:[%s6225_s1 + $0x3ac] sm:$0xf]  ;;  %v4254_v9 = vld [vmem:[%s6225_s1 + $0x3b8] sm:$0xf0] }
 0x23d   :  { %v2105_v18 = vadd.f32 %v2104_v59, %v2016_v37  ;;  %v4129_v59 = vor.u32 %v4439_v30, %v4126_v56  ;;  %v4407_v56 = vld [vmem:[%s6225_s1 + $0x1ac] sm:$0xf] }
 0x23f   :  { %v3321_v8 = vadd.f32 %v5707_v11, %v2105_v18  ;;  %2675 = vmatpush.bf16.msrb.mxu2 %v4129_v59 }
 0x241   :  { %3449 = vst [vmem:[#allocation3 + $0x248] sm:$0xff] %v3321_v8 }
 0x242   :  { %v2017_v62 = vpop.f32.mrf.mxu2  ;;  %v2106_v31 = vpop.f32.mrf.mxu3 }
 0x243   :  { %v2018_v39 = vadd.f32 %v2017_v62, %v1929_v61  ;;  %v1842_v7 = vpop.f32.mrf.mxu0  ;;  %v1931_v38 = vpop.f32.mrf.mxu1  ;;  %v4257_v62 = vor.u32 %v4471_v4, %v4254_v9 }
 0x244   :  { %v1932_v63 = vadd.f32 %v1931_v38, %v1842_v7 }
 0x245   :  { %v2107_v29 = vadd.f32 %v2106_v31, %v2018_v39  ;;  %2764 = vmatpush.bf16.msrb.mxu3 %v4257_v62 }
 0x246   :  { %2157 = vmatmul.bf16.gmra.mxu0 %v4872_v24  ;;  %2246 = vmatmul.bf16.gmra.mxu1 %v4874_v25 }
 0x247   :  { %v3325_v36 = vadd.f32 %v5707_v11, %v2107_v29  ;;  %2335 = vmatmul.bf16.gmra.mxu2 %v4876_v26  ;;  %2424 = vmatmul.bf16.gmra.mxu3 %v4878_v27  ;;  %v4375_v29 = vld [vmem:[%s6225_s1 + $0xac] sm:$0xf] }
 0x249   :  { %3453 = vst [vmem:[#allocation3 + $0x268] sm:$0xff] %v3325_v36  ;;  %v3870_v36 = vld [vmem:[%s6225_s1 + $0xb8] sm:$0xf0] }
 0x24a   :  { %v2020_v37 = vpop.f32.mrf.mxu2  ;;  %v2109_v8 = vpop.f32.mrf.mxu3  ;;  %v3873_v30 = vor.u32 %v4375_v29, %v3870_v36 }
 0x24b   :  { %v2021_v18 = vadd.f32 %v2020_v37, %v1932_v63  ;;  %v1844_v61 = vpop.f32.mrf.mxu0  ;;  %v1933_v39 = vpop.f32.mrf.mxu1  ;;  %v3998_v37 = vld [vmem:[%s6225_s1 + $0x1b8] sm:$0xf0] }
 0x24c   :  { %v1934_v38 = vadd.f32 %v1933_v39, %v1844_v61  ;;  %2497 = vmatpush.bf16.msrb.mxu0 %v3873_v30 }
 0x24d   :  { %v2110_v31 = vadd.f32 %v2109_v8, %v2021_v18  ;;  %v4001_v18 = vor.u32 %v4407_v56, %v3998_v37 }
 0x24f   :  { %v3329_v7 = vadd.f32 %v5707_v11, %v2110_v31  ;;  %2586 = vmatpush.bf16.msrb.mxu1 %v4001_v18 }
 0x251   :  { %3457 = vst [vmem:[#allocation3 + $0x288] sm:$0xff] %v3329_v7 }
 0x252   :  { %v2022_v63 = vpop.f32.mrf.mxu2  ;;  %v2111_v4 = vpop.f32.mrf.mxu3 }
 0x253   :  { %v2023_v59 = vadd.f32 %v2022_v63, %v1934_v38  ;;  %v1847_v9 = vpop.f32.mrf.mxu0  ;;  %v1936_v8 = vpop.f32.mrf.mxu1 }
 0x254   :  { %v1937_v39 = vadd.f32 %v1936_v8, %v1847_v9 }
 0x255   :  { %v2112_v61 = vadd.f32 %v2111_v4, %v2023_v59 }
 0x256   :  { %2162 = vmatmul.bf16.gmra.mxu0 %v4932_v49  ;;  %2251 = vmatmul.bf16.gmra.mxu1 %v4934_v50 }
 0x257   :  { %v3333_v62 = vadd.f32 %v5707_v11, %v2112_v61  ;;  %2340 = vmatmul.bf16.gmra.mxu2 %v4936_v54  ;;  %2429 = vmatmul.bf16.gmra.mxu3 %v4938_v55 }
 0x259   :  { %3461 = vst [vmem:[#allocation3 + $0x2a8] sm:$0xff] %v3333_v62 }
 0x25a   :  { %v2025_v31 = vpop.f32.mrf.mxu2  ;;  %v2114_v38 = vpop.f32.mrf.mxu3 }
 0x25b   :  { %v2026_v7 = vadd.f32 %v2025_v31, %v1937_v39  ;;  %v1849_v29 = vpop.f32.mrf.mxu0  ;;  %v1938_v36 = vpop.f32.mrf.mxu1  ;;  %v4435_v39 = vld [vmem:[%s6225_s1 + $0x28c] sm:$0xf]  ;;  %v4110_v31 = vld [vmem:[%s6225_s1 + $0x298] sm:$0xf0] }
 0x25c   :  { %v1939_v56 = vadd.f32 %v1938_v36, %v1849_v29  ;;  %v4467_v29 = vld [vmem:[%s6225_s1 + $0x38c] sm:$0xf]  ;;  %v4238_v36 = vld [vmem:[%s6225_s1 + $0x398] sm:$0xf0] }
 0x25d   :  { %v2115_v63 = vadd.f32 %v2114_v38, %v2026_v7  ;;  %v4113_v38 = vor.u32 %v4435_v39, %v4110_v31  ;;  %v4403_v31 = vld [vmem:[%s6225_s1 + $0x18c] sm:$0xf] }
 0x25f   :  { %v3337_v30 = vadd.f32 %v5707_v11, %v2115_v63  ;;  %2676 = vmatpush.bf16.msrb.mxu2 %v4113_v38 }
 0x261   :  { %3465 = vst [vmem:[#allocation3 + $0x2c8] sm:$0xff] %v3337_v30 }
 0x262   :  { %v2027_v37 = vpop.f32.mrf.mxu2  ;;  %v2116_v4 = vpop.f32.mrf.mxu3 }
 0x263   :  { %v2028_v59 = vadd.f32 %v2027_v37, %v1939_v56  ;;  %v1852_v9 = vpop.f32.mrf.mxu0  ;;  %v1941_v18 = vpop.f32.mrf.mxu1  ;;  %v4241_v37 = vor.u32 %v4467_v29, %v4238_v36 }
 0x264   :  { %v1942_v62 = vadd.f32 %v1941_v18, %v1852_v9 }
 0x265   :  { %v2117_v8 = vadd.f32 %v2116_v4, %v2028_v59  ;;  %2765 = vmatpush.bf16.msrb.mxu3 %v4241_v37 }
 0x266   :  { %2167 = vmatmul.bf16.gmra.mxu0 %v4968_v0  ;;  %2256 = vmatmul.bf16.gmra.mxu1 %v4970_v1 }
 0x267   :  { %v3341_v61 = vadd.f32 %v5707_v11, %v2117_v8  ;;  %2345 = vmatmul.bf16.gmra.mxu2 %v4972_v2  ;;  %2434 = vmatmul.bf16.gmra.mxu3 %v4974_v3  ;;  %v4371_v8 = vld [vmem:[%s6225_s1 + $0x8c] sm:$0xf] }
 0x269   :  { %3469 = vst [vmem:[#allocation3 + $0x2e8] sm:$0xff] %v3341_v61  ;;  %v3854_v61 = vld [vmem:[%s6225_s1 + $0x98] sm:$0xf0] }
 0x26a   :  { %v2030_v7 = vpop.f32.mrf.mxu2  ;;  %v2119_v30 = vpop.f32.mrf.mxu3  ;;  %v3857_v39 = vor.u32 %v4371_v8, %v3854_v61 }
 0x26b   :  { %v2031_v63 = vadd.f32 %v2030_v7, %v1942_v62  ;;  %v1854_v56 = vpop.f32.mrf.mxu0  ;;  %v1943_v59 = vpop.f32.mrf.mxu1  ;;  %v3982_v7 = vld [vmem:[%s6225_s1 + $0x198] sm:$0xf0] }
 0x26c   :  { %v1944_v18 = vadd.f32 %v1943_v59, %v1854_v56  ;;  %2498 = vmatpush.bf16.msrb.mxu0 %v3857_v39 }
 0x26d   :  { %v2120_v4 = vadd.f32 %v2119_v30, %v2031_v63  ;;  %v3985_v63 = vor.u32 %v4403_v31, %v3982_v7 }
 0x26f   :  { %v3345_v9 = vadd.f32 %v5707_v11, %v2120_v4  ;;  %2587 = vmatpush.bf16.msrb.mxu1 %v3985_v63 }
 0x271   :  { %3473 = vst [vmem:[#allocation3 + $0x308] sm:$0xff] %v3345_v9 }
 0x272   :  { %v2032_v62 = vpop.f32.mrf.mxu2  ;;  %v2121_v29 = vpop.f32.mrf.mxu3 }
 0x273   :  { %v2033_v38 = vadd.f32 %v2032_v62, %v1944_v18  ;;  %v1857_v36 = vpop.f32.mrf.mxu0  ;;  %v1946_v30 = vpop.f32.mrf.mxu1 }
 0x274   :  { %v1947_v59 = vadd.f32 %v1946_v30, %v1857_v36 }
 0x275   :  { %v2122_v56 = vadd.f32 %v2121_v29, %v2033_v38 }
 0x276   :  { %2172 = vmatmul.bf16.gmra.mxu0 %v5028_v32  ;;  %2261 = vmatmul.bf16.gmra.mxu1 %v5030_v33 }
 0x277   :  { %v3349_v37 = vadd.f32 %v5707_v11, %v2122_v56  ;;  %2350 = vmatmul.bf16.gmra.mxu2 %v5032_v34  ;;  %2439 = vmatmul.bf16.gmra.mxu3 %v5034_v35 }
 0x279   :  { %3477 = vst [vmem:[#allocation3 + $0x328] sm:$0xff] %v3349_v37 }
 0x27a   :  { %v2035_v4 = vpop.f32.mrf.mxu2  ;;  %v2124_v18 = vpop.f32.mrf.mxu3 }
 0x27b   :  { %v2036_v9 = vadd.f32 %v2035_v4, %v1947_v59  ;;  %v1859_v8 = vpop.f32.mrf.mxu0  ;;  %v1948_v61 = vpop.f32.mrf.mxu1  ;;  %v4431_v59 = vld [vmem:[%s6225_s1 + $0x26c] sm:$0xf]  ;;  %v4094_v4 = vld [vmem:[%s6225_s1 + $0x278] sm:$0xf0] }
 0x27c   :  { %v1949_v31 = vadd.f32 %v1948_v61, %v1859_v8  ;;  %v4463_v8 = vld [vmem:[%s6225_s1 + $0x36c] sm:$0xf]  ;;  %v4222_v61 = vld [vmem:[%s6225_s1 + $0x378] sm:$0xf0] }
 0x27d   :  { %v2125_v62 = vadd.f32 %v2124_v18, %v2036_v9  ;;  %v4097_v18 = vor.u32 %v4431_v59, %v4094_v4  ;;  %v4399_v4 = vld [vmem:[%s6225_s1 + $0x16c] sm:$0xf] }
 0x27f   :  { %v3353_v39 = vadd.f32 %v5707_v11, %v2125_v62  ;;  %2677 = vmatpush.bf16.msrb.mxu2 %v4097_v18 }
 0x281   :  { %3481 = vst [vmem:[#allocation3 + $0x348] sm:$0xff] %v3353_v39 }
 0x282   :  { %v2037_v7 = vpop.f32.mrf.mxu2  ;;  %v2126_v29 = vpop.f32.mrf.mxu3 }
 0x283   :  { %v2038_v38 = vadd.f32 %v2037_v7, %v1949_v31  ;;  %v1862_v36 = vpop.f32.mrf.mxu0  ;;  %v1951_v63 = vpop.f32.mrf.mxu1  ;;  %v4225_v7 = vor.u32 %v4463_v8, %v4222_v61 }
 0x284   :  { %v1952_v37 = vadd.f32 %v1951_v63, %v1862_v36 }
 0x285   :  { %v2127_v30 = vadd.f32 %v2126_v29, %v2038_v38  ;;  %2766 = vmatpush.bf16.msrb.mxu3 %v4225_v7 }
 0x286   :  { %2177 = vmatmul.bf16.gmra.mxu0 %v5064_v44  ;;  %2266 = vmatmul.bf16.gmra.mxu1 %v5066_v45 }
 0x287   :  { %v3357_v56 = vadd.f32 %v5707_v11, %v2127_v30  ;;  %2355 = vmatmul.bf16.gmra.mxu2 %v5068_v46  ;;  %2444 = vmatmul.bf16.gmra.mxu3 %v5070_v48  ;;  %v4367_v30 = vld [vmem:[%s6225_s1 + $0x6c] sm:$0xf] }
 0x289   :  { %3485 = vst [vmem:[#allocation3 + $0x368] sm:$0xff] %v3357_v56  ;;  %v3838_v56 = vld [vmem:[%s6225_s1 + $0x78] sm:$0xf0] }
 0x28a   :  { %v2040_v9 = vpop.f32.mrf.mxu2  ;;  %v2129_v39 = vpop.f32.mrf.mxu3  ;;  %v3841_v59 = vor.u32 %v4367_v30, %v3838_v56 }
 0x28b   :  { %v2041_v62 = vadd.f32 %v2040_v9, %v1952_v37  ;;  %v1864_v31 = vpop.f32.mrf.mxu0  ;;  %v1953_v38 = vpop.f32.mrf.mxu1  ;;  %v3966_v9 = vld [vmem:[%s6225_s1 + $0x178] sm:$0xf0] }
 0x28c   :  { %v1954_v63 = vadd.f32 %v1953_v38, %v1864_v31  ;;  %2499 = vmatpush.bf16.msrb.mxu0 %v3841_v59 }
 0x28d   :  { %v2130_v29 = vadd.f32 %v2129_v39, %v2041_v62  ;;  %v3969_v62 = vor.u32 %v4399_v4, %v3966_v9 }
 0x28f   :  { %v3361_v36 = vadd.f32 %v5707_v11, %v2130_v29  ;;  %2588 = vmatpush.bf16.msrb.mxu1 %v3969_v62 }
 0x291   :  { %3489 = vst [vmem:[#allocation3 + $0x388] sm:$0xff] %v3361_v36 }
 0x292   :  { %v2042_v37 = vpop.f32.mrf.mxu2  ;;  %v2131_v8 = vpop.f32.mrf.mxu3 }
 0x293   :  { %v2043_v18 = vadd.f32 %v2042_v37, %v1954_v63  ;;  %v1867_v61 = vpop.f32.mrf.mxu0  ;;  %v1956_v39 = vpop.f32.mrf.mxu1 }
 0x294   :  { %v1957_v38 = vadd.f32 %v1956_v39, %v1867_v61 }
 0x295   :  { %v2132_v31 = vadd.f32 %v2131_v8, %v2043_v18 }
 0x296   :  { %2182 = vmatmul.bf16.gmra.mxu0 %v5121_v17  ;;  %2271 = vmatmul.bf16.gmra.mxu1 %v5126_v20 }
 0x297   :  { %v3365_v7 = vadd.f32 %v5707_v11, %v2132_v31  ;;  %2360 = vmatmul.bf16.gmra.mxu2 %v5128_v21  ;;  %2449 = vmatmul.bf16.gmra.mxu3 %v5130_v23 }
 0x299   :  { %3493 = vst [vmem:[#allocation3 + $0x3a8] sm:$0xff] %v3365_v7 }
 0x29a   :  { %v2045_v29 = vpop.f32.mrf.mxu2  ;;  %v2134_v63 = vpop.f32.mrf.mxu3 }
 0x29b   :  { %v2046_v36 = vadd.f32 %v2045_v29, %v1957_v38  ;;  %v1869_v30 = vpop.f32.mrf.mxu0  ;;  %v1958_v56 = vpop.f32.mrf.mxu1  ;;  %v4427_v38 = vld [vmem:[%s6225_s1 + $0x24c] sm:$0xf]  ;;  %v4078_v29 = vld [vmem:[%s6225_s1 + $0x258] sm:$0xf0] }
 0x29c   :  { %v1959_v4 = vadd.f32 %v1958_v56, %v1869_v30  ;;  %v4206_v30 = vld [vmem:[%s6225_s1 + $0x358] sm:$0xf0] }
 0x29d   :  { %v2135_v37 = vadd.f32 %v2134_v63, %v2046_v36  ;;  %v4081_v63 = vor.u32 %v4427_v38, %v4078_v29  ;;  %v4395_v38 = vld [vmem:[%s6225_s1 + $0x14c] sm:$0xf]  ;;  %v3950_v29 = vld [vmem:[%s6225_s1 + $0x158] sm:$0xf0] }
 0x29f   :  { %v3369_v59 = vadd.f32 %v5707_v11, %v2135_v37  ;;  %2678 = vmatpush.bf16.msrb.mxu2 %v4081_v63 }
 0x2a1   :  { %3497 = vst [vmem:[#allocation3 + $0x3c8] sm:$0xff] %v3369_v59  ;;  %v5998_v59 = vperm.slane %v5704_v19, 2 }
 0x2a2   :  { %v2047_v9 = vpop.f32.mrf.mxu2  ;;  %v2136_v8 = vpop.f32.mrf.mxu3 }
 0x2a3   :  { %v2048_v18 = vadd.f32 %v2047_v9, %v1959_v4  ;;  %v2148_v61 = vpop.f32.mrf.mxu0  ;;  %v2237_v62 = vpop.f32.mrf.mxu1 }
 0x2a4   :  { %v2238_v7 = vadd.f32 %v2237_v62, %v2148_v61 }
 0x2a5   :  { %v2137_v39 = vadd.f32 %v2136_v8, %v2048_v18 }
 0x2a6   :  { %2187 = vmatmul.bf16.gmra.mxu0 %v5160_v40  ;;  %2276 = vmatmul.bf16.gmra.mxu1 %v5162_v42 }
 0x2a7   :  { %v3373_v31 = vadd.f32 %v5707_v11, %v2137_v39  ;;  %2365 = vmatmul.bf16.gmra.mxu2 %v5164_v43  ;;  %2454 = vmatmul.bf16.gmra.mxu3 %v5166_v57  ;;  %v4459_v11 = vld [vmem:[%s6225_s1 + $0x34c] sm:$0xf] }
 0x2a8   :  { %v4209_v9 = vor.u32 %v4459_v11, %v4206_v30  ;;  %v4363_v39 = vld [vmem:[%s6225_s1 + $0x4c] sm:$0xf]  ;;  %v3953_v30 = vor.u32 %v4395_v38, %v3950_v29 }
 0x2a9   :  { %3501 = vst [vmem:[#allocation3 + $0x3e8] sm:$0xff] %v3373_v31  ;;  %v3822_v31 = vld [vmem:[%s6225_s1 + $0x58] sm:$0xf0] }
 0x2aa   :  { %v2326_v36 = vpop.f32.mrf.mxu2  ;;  %v2415_v37 = vpop.f32.mrf.mxu3  ;;  %2767 = vmatpush.bf16.msrb.mxu3 %v4209_v9  ;;  %2589 = vmatpush.bf16.msrb.mxu1 %v3953_v30 }
 0x2ab   :  { %v2327_v56 = vadd.f32 %v2326_v36, %v2238_v7  ;;  %v2150_v4 = vpop.f32.mrf.mxu0  ;;  %v2239_v18 = vpop.f32.mrf.mxu1  ;;  %v3825_v7 = vor.u32 %v4363_v39, %v3822_v31 }
 0x2ac   :  { %v2240_v62 = vadd.f32 %v2239_v18, %v2150_v4 }
 0x2ad   :  { %v2416_v8 = vadd.f32 %v2415_v37, %v2327_v56  ;;  %2500 = vmatpush.bf16.msrb.mxu0 %v3825_v7 }
 0x2af   :  { %v3250_v61 = vadd.f32 %v5998_v59, %v2416_v8 }
 0x2b1   :  { %3378 = vst [vmem:[#allocation3 + $0x10] sm:$0xff] %v3250_v61 }
 0x2b2   :  { %v2328_v19 = vpop.f32.mrf.mxu2  ;;  %v2417_v63 = vpop.f32.mrf.mxu3 }
 0x2b3   :  { %v2329_v36 = vadd.f32 %v2328_v19, %v2240_v62  ;;  %v2153_v11 = vpop.f32.mrf.mxu0  ;;  %v2242_v56 = vpop.f32.mrf.mxu1 }
 0x2b4   :  { %v2243_v9 = vadd.f32 %v2242_v56, %v2153_v11  ;;  %v6314_v56 = vld [vmem:[#allocation6_spill] sm:$0xff] }
 0x2b5   :  { %v2418_v37 = vadd.f32 %v2417_v63, %v2329_v36 }
 0x2b6   :  { %2192 = vmatmul.bf16.gmra.mxu0 %v5220_v58  ;;  %2281 = vmatmul.bf16.gmra.mxu1 %v5228_v5 }
 0x2b7   :  { %v3254_v4 = vadd.f32 %v5998_v59, %v2418_v37  ;;  %2370 = vmatmul.bf16.gmra.mxu2 %v5230_v6  ;;  %2459 = vmatmul.bf16.gmra.mxu3 %v5232_v10 }
 0x2b9   :  { %3382 = vst [vmem:[#allocation3 + $0x30] sm:$0xff] %v3254_v4 }
 0x2ba   :  { %v2331_v18 = vpop.f32.mrf.mxu2  ;;  %v2420_v61 = vpop.f32.mrf.mxu3 }
 0x2bb   :  { %v2332_v8 = vadd.f32 %v2331_v18, %v2243_v9  ;;  %v2155_v62 = vpop.f32.mrf.mxu0  ;;  %v2244_v39 = vpop.f32.mrf.mxu1  ;;  %v6315_v9 = vld [vmem:[#allocation7_spill] sm:$0xff]  ;;  %v6316_v18 = vld [vmem:[#allocation8_spill] sm:$0xff] }
 0x2bc   :  { %v2245_v7 = vadd.f32 %v2244_v39, %v2155_v62  ;;  %v4062_v62 = vld [vmem:[%s6225_s1 + $0x238] sm:$0xf0] }
 0x2bd   :  { %v2421_v31 = vadd.f32 %v2420_v61, %v2332_v8  ;;  %v6317_v8 = vld [vmem:[#allocation9_spill] sm:$0xff]  ;;  %v4423_v61 = vld [vmem:[%s6225_s1 + $0x22c] sm:$0xf] }
 0x2bf   :  { %v3258_v19 = vadd.f32 %v5998_v59, %v2421_v31  ;;  %v4065_v31 = vor.u32 %v4423_v61, %v4062_v62  ;;  %v4359_v62 = vld [vmem:[%s6225_s1 + $0x2c] sm:$0xf] }
 0x2c1   :  { %3386 = vst [vmem:[#allocation3 + $0x50] sm:$0xff] %v3258_v19  ;;  %v4455_v19 = vld [vmem:[%s6225_s1 + $0x32c] sm:$0xf]  ;;  %2679 = vmatpush.bf16.msrb.mxu2 %v4065_v31 }
 0x2c2   :  { %v2333_v38 = vpop.f32.mrf.mxu2  ;;  %v2422_v36 = vpop.f32.mrf.mxu3  ;;  %v4391_v31 = vld [vmem:[%s6225_s1 + $0x12c] sm:$0xf] }
 0x2c3   :  { %v2334_v29 = vadd.f32 %v2333_v38, %v2245_v7  ;;  %v2158_v63 = vpop.f32.mrf.mxu0  ;;  %v2247_v11 = vpop.f32.mrf.mxu1  ;;  %v4190_v7 = vld [vmem:[%s6225_s1 + $0x338] sm:$0xf0] }
 0x2c4   :  { %v2248_v4 = vadd.f32 %v2247_v11, %v2158_v63  ;;  %v4193_v63 = vor.u32 %v4455_v19, %v4190_v7  ;;  %v3934_v19 = vld [vmem:[%s6225_s1 + $0x138] sm:$0xf0] }
 0x2c5   :  { %v2423_v30 = vadd.f32 %v2422_v36, %v2334_v29 }
 0x2c6   :  { %2197 = vmatmul.bf16.gmra.mxu0 %v6314_v56  ;;  %2286 = vmatmul.bf16.gmra.mxu1 %v6315_v9  ;;  %v6321_v9 = vld [vmem:[#allocation13_spill] sm:$0xff] }
 0x2c7   :  { %v3262_v37 = vadd.f32 %v5998_v59, %v2423_v30  ;;  %2375 = vmatmul.bf16.gmra.mxu2 %v6316_v18  ;;  %2464 = vmatmul.bf16.gmra.mxu3 %v6317_v8  ;;  %v3806_v8 = vld [vmem:[%s6225_s1 + $0x38] sm:$0xf0]  ;;  %v6320_v18 = vld [vmem:[#allocation12_spill] sm:$0xff] }
 0x2c8   :  { %2768 = vmatpush.bf16.msrb.mxu3 %v4193_v63 }
 0x2c9   :  { %3390 = vst [vmem:[#allocation3 + $0x70] sm:$0xff] %v3262_v37 }
 0x2ca   :  { %v2336_v39 = vpop.f32.mrf.mxu2  ;;  %v2425_v29 = vpop.f32.mrf.mxu3 }
 0x2cb   :  { %v2337_v38 = vadd.f32 %v2336_v39, %v2248_v4  ;;  %v2160_v36 = vpop.f32.mrf.mxu0  ;;  %v2249_v11 = vpop.f32.mrf.mxu1  ;;  %v3809_v39 = vor.u32 %v4359_v62, %v3806_v8  ;;  %v6319_v62 = vld [vmem:[#allocation11_spill] sm:$0xff] }
 0x2cc   :  { %v2250_v61 = vadd.f32 %v2249_v11, %v2160_v36  ;;  %v3937_v36 = vor.u32 %v4391_v31, %v3934_v19 }
 0x2cd   :  { %v2426_v30 = vadd.f32 %v2425_v29, %v2337_v38  ;;  %2501 = vmatpush.bf16.msrb.mxu0 %v3809_v39 }
 0x2ce   :  { %2590 = vmatpush.bf16.msrb.mxu1 %v3937_v36 }
 0x2cf   :  { %v3266_v37 = vadd.f32 %v5998_v59, %v2426_v30  ;;  %v6318_v30 = vld [vmem:[#allocation10_spill] sm:$0xff] }
 0x2d1   :  { %3394 = vst [vmem:[#allocation3 + $0x90] sm:$0xff] %v3266_v37 }
 0x2d2   :  { %v2338_v4 = vpop.f32.mrf.mxu2  ;;  %v2427_v38 = vpop.f32.mrf.mxu3 }
 0x2d3   :  { %v2339_v7 = vadd.f32 %v2338_v4, %v2250_v61  ;;  %v2163_v29 = vpop.f32.mrf.mxu0  ;;  %v2252_v63 = vpop.f32.mrf.mxu1 }
 0x2d4   :  { %v2253_v37 = vadd.f32 %v2252_v63, %v2163_v29 }
 0x2d5   :  { %v2428_v11 = vadd.f32 %v2427_v38, %v2339_v7 }
 0x2d6   :  { %2202 = vmatmul.bf16.gmra.mxu0 %v6318_v30  ;;  %2291 = vmatmul.bf16.gmra.mxu1 %v6319_v62 }
 0x2d7   :  { %v3270_v8 = vadd.f32 %v5998_v59, %v2428_v11  ;;  %2380 = vmatmul.bf16.gmra.mxu2 %v6320_v18  ;;  %2469 = vmatmul.bf16.gmra.mxu3 %v6321_v9  ;;  %v6322_v18 = vld [vmem:[#allocation14_spill] sm:$0xff] }
 0x2d9   :  { %3398 = vst [vmem:[#allocation3 + $0xb0] sm:$0xff] %v3270_v8 }
 0x2da   :  { %v2341_v61 = vpop.f32.mrf.mxu2  ;;  %v2430_v56 = vpop.f32.mrf.mxu3 }
 0x2db   :  { %v2342_v4 = vadd.f32 %v2341_v61, %v2253_v37  ;;  %v2165_v31 = vpop.f32.mrf.mxu0  ;;  %v2254_v19 = vpop.f32.mrf.mxu1  ;;  %v6323_v37 = vld [vmem:[#allocation15_spill] sm:$0xff]  ;;  %v6324_v61 = vld [vmem:[#allocation16_spill] sm:$0xff] }
 0x2dc   :  { %v2255_v38 = vadd.f32 %v2254_v19, %v2165_v31  ;;  %v4046_v31 = vld [vmem:[%s6225_s1 + $0x218] sm:$0xf0] }
 0x2dd   :  { %v2431_v39 = vadd.f32 %v2430_v56, %v2342_v4  ;;  %v6325_v56 = vld [vmem:[#allocation17_spill] sm:$0xff]  ;;  %v4419_v4 = vld [vmem:[%s6225_s1 + $0x20c] sm:$0xf] }
 0x2df   :  { %v3274_v7 = vadd.f32 %v5998_v59, %v2431_v39  ;;  %v4049_v39 = vor.u32 %v4419_v4, %v4046_v31  ;;  %v4355_v31 = vld [vmem:[%s6225_s1 + $0xc] sm:$0xf] }
 0x2e1   :  { %3402 = vst [vmem:[#allocation3 + $0xd0] sm:$0xff] %v3274_v7  ;;  %2680 = vmatpush.bf16.msrb.mxu2 %v4049_v39  ;;  %v4387_v39 = vld [vmem:[%s6225_s1 + $0x10c] sm:$0xf] }
 0x2e2   :  { %v2343_v36 = vpop.f32.mrf.mxu2  ;;  %v2432_v29 = vpop.f32.mrf.mxu3 }
 0x2e3   :  { %v2344_v11 = vadd.f32 %v2343_v36, %v2255_v38  ;;  %v2168_v63 = vpop.f32.mrf.mxu0  ;;  %v2257_v62 = vpop.f32.mrf.mxu1 }
 0x2e4   :  { %v2258_v9 = vadd.f32 %v2257_v62, %v2168_v63  ;;  %v4174_v62 = vld [vmem:[%s6225_s1 + $0x318] sm:$0xf0] }
 0x2e5   :  { %v2433_v30 = vadd.f32 %v2432_v29, %v2344_v11 }
 0x2e6   :  { %2207 = vmatmul.bf16.gmra.mxu0 %v6322_v18  ;;  %2296 = vmatmul.bf16.gmra.mxu1 %v6323_v37  ;;  %v6329_v37 = vld [vmem:[#allocation21_spill] sm:$0xff] }
 0x2e7   :  { %v3278_v8 = vadd.f32 %v5998_v59, %v2433_v30  ;;  %2385 = vmatmul.bf16.gmra.mxu2 %v6324_v61  ;;  %2474 = vmatmul.bf16.gmra.mxu3 %v6325_v56  ;;  %v4451_v30 = vld [vmem:[%s6225_s1 + $0x30c] sm:$0xf]  ;;  %v3790_v56 = vld [vmem:[%s6225_s1 + $0x18] sm:$0xf0]  ;;  %v6328_v61 = vld [vmem:[#allocation20_spill] sm:$0xff] }
 0x2e8   :  { %v4177_v11 = vor.u32 %v4451_v30, %v4174_v62  ;;  %v3918_v30 = vld [vmem:[%s6225_s1 + $0x118] sm:$0xf0] }
 0x2e9   :  { %3406 = vst [vmem:[#allocation3 + $0xf0] sm:$0xff] %v3278_v8 }
 0x2ea   :  { %v2346_v19 = vpop.f32.mrf.mxu2  ;;  %v2435_v38 = vpop.f32.mrf.mxu3  ;;  %2769 = vmatpush.bf16.msrb.mxu3 %v4177_v11 }
 0x2eb   :  { %v2347_v7 = vadd.f32 %v2346_v19, %v2258_v9  ;;  %v2170_v36 = vpop.f32.mrf.mxu0  ;;  %v2259_v29 = vpop.f32.mrf.mxu1  ;;  %v3793_v19 = vor.u32 %v4355_v31, %v3790_v56  ;;  %v6327_v31 = vld [vmem:[#allocation19_spill] sm:$0xff] }
 0x2ec   :  { %v2260_v4 = vadd.f32 %v2259_v29, %v2170_v36  ;;  %v3921_v36 = vor.u32 %v4387_v39, %v3918_v30 }
 0x2ed   :  { %v2436_v63 = vadd.f32 %v2435_v38, %v2347_v7  ;;  %2502 = vmatpush.bf16.msrb.mxu0 %v3793_v19 }
 0x2ee   :  { %2591 = vmatpush.bf16.msrb.mxu1 %v3921_v36 }
 0x2ef   :  { %v3282_v8 = vadd.f32 %v5998_v59, %v2436_v63  ;;  %v6326_v63 = vld [vmem:[#allocation18_spill] sm:$0xff] }
 0x2f1   :  { %3410 = vst [vmem:[#allocation3 + $0x110] sm:$0xff] %v3282_v8 }
 0x2f2   :  { %v2348_v9 = vpop.f32.mrf.mxu2  ;;  %v2437_v7 = vpop.f32.mrf.mxu3 }
 0x2f3   :  { %v2349_v62 = vadd.f32 %v2348_v9, %v2260_v4  ;;  %v2173_v38 = vpop.f32.mrf.mxu0  ;;  %v2262_v11 = vpop.f32.mrf.mxu1 }
 0x2f4   :  { %v2263_v8 = vadd.f32 %v2262_v11, %v2173_v38 }
 0x2f5   :  { %v2438_v29 = vadd.f32 %v2437_v7, %v2349_v62 }
 0x2f6   :  { %2212 = vmatmul.bf16.gmra.mxu0 %v6326_v63  ;;  %2301 = vmatmul.bf16.gmra.mxu1 %v6327_v31 }
 0x2f7   :  { %v3286_v56 = vadd.f32 %v5998_v59, %v2438_v29  ;;  %2390 = vmatmul.bf16.gmra.mxu2 %v6328_v61  ;;  %2479 = vmatmul.bf16.gmra.mxu3 %v6329_v37 }
 0x2f9   :  { %3414 = vst [vmem:[#allocation3 + $0x130] sm:$0xff] %v3286_v56 }
 0x2fa   :  { %v2351_v4 = vpop.f32.mrf.mxu2  ;;  %v2440_v18 = vpop.f32.mrf.mxu3 }
 0x2fb   :  { %v2352_v9 = vadd.f32 %v2351_v4, %v2263_v8  ;;  %v2175_v39 = vpop.f32.mrf.mxu0  ;;  %v2264_v30 = vpop.f32.mrf.mxu1 }
 0x2fc   :  { %v2265_v7 = vadd.f32 %v2264_v30, %v2175_v39 }
 0x2fd   :  { %v2441_v19 = vadd.f32 %v2440_v18, %v2352_v9  ;;  %v6330_v18 = vld [vmem:[#allocation25_spill] sm:$0xff] }
 0x2ff   :  { %v3290_v62 = vadd.f32 %v5998_v59, %v2441_v19 }
 0x301   :  { %3418 = vst [vmem:[#allocation3 + $0x150] sm:$0xff] %v3290_v62 }
 0x302   :  { %v2353_v36 = vpop.f32.mrf.mxu2  ;;  %v2442_v38 = vpop.f32.mrf.mxu3 }
 0x303   :  { %v2354_v29 = vadd.f32 %v2353_v36, %v2265_v7  ;;  %v2178_v11 = vpop.f32.mrf.mxu0  ;;  %v2267_v31 = vpop.f32.mrf.mxu1 }
 0x304   :  { %v2268_v37 = vadd.f32 %v2267_v31, %v2178_v11 }
 0x305   :  { %v2443_v63 = vadd.f32 %v2442_v38, %v2354_v29 }
 0x306   :  { %2217 = vmatmul.bf16.gmra.mxu0 %v6310_v22  ;;  %2306 = vmatmul.bf16.gmra.mxu1 %v6311_v28 }
 0x307   :  { %v3294_v56 = vadd.f32 %v5998_v59, %v2443_v63  ;;  %2395 = vmatmul.bf16.gmra.mxu2 %v6312_v41  ;;  %2484 = vmatmul.bf16.gmra.mxu3 %v6330_v18 }
 0x309   :  { %3422 = vst [vmem:[#allocation3 + $0x170] sm:$0xff] %v3294_v56 }
 0x30a   :  { %v2356_v8 = vpop.f32.mrf.mxu2  ;;  %v2445_v9 = vpop.f32.mrf.mxu3 }
 0x30b   :  { %v2357_v4 = vadd.f32 %v2356_v8, %v2268_v37  ;;  %v2180_v39 = vpop.f32.mrf.mxu0  ;;  %v2269_v30 = vpop.f32.mrf.mxu1  ;;  %v6331_v37 = vld [vmem:[#allocation26_spill] sm:$0xff]  ;;  %v6332_v8 = vld [vmem:[#allocation27_spill] sm:$0xff] }
 0x30c   :  { %v2270_v7 = vadd.f32 %v2269_v30, %v2180_v39 }
 0x30d   :  { %v2446_v19 = vadd.f32 %v2445_v9, %v2357_v4 }
 0x30f   :  { %v3298_v62 = vadd.f32 %v5998_v59, %v2446_v19 }
 0x311   :  { %3426 = vst [vmem:[#allocation3 + $0x190] sm:$0xff] %v3298_v62 }
 0x312   :  { %v2358_v36 = vpop.f32.mrf.mxu2  ;;  %v2447_v31 = vpop.f32.mrf.mxu3 }
 0x313   :  { %v2359_v63 = vadd.f32 %v2358_v36, %v2270_v7  ;;  %v2183_v29 = vpop.f32.mrf.mxu0  ;;  %v2272_v38 = vpop.f32.mrf.mxu1 }
 0x314   :  { %v2273_v18 = vadd.f32 %v2272_v38, %v2183_v29 }
 0x315   :  { %v2448_v11 = vadd.f32 %v2447_v31, %v2359_v63 }
 0x316   :  { %2222 = vmatmul.bf16.gmra.mxu0 %v5520_v16  ;;  %2311 = vmatmul.bf16.gmra.mxu1 %v6331_v37 }
 0x317   :  { %v3302_v56 = vadd.f32 %v5998_v59, %v2448_v11  ;;  %2400 = vmatmul.bf16.gmra.mxu2 %v5530_v60  ;;  %2489 = vmatmul.bf16.gmra.mxu3 %v6332_v8 }
 0x319   :  { %3430 = vst [vmem:[#allocation3 + $0x1b0] sm:$0xff] %v3302_v56 }
 0x31a   :  { %v2361_v4 = vpop.f32.mrf.mxu2  ;;  %v2450_v39 = vpop.f32.mrf.mxu3 }
 0x31b   :  { %v2362_v9 = vadd.f32 %v2361_v4, %v2273_v18  ;;  %v2185_v30 = vpop.f32.mrf.mxu0  ;;  %v2274_v19 = vpop.f32.mrf.mxu1 }
 0x31c   :  { %v2275_v36 = vadd.f32 %v2274_v19, %v2185_v30 }
 0x31d   :  { %v2451_v62 = vadd.f32 %v2450_v39, %v2362_v9 }
 0x31f   :  { %v3306_v7 = vadd.f32 %v5998_v59, %v2451_v62 }
 0x321   :  { %3434 = vst [vmem:[#allocation3 + $0x1d0] sm:$0xff] %v3306_v7 }
 0x322   :  { %v2363_v63 = vpop.f32.mrf.mxu2  ;;  %v2452_v29 = vpop.f32.mrf.mxu3 }
 0x323   :  { %v2364_v31 = vadd.f32 %v2363_v63, %v2275_v36  ;;  %v2188_v38 = vpop.f32.mrf.mxu0  ;;  %v2277_v11 = vpop.f32.mrf.mxu1 }
 0x324   :  { %v2278_v8 = vadd.f32 %v2277_v11, %v2188_v38 }
 0x325   :  { %v2453_v37 = vadd.f32 %v2452_v29, %v2364_v31 }
 0x326   :  { %2503 = vmatmul.bf16.vlgmr.msrb.gmra.mxu0 %v4770_v47  ;;  %2592 = vmatmul.bf16.vlgmr.msrb.gmra.mxu1 %v4778_v51 }
 0x327   :  { %v3310_v56 = vadd.f32 %v5998_v59, %v2453_v37  ;;  %2681 = vmatmul.bf16.vlgmr.msrb.gmra.mxu2 %v4780_v52  ;;  %2770 = vmatmul.bf16.vlgmr.msrb.gmra.mxu3 %v4782_v53 }
 0x329   :  { %3438 = vst [vmem:[#allocation3 + $0x1f0] sm:$0xff] %v3310_v56 }
 0x32a   :  { %v2366_v18 = vpop.f32.mrf.mxu2  ;;  %v2455_v9 = vpop.f32.mrf.mxu3 }
 0x32b   :  { %v2367_v4 = vadd.f32 %v2366_v18, %v2278_v8  ;;  %v2190_v39 = vpop.f32.mrf.mxu0  ;;  %v2279_v30 = vpop.f32.mrf.mxu1 }
 0x32c   :  { %v2280_v47 = vadd.f32 %v2279_v30, %v2190_v39 }
 0x32d   :  { %v2456_v19 = vadd.f32 %v2455_v9, %v2367_v4 }
 0x32f   :  { %v3314_v62 = vadd.f32 %v5998_v59, %v2456_v19 }
 0x331   :  { %3442 = vst [vmem:[#allocation3 + $0x210] sm:$0xff] %v3314_v62 }
 0x332   :  { %v2368_v7 = vpop.f32.mrf.mxu2  ;;  %v2457_v36 = vpop.f32.mrf.mxu3 }
 0x333   :  { %v2369_v37 = vadd.f32 %v2368_v7, %v2280_v47  ;;  %v2193_v63 = vpop.f32.mrf.mxu0  ;;  %v2282_v51 = vpop.f32.mrf.mxu1 }
 0x334   :  { %v2283_v53 = vadd.f32 %v2282_v51, %v2193_v63 }
 0x335   :  { %v2458_v31 = vadd.f32 %v2457_v36, %v2369_v37 }
 0x336   :  { %2508 = vmatmul.bf16.gmra.mxu0 %v4836_v12  ;;  %2597 = vmatmul.bf16.gmra.mxu1 %v4838_v13 }
 0x337   :  { %v3318_v52 = vadd.f32 %v5998_v59, %v2458_v31  ;;  %2686 = vmatmul.bf16.gmra.mxu2 %v4840_v14  ;;  %2775 = vmatmul.bf16.gmra.mxu3 %v4842_v15 }
 0x339   :  { %3446 = vst [vmem:[#allocation3 + $0x230] sm:$0xff] %v3318_v52 }
 0x33a   :  { %v2371_v8 = vpop.f32.mrf.mxu2  ;;  %v2460_v38 = vpop.f32.mrf.mxu3 }
 0x33b   :  { %v2372_v29 = vadd.f32 %v2371_v8, %v2283_v53  ;;  %v2195_v11 = vpop.f32.mrf.mxu0  ;;  %v2284_v56 = vpop.f32.mrf.mxu1 }
 0x33c   :  { %v2285_v12 = vadd.f32 %v2284_v56, %v2195_v11 }
 0x33d   :  { %v2461_v18 = vadd.f32 %v2460_v38, %v2372_v29 }
 0x33f   :  { %v3322_v4 = vadd.f32 %v5998_v59, %v2461_v18 }
 0x341   :  { %3450 = vst [vmem:[#allocation3 + $0x250] sm:$0xff] %v3322_v4 }
 0x342   :  { %v2373_v9 = vpop.f32.mrf.mxu2  ;;  %v2462_v30 = vpop.f32.mrf.mxu3 }
 0x343   :  { %v2374_v39 = vadd.f32 %v2373_v9, %v2285_v12  ;;  %v2198_v19 = vpop.f32.mrf.mxu0  ;;  %v2287_v13 = vpop.f32.mrf.mxu1 }
 0x344   :  { %v2288_v15 = vadd.f32 %v2287_v13, %v2198_v19 }
 0x345   :  { %v2463_v62 = vadd.f32 %v2462_v30, %v2374_v39 }
 0x346   :  { %2513 = vmatmul.bf16.gmra.mxu0 %v4872_v24  ;;  %2602 = vmatmul.bf16.gmra.mxu1 %v4874_v25 }
 0x347   :  { %v3326_v14 = vadd.f32 %v5998_v59, %v2463_v62  ;;  %2691 = vmatmul.bf16.gmra.mxu2 %v4876_v26  ;;  %2780 = vmatmul.bf16.gmra.mxu3 %v4878_v27 }
 0x349   :  { %3454 = vst [vmem:[#allocation3 + $0x270] sm:$0xff] %v3326_v14 }
 0x34a   :  { %v2376_v47 = vpop.f32.mrf.mxu2  ;;  %v2465_v37 = vpop.f32.mrf.mxu3 }
 0x34b   :  { %v2377_v7 = vadd.f32 %v2376_v47, %v2288_v15  ;;  %v2200_v36 = vpop.f32.mrf.mxu0  ;;  %v2289_v63 = vpop.f32.mrf.mxu1 }
 0x34c   :  { %v2290_v24 = vadd.f32 %v2289_v63, %v2200_v36 }
 0x34d   :  { %v2466_v51 = vadd.f32 %v2465_v37, %v2377_v7 }
 0x34f   :  { %v3330_v31 = vadd.f32 %v5998_v59, %v2466_v51 }
 0x351   :  { %3458 = vst [vmem:[#allocation3 + $0x290] sm:$0xff] %v3330_v31 }
 0x352   :  { %v2378_v52 = vpop.f32.mrf.mxu2  ;;  %v2467_v8 = vpop.f32.mrf.mxu3 }
 0x353   :  { %v2379_v53 = vadd.f32 %v2378_v52, %v2290_v24  ;;  %v2203_v29 = vpop.f32.mrf.mxu0  ;;  %v2292_v25 = vpop.f32.mrf.mxu1 }
 0x354   :  { %v2293_v27 = vadd.f32 %v2292_v25, %v2203_v29 }
 0x355   :  { %v2468_v38 = vadd.f32 %v2467_v8, %v2379_v53 }
 0x356   :  { %2518 = vmatmul.bf16.gmra.mxu0 %v4932_v49  ;;  %2607 = vmatmul.bf16.gmra.mxu1 %v4934_v50 }
 0x357   :  { %v3334_v26 = vadd.f32 %v5998_v59, %v2468_v38  ;;  %2696 = vmatmul.bf16.gmra.mxu2 %v4936_v54  ;;  %2785 = vmatmul.bf16.gmra.mxu3 %v4938_v55 }
 0x359   :  { %3462 = vst [vmem:[#allocation3 + $0x2b0] sm:$0xff] %v3334_v26 }
 0x35a   :  { %v2381_v11 = vpop.f32.mrf.mxu2  ;;  %v2470_v18 = vpop.f32.mrf.mxu3 }
 0x35b   :  { %v2382_v56 = vadd.f32 %v2381_v11, %v2293_v27  ;;  %v2205_v4 = vpop.f32.mrf.mxu0  ;;  %v2294_v12 = vpop.f32.mrf.mxu1 }
 0x35c   :  { %v2295_v49 = vadd.f32 %v2294_v12, %v2205_v4 }
 0x35d   :  { %v2471_v9 = vadd.f32 %v2470_v18, %v2382_v56 }
 0x35f   :  { %v3338_v39 = vadd.f32 %v5998_v59, %v2471_v9 }
 0x361   :  { %3466 = vst [vmem:[#allocation3 + $0x2d0] sm:$0xff] %v3338_v39 }
 0x362   :  { %v2383_v30 = vpop.f32.mrf.mxu2  ;;  %v2472_v13 = vpop.f32.mrf.mxu3 }
 0x363   :  { %v2384_v19 = vadd.f32 %v2383_v30, %v2295_v49  ;;  %v2208_v62 = vpop.f32.mrf.mxu0  ;;  %v2297_v50 = vpop.f32.mrf.mxu1 }
 0x364   :  { %v2298_v55 = vadd.f32 %v2297_v50, %v2208_v62 }
 0x365   :  { %v2473_v14 = vadd.f32 %v2472_v13, %v2384_v19 }
 0x366   :  { %2523 = vmatmul.bf16.gmra.mxu0 %v4968_v0  ;;  %2612 = vmatmul.bf16.gmra.mxu1 %v4970_v1 }
 0x367   :  { %v3342_v54 = vadd.f32 %v5998_v59, %v2473_v14  ;;  %2701 = vmatmul.bf16.gmra.mxu2 %v4972_v2  ;;  %2790 = vmatmul.bf16.gmra.mxu3 %v4974_v3 }
 0x369   :  { %3470 = vst [vmem:[#allocation3 + $0x2f0] sm:$0xff] %v3342_v54 }
 0x36a   :  { %v2386_v15 = vpop.f32.mrf.mxu2  ;;  %v2475_v7 = vpop.f32.mrf.mxu3 }
 0x36b   :  { %v2387_v47 = vadd.f32 %v2386_v15, %v2298_v55  ;;  %v2210_v37 = vpop.f32.mrf.mxu0  ;;  %v2299_v36 = vpop.f32.mrf.mxu1 }
 0x36c   :  { %v2300_v0 = vadd.f32 %v2299_v36, %v2210_v37 }
 0x36d   :  { %v2476_v63 = vadd.f32 %v2475_v7, %v2387_v47 }
 0x36f   :  { %v3346_v51 = vadd.f32 %v5998_v59, %v2476_v63 }
 0x371   :  { %3474 = vst [vmem:[#allocation3 + $0x310] sm:$0xff] %v3346_v51 }
 0x372   :  { %v2388_v31 = vpop.f32.mrf.mxu2  ;;  %v2477_v52 = vpop.f32.mrf.mxu3 }
 0x373   :  { %v2389_v24 = vadd.f32 %v2388_v31, %v2300_v0  ;;  %v2213_v53 = vpop.f32.mrf.mxu0  ;;  %v2302_v1 = vpop.f32.mrf.mxu1 }
 0x374   :  { %v2303_v3 = vadd.f32 %v2302_v1, %v2213_v53 }
 0x375   :  { %v2478_v8 = vadd.f32 %v2477_v52, %v2389_v24 }
 0x376   :  { %2528 = vmatmul.bf16.gmra.mxu0 %v5028_v32  ;;  %2617 = vmatmul.bf16.gmra.mxu1 %v5030_v33 }
 0x377   :  { %v3350_v2 = vadd.f32 %v5998_v59, %v2478_v8  ;;  %2706 = vmatmul.bf16.gmra.mxu2 %v5032_v34  ;;  %2795 = vmatmul.bf16.gmra.mxu3 %v5034_v35 }
 0x379   :  { %3478 = vst [vmem:[#allocation3 + $0x330] sm:$0xff] %v3350_v2 }
 0x37a   :  { %v2391_v29 = vpop.f32.mrf.mxu2  ;;  %v2480_v38 = vpop.f32.mrf.mxu3 }
 0x37b   :  { %v2392_v25 = vadd.f32 %v2391_v29, %v2303_v3  ;;  %v2215_v26 = vpop.f32.mrf.mxu0  ;;  %v2304_v27 = vpop.f32.mrf.mxu1 }
 0x37c   :  { %v2305_v32 = vadd.f32 %v2304_v27, %v2215_v26 }
 0x37d   :  { %v2481_v11 = vadd.f32 %v2480_v38, %v2392_v25  ;;  %v4486_v38 = vld [vmem:[%s6226_s2] sm:$0xf]  ;;  %s4513_s2 = smov [#allocation3]  }
 0x37e   :  { %v6159_v26 = vperm.slane %v4486_v38, 3  ;;  %s3508_s20 = sshll.u32 %s4513_s2, 4  ;;  %s3509_s20 = int_to_ptr.vmem [resolvable:$true] %s3508_s20 }
 0x37f   :  { %v3354_v56 = vadd.f32 %v5998_v59, %v2481_v11 }
 0x381   :  { %3482 = vst [vmem:[#allocation3 + $0x350] sm:$0xff] %v3354_v56 }
 0x382   :  { %v2393_v18 = vpop.f32.mrf.mxu2  ;;  %v2482_v12 = vpop.f32.mrf.mxu3 }
 0x383   :  { %v2394_v4 = vadd.f32 %v2393_v18, %v2305_v32  ;;  %v2218_v9 = vpop.f32.mrf.mxu0  ;;  %v2307_v33 = vpop.f32.mrf.mxu1 }
 0x384   :  { %v2308_v35 = vadd.f32 %v2307_v33, %v2218_v9 }
 0x385   :  { %v2483_v39 = vadd.f32 %v2482_v12, %v2394_v4 }
 0x386   :  { %2533 = vmatmul.bf16.gmra.mxu0 %v5064_v44  ;;  %2622 = vmatmul.bf16.gmra.mxu1 %v5066_v45 }
 0x387   :  { %v3358_v34 = vadd.f32 %v5998_v59, %v2483_v39  ;;  %2711 = vmatmul.bf16.gmra.mxu2 %v5068_v46  ;;  %2800 = vmatmul.bf16.gmra.mxu3 %v5070_v48 }
 0x389   :  { %3486 = vst [vmem:[#allocation3 + $0x370] sm:$0xff] %v3358_v34 }
 0x38a   :  { %v2396_v49 = vpop.f32.mrf.mxu2  ;;  %v2485_v19 = vpop.f32.mrf.mxu3 }
 0x38b   :  { %v2397_v30 = vadd.f32 %v2396_v49, %v2308_v35  ;;  %v2220_v13 = vpop.f32.mrf.mxu0  ;;  %v2309_v62 = vpop.f32.mrf.mxu1 }
 0x38c   :  { %v2310_v44 = vadd.f32 %v2309_v62, %v2220_v13 }
 0x38d   :  { %v2486_v50 = vadd.f32 %v2485_v19, %v2397_v30 }
 0x38f   :  { %v3362_v14 = vadd.f32 %v5998_v59, %v2486_v50 }
 0x391   :  { %3490 = vst [vmem:[#allocation3 + $0x390] sm:$0xff] %v3362_v14 }
 0x392   :  { %v2398_v54 = vpop.f32.mrf.mxu2  ;;  %v2487_v15 = vpop.f32.mrf.mxu3 }
 0x393   :  { %v2399_v55 = vadd.f32 %v2398_v54, %v2310_v44  ;;  %v2223_v47 = vpop.f32.mrf.mxu0  ;;  %v2312_v45 = vpop.f32.mrf.mxu1 }
 0x394   :  { %v2313_v48 = vadd.f32 %v2312_v45, %v2223_v47  ;;  %v6336_v47 = vld [vmem:[#allocation9_spill] sm:$0xff] }
 0x395   :  { %v2488_v7 = vadd.f32 %v2487_v15, %v2399_v55  ;;  %v6334_v55 = vld [vmem:[#allocation7_spill] sm:$0xff]  ;;  %v6335_v15 = vld [vmem:[#allocation8_spill] sm:$0xff] }
 0x396   :  { %2538 = vmatmul.bf16.gmra.mxu0 %v5121_v17  ;;  %2627 = vmatmul.bf16.gmra.mxu1 %v5126_v20 }
 0x397   :  { %v3366_v46 = vadd.f32 %v5998_v59, %v2488_v7  ;;  %2716 = vmatmul.bf16.gmra.mxu2 %v5128_v21  ;;  %2805 = vmatmul.bf16.gmra.mxu3 %v5130_v23 }
 0x399   :  { %3494 = vst [vmem:[#allocation3 + $0x3b0] sm:$0xff] %v3366_v46 }
 0x39a   :  { %v2401_v37 = vpop.f32.mrf.mxu2  ;;  %v2490_v63 = vpop.f32.mrf.mxu3 }
 0x39b   :  { %v2402_v36 = vadd.f32 %v2401_v37, %v2313_v48  ;;  %v2225_v51 = vpop.f32.mrf.mxu0  ;;  %v2314_v0 = vpop.f32.mrf.mxu1 }
 0x39c   :  { %v2315_v17 = vadd.f32 %v2314_v0, %v2225_v51 }
 0x39d   :  { %v2491_v31 = vadd.f32 %v2490_v63, %v2402_v36 }
 0x39f   :  { %v3370_v24 = vadd.f32 %v5998_v59, %v2491_v31 }
 0x3a1   :  { %3498 = vst [vmem:[#allocation3 + $0x3d0] sm:$0xff] %v3370_v24 }
 0x3a2   :  { %v2403_v52 = vpop.f32.mrf.mxu2  ;;  %v2492_v1 = vpop.f32.mrf.mxu3 }
 0x3a3   :  { %v2404_v53 = vadd.f32 %v2403_v52, %v2315_v17  ;;  %v2504_v8 = vpop.f32.mrf.mxu0  ;;  %v2593_v20 = vpop.f32.mrf.mxu1 }
 0x3a4   :  { %v2594_v23 = vadd.f32 %v2593_v20, %v2504_v8 }
 0x3a5   :  { %v2493_v2 = vadd.f32 %v2492_v1, %v2404_v53  ;;  %v6337_v1 = vld [vmem:[#allocation10_spill] sm:$0xff] }
 0x3a6   :  { %2543 = vmatmul.bf16.gmra.mxu0 %v5160_v40  ;;  %2632 = vmatmul.bf16.gmra.mxu1 %v5162_v42 }
 0x3a7   :  { %v3374_v21 = vadd.f32 %v5998_v59, %v2493_v2  ;;  %2721 = vmatmul.bf16.gmra.mxu2 %v5164_v43  ;;  %2810 = vmatmul.bf16.gmra.mxu3 %v5166_v57  ;;  %v6338_v2 = vld [vmem:[#allocation11_spill] sm:$0xff] }
 0x3a9   :  { %3502 = vst [vmem:[#allocation3 + $0x3f0] sm:$0xff] %v3374_v21  ;;  %v6339_v21 = vld [vmem:[#allocation12_spill] sm:$0xff] }
 0x3aa   :  { %v2682_v3 = vpop.f32.mrf.mxu2  ;;  %v2771_v25 = vpop.f32.mrf.mxu3 }
 0x3ab   :  { %v2683_v29 = vadd.f32 %v2682_v3, %v2594_v23  ;;  %v2506_v40 = vpop.f32.mrf.mxu0  ;;  %v2595_v27 = vpop.f32.mrf.mxu1  ;;  %v6340_v23 = vld [vmem:[#allocation13_spill] sm:$0xff] }
 0x3ac   :  { %v2596_v42 = vadd.f32 %v2595_v27, %v2506_v40 }
 0x3ad   :  { %v2772_v59 = vadd.f32 %v2771_v25, %v2683_v29 }
 0x3af   :  { %v3251_v11 = vadd.f32 %v6159_v26, %v2772_v59 }
 0x3b1   :  { %3379 = vst [vmem:[#allocation3 + $0x18] sm:$0xff] %v3251_v11 }
 0x3b2   :  { %v2684_v43 = vpop.f32.mrf.mxu2  ;;  %v2773_v57 = vpop.f32.mrf.mxu3 }
 0x3b3   :  { %v2685_v56 = vadd.f32 %v2684_v43, %v2596_v42  ;;  %v2509_v32 = vpop.f32.mrf.mxu0  ;;  %v2598_v18 = vpop.f32.mrf.mxu1 }
 0x3b4   :  { %v2599_v9 = vadd.f32 %v2598_v18, %v2509_v32 }
 0x3b5   :  { %v2774_v4 = vadd.f32 %v2773_v57, %v2685_v56 }
 0x3b6   :  { %2548 = vmatmul.bf16.gmra.mxu0 %v5220_v58  ;;  %2637 = vmatmul.bf16.gmra.mxu1 %v5228_v5 }
 0x3b7   :  { %v3255_v12 = vadd.f32 %v6159_v26, %v2774_v4  ;;  %2726 = vmatmul.bf16.gmra.mxu2 %v5230_v6  ;;  %2815 = vmatmul.bf16.gmra.mxu3 %v5232_v10  ;;  %v6333_v6 = vld [vmem:[#allocation6_spill] sm:$0xff] }
 0x3b8   :  { %v6341_v4 = vld [vmem:[#allocation14_spill] sm:$0xff] }
 0x3b9   :  { %3383 = vst [vmem:[#allocation3 + $0x38] sm:$0xff] %v3255_v12 }
 0x3ba   :  { %v2687_v33 = vpop.f32.mrf.mxu2  ;;  %v2776_v34 = vpop.f32.mrf.mxu3 }
 0x3bb   :  { %v2688_v39 = vadd.f32 %v2687_v33, %v2599_v9  ;;  %v2511_v35 = vpop.f32.mrf.mxu0  ;;  %v2600_v49 = vpop.f32.mrf.mxu1  ;;  %v6342_v33 = vld [vmem:[#allocation15_spill] sm:$0xff] }
 0x3bc   :  { %v2601_v58 = vadd.f32 %v2600_v49, %v2511_v35 }
 0x3bd   :  { %v2777_v30 = vadd.f32 %v2776_v34, %v2688_v39  ;;  %v6343_v39 = vld [vmem:[#allocation16_spill] sm:$0xff]  ;;  %v6344_v34 = vld [vmem:[#allocation17_spill] sm:$0xff] }
 0x3bf   :  { %v3259_v19 = vadd.f32 %v6159_v26, %v2777_v30 }
 0x3c1   :  { %3387 = vst [vmem:[#allocation3 + $0x58] sm:$0xff] %v3259_v19 }
 0x3c2   :  { %v2689_v13 = vpop.f32.mrf.mxu2  ;;  %v2778_v50 = vpop.f32.mrf.mxu3 }
 0x3c3   :  { %v2690_v62 = vadd.f32 %v2689_v13, %v2601_v58  ;;  %v2514_v14 = vpop.f32.mrf.mxu0  ;;  %v2603_v5 = vpop.f32.mrf.mxu1 }
 0x3c4   :  { %v2604_v54 = vadd.f32 %v2603_v5, %v2514_v14 }
 0x3c5   :  { %v2779_v44 = vadd.f32 %v2778_v50, %v2690_v62 }
 0x3c6   :  { %2553 = vmatmul.bf16.gmra.mxu0 %v6333_v6  ;;  %2642 = vmatmul.bf16.gmra.mxu1 %v6334_v55  ;;  %v6345_v55 = vld [vmem:[#allocation18_spill] sm:$0xff] }
 0x3c7   :  { %v3263_v10 = vadd.f32 %v6159_v26, %v2779_v44  ;;  %2731 = vmatmul.bf16.gmra.mxu2 %v6335_v15  ;;  %2820 = vmatmul.bf16.gmra.mxu3 %v6336_v47 }
 0x3c9   :  { %3391 = vst [vmem:[#allocation3 + $0x78] sm:$0xff] %v3263_v10 }
 0x3ca   :  { %v2692_v45 = vpop.f32.mrf.mxu2  ;;  %v2781_v46 = vpop.f32.mrf.mxu3 }
 0x3cb   :  { %v2693_v7 = vadd.f32 %v2692_v45, %v2604_v54  ;;  %v2516_v48 = vpop.f32.mrf.mxu0  ;;  %v2605_v37 = vpop.f32.mrf.mxu1  ;;  %v6346_v45 = vld [vmem:[#allocation19_spill] sm:$0xff] }
 0x3cc   :  { %v2606_v51 = vadd.f32 %v2605_v37, %v2516_v48 }
 0x3cd   :  { %v2782_v36 = vadd.f32 %v2781_v46, %v2693_v7  ;;  %v6347_v7 = vld [vmem:[#allocation21_spill] sm:$0xff] }
 0x3cf   :  { %v3267_v63 = vadd.f32 %v6159_v26, %v2782_v36 }
 0x3d1   :  { %3395 = vst [vmem:[#allocation3 + $0x98] sm:$0xff] %v3267_v63 }
 0x3d2   :  { %v2694_v0 = vpop.f32.mrf.mxu2  ;;  %v2783_v24 = vpop.f32.mrf.mxu3 }
 0x3d3   :  { %v2695_v31 = vadd.f32 %v2694_v0, %v2606_v51  ;;  %v2519_v17 = vpop.f32.mrf.mxu0  ;;  %v2608_v52 = vpop.f32.mrf.mxu1 }
 0x3d4   :  { %v2609_v20 = vadd.f32 %v2608_v52, %v2519_v17 }
 0x3d5   :  { %v2784_v53 = vadd.f32 %v2783_v24, %v2695_v31 }
 0x3d6   :  { %2558 = vmatmul.bf16.gmra.mxu0 %v6337_v1  ;;  %2647 = vmatmul.bf16.gmra.mxu1 %v6338_v2  ;;  %v6348_v2 = vld [vmem:[#allocation25_spill] sm:$0xff] }
 0x3d7   :  { %v3271_v8 = vadd.f32 %v6159_v26, %v2784_v53  ;;  %2736 = vmatmul.bf16.gmra.mxu2 %v6339_v21  ;;  %2825 = vmatmul.bf16.gmra.mxu3 %v6340_v23 }
 0x3d9   :  { %3399 = vst [vmem:[#allocation3 + $0xb8] sm:$0xff] %v3271_v8 }
 0x3da   :  { %v2697_v3 = vpop.f32.mrf.mxu2  ;;  %v2786_v25 = vpop.f32.mrf.mxu3 }
 0x3db   :  { %v2698_v29 = vadd.f32 %v2697_v3, %v2609_v20  ;;  %v2521_v38 = vpop.f32.mrf.mxu0  ;;  %v2610_v40 = vpop.f32.mrf.mxu1 }
 0x3dc   :  { %v2611_v11 = vadd.f32 %v2610_v40, %v2521_v38 }
 0x3dd   :  { %v2787_v27 = vadd.f32 %v2786_v25, %v2698_v29 }
 0x3df   :  { %v3275_v59 = vadd.f32 %v6159_v26, %v2787_v27 }
 0x3e1   :  { %3403 = vst [vmem:[#allocation3 + $0xd8] sm:$0xff] %v3275_v59 }
 0x3e2   :  { %v2699_v42 = vpop.f32.mrf.mxu2  ;;  %v2788_v56 = vpop.f32.mrf.mxu3 }
 0x3e3   :  { %v2700_v43 = vadd.f32 %v2699_v42, %v2611_v11  ;;  %v2524_v57 = vpop.f32.mrf.mxu0  ;;  %v2613_v32 = vpop.f32.mrf.mxu1 }
 0x3e4   :  { %v2614_v9 = vadd.f32 %v2613_v32, %v2524_v57  ;;  %v6349_v57 = vld [vmem:[#allocation26_spill] sm:$0xff]  ;;  %v6350_v32 = vld [vmem:[#allocation27_spill] sm:$0xff] }
 0x3e5   :  { %v2789_v18 = vadd.f32 %v2788_v56, %v2700_v43 }
 0x3e6   :  { %2563 = vmatmul.bf16.gmra.mxu0 %v6341_v4  ;;  %2652 = vmatmul.bf16.gmra.mxu1 %v6342_v33 }
 0x3e7   :  { %v3279_v12 = vadd.f32 %v6159_v26, %v2789_v18  ;;  %2741 = vmatmul.bf16.gmra.mxu2 %v6343_v39  ;;  %2830 = vmatmul.bf16.gmra.mxu3 %v6344_v34 }
 0x3e9   :  { %3407 = vst [vmem:[#allocation3 + $0xf8] sm:$0xff] %v3279_v12 }
 0x3ea   :  { %v2702_v35 = vpop.f32.mrf.mxu2  ;;  %v2791_v30 = vpop.f32.mrf.mxu3 }
 0x3eb   :  { %v2703_v49 = vadd.f32 %v2702_v35, %v2614_v9  ;;  %v2526_v19 = vpop.f32.mrf.mxu0  ;;  %v2615_v58 = vpop.f32.mrf.mxu1 }
 0x3ec   :  { %v2616_v50 = vadd.f32 %v2615_v58, %v2526_v19 }
 0x3ed   :  { %v2792_v13 = vadd.f32 %v2791_v30, %v2703_v49 }
 0x3ef   :  { %v3283_v62 = vadd.f32 %v6159_v26, %v2792_v13 }
 0x3f1   :  { %3411 = vst [vmem:[#allocation3 + $0x118] sm:$0xff] %v3283_v62 }
 0x3f2   :  { %v2704_v14 = vpop.f32.mrf.mxu2  ;;  %v2793_v44 = vpop.f32.mrf.mxu3 }
 0x3f3   :  { %v2705_v5 = vadd.f32 %v2704_v14, %v2616_v50  ;;  %v2529_v6 = vpop.f32.mrf.mxu0  ;;  %v2618_v10 = vpop.f32.mrf.mxu1 }
 0x3f4   :  { %v2619_v47 = vadd.f32 %v2618_v10, %v2529_v6 }
 0x3f5   :  { %v2794_v54 = vadd.f32 %v2793_v44, %v2705_v5 }
 0x3f6   :  { %2568 = vmatmul.bf16.gmra.mxu0 %v6345_v55  ;;  %2657 = vmatmul.bf16.gmra.mxu1 %v6346_v45 }
 0x3f7   :  { %v3287_v15 = vadd.f32 %v6159_v26, %v2794_v54  ;;  %2746 = vmatmul.bf16.gmra.mxu2 %v6328_v61  ;;  %2835 = vmatmul.bf16.gmra.mxu3 %v6347_v7 }
 0x3f9   :  { %3415 = vst [vmem:[#allocation3 + $0x138] sm:$0xff] %v3287_v15 }
 0x3fa   :  { %v2707_v46 = vpop.f32.mrf.mxu2  ;;  %v2796_v37 = vpop.f32.mrf.mxu3 }
 0x3fb   :  { %v2708_v48 = vadd.f32 %v2707_v46, %v2619_v47  ;;  %v2531_v36 = vpop.f32.mrf.mxu0  ;;  %v2620_v63 = vpop.f32.mrf.mxu1 }
 0x3fc   :  { %v2621_v31 = vadd.f32 %v2620_v63, %v2531_v36 }
 0x3fd   :  { %v2797_v51 = vadd.f32 %v2796_v37, %v2708_v48 }
 0x3ff   :  { %v3291_v0 = vadd.f32 %v6159_v26, %v2797_v51 }
 0x401   :  { %3419 = vst [vmem:[#allocation3 + $0x158] sm:$0xff] %v3291_v0 }
 0x402   :  { %v2709_v24 = vpop.f32.mrf.mxu2  ;;  %v2798_v52 = vpop.f32.mrf.mxu3 }
 0x403   :  { %v2710_v17 = vadd.f32 %v2709_v24, %v2621_v31  ;;  %v2534_v53 = vpop.f32.mrf.mxu0  ;;  %v2623_v1 = vpop.f32.mrf.mxu1 }
 0x404   :  { %v2624_v20 = vadd.f32 %v2623_v1, %v2534_v53 }
 0x405   :  { %v2799_v8 = vadd.f32 %v2798_v52, %v2710_v17 }
 0x406   :  { %2573 = vmatmul.bf16.gmra.mxu0 %v6310_v22  ;;  %2662 = vmatmul.bf16.gmra.mxu1 %v6311_v28 }
 0x407   :  { %v3295_v61 = vadd.f32 %v6159_v26, %v2799_v8  ;;  %2751 = vmatmul.bf16.gmra.mxu2 %v6312_v41  ;;  %2840 = vmatmul.bf16.gmra.mxu3 %v6348_v2 }
 0x409   :  { %3423 = vst [vmem:[#allocation3 + $0x178] sm:$0xff] %v3295_v61 }
 0x40a   :  { %v2712_v21 = vpop.f32.mrf.mxu2  ;;  %v2801_v3 = vpop.f32.mrf.mxu3 }
 0x40b   :  { %v2713_v23 = vadd.f32 %v2712_v21, %v2624_v20  ;;  %v2536_v29 = vpop.f32.mrf.mxu0  ;;  %v2625_v25 = vpop.f32.mrf.mxu1 }
 0x40c   :  { %v2626_v22 = vadd.f32 %v2625_v25, %v2536_v29 }
 0x40d   :  { %v2802_v38 = vadd.f32 %v2801_v3, %v2713_v23 }
 0x40f   :  { %v3299_v40 = vadd.f32 %v6159_v26, %v2802_v38 }
 0x411   :  { %3427 = vst [vmem:[#allocation3 + $0x198] sm:$0xff] %v3299_v40 }
 0x412   :  { %v2714_v27 = vpop.f32.mrf.mxu2  ;;  %v2803_v11 = vpop.f32.mrf.mxu3 }
 0x413   :  { %v2715_v59 = vadd.f32 %v2714_v27, %v2626_v22  ;;  %v2539_v42 = vpop.f32.mrf.mxu0  ;;  %v2628_v28 = vpop.f32.mrf.mxu1 }
 0x414   :  { %v2629_v56 = vadd.f32 %v2628_v28, %v2539_v42 }
 0x415   :  { %v2804_v43 = vadd.f32 %v2803_v11, %v2715_v59 }
 0x416   :  { %2578 = vmatmul.bf16.gmra.mxu0 %v5520_v16  ;;  %2667 = vmatmul.bf16.gmra.mxu1 %v6349_v57 }
 0x417   :  { %v3303_v41 = vadd.f32 %v6159_v26, %v2804_v43  ;;  %2756 = vmatmul.bf16.gmra.mxu2 %v5530_v60  ;;  %2845 = vmatmul.bf16.gmra.mxu3 %v6350_v32 }
 0x419   :  { %3431 = vst [vmem:[#allocation3 + $0x1b8] sm:$0xff] %v3303_v41 }
 0x41a   :  { %v2717_v18 = vpop.f32.mrf.mxu2  ;;  %v2806_v12 = vpop.f32.mrf.mxu3 }
 0x41b   :  { %v2718_v4 = vadd.f32 %v2717_v18, %v2629_v56  ;;  %v2541_v9 = vpop.f32.mrf.mxu0  ;;  %v2630_v33 = vpop.f32.mrf.mxu1 }
 0x41c   :  { %v2631_v16 = vadd.f32 %v2630_v33, %v2541_v9 }
 0x41d   :  { %v2807_v39 = vadd.f32 %v2806_v12, %v2718_v4 }
 0x41f   :  { %v3307_v34 = vadd.f32 %v6159_v26, %v2807_v39 }
 0x421   :  { %3435 = vst [vmem:[#allocation3 + $0x1d8] sm:$0xff] %v3307_v34 }
 0x422   :  { %v2719_v35 = vpop.f32.mrf.mxu2  ;;  %v2808_v30 = vpop.f32.mrf.mxu3 }
 0x423   :  { %v2720_v49 = vadd.f32 %v2719_v35, %v2631_v16  ;;  %v2544_v19 = vpop.f32.mrf.mxu0  ;;  %v2633_v58 = vpop.f32.mrf.mxu1 }
 0x424   :  { %v2634_v62 = vadd.f32 %v2633_v58, %v2544_v19 }
 0x425   :  { %v2809_v13 = vadd.f32 %v2808_v30, %v2720_v49 }
 0x427   :  { %v3311_v60 = vadd.f32 %v6159_v26, %v2809_v13 }
 0x429   :  { %3439 = vst [vmem:[#allocation3 + $0x1f8] sm:$0xff] %v3311_v60 }
 0x42a   :  { %v2722_v50 = vpop.f32.mrf.mxu2  ;;  %v2811_v5 = vpop.f32.mrf.mxu3 }
 0x42b   :  { %v2723_v14 = vadd.f32 %v2722_v50, %v2634_v62  ;;  %v2546_v44 = vpop.f32.mrf.mxu0  ;;  %v2635_v6 = vpop.f32.mrf.mxu1 }
 0x42c   :  { %v2636_v55 = vadd.f32 %v2635_v6, %v2546_v44 }
 0x42d   :  { %v2812_v10 = vadd.f32 %v2811_v5, %v2723_v14 }
 0x42f   :  { %v3315_v54 = vadd.f32 %v6159_v26, %v2812_v10 }
 0x431   :  { %3443 = vst [vmem:[#allocation3 + $0x218] sm:$0xff] %v3315_v54 }
 0x432   :  { %v2724_v15 = vpop.f32.mrf.mxu2  ;;  %v2813_v45 = vpop.f32.mrf.mxu3 }
 0x433   :  { %v2725_v47 = vadd.f32 %v2724_v15, %v2636_v55  ;;  %v2549_v7 = vpop.f32.mrf.mxu0  ;;  %v2638_v46 = vpop.f32.mrf.mxu1 }
 0x434   :  { %v2639_v36 = vadd.f32 %v2638_v46, %v2549_v7 }
 0x435   :  { %v2814_v48 = vadd.f32 %v2813_v45, %v2725_v47 }
 0x437   :  { %v3319_v37 = vadd.f32 %v6159_v26, %v2814_v48 }
 0x439   :  { %3447 = vst [vmem:[#allocation3 + $0x238] sm:$0xff] %v3319_v37 }
 0x43a   :  { %v2727_v63 = vpop.f32.mrf.mxu2  ;;  %v2816_v0 = vpop.f32.mrf.mxu3 }
 0x43b   :  { %v2728_v51 = vadd.f32 %v2727_v63, %v2639_v36  ;;  %v2551_v31 = vpop.f32.mrf.mxu0  ;;  %v2640_v24 = vpop.f32.mrf.mxu1 }
 0x43c   :  { %v2641_v53 = vadd.f32 %v2640_v24, %v2551_v31 }
 0x43d   :  { %v2817_v17 = vadd.f32 %v2816_v0, %v2728_v51 }
 0x43f   :  { %v3323_v52 = vadd.f32 %v6159_v26, %v2817_v17 }
 0x441   :  { %3451 = vst [vmem:[#allocation3 + $0x258] sm:$0xff] %v3323_v52 }
 0x442   :  { %v2729_v1 = vpop.f32.mrf.mxu2  ;;  %v2818_v61 = vpop.f32.mrf.mxu3 }
 0x443   :  { %v2730_v8 = vadd.f32 %v2729_v1, %v2641_v53  ;;  %v2554_v20 = vpop.f32.mrf.mxu0  ;;  %v2643_v2 = vpop.f32.mrf.mxu1 }
 0x444   :  { %v2644_v3 = vadd.f32 %v2643_v2, %v2554_v20 }
 0x445   :  { %v2819_v21 = vadd.f32 %v2818_v61, %v2730_v8 }
 0x447   :  { %v3327_v23 = vadd.f32 %v6159_v26, %v2819_v21 }
 0x449   :  { %3455 = vst [vmem:[#allocation3 + $0x278] sm:$0xff] %v3327_v23 }
 0x44a   :  { %v2732_v29 = vpop.f32.mrf.mxu2  ;;  %v2821_v38 = vpop.f32.mrf.mxu3 }
 0x44b   :  { %v2733_v25 = vadd.f32 %v2732_v29, %v2644_v3  ;;  %v2556_v40 = vpop.f32.mrf.mxu0  ;;  %v2645_v22 = vpop.f32.mrf.mxu1 }
 0x44c   :  { %v2646_v11 = vadd.f32 %v2645_v22, %v2556_v40 }
 0x44d   :  { %v2822_v27 = vadd.f32 %v2821_v38, %v2733_v25 }
 0x44f   :  { %v3331_v59 = vadd.f32 %v6159_v26, %v2822_v27 }
 0x451   :  { %3459 = vst [vmem:[#allocation3 + $0x298] sm:$0xff] %v3331_v59 }
 0x452   :  { %v2734_v42 = vpop.f32.mrf.mxu2  ;;  %v2823_v43 = vpop.f32.mrf.mxu3 }
 0x453   :  { %v2735_v28 = vadd.f32 %v2734_v42, %v2646_v11  ;;  %v2559_v41 = vpop.f32.mrf.mxu0  ;;  %v2648_v56 = vpop.f32.mrf.mxu1 }
 0x454   :  { %v2649_v18 = vadd.f32 %v2648_v56, %v2559_v41 }
 0x455   :  { %v2824_v57 = vadd.f32 %v2823_v43, %v2735_v28 }
 0x457   :  { %v3335_v32 = vadd.f32 %v6159_v26, %v2824_v57 }
 0x459   :  { %3463 = vst [vmem:[#allocation3 + $0x2b8] sm:$0xff] %v3335_v32 }
 0x45a   :  { %v2737_v4 = vpop.f32.mrf.mxu2  ;;  %v2826_v9 = vpop.f32.mrf.mxu3 }
 0x45b   :  { %v2738_v12 = vadd.f32 %v2737_v4, %v2649_v18  ;;  %v2561_v33 = vpop.f32.mrf.mxu0  ;;  %v2650_v39 = vpop.f32.mrf.mxu1 }
 0x45c   :  { %v2651_v35 = vadd.f32 %v2650_v39, %v2561_v33 }
 0x45d   :  { %v2827_v34 = vadd.f32 %v2826_v9, %v2738_v12 }
 0x45f   :  { %v3339_v16 = vadd.f32 %v6159_v26, %v2827_v34 }
 0x461   :  { %3467 = vst [vmem:[#allocation3 + $0x2d8] sm:$0xff] %v3339_v16 }
 0x462   :  { %v2739_v49 = vpop.f32.mrf.mxu2  ;;  %v2828_v19 = vpop.f32.mrf.mxu3 }
 0x463   :  { %v2740_v30 = vadd.f32 %v2739_v49, %v2651_v35  ;;  %v2564_v58 = vpop.f32.mrf.mxu0  ;;  %v2653_v13 = vpop.f32.mrf.mxu1 }
 0x464   :  { %v2654_v50 = vadd.f32 %v2653_v13, %v2564_v58 }
 0x465   :  { %v2829_v60 = vadd.f32 %v2828_v19, %v2740_v30 }
 0x467   :  { %v3343_v62 = vadd.f32 %v6159_v26, %v2829_v60 }
 0x469   :  { %3471 = vst [vmem:[#allocation3 + $0x2f8] sm:$0xff] %v3343_v62 }
 0x46a   :  { %v2742_v14 = vpop.f32.mrf.mxu2  ;;  %v2831_v44 = vpop.f32.mrf.mxu3 }
 0x46b   :  { %v2743_v5 = vadd.f32 %v2742_v14, %v2654_v50  ;;  %v2566_v6 = vpop.f32.mrf.mxu0  ;;  %v2655_v10 = vpop.f32.mrf.mxu1 }
 0x46c   :  { %v2656_v15 = vadd.f32 %v2655_v10, %v2566_v6 }
 0x46d   :  { %v2832_v54 = vadd.f32 %v2831_v44, %v2743_v5 }
 0x46f   :  { %v3347_v55 = vadd.f32 %v6159_v26, %v2832_v54 }
 0x471   :  { %3475 = vst [vmem:[#allocation3 + $0x318] sm:$0xff] %v3347_v55 }
 0x472   :  { %v2744_v47 = vpop.f32.mrf.mxu2  ;;  %v2833_v7 = vpop.f32.mrf.mxu3 }
 0x473   :  { %v2745_v45 = vadd.f32 %v2744_v47, %v2656_v15  ;;  %v2569_v46 = vpop.f32.mrf.mxu0  ;;  %v2658_v48 = vpop.f32.mrf.mxu1 }
 0x474   :  { %v2659_v63 = vadd.f32 %v2658_v48, %v2569_v46 }
 0x475   :  { %v2834_v37 = vadd.f32 %v2833_v7, %v2745_v45 }
 0x477   :  { %v3351_v36 = vadd.f32 %v6159_v26, %v2834_v37 }
 0x479   :  { %3479 = vst [vmem:[#allocation3 + $0x338] sm:$0xff] %v3351_v36 }
 0x47a   :  { %v2747_v51 = vpop.f32.mrf.mxu2  ;;  %v2836_v31 = vpop.f32.mrf.mxu3 }
 0x47b   :  { %v2748_v0 = vadd.f32 %v2747_v51, %v2659_v63  ;;  %v2571_v24 = vpop.f32.mrf.mxu0  ;;  %v2660_v17 = vpop.f32.mrf.mxu1 }
 0x47c   :  { %v2661_v1 = vadd.f32 %v2660_v17, %v2571_v24 }
 0x47d   :  { %v2837_v52 = vadd.f32 %v2836_v31, %v2748_v0 }
 0x47f   :  { %v3355_v53 = vadd.f32 %v6159_v26, %v2837_v52 }
 0x481   :  { %3483 = vst [vmem:[#allocation3 + $0x358] sm:$0xff] %v3355_v53 }
 0x482   :  { %v2749_v8 = vpop.f32.mrf.mxu2  ;;  %v2838_v20 = vpop.f32.mrf.mxu3 }
 0x483   :  { %v2750_v61 = vadd.f32 %v2749_v8, %v2661_v1  ;;  %v2574_v2 = vpop.f32.mrf.mxu0  ;;  %v2663_v21 = vpop.f32.mrf.mxu1 }
 0x484   :  { %v2664_v29 = vadd.f32 %v2663_v21, %v2574_v2 }
 0x485   :  { %v2839_v23 = vadd.f32 %v2838_v20, %v2750_v61 }
 0x487   :  { %v3359_v3 = vadd.f32 %v6159_v26, %v2839_v23 }
 0x489   :  { %3487 = vst [vmem:[#allocation3 + $0x378] sm:$0xff] %v3359_v3 }
 0x48a   :  { %v2752_v25 = vpop.f32.mrf.mxu2  ;;  %v2841_v40 = vpop.f32.mrf.mxu3 }
 0x48b   :  { %v2753_v38 = vadd.f32 %v2752_v25, %v2664_v29  ;;  %v2576_v22 = vpop.f32.mrf.mxu0  ;;  %v2665_v27 = vpop.f32.mrf.mxu1 }
 0x48c   :  { %v2666_v42 = vadd.f32 %v2665_v27, %v2576_v22 }
 0x48d   :  { %v2842_v59 = vadd.f32 %v2841_v40, %v2753_v38 }
 0x48f   :  { %v3363_v11 = vadd.f32 %v6159_v26, %v2842_v59 }
 0x491   :  { %3491 = vst [vmem:[#allocation3 + $0x398] sm:$0xff] %v3363_v11 }
 0x492   :  { %v2754_v28 = vpop.f32.mrf.mxu2  ;;  %v2843_v41 = vpop.f32.mrf.mxu3 }
 0x493   :  { %v2755_v43 = vadd.f32 %v2754_v28, %v2666_v42  ;;  %v2579_v56 = vpop.f32.mrf.mxu0  ;;  %v2668_v57 = vpop.f32.mrf.mxu1 }
 0x494   :  { %v2669_v4 = vadd.f32 %v2668_v57, %v2579_v56 }
 0x495   :  { %v2844_v32 = vadd.f32 %v2843_v41, %v2755_v43 }
 0x497   :  { %v3367_v18 = vadd.f32 %v6159_v26, %v2844_v32 }
 0x499   :  { %3495 = vst [vmem:[#allocation3 + $0x3b8] sm:$0xff] %v3367_v18 }
 0x49a   :  { %v2757_v12 = vpop.f32.mrf.mxu2  ;;  %v2846_v33 = vpop.f32.mrf.mxu3 }
 0x49b   :  { %v2758_v9 = vadd.f32 %v2757_v12, %v2669_v4  ;;  %v2581_v34 = vpop.f32.mrf.mxu0  ;;  %v2670_v16 = vpop.f32.mrf.mxu1 }
 0x49c   :  { %v2671_v49 = vadd.f32 %v2670_v16, %v2581_v34 }
 0x49d   :  { %v2847_v39 = vadd.f32 %v2846_v33, %v2758_v9 }
 0x49f   :  { %v3371_v35 = vadd.f32 %v6159_v26, %v2847_v39 }
 0x4a1   :  { %3499 = vst [vmem:[#allocation3 + $0x3d8] sm:$0xff] %v3371_v35 }
 0x4a2   :  { %v2759_v30 = vpop.f32.mrf.mxu2  ;;  %v2848_v58 = vpop.f32.mrf.mxu3 }
 0x4a3   :  { %v2760_v19 = vadd.f32 %v2759_v30, %v2671_v49 }
 0x4a5   :  { %v2849_v13 = vadd.f32 %v2848_v58, %v2760_v19 }
 0x4a7   :  { %v3375_v60 = vadd.f32 %v6159_v26, %v2849_v13 }
 0x4a9   :  { %3503 = vst [vmem:[#allocation3 + $0x3f8] sm:$0xff] %v3375_v60 }
 0x4aa   :  { %3516 = dma.vmem_to_hbm [thread:$0]  %s3509_s20, 16384, %s3511_s23, [#allocation4], %s4514_s24, %s4514_s24, %s4515_s25  }
 0x4ab   :  { %4511 = dma.done.wait [#allocation4], 16384  }
 0x4ac   :  { %4512 = vsyncadd [#allocation4], 4294950912 }
 0x4ad   :  { %3521 = vsyncpa [#allocation4], 1 }

// kernel: projector_forward.4
= control target key start
LH: loop header
LB: loop body
LE: loop exit
PB: predicated region body
PF: predicated region fallthrough
CT: control target
= control target key end

     0   :  { %s9808_s1 = inlined_call_operand.vmem [shape: bf16[512,512], index: 1, kind: input, shape index: {}]   ;;  %s9809_s0 = inlined_call_operand.vmem [shape: bf16[256,512], index: 0, kind: input, shape index: {}]   ;;  %s9810_s2 = inlined_call_operand.vmem [shape: f32[1,512], index: 2, kind: input, shape index: {}]   ;;  %s9811_s3 = inlined_call_operand.vmem [shape: f32[1,512], index: 3, kind: input, shape index: {}]   ;;  %s9812_s4 = inlined_call_operand.vmem [shape: f32[256,512], index: 4, kind: output, shape index: {}]  }
   0x1   :  { %v4885_v0 = vld [vmem:[%s9808_s1 + $0xe0] sm:$0xf]  ;;  %v5377_v1 = vld [vmem:[%s9808_s1 + $0xec] sm:$0xf0] }
   0x2   :  { %v5013_v2 = vld [vmem:[%s9808_s1 + $0x1e0] sm:$0xf]  ;;  %v4886_v3 = vor.u32 %v5377_v1, %v4885_v0  ;;  %v5409_v4 = vld [vmem:[%s9808_s1 + $0x1ec] sm:$0xf0] }
   0x3   :  { %v5141_v5 = vld [vmem:[%s9808_s1 + $0x2e0] sm:$0xf]  ;;  %v5441_v6 = vld [vmem:[%s9808_s1 + $0x2ec] sm:$0xf0]  ;;  %v5014_v7 = vor.u32 %v5409_v4, %v5013_v2 }
   0x4   :  { %v5142_v8 = vor.u32 %v5441_v6, %v5141_v5  ;;  %v5269_v9 = vld [vmem:[%s9808_s1 + $0x3e0] sm:$0xf]  ;;  %v5473_v10 = vld [vmem:[%s9808_s1 + $0x3ec] sm:$0xf0]  ;;  %1429 = vmatpush.bf16.msra.mxu0 %v4886_v3 }
   0x5   :  { %v4869_v11 = vld [vmem:[%s9808_s1 + $0xc0] sm:$0xf]  ;;  %v5270_v12 = vor.u32 %v5473_v10, %v5269_v9  ;;  %v5373_v13 = vld [vmem:[%s9808_s1 + $0xcc] sm:$0xf0]  ;;  %1518 = vmatpush.bf16.msra.mxu1 %v5014_v7 }
   0x6   :  { %v4997_v14 = vld [vmem:[%s9808_s1 + $0x1c0] sm:$0xf]  ;;  %v5405_v15 = vld [vmem:[%s9808_s1 + $0x1cc] sm:$0xf0]  ;;  %1607 = vmatpush.bf16.msra.mxu2 %v5142_v8  ;;  %v4870_v16 = vor.u32 %v5373_v13, %v4869_v11 }
   0x7   :  { %v4998_v17 = vor.u32 %v5405_v15, %v4997_v14  ;;  %v5125_v18 = vld [vmem:[%s9808_s1 + $0x2c0] sm:$0xf]  ;;  %v5437_v19 = vld [vmem:[%s9808_s1 + $0x2cc] sm:$0xf0]  ;;  %1696 = vmatpush.bf16.msra.mxu3 %v5270_v12 }
   0x8   :  { %v5253_v20 = vld [vmem:[%s9808_s1 + $0x3c0] sm:$0xf]  ;;  %v5126_v21 = vor.u32 %v5437_v19, %v5125_v18  ;;  %v5469_v22 = vld [vmem:[%s9808_s1 + $0x3cc] sm:$0xf0]  ;;  %1430 = vmatpush.bf16.msra.mxu0 %v4870_v16 }
   0x9   :  { %v4853_v23 = vld [vmem:[%s9808_s1 + $0xa0] sm:$0xf]  ;;  %v5369_v24 = vld [vmem:[%s9808_s1 + $0xac] sm:$0xf0]  ;;  %v5254_v25 = vor.u32 %v5469_v22, %v5253_v20  ;;  %1519 = vmatpush.bf16.msra.mxu1 %v4998_v17 }
   0xa   :  { %v4981_v26 = vld [vmem:[%s9808_s1 + $0x1a0] sm:$0xf]  ;;  %v5401_v27 = vld [vmem:[%s9808_s1 + $0x1ac] sm:$0xf0]  ;;  %v4854_v29 = vor.u32 %v5369_v24, %v4853_v23  ;;  %1608 = vmatpush.bf16.msra.mxu2 %v5126_v21 }
   0xb   :  { %v5109_v28 = vld [vmem:[%s9808_s1 + $0x2a0] sm:$0xf]  ;;  %v5433_v30 = vld [vmem:[%s9808_s1 + $0x2ac] sm:$0xf0]  ;;  %v4982_v33 = vor.u32 %v5401_v27, %v4981_v26  ;;  %1697 = vmatpush.bf16.msra.mxu3 %v5254_v25 }
   0xc   :  { %v5237_v31 = vld [vmem:[%s9808_s1 + $0x3a0] sm:$0xf]  ;;  %v5465_v32 = vld [vmem:[%s9808_s1 + $0x3ac] sm:$0xf0]  ;;  %v5110_v34 = vor.u32 %v5433_v30, %v5109_v28  ;;  %1431 = vmatpush.bf16.msra.mxu0 %v4854_v29  ;;  %v5283_v30 = vld [vmem:[%s9809_s0 + $0x4] sm:$0xf] }
   0xd   :  { %v4837_v35 = vld [vmem:[%s9808_s1 + $0x80] sm:$0xf]  ;;  %v5365_v36 = vld [vmem:[%s9808_s1 + $0x8c] sm:$0xf0]  ;;  %v5238_v38 = vor.u32 %v5465_v32, %v5237_v31  ;;  %1520 = vmatpush.bf16.msra.mxu1 %v4982_v33  ;;  %v5439_v31 = vld [vmem:[%s9808_s1 + $0x2e4] sm:$0xf] }
   0xe   :  { %v4965_v37 = vld [vmem:[%s9808_s1 + $0x180] sm:$0xf]  ;;  %v5397_v39 = vld [vmem:[%s9808_s1 + $0x18c] sm:$0xf0]  ;;  %v4838_v44 = vor.u32 %v5365_v36, %v4837_v35  ;;  %1609 = vmatpush.bf16.msra.mxu2 %v5110_v34  ;;  %v5143_v32 = vld [vmem:[%s9808_s1 + $0x2f0] sm:$0xf0] }
   0xf   :  { %v5093_v40 = vld [vmem:[%s9808_s1 + $0x280] sm:$0xf]  ;;  %v5429_v41 = vld [vmem:[%s9808_s1 + $0x28c] sm:$0xf0]  ;;  %v4966_v45 = vor.u32 %v5397_v39, %v4965_v37  ;;  %1698 = vmatpush.bf16.msra.mxu3 %v5238_v38  ;;  %v4519_v34 = vld [vmem:[%s9809_s0 + $0x10] sm:$0xf0] }
  0x10   :  { %v5221_v42 = vld [vmem:[%s9808_s1 + $0x380] sm:$0xf]  ;;  %v5461_v43 = vld [vmem:[%s9808_s1 + $0x38c] sm:$0xf0]  ;;  %v5094_v46 = vor.u32 %v5429_v41, %v5093_v40  ;;  %1432 = vmatpush.bf16.msra.mxu0 %v4838_v44  ;;  %v5471_v35 = vld [vmem:[%s9808_s1 + $0x3e4] sm:$0xf]  ;;  %v5146_v44 = vor.u32 %v5439_v31, %v5143_v32 }
  0x11   :  { %v4821_v47 = vld [vmem:[%s9808_s1 + $0x60] sm:$0xf]  ;;  %v5361_v48 = vld [vmem:[%s9808_s1 + $0x6c] sm:$0xf0]  ;;  %v5222_v50 = vor.u32 %v5461_v43, %v5221_v42  ;;  %1521 = vmatpush.bf16.msra.mxu1 %v4966_v45  ;;  %v5271_v36 = vld [vmem:[%s9808_s1 + $0x3f0] sm:$0xf0] }
  0x12   :  { %v4949_v49 = vld [vmem:[%s9808_s1 + $0x160] sm:$0xf]  ;;  %v5393_v51 = vld [vmem:[%s9808_s1 + $0x16c] sm:$0xf0]  ;;  %v4822_v56 = vor.u32 %v5361_v48, %v4821_v47  ;;  %1610 = vmatpush.bf16.msra.mxu2 %v5094_v46  ;;  %v4525_v39 = vld [vmem:[%s9809_s0 + $0x8] sm:$0xf]  ;;  %v5274_v48 = vor.u32 %v5471_v35, %v5271_v36 }
  0x13   :  { %v5077_v52 = vld [vmem:[%s9808_s1 + $0x260] sm:$0xf]  ;;  %v5425_v53 = vld [vmem:[%s9808_s1 + $0x26c] sm:$0xf0]  ;;  %v4950_v57 = vor.u32 %v5393_v51, %v4949_v49  ;;  %1699 = vmatpush.bf16.msra.mxu3 %v5222_v50  ;;  %v5286_v40 = vld [vmem:[%s9809_s0 + $0x14] sm:$0xf0]  ;;  %v5758_v51 = vor.u32 %v5283_v30, %v4519_v34 }
  0x14   :  { %v5205_v54 = vld [vmem:[%s9808_s1 + $0x360] sm:$0xf]  ;;  %v5457_v55 = vld [vmem:[%s9808_s1 + $0x36c] sm:$0xf0]  ;;  %v5078_v58 = vor.u32 %v5425_v53, %v5077_v52  ;;  %1433 = vmatpush.bf16.msra.mxu0 %v4822_v56  ;;  %v5284_v41 = vld [vmem:[%s9809_s0 + $0xc] sm:$0xf]  ;;  %v5760_v52 = vor.u32 %v5286_v40, %v4525_v39 }
  0x15   :  { %v4805_v59 = vld [vmem:[%s9808_s1 + $0x40] sm:$0xf]  ;;  %v5357_v60 = vld [vmem:[%s9808_s1 + $0x4c] sm:$0xf0]  ;;  %v5206_v62 = vor.u32 %v5457_v55, %v5205_v54  ;;  %1522 = vmatpush.bf16.msra.mxu1 %v4950_v57  ;;  %v4527_v43 = vld [vmem:[%s9809_s0 + $0x18] sm:$0xf0] }
  0x16   :  { %v4933_v61 = vld [vmem:[%s9808_s1 + $0x140] sm:$0xf]  ;;  %v5389_v63 = vld [vmem:[%s9808_s1 + $0x14c] sm:$0xf0]  ;;  %v4806_v4 = vor.u32 %v5357_v60, %v4805_v59  ;;  %1611 = vmatpush.bf16.msra.mxu2 %v5078_v58  ;;  %v5375_v45 = vld [vmem:[%s9808_s1 + $0xe4] sm:$0xf]  ;;  %v5762_v53 = vor.u32 %v5284_v41, %v4527_v43 }
  0x17   :  { %v5061_v0 = vld [vmem:[%s9808_s1 + $0x240] sm:$0xf]  ;;  %v5421_v1 = vld [vmem:[%s9808_s1 + $0x24c] sm:$0xf0]  ;;  %v4934_v5 = vor.u32 %v5389_v63, %v4933_v61  ;;  %1700 = vmatpush.bf16.msra.mxu3 %v5206_v62  ;;  %v4887_v46 = vld [vmem:[%s9808_s1 + $0xf0] sm:$0xf0] }
  0x18   :  { %v5189_v2 = vld [vmem:[%s9808_s1 + $0x340] sm:$0xf]  ;;  %v5453_v3 = vld [vmem:[%s9808_s1 + $0x34c] sm:$0xf0]  ;;  %v5062_v6 = vor.u32 %v5421_v1, %v5061_v0  ;;  %1434 = vmatpush.bf16.msra.mxu0 %v4806_v4  ;;  %v5407_v49 = vld [vmem:[%s9808_s1 + $0x1e4] sm:$0xf]  ;;  %v4890_v54 = vor.u32 %v5375_v45, %v4887_v46 }
  0x19   :  { %v4789_v7 = vld [vmem:[%s9808_s1 + $0x20] sm:$0xf]  ;;  %v5353_v8 = vld [vmem:[%s9808_s1 + $0x2c] sm:$0xf0]  ;;  %v5190_v10 = vor.u32 %v5453_v3, %v5189_v2  ;;  %1523 = vmatpush.bf16.msra.mxu1 %v4934_v5  ;;  %v5015_v50 = vld [vmem:[%s9808_s1 + $0x1f0] sm:$0xf0] }
  0x1a   :  { %v4917_v9 = vld [vmem:[%s9808_s1 + $0x120] sm:$0xf]  ;;  %v5385_v11 = vld [vmem:[%s9808_s1 + $0x12c] sm:$0xf0]  ;;  %v4790_v17 = vor.u32 %v5353_v8, %v4789_v7  ;;  %1612 = vmatpush.bf16.msra.mxu2 %v5062_v6  ;;  %9984 = vst [vmem:[#allocation4_spill] sm:$0xff] %v5758_v51  ;;  %v5018_v55 = vor.u32 %v5407_v49, %v5015_v50 }
  0x1b   :  { %v5045_v12 = vld [vmem:[%s9808_s1 + $0x220] sm:$0xf]  ;;  %v5417_v13 = vld [vmem:[%s9808_s1 + $0x22c] sm:$0xf0]  ;;  %v4918_v21 = vor.u32 %v5385_v11, %v4917_v9  ;;  %1701 = vmatpush.bf16.msra.mxu3 %v5190_v10  ;;  %9985 = vst [vmem:[#allocation5_spill] sm:$0xff] %v5760_v52 }
  0x1c   :  { %v5173_v14 = vld [vmem:[%s9808_s1 + $0x320] sm:$0xf]  ;;  %v5449_v15 = vld [vmem:[%s9808_s1 + $0x32c] sm:$0xf0]  ;;  %v5046_v22 = vor.u32 %v5417_v13, %v5045_v12  ;;  %1435 = vmatpush.bf16.msra.mxu0 %v4790_v17  ;;  %9986 = vst [vmem:[#allocation6_spill] sm:$0xff] %v5762_v53 }
  0x1d   :  { %v4773_v16 = vld [vmem:[%s9808_s1] sm:$0xf]  ;;  %v5349_v18 = vld [vmem:[%s9808_s1 + $0xc] sm:$0xf0]  ;;  %v5174_v26 = vor.u32 %v5449_v15, %v5173_v14  ;;  %1524 = vmatpush.bf16.msra.mxu1 %v4918_v21  ;;  %v5435_v56 = vld [vmem:[%s9808_s1 + $0x2c4] sm:$0xf] }
  0x1e   :  { %v4901_v19 = vld [vmem:[%s9808_s1 + $0x100] sm:$0xf]  ;;  %v5381_v20 = vld [vmem:[%s9808_s1 + $0x10c] sm:$0xf0]  ;;  %v4774_v33 = vor.u32 %v5349_v18, %v4773_v16  ;;  %1613 = vmatpush.bf16.msra.mxu2 %v5046_v22  ;;  %v5127_v57 = vld [vmem:[%s9808_s1 + $0x2d0] sm:$0xf0] }
  0x1f   :  { %v5029_v23 = vld [vmem:[%s9808_s1 + $0x200] sm:$0xf]  ;;  %v5413_v24 = vld [vmem:[%s9808_s1 + $0x20c] sm:$0xf0]  ;;  %v4902_v37 = vor.u32 %v5381_v20, %v4901_v19  ;;  %1702 = vmatpush.bf16.msra.mxu3 %v5174_v26  ;;  %v5467_v58 = vld [vmem:[%s9808_s1 + $0x3c4] sm:$0xf]  ;;  %v5130_v59 = vor.u32 %v5435_v56, %v5127_v57 }
  0x20   :  { %v5157_v25 = vld [vmem:[%s9808_s1 + $0x300] sm:$0xf]  ;;  %v5445_v27 = vld [vmem:[%s9808_s1 + $0x30c] sm:$0xf0]  ;;  %v5030_v38 = vor.u32 %v5413_v24, %v5029_v23  ;;  %1436 = vmatpush.bf16.msra.mxu0 %v4774_v33  ;;  %v5255_v60 = vld [vmem:[%s9808_s1 + $0x3d0] sm:$0xf0] }
  0x21   :  { %v4517_v28 = vld [vmem:[%s9809_s0] sm:$0xf]  ;;  %v5285_v29 = vld [vmem:[%s9809_s0 + $0xc] sm:$0xf0]  ;;  %v5158_v42 = vor.u32 %v5445_v27, %v5157_v25  ;;  %1525 = vmatpush.bf16.msra.mxu1 %v4902_v37  ;;  %v5371_v61 = vld [vmem:[%s9808_s1 + $0xc4] sm:$0xf]  ;;  %v5258_v63 = vor.u32 %v5467_v58, %v5255_v60 }
  0x22   :  { %v5750_v47 = vor.u32 %v5285_v29, %v4517_v28  ;;  %1614 = vmatpush.bf16.msra.mxu2 %v5030_v38  ;;  %v4871_v62 = vld [vmem:[%s9808_s1 + $0xd0] sm:$0xf0]  ;;  %v5403_v1 = vld [vmem:[%s9808_s1 + $0x1c4] sm:$0xf]  ;;  %v4533_v4 = vld [vmem:[%s9809_s0 + $0x20] sm:$0xf] }
  0x23   :  { %1703 = vmatpush.bf16.msra.mxu3 %v5158_v42  ;;  %v4874_v0 = vor.u32 %v5371_v61, %v4871_v62  ;;  %v4999_v2 = vld [vmem:[%s9808_s1 + $0x1d0] sm:$0xf0]  ;;  %v5289_v5 = vld [vmem:[%s9809_s0 + $0x2c] sm:$0xf0]  ;;  %v5287_v6 = vld [vmem:[%s9809_s0 + $0x24] sm:$0xf] }
  0x24   :  { %9983 = vst [vmem:[#allocation3_spill] sm:$0xff] %v5750_v47  ;;  %1437 = vmatmul.bf16.vlgmr.msra.gmra.mxu0 %v5750_v47  ;;  %1526 = vmatmul.bf16.vlgmr.msra.gmra.mxu1 %v5758_v51  ;;  %v5002_v3 = vor.u32 %v5403_v1, %v4999_v2  ;;  %v4535_v7 = vld [vmem:[%s9809_s0 + $0x30] sm:$0xf0]  ;;  %v4541_v8 = vld [vmem:[%s9809_s0 + $0x28] sm:$0xf]  ;;  %v5816_v12 = vor.u32 %v5289_v5, %v4533_v4 }
  0x25   :  { %1615 = vmatmul.bf16.vlgmr.msra.gmra.mxu2 %v5760_v52  ;;  %1785 = vmatpush.bf16.msrb.mxu0 %v4890_v54  ;;  %v5290_v9 = vld [vmem:[%s9809_s0 + $0x34] sm:$0xf0]  ;;  %v5288_v10 = vld [vmem:[%s9809_s0 + $0x2c] sm:$0xf]  ;;  %v4543_v11 = vld [vmem:[%s9809_s0 + $0x38] sm:$0xf0]  ;;  %v5818_v13 = vor.u32 %v5287_v6, %v4535_v7 }
  0x26   :  { %1963 = vmatpush.bf16.msrb.mxu2 %v5146_v44  ;;  %1704 = vmatmul.bf16.vlgmr.msra.gmra.mxu3 %v5762_v53  ;;  %9987 = vst [vmem:[#allocation7_spill] sm:$0xff] %v5816_v12  ;;  %v5820_v14 = vor.u32 %v5290_v9, %v4541_v8  ;;  %v5822_v15 = vor.u32 %v5288_v10, %v4543_v11  ;;  %v4549_v16 = vld [vmem:[%s9809_s0 + $0x40] sm:$0xf]  ;;  %v5293_v17 = vld [vmem:[%s9809_s0 + $0x4c] sm:$0xf0] }
  0x27   :  { %2052 = vmatpush.bf16.msrb.mxu3 %v5274_v48  ;;  %1874 = vmatpush.bf16.msrb.mxu1 %v5018_v55  ;;  %9988 = vst [vmem:[#allocation8_spill] sm:$0xff] %v5818_v13  ;;  %v5291_v18 = vld [vmem:[%s9809_s0 + $0x44] sm:$0xf]  ;;  %v4551_v19 = vld [vmem:[%s9809_s0 + $0x50] sm:$0xf0]  ;;  %v5852_v24 = vor.u32 %v5293_v17, %v4549_v16 }
  0x28   :  { %9989 = vst [vmem:[#allocation9_spill] sm:$0xff] %v5820_v14  ;;  %v4557_v20 = vld [vmem:[%s9809_s0 + $0x48] sm:$0xf]  ;;  %v5294_v21 = vld [vmem:[%s9809_s0 + $0x54] sm:$0xf0]  ;;  %v5854_v25 = vor.u32 %v5291_v18, %v4551_v19 }
  0x29   :  { %1786 = vmatpush.bf16.msrb.mxu0 %v4874_v0  ;;  %9990 = vst [vmem:[#allocation10_spill] sm:$0xff] %v5822_v15  ;;  %v5292_v22 = vld [vmem:[%s9809_s0 + $0x4c] sm:$0xf]  ;;  %v4559_v23 = vld [vmem:[%s9809_s0 + $0x58] sm:$0xf0]  ;;  %v5856_v26 = vor.u32 %v5294_v21, %v4557_v20 }
  0x2a   :  { %1964 = vmatpush.bf16.msrb.mxu2 %v5130_v59  ;;  %9991 = vst [vmem:[#allocation11_spill] sm:$0xff] %v5852_v24  ;;  %v5858_v27 = vor.u32 %v5292_v22, %v4559_v23  ;;  %v5431_v28 = vld [vmem:[%s9808_s1 + $0x2a4] sm:$0xf]  ;;  %v5111_v29 = vld [vmem:[%s9808_s1 + $0x2b0] sm:$0xf0] }
  0x2b   :  { %2053 = vmatpush.bf16.msrb.mxu3 %v5258_v63  ;;  %1875 = vmatpush.bf16.msrb.mxu1 %v5002_v3  ;;  %9992 = vst [vmem:[#allocation12_spill] sm:$0xff] %v5854_v25  ;;  %v5463_v30 = vld [vmem:[%s9808_s1 + $0x3a4] sm:$0xf]  ;;  %v5114_v31 = vor.u32 %v5431_v28, %v5111_v29  ;;  %v5239_v32 = vld [vmem:[%s9808_s1 + $0x3b0] sm:$0xf0] }
  0x2c   :  { %9993 = vst [vmem:[#allocation13_spill] sm:$0xff] %v5856_v26  ;;  %v5367_v33 = vld [vmem:[%s9808_s1 + $0xa4] sm:$0xf]  ;;  %v4855_v34 = vld [vmem:[%s9808_s1 + $0xb0] sm:$0xf0]  ;;  %v5242_v35 = vor.u32 %v5463_v30, %v5239_v32 }
  0x2d   :  { %9994 = vst [vmem:[#allocation14_spill] sm:$0xff] %v5858_v27  ;;  %v4858_v36 = vor.u32 %v5367_v33, %v4855_v34  ;;  %v5399_v37 = vld [vmem:[%s9808_s1 + $0x1a4] sm:$0xf]  ;;  %v4983_v38 = vld [vmem:[%s9808_s1 + $0x1b0] sm:$0xf0] }
  0x2e   :  { %1965 = vmatpush.bf16.msrb.mxu2 %v5114_v31  ;;  %v4986_v39 = vor.u32 %v5399_v37, %v4983_v38  ;;  %v4565_v40 = vld [vmem:[%s9809_s0 + $0x60] sm:$0xf]  ;;  %v5297_v41 = vld [vmem:[%s9809_s0 + $0x6c] sm:$0xf0]  ;;  %v5295_v42 = vld [vmem:[%s9809_s0 + $0x64] sm:$0xf] }
  0x2f   :  { %2054 = vmatpush.bf16.msrb.mxu3 %v5242_v35  ;;  %1787 = vmatpush.bf16.msrb.mxu0 %v4858_v36  ;;  %v4567_v43 = vld [vmem:[%s9809_s0 + $0x70] sm:$0xf0]  ;;  %v4573_v44 = vld [vmem:[%s9809_s0 + $0x68] sm:$0xf]  ;;  %v5298_v45 = vld [vmem:[%s9809_s0 + $0x74] sm:$0xf0]  ;;  %v5912_v49 = vor.u32 %v5297_v41, %v4565_v40 }
  0x30   :  { %1876 = vmatpush.bf16.msrb.mxu1 %v4986_v39  ;;  %v5296_v46 = vld [vmem:[%s9809_s0 + $0x6c] sm:$0xf]  ;;  %v4575_v48 = vld [vmem:[%s9809_s0 + $0x78] sm:$0xf0]  ;;  %v5914_v50 = vor.u32 %v5295_v42, %v4567_v43  ;;  %v5916_v54 = vor.u32 %v5298_v45, %v4573_v44  ;;  %v4581_v56 = vld [vmem:[%s9809_s0 + $0x80] sm:$0xf] }
  0x31   :  { %9995 = vst [vmem:[#allocation15_spill] sm:$0xff] %v5912_v49  ;;  %v5918_v55 = vor.u32 %v5296_v46, %v4575_v48  ;;  %v5301_v57 = vld [vmem:[%s9809_s0 + $0x8c] sm:$0xf0]  ;;  %v5299_v58 = vld [vmem:[%s9809_s0 + $0x84] sm:$0xf] }
  0x32   :  { %9996 = vst [vmem:[#allocation16_spill] sm:$0xff] %v5914_v50  ;;  %v4583_v59 = vld [vmem:[%s9809_s0 + $0x90] sm:$0xf0]  ;;  %v4589_v60 = vld [vmem:[%s9809_s0 + $0x88] sm:$0xf]  ;;  %v5948_v0 = vor.u32 %v5301_v57, %v4581_v56 }
  0x33   :  { %9997 = vst [vmem:[#allocation17_spill] sm:$0xff] %v5916_v54  ;;  %v5302_v61 = vld [vmem:[%s9809_s0 + $0x94] sm:$0xf0]  ;;  %v5300_v62 = vld [vmem:[%s9809_s0 + $0x8c] sm:$0xf]  ;;  %v5950_v1 = vor.u32 %v5299_v58, %v4583_v59 }
  0x34   :  { %1442 = vmatmul.bf16.gmra.mxu0 %v5816_v12  ;;  %1531 = vmatmul.bf16.gmra.mxu1 %v5818_v13  ;;  %9998 = vst [vmem:[#allocation18_spill] sm:$0xff] %v5918_v55  ;;  %v4591_v63 = vld [vmem:[%s9809_s0 + $0x98] sm:$0xf0]  ;;  %v5952_v2 = vor.u32 %v5302_v61, %v4589_v60  ;;  %v5427_v4 = vld [vmem:[%s9808_s1 + $0x284] sm:$0xf] }
  0x35   :  { %1620 = vmatmul.bf16.gmra.mxu2 %v5820_v14  ;;  %9999 = vst [vmem:[#allocation19_spill] sm:$0xff] %v5948_v0  ;;  %v5954_v3 = vor.u32 %v5300_v62, %v4591_v63  ;;  %v5095_v5 = vld [vmem:[%s9808_s1 + $0x290] sm:$0xf0]  ;;  %v5459_v6 = vld [vmem:[%s9808_s1 + $0x384] sm:$0xf] }
  0x36   :  { %1709 = vmatmul.bf16.gmra.mxu3 %v5822_v15  ;;  %10000 = vst [vmem:[#allocation20_spill] sm:$0xff] %v5950_v1  ;;  %v5098_v7 = vor.u32 %v5427_v4, %v5095_v5  ;;  %v5223_v8 = vld [vmem:[%s9808_s1 + $0x390] sm:$0xf0]  ;;  %v5363_v9 = vld [vmem:[%s9808_s1 + $0x84] sm:$0xf] }
  0x37   :  { %10001 = vst [vmem:[#allocation21_spill] sm:$0xff] %v5952_v2  ;;  %v4839_v10 = vld [vmem:[%s9808_s1 + $0x90] sm:$0xf0]  ;;  %v5226_v11 = vor.u32 %v5459_v6, %v5223_v8  ;;  %v5395_v17 = vld [vmem:[%s9808_s1 + $0x184] sm:$0xf] }
  0x38   :  { %10002 = vst [vmem:[#allocation22_spill] sm:$0xff] %v5954_v3  ;;  %v4842_v16 = vor.u32 %v5363_v9, %v4839_v10  ;;  %v4967_v18 = vld [vmem:[%s9808_s1 + $0x190] sm:$0xf0]  ;;  %1966 = vmatpush.bf16.msrb.mxu2 %v5098_v7  ;;  %v4597_v20 = vld [vmem:[%s9809_s0 + $0xa0] sm:$0xf] }
  0x39   :  { %v4970_v19 = vor.u32 %v5395_v17, %v4967_v18  ;;  %2055 = vmatpush.bf16.msrb.mxu3 %v5226_v11  ;;  %v5305_v21 = vld [vmem:[%s9809_s0 + $0xac] sm:$0xf0]  ;;  %v5303_v22 = vld [vmem:[%s9809_s0 + $0xa4] sm:$0xf]  ;;  %v4599_v23 = vld [vmem:[%s9809_s0 + $0xb0] sm:$0xf0] }
  0x3a   :  { %1788 = vmatpush.bf16.msrb.mxu0 %v4842_v16  ;;  %v4605_v28 = vld [vmem:[%s9809_s0 + $0xa8] sm:$0xf]  ;;  %v5306_v29 = vld [vmem:[%s9809_s0 + $0xb4] sm:$0xf0]  ;;  %v5304_v30 = vld [vmem:[%s9809_s0 + $0xac] sm:$0xf]  ;;  %v6008_v32 = vor.u32 %v5305_v21, %v4597_v20  ;;  %v6010_v33 = vor.u32 %v5303_v22, %v4599_v23 }
  0x3b   :  { %1877 = vmatpush.bf16.msrb.mxu1 %v4970_v19  ;;  %v4607_v31 = vld [vmem:[%s9809_s0 + $0xb8] sm:$0xf0]  ;;  %v6012_v34 = vor.u32 %v5306_v29, %v4605_v28  ;;  %v4613_v36 = vld [vmem:[%s9809_s0 + $0xc0] sm:$0xf]  ;;  %v5309_v37 = vld [vmem:[%s9809_s0 + $0xcc] sm:$0xf0] }
  0x3c   :  { %10003 = vst [vmem:[#allocation23_spill] sm:$0xff] %v6008_v32  ;;  %v6014_v35 = vor.u32 %v5304_v30, %v4607_v31  ;;  %v5307_v38 = vld [vmem:[%s9809_s0 + $0xc4] sm:$0xf]  ;;  %v4615_v39 = vld [vmem:[%s9809_s0 + $0xd0] sm:$0xf0]  ;;  %v6044_v44 = vor.u32 %v5309_v37, %v4613_v36 }
  0x3d   :  { %10004 = vst [vmem:[#allocation24_spill] sm:$0xff] %v6010_v33  ;;  %v4621_v40 = vld [vmem:[%s9809_s0 + $0xc8] sm:$0xf]  ;;  %v5310_v41 = vld [vmem:[%s9809_s0 + $0xd4] sm:$0xf0]  ;;  %v6046_v45 = vor.u32 %v5307_v38, %v4615_v39 }
  0x3e   :  { %10005 = vst [vmem:[#allocation25_spill] sm:$0xff] %v6012_v34  ;;  %v5308_v42 = vld [vmem:[%s9809_s0 + $0xcc] sm:$0xf]  ;;  %v4623_v43 = vld [vmem:[%s9809_s0 + $0xd8] sm:$0xf0]  ;;  %v6048_v46 = vor.u32 %v5310_v41, %v4621_v40 }
  0x3f   :  { %10006 = vst [vmem:[#allocation26_spill] sm:$0xff] %v6014_v35  ;;  %v6050_v48 = vor.u32 %v5308_v42, %v4623_v43  ;;  %v5423_v56 = vld [vmem:[%s9808_s1 + $0x264] sm:$0xf]  ;;  %v5079_v57 = vld [vmem:[%s9808_s1 + $0x270] sm:$0xf0] }
  0x40   :  { %10007 = vst [vmem:[#allocation27_spill] sm:$0xff] %v6044_v44  ;;  %v5455_v58 = vld [vmem:[%s9808_s1 + $0x364] sm:$0xf]  ;;  %v5082_v59 = vor.u32 %v5423_v56, %v5079_v57  ;;  %v5207_v60 = vld [vmem:[%s9808_s1 + $0x370] sm:$0xf0] }
  0x41   :  { %10008 = vst [vmem:[#allocation28_spill] sm:$0xff] %v6046_v45  ;;  %v5210_v61 = vor.u32 %v5455_v58, %v5207_v60  ;;  %v5359_v62 = vld [vmem:[%s9808_s1 + $0x64] sm:$0xf]  ;;  %v4823_v63 = vld [vmem:[%s9808_s1 + $0x70] sm:$0xf0] }
  0x42   :  { %10009 = vst [vmem:[#allocation29_spill] sm:$0xff] %v6048_v46  ;;  %1967 = vmatpush.bf16.msrb.mxu2 %v5082_v59  ;;  %v5391_v4 = vld [vmem:[%s9808_s1 + $0x164] sm:$0xf]  ;;  %v4826_v5 = vor.u32 %v5359_v62, %v4823_v63  ;;  %v4951_v6 = vld [vmem:[%s9808_s1 + $0x170] sm:$0xf0] }
  0x43   :  { %10010 = vst [vmem:[#allocation30_spill] sm:$0xff] %v6050_v48  ;;  %2056 = vmatpush.bf16.msrb.mxu3 %v5210_v61  ;;  %v4629_v7 = vld [vmem:[%s9809_s0 + $0xe0] sm:$0xf]  ;;  %v5313_v8 = vld [vmem:[%s9809_s0 + $0xec] sm:$0xf0]  ;;  %v4954_v10 = vor.u32 %v5391_v4, %v4951_v6 }
  0x44   :  { %1447 = vmatmul.bf16.gmra.mxu0 %v5852_v24  ;;  %1536 = vmatmul.bf16.gmra.mxu1 %v5854_v25  ;;  %v5311_v9 = vld [vmem:[%s9809_s0 + $0xe4] sm:$0xf]  ;;  %v4631_v11 = vld [vmem:[%s9809_s0 + $0xf0] sm:$0xf0]  ;;  %v4637_v16 = vld [vmem:[%s9809_s0 + $0xe8] sm:$0xf]  ;;  %v6104_v20 = vor.u32 %v5313_v8, %v4629_v7 }
  0x45   :  { %1625 = vmatmul.bf16.gmra.mxu2 %v5856_v26  ;;  %v5314_v17 = vld [vmem:[%s9809_s0 + $0xf4] sm:$0xf0]  ;;  %1789 = vmatpush.bf16.msrb.mxu0 %v4826_v5  ;;  %v5312_v18 = vld [vmem:[%s9809_s0 + $0xec] sm:$0xf]  ;;  %v4639_v19 = vld [vmem:[%s9809_s0 + $0xf8] sm:$0xf0]  ;;  %v6106_v21 = vor.u32 %v5311_v9, %v4631_v11 }
  0x46   :  { %1714 = vmatmul.bf16.gmra.mxu3 %v5858_v27  ;;  %1878 = vmatpush.bf16.msrb.mxu1 %v4954_v10  ;;  %10011 = vst [vmem:[#allocation31_spill] sm:$0xff] %v6104_v20  ;;  %v6108_v22 = vor.u32 %v5314_v17, %v4637_v16  ;;  %v6110_v23 = vor.u32 %v5312_v18, %v4639_v19  ;;  %v4645_v28 = vld [vmem:[%s9809_s0 + $0x100] sm:$0xf]  ;;  %v5317_v29 = vld [vmem:[%s9809_s0 + $0x10c] sm:$0xf0] }
  0x47   :  { %10012 = vst [vmem:[#allocation32_spill] sm:$0xff] %v6106_v21  ;;  %v5315_v30 = vld [vmem:[%s9809_s0 + $0x104] sm:$0xf]  ;;  %v4647_v31 = vld [vmem:[%s9809_s0 + $0x110] sm:$0xf0]  ;;  %v6140_v40 = vor.u32 %v5317_v29, %v4645_v28 }
  0x48   :  { %10013 = vst [vmem:[#allocation33_spill] sm:$0xff] %v6108_v22  ;;  %v4653_v36 = vld [vmem:[%s9809_s0 + $0x108] sm:$0xf]  ;;  %v5318_v37 = vld [vmem:[%s9809_s0 + $0x114] sm:$0xf0]  ;;  %v6142_v42 = vor.u32 %v5315_v30, %v4647_v31 }
  0x49   :  { %10014 = vst [vmem:[#allocation34_spill] sm:$0xff] %v6110_v23  ;;  %v5316_v38 = vld [vmem:[%s9809_s0 + $0x10c] sm:$0xf]  ;;  %v4655_v39 = vld [vmem:[%s9809_s0 + $0x118] sm:$0xf0]  ;;  %v6144_v43 = vor.u32 %v5318_v37, %v4653_v36 }
  0x4a   :  { %10015 = vst [vmem:[#allocation35_spill] sm:$0xff] %v6140_v40  ;;  %v6146_v57 = vor.u32 %v5316_v38, %v4655_v39  ;;  %v5419_v59 = vld [vmem:[%s9808_s1 + $0x244] sm:$0xf]  ;;  %v5063_v60 = vld [vmem:[%s9808_s1 + $0x250] sm:$0xf0] }
  0x4b   :  { %10016 = vst [vmem:[#allocation36_spill] sm:$0xff] %v6142_v42  ;;  %v5451_v61 = vld [vmem:[%s9808_s1 + $0x344] sm:$0xf]  ;;  %v5066_v62 = vor.u32 %v5419_v59, %v5063_v60  ;;  %v5191_v63 = vld [vmem:[%s9808_s1 + $0x350] sm:$0xf0] }
  0x4c   :  { %10017 = vst [vmem:[#allocation37_spill] sm:$0xff] %v6144_v43  ;;  %v5194_v5 = vor.u32 %v5451_v61, %v5191_v63  ;;  %v4661_v16 = vld [vmem:[%s9809_s0 + $0x120] sm:$0xf]  ;;  %v5321_v17 = vld [vmem:[%s9809_s0 + $0x12c] sm:$0xf0] }
  0x4d   :  { %10018 = vst [vmem:[#allocation38_spill] sm:$0xff] %v6146_v57  ;;  %1968 = vmatpush.bf16.msrb.mxu2 %v5066_v62  ;;  %v5319_v18 = vld [vmem:[%s9809_s0 + $0x124] sm:$0xf]  ;;  %v4663_v19 = vld [vmem:[%s9809_s0 + $0x130] sm:$0xf0]  ;;  %v6202_v59 = vor.u32 %v5321_v17, %v4661_v16 }
  0x4e   :  { %2057 = vmatpush.bf16.msrb.mxu3 %v5194_v5  ;;  %v5355_v28 = vld [vmem:[%s9808_s1 + $0x44] sm:$0xf]  ;;  %v4807_v29 = vld [vmem:[%s9808_s1 + $0x50] sm:$0xf0]  ;;  %v4669_v31 = vld [vmem:[%s9809_s0 + $0x128] sm:$0xf]  ;;  %v6204_v63 = vor.u32 %v5319_v18, %v4663_v19 }
  0x4f   :  { %v5387_v30 = vld [vmem:[%s9808_s1 + $0x144] sm:$0xf]  ;;  %v5322_v36 = vld [vmem:[%s9809_s0 + $0x134] sm:$0xf0]  ;;  %v4810_v37 = vor.u32 %v5355_v28, %v4807_v29  ;;  %v4935_v38 = vld [vmem:[%s9808_s1 + $0x150] sm:$0xf0] }
  0x50   :  { %v5320_v39 = vld [vmem:[%s9809_s0 + $0x12c] sm:$0xf]  ;;  %10019 = vst [vmem:[#allocation39_spill] sm:$0xff] %v6202_v59  ;;  %v4677_v29 = vld [vmem:[%s9809_s0 + $0x140] sm:$0xf] }
  0x51   :  { %1790 = vmatpush.bf16.msrb.mxu0 %v4810_v37  ;;  %10020 = vst [vmem:[#allocation40_spill] sm:$0xff] %v6204_v63  ;;  %v4685_v37 = vld [vmem:[%s9809_s0 + $0x148] sm:$0xf] }
  0x54   :  { %1452 = vmatmul.bf16.gmra.mxu0 %v5912_v49  ;;  %1541 = vmatmul.bf16.gmra.mxu1 %v5914_v50 }
  0x55   :  { %1630 = vmatmul.bf16.gmra.mxu2 %v5916_v54 }
  0x56   :  { %1719 = vmatmul.bf16.gmra.mxu3 %v5918_v55 }
  0x64   :  { %1457 = vmatmul.bf16.gmra.mxu0 %v5948_v0  ;;  %1546 = vmatmul.bf16.gmra.mxu1 %v5950_v1 }
  0x65   :  { %1635 = vmatmul.bf16.gmra.mxu2 %v5952_v2 }
  0x66   :  { %1724 = vmatmul.bf16.gmra.mxu3 %v5954_v3 }
  0x74   :  { %1462 = vmatmul.bf16.gmra.mxu0 %v6008_v32  ;;  %1551 = vmatmul.bf16.gmra.mxu1 %v6010_v33 }
  0x75   :  { %1640 = vmatmul.bf16.gmra.mxu2 %v6012_v34 }
  0x76   :  { %1729 = vmatmul.bf16.gmra.mxu3 %v6014_v35 }
  0x84   :  { %1467 = vmatmul.bf16.gmra.mxu0 %v6044_v44  ;;  %1556 = vmatmul.bf16.gmra.mxu1 %v6046_v45 }
  0x85   :  { %1645 = vmatmul.bf16.gmra.mxu2 %v6048_v46 }
  0x86   :  { %1734 = vmatmul.bf16.gmra.mxu3 %v6050_v48 }
  0x94   :  { %1472 = vmatmul.bf16.gmra.mxu0 %v6104_v20  ;;  %1561 = vmatmul.bf16.gmra.mxu1 %v6106_v21 }
  0x95   :  { %1650 = vmatmul.bf16.gmra.mxu2 %v6108_v22 }
  0x96   :  { %1739 = vmatmul.bf16.gmra.mxu3 %v6110_v23 }
  0xa1   :  { %v1438_v41 = vpop.f32.mrf.mxu0  ;;  %v1527_v56 = vpop.f32.mrf.mxu1 }
  0xa2   :  { %v1528_v58 = vadd.f32 %v1527_v56, %v1438_v41  ;;  %v4671_v41 = vld [vmem:[%s9809_s0 + $0x138] sm:$0xf0]  ;;  %v4938_v56 = vor.u32 %v5387_v30, %v4935_v38  ;;  %v5325_v30 = vld [vmem:[%s9809_s0 + $0x14c] sm:$0xf0]  ;;  %v5326_v38 = vld [vmem:[%s9809_s0 + $0x154] sm:$0xf0] }
  0xa4   :  { %1477 = vmatmul.bf16.gmra.mxu0 %v6140_v40  ;;  %1566 = vmatmul.bf16.gmra.mxu1 %v6142_v42 }
  0xa5   :  { %1655 = vmatmul.bf16.gmra.mxu2 %v6144_v43  ;;  %1879 = vmatpush.bf16.msrb.mxu1 %v4938_v56 }
  0xa6   :  { %1744 = vmatmul.bf16.gmra.mxu3 %v6146_v57 }
  0xa8   :  { %v1616_v4 = vpop.f32.mrf.mxu2 }
  0xa9   :  { %v1617_v6 = vadd.f32 %v1616_v4, %v1528_v58  ;;  %v1705_v7 = vpop.f32.mrf.mxu3  ;;  %v1440_v8 = vpop.f32.mrf.mxu0  ;;  %v6206_v4 = vor.u32 %v5322_v36, %v4669_v31  ;;  %v5323_v31 = vld [vmem:[%s9809_s0 + $0x144] sm:$0xf]  ;;  %v4679_v36 = vld [vmem:[%s9809_s0 + $0x150] sm:$0xf0] }
  0xaa   :  { %v1529_v9 = vpop.f32.mrf.mxu1 }
  0xab   :  { %v6164_v10 = vadd.f32 %v1705_v7, %v1617_v6  ;;  %v1530_v11 = vadd.f32 %v1529_v9, %v1440_v8  ;;  %10021 = vst [vmem:[#allocation41_spill] sm:$0xff] %v6206_v4  ;;  %v6208_v6 = vor.u32 %v5320_v39, %v4671_v41  ;;  %v5324_v39 = vld [vmem:[%s9809_s0 + $0x14c] sm:$0xf]  ;;  %v4687_v41 = vld [vmem:[%s9809_s0 + $0x158] sm:$0xf0] }
  0xad   :  { %10022 = vst [vmem:[#allocation42_spill] sm:$0xff] %v6208_v6 }
  0xb0   :  { %v1618_v58 = vpop.f32.mrf.mxu2 }
  0xb1   :  { %v1619_v60 = vadd.f32 %v1618_v58, %v1530_v11  ;;  %v1707_v61 = vpop.f32.mrf.mxu3  ;;  %v1443_v62 = vpop.f32.mrf.mxu0  ;;  %v6242_v58 = vor.u32 %v5325_v30, %v4677_v29  ;;  %v5447_v29 = vld [vmem:[%s9808_s1 + $0x324] sm:$0xf] }
  0xb2   :  { %v1532_v5 = vpop.f32.mrf.mxu1 }
  0xb3   :  { %v6210_v7 = vadd.f32 %v1707_v61, %v1619_v60  ;;  %v1533_v8 = vadd.f32 %v1532_v5, %v1443_v62  ;;  %10023 = vst [vmem:[#allocation43_spill] sm:$0xff] %v6242_v58  ;;  %v6244_v5 = vor.u32 %v5323_v31, %v4679_v36  ;;  %v5175_v31 = vld [vmem:[%s9808_s1 + $0x330] sm:$0xf0] }
  0xb4   :  { %1482 = vmatmul.bf16.gmra.mxu0 %v6202_v59  ;;  %1571 = vmatmul.bf16.gmra.mxu1 %v6204_v63 }
  0xb5   :  { %1660 = vmatmul.bf16.gmra.mxu2 %v6206_v4  ;;  %10024 = vst [vmem:[#allocation44_spill] sm:$0xff] %v6244_v5 }
  0xb6   :  { %1749 = vmatmul.bf16.gmra.mxu3 %v6208_v6 }
  0xb8   :  { %v1621_v9 = vpop.f32.mrf.mxu2 }
  0xb9   :  { %v1622_v11 = vadd.f32 %v1621_v9, %v1533_v8  ;;  %v1710_v16 = vpop.f32.mrf.mxu3  ;;  %v1445_v17 = vpop.f32.mrf.mxu0  ;;  %v6246_v8 = vor.u32 %v5326_v38, %v4685_v37  ;;  %v5178_v37 = vor.u32 %v5447_v29, %v5175_v31  ;;  %v4791_v29 = vld [vmem:[%s9808_s1 + $0x30] sm:$0xf0]  ;;  %v4701_v31 = vld [vmem:[%s9809_s0 + $0x168] sm:$0xf] }
  0xba   :  { %v1534_v18 = vpop.f32.mrf.mxu1 }
  0xbb   :  { %v6216_v19 = vadd.f32 %v1710_v16, %v1622_v11  ;;  %v1535_v28 = vadd.f32 %v1534_v18, %v1445_v17  ;;  %10025 = vst [vmem:[#allocation45_spill] sm:$0xff] %v6246_v8  ;;  %v6248_v11 = vor.u32 %v5324_v39, %v4687_v41  ;;  %v5415_v18 = vld [vmem:[%s9808_s1 + $0x224] sm:$0xf]  ;;  %2058 = vmatpush.bf16.msrb.mxu3 %v5178_v37 }
  0xbd   :  { %10026 = vst [vmem:[#allocation46_spill] sm:$0xff] %v6248_v11 }
  0xc0   :  { %v1623_v56 = vpop.f32.mrf.mxu2 }
  0xc1   :  { %v1624_v60 = vadd.f32 %v1623_v56, %v1535_v28  ;;  %v1712_v61 = vpop.f32.mrf.mxu3  ;;  %v1448_v62 = vpop.f32.mrf.mxu0  ;;  %v5047_v28 = vld [vmem:[%s9808_s1 + $0x230] sm:$0xf0] }
  0xc2   :  { %v1537_v9 = vpop.f32.mrf.mxu1  ;;  %v5050_v30 = vor.u32 %v5415_v18, %v5047_v28  ;;  %v4695_v18 = vld [vmem:[%s9809_s0 + $0x170] sm:$0xf0]  ;;  %v5351_v28 = vld [vmem:[%s9808_s1 + $0x24] sm:$0xf] }
  0xc3   :  { %v6250_v16 = vadd.f32 %v1712_v61, %v1624_v60  ;;  %v1538_v17 = vadd.f32 %v1537_v9, %v1448_v62  ;;  %v4693_v62 = vld [vmem:[%s9809_s0 + $0x160] sm:$0xf]  ;;  %v5329_v9 = vld [vmem:[%s9809_s0 + $0x16c] sm:$0xf0]  ;;  %v4794_v37 = vor.u32 %v5351_v28, %v4791_v29 }
  0xc4   :  { %1487 = vmatmul.bf16.gmra.mxu0 %v6242_v58  ;;  %1576 = vmatmul.bf16.gmra.mxu1 %v6244_v5 }
  0xc5   :  { %1665 = vmatmul.bf16.gmra.mxu2 %v6246_v8  ;;  %v6306_v8 = vor.u32 %v5329_v9, %v4693_v62  ;;  %1791 = vmatpush.bf16.msrb.mxu0 %v4794_v37  ;;  %v5332_v37 = vld [vmem:[%s9809_s0 + $0x18c] sm:$0xf] }
  0xc6   :  { %1754 = vmatmul.bf16.gmra.mxu3 %v6248_v11  ;;  %1969 = vmatpush.bf16.msrb.mxu2 %v5050_v30  ;;  %v5383_v30 = vld [vmem:[%s9808_s1 + $0x124] sm:$0xf] }
  0xc7   :  { %10027 = vst [vmem:[#allocation47_spill] sm:$0xff] %v6306_v8 }
  0xc8   :  { %v1626_v36 = vpop.f32.mrf.mxu2 }
  0xc9   :  { %v1627_v38 = vadd.f32 %v1626_v36, %v1538_v17  ;;  %v1715_v39 = vpop.f32.mrf.mxu3  ;;  %v1450_v41 = vpop.f32.mrf.mxu0  ;;  %v5327_v17 = vld [vmem:[%s9809_s0 + $0x164] sm:$0xf]  ;;  %v5330_v36 = vld [vmem:[%s9809_s0 + $0x174] sm:$0xf0] }
  0xca   :  { %v1539_v56 = vpop.f32.mrf.mxu1  ;;  %v6308_v29 = vor.u32 %v5327_v17, %v4695_v18  ;;  %v6310_v6 = vor.u32 %v5330_v36, %v4701_v31  ;;  %v4717_v31 = vld [vmem:[%s9809_s0 + $0x188] sm:$0xf]  ;;  %v5334_v36 = vld [vmem:[%s9809_s0 + $0x194] sm:$0xf0] }
  0xcb   :  { %v6268_v60 = vadd.f32 %v1715_v39, %v1627_v38  ;;  %v1540_v61 = vadd.f32 %v1539_v56, %v1450_v41  ;;  %v4919_v38 = vld [vmem:[%s9808_s1 + $0x130] sm:$0xf0]  ;;  %v5328_v39 = vld [vmem:[%s9809_s0 + $0x16c] sm:$0xf]  ;;  %v4703_v41 = vld [vmem:[%s9809_s0 + $0x178] sm:$0xf0] }
  0xcc   :  { %v4922_v56 = vor.u32 %v5383_v30, %v4919_v38  ;;  %10028 = vst [vmem:[#allocation48_spill] sm:$0xff] %v6308_v29  ;;  %v6312_v63 = vor.u32 %v5328_v39, %v4703_v41  ;;  %v4719_v38 = vld [vmem:[%s9809_s0 + $0x198] sm:$0xf0] }
  0xcd   :  { %10029 = vst [vmem:[#allocation49_spill] sm:$0xff] %v6310_v6 }
  0xce   :  { %1880 = vmatpush.bf16.msrb.mxu1 %v4922_v56  ;;  %10030 = vst [vmem:[#allocation50_spill] sm:$0xff] %v6312_v63 }
  0xd0   :  { %v1628_v11 = vpop.f32.mrf.mxu2 }
  0xd1   :  { %v1629_v5 = vadd.f32 %v1628_v11, %v1540_v61  ;;  %v1717_v58 = vpop.f32.mrf.mxu3  ;;  %v1453_v28 = vpop.f32.mrf.mxu0 }
  0xd2   :  { %v1542_v4 = vpop.f32.mrf.mxu1 }
  0xd3   :  { %v6314_v59 = vadd.f32 %v1717_v58, %v1629_v5  ;;  %v1543_v57 = vadd.f32 %v1542_v4, %v1453_v28  ;;  %v4709_v4 = vld [vmem:[%s9809_s0 + $0x180] sm:$0xf]  ;;  %v5333_v58 = vld [vmem:[%s9809_s0 + $0x18c] sm:$0xf0]  ;;  %v5331_v5 = vld [vmem:[%s9809_s0 + $0x184] sm:$0xf] }
  0xd4   :  { %1492 = vmatmul.bf16.gmra.mxu0 %v6306_v8  ;;  %1581 = vmatmul.bf16.gmra.mxu1 %v6308_v29  ;;  %v6346_v41 = vor.u32 %v5333_v58, %v4709_v4  ;;  %v5031_v4 = vld [vmem:[%s9808_s1 + $0x210] sm:$0xf0]  ;;  %v5443_v58 = vld [vmem:[%s9808_s1 + $0x304] sm:$0xf] }
  0xd5   :  { %1670 = vmatmul.bf16.gmra.mxu2 %v6310_v6 }
  0xd6   :  { %1759 = vmatmul.bf16.gmra.mxu3 %v6312_v63  ;;  %10031 = vst [vmem:[#allocation51_spill] sm:$0xff] %v6346_v41 }
  0xd8   :  { %v1631_v11 = vpop.f32.mrf.mxu2 }
  0xd9   :  { %v1632_v61 = vadd.f32 %v1631_v11, %v1543_v57  ;;  %v1720_v62 = vpop.f32.mrf.mxu3  ;;  %v1455_v9 = vpop.f32.mrf.mxu0  ;;  %v4711_v57 = vld [vmem:[%s9809_s0 + $0x190] sm:$0xf0] }
  0xda   :  { %v1544_v17 = vpop.f32.mrf.mxu1 }
  0xdb   :  { %v6320_v18 = vadd.f32 %v1720_v62, %v1632_v61  ;;  %v1545_v30 = vadd.f32 %v1544_v17, %v1455_v9  ;;  %v6348_v61 = vor.u32 %v5331_v5, %v4711_v57  ;;  %v6350_v62 = vor.u32 %v5334_v36, %v4717_v31  ;;  %v5159_v57 = vld [vmem:[%s9808_s1 + $0x310] sm:$0xf0] }
  0xdc   :  { %v6352_v17 = vor.u32 %v5332_v37, %v4719_v38  ;;  %v5162_v36 = vor.u32 %v5443_v58, %v5159_v57  ;;  %v5347_v58 = vld [vmem:[%s9808_s1 + $0x4] sm:$0xf] }
  0xdd   :  { %10032 = vst [vmem:[#allocation52_spill] sm:$0xff] %v6348_v61  ;;  %v5379_v57 = vld [vmem:[%s9808_s1 + $0x104] sm:$0xf] }
  0xde   :  { %10033 = vst [vmem:[#allocation53_spill] sm:$0xff] %v6350_v62  ;;  %2059 = vmatpush.bf16.msrb.mxu3 %v5162_v36  ;;  %v5338_v36 = vld [vmem:[%s9809_s0 + $0x1b4] sm:$0xf0] }
  0xdf   :  { %10034 = vst [vmem:[#allocation54_spill] sm:$0xff] %v6352_v17 }
  0xe0   :  { %v1633_v39 = vpop.f32.mrf.mxu2 }
  0xe1   :  { %v1634_v56 = vadd.f32 %v1633_v39, %v1545_v30  ;;  %v1722_v28 = vpop.f32.mrf.mxu3  ;;  %v1458_v11 = vpop.f32.mrf.mxu0  ;;  %v5411_v30 = vld [vmem:[%s9808_s1 + $0x204] sm:$0xf] }
  0xe2   :  { %v1547_v9 = vpop.f32.mrf.mxu1  ;;  %v5034_v5 = vor.u32 %v5411_v30, %v5031_v4  ;;  %v5337_v30 = vld [vmem:[%s9809_s0 + $0x1ac] sm:$0xf0]  ;;  %v4727_v4 = vld [vmem:[%s9809_s0 + $0x1b0] sm:$0xf0] }
  0xe3   :  { %v6354_v63 = vadd.f32 %v1722_v28, %v1634_v56  ;;  %v1548_v6 = vadd.f32 %v1547_v9, %v1458_v11  ;;  %v4725_v9 = vld [vmem:[%s9809_s0 + $0x1a0] sm:$0xf] }
  0xe4   :  { %1497 = vmatmul.bf16.gmra.mxu0 %v6346_v41  ;;  %1586 = vmatmul.bf16.gmra.mxu1 %v6348_v61  ;;  %v6410_v61 = vor.u32 %v5337_v30, %v4725_v9 }
  0xe5   :  { %1675 = vmatmul.bf16.gmra.mxu2 %v6350_v62 }
  0xe6   :  { %1764 = vmatmul.bf16.gmra.mxu3 %v6352_v17  ;;  %1970 = vmatpush.bf16.msrb.mxu2 %v5034_v5  ;;  %v4775_v5 = vld [vmem:[%s9808_s1 + $0x10] sm:$0xf0]  ;;  %10035 = vst [vmem:[#allocation55_spill] sm:$0xff] %v6410_v61 }
  0xe8   :  { %v1636_v31 = vpop.f32.mrf.mxu2 }
  0xe9   :  { %v1637_v37 = vadd.f32 %v1636_v31, %v1548_v6  ;;  %v1725_v38 = vpop.f32.mrf.mxu3  ;;  %v1460_v39 = vpop.f32.mrf.mxu0  ;;  %v5335_v6 = vld [vmem:[%s9809_s0 + $0x1a4] sm:$0xf]  ;;  %v4733_v31 = vld [vmem:[%s9809_s0 + $0x1a8] sm:$0xf] }
  0xea   :  { %v1549_v56 = vpop.f32.mrf.mxu1  ;;  %v6414_v8 = vor.u32 %v5338_v36, %v4733_v31  ;;  %v5342_v31 = vld [vmem:[%s9809_s0 + $0x1d4] sm:$0xf0]  ;;  %v5340_v36 = vld [vmem:[%s9809_s0 + $0x1cc] sm:$0xf] }
  0xeb   :  { %v6372_v28 = vadd.f32 %v1725_v38, %v1637_v37  ;;  %v1550_v11 = vadd.f32 %v1549_v56, %v1460_v39  ;;  %v4778_v37 = vor.u32 %v5347_v58, %v4775_v5  ;;  %v4903_v38 = vld [vmem:[%s9808_s1 + $0x110] sm:$0xf0]  ;;  %v5336_v39 = vld [vmem:[%s9809_s0 + $0x1ac] sm:$0xf]  ;;  %v4735_v56 = vld [vmem:[%s9809_s0 + $0x1b8] sm:$0xf0]  ;;  %v6412_v5 = vor.u32 %v5335_v6, %v4727_v4 }
  0xec   :  { %v4906_v17 = vor.u32 %v5379_v57, %v4903_v38  ;;  %10037 = vst [vmem:[#allocation57_spill] sm:$0xff] %v6414_v8  ;;  %v6416_v42 = vor.u32 %v5336_v39, %v4735_v56  ;;  %v4749_v57 = vld [vmem:[%s9809_s0 + $0x1c8] sm:$0xf] }
  0xed   :  { %1792 = vmatpush.bf16.msrb.mxu0 %v4778_v37  ;;  %10036 = vst [vmem:[#allocation56_spill] sm:$0xff] %v6412_v5  ;;  %v4751_v37 = vld [vmem:[%s9809_s0 + $0x1d8] sm:$0xf0] }
  0xee   :  { %1881 = vmatpush.bf16.msrb.mxu1 %v4906_v17  ;;  %10038 = vst [vmem:[#allocation58_spill] sm:$0xff] %v6416_v42 }
  0xf0   :  { %v1638_v62 = vpop.f32.mrf.mxu2 }
  0xf1   :  { %v1639_v41 = vadd.f32 %v1638_v62, %v1550_v11  ;;  %v1727_v29 = vpop.f32.mrf.mxu3  ;;  %v1463_v58 = vpop.f32.mrf.mxu0 }
  0xf2   :  { %v1552_v43 = vpop.f32.mrf.mxu1 }
  0xf3   :  { %v6418_v40 = vadd.f32 %v1727_v29, %v1639_v41  ;;  %v1553_v23 = vadd.f32 %v1552_v43, %v1463_v58  ;;  %v4741_v43 = vld [vmem:[%s9809_s0 + $0x1c0] sm:$0xf]  ;;  %v5341_v29 = vld [vmem:[%s9809_s0 + $0x1cc] sm:$0xf0]  ;;  %v5339_v41 = vld [vmem:[%s9809_s0 + $0x1c4] sm:$0xf] }
  0xf4   :  { %1502 = vmatmul.bf16.gmra.mxu0 %v6410_v61  ;;  %1591 = vmatmul.bf16.gmra.mxu1 %v6412_v5  ;;  %v6450_v39 = vor.u32 %v5341_v29, %v4741_v43  ;;  %v5442_v43 = vld [vmem:[%s9808_s1 + $0x2f4] sm:$0xf0]  ;;  %v5277_v29 = vld [vmem:[%s9808_s1 + $0x3e8] sm:$0xf] }
  0xf5   :  { %1680 = vmatmul.bf16.gmra.mxu2 %v6414_v8 }
  0xf6   :  { %1769 = vmatmul.bf16.gmra.mxu3 %v6416_v42  ;;  %10039 = vst [vmem:[#allocation59_spill] sm:$0xff] %v6450_v39 }
  0xf8   :  { %v1641_v62 = vpop.f32.mrf.mxu2 }
  0xf9   :  { %v1642_v11 = vadd.f32 %v1641_v62, %v1553_v23  ;;  %v1730_v9 = vpop.f32.mrf.mxu3  ;;  %v1465_v30 = vpop.f32.mrf.mxu0  ;;  %v4743_v23 = vld [vmem:[%s9809_s0 + $0x1d0] sm:$0xf0] }
  0xfa   :  { %v1554_v6 = vpop.f32.mrf.mxu1 }
  0xfb   :  { %v6424_v17 = vadd.f32 %v1730_v9, %v1642_v11  ;;  %v1555_v4 = vadd.f32 %v1554_v6, %v1465_v30  ;;  %v6452_v11 = vor.u32 %v5339_v41, %v4743_v23  ;;  %v6454_v9 = vor.u32 %v5342_v31, %v4749_v57  ;;  %v5474_v23 = vld [vmem:[%s9808_s1 + $0x3f4] sm:$0xf0] }
  0xfc   :  { %v6456_v6 = vor.u32 %v5340_v36, %v4751_v37  ;;  %v5278_v31 = vor.u32 %v5474_v23, %v5277_v29  ;;  %v4893_v29 = vld [vmem:[%s9808_s1 + $0xe8] sm:$0xf] }
  0xfd   :  { %10040 = vst [vmem:[#allocation60_spill] sm:$0xff] %v6452_v11  ;;  %v5021_v23 = vld [vmem:[%s9808_s1 + $0x1e8] sm:$0xf] }
  0xfe   :  { %10041 = vst [vmem:[#allocation61_spill] sm:$0xff] %v6454_v9  ;;  %2408 = vmatpush.bf16.msra.mxu3 %v5278_v31  ;;  %v5346_v31 = vld [vmem:[%s9809_s0 + $0x1f4] sm:$0xf0] }
  0xff   :  { %10042 = vst [vmem:[#allocation62_spill] sm:$0xff] %v6456_v6 }
 0x100   :  { %v1643_v38 = vpop.f32.mrf.mxu2 }
 0x101   :  { %v1644_v56 = vadd.f32 %v1643_v38, %v1555_v4  ;;  %v1732_v58 = vpop.f32.mrf.mxu3  ;;  %v1468_v62 = vpop.f32.mrf.mxu0  ;;  %v5149_v4 = vld [vmem:[%s9808_s1 + $0x2e8] sm:$0xf] }
 0x102   :  { %v1557_v30 = vpop.f32.mrf.mxu1  ;;  %v5150_v41 = vor.u32 %v5442_v43, %v5149_v4  ;;  %v5345_v4 = vld [vmem:[%s9809_s0 + $0x1ec] sm:$0xf0]  ;;  %v4759_v43 = vld [vmem:[%s9809_s0 + $0x1f0] sm:$0xf0] }
 0x103   :  { %v6458_v42 = vadd.f32 %v1732_v58, %v1644_v56  ;;  %v1558_v8 = vadd.f32 %v1557_v30, %v1468_v62  ;;  %v4757_v30 = vld [vmem:[%s9809_s0 + $0x1e0] sm:$0xf] }
 0x104   :  { %1507 = vmatmul.bf16.gmra.mxu0 %v6450_v39  ;;  %1596 = vmatmul.bf16.gmra.mxu1 %v6452_v11  ;;  %v6514_v11 = vor.u32 %v5345_v4, %v4757_v30 }
 0x105   :  { %1685 = vmatmul.bf16.gmra.mxu2 %v6454_v9 }
 0x106   :  { %1774 = vmatmul.bf16.gmra.mxu3 %v6456_v6  ;;  %2319 = vmatpush.bf16.msra.mxu2 %v5150_v41  ;;  %v5378_v41 = vld [vmem:[%s9808_s1 + $0xf4] sm:$0xf0]  ;;  %10043 = vst [vmem:[#allocation63_spill] sm:$0xff] %v6514_v11 }
 0x108   :  { %v1646_v57 = vpop.f32.mrf.mxu2 }
 0x109   :  { %v1647_v36 = vadd.f32 %v1646_v57, %v1558_v8  ;;  %v1735_v37 = vpop.f32.mrf.mxu3  ;;  %v1470_v38 = vpop.f32.mrf.mxu0  ;;  %v5343_v8 = vld [vmem:[%s9809_s0 + $0x1e4] sm:$0xf]  ;;  %v4765_v57 = vld [vmem:[%s9809_s0 + $0x1e8] sm:$0xf] }
 0x10a   :  { %v1559_v56 = vpop.f32.mrf.mxu1  ;;  %v6518_v61 = vor.u32 %v5346_v31, %v4765_v57 }
 0x10b   :  { %v6476_v58 = vadd.f32 %v1735_v37, %v1647_v36  ;;  %v1560_v62 = vadd.f32 %v1559_v56, %v1470_v38  ;;  %v4894_v36 = vor.u32 %v5378_v41, %v4893_v29  ;;  %v5410_v37 = vld [vmem:[%s9808_s1 + $0x1f4] sm:$0xf0]  ;;  %v5344_v38 = vld [vmem:[%s9809_s0 + $0x1ec] sm:$0xf]  ;;  %v4767_v56 = vld [vmem:[%s9809_s0 + $0x1f8] sm:$0xf0]  ;;  %v6516_v41 = vor.u32 %v5343_v8, %v4759_v43 }
 0x10c   :  { %v5022_v6 = vor.u32 %v5410_v37, %v5021_v23  ;;  %10045 = vst [vmem:[#allocation65_spill] sm:$0xff] %v6518_v61  ;;  %v6520_v21 = vor.u32 %v5344_v38, %v4767_v56  ;;  %v5438_v37 = vld [vmem:[%s9808_s1 + $0x2d4] sm:$0xf0]  ;;  %v5261_v38 = vld [vmem:[%s9808_s1 + $0x3c8] sm:$0xf] }
 0x10d   :  { %2141 = vmatpush.bf16.msra.mxu0 %v4894_v36  ;;  %10044 = vst [vmem:[#allocation64_spill] sm:$0xff] %v6516_v41 }
 0x10e   :  { %2230 = vmatpush.bf16.msra.mxu1 %v5022_v6  ;;  %10046 = vst [vmem:[#allocation66_spill] sm:$0xff] %v6520_v21 }
 0x110   :  { %v1648_v9 = vpop.f32.mrf.mxu2 }
 0x111   :  { %v1649_v39 = vadd.f32 %v1648_v9, %v1560_v62  ;;  %v1737_v5 = vpop.f32.mrf.mxu3  ;;  %v1473_v29 = vpop.f32.mrf.mxu0 }
 0x112   :  { %v1562_v22 = vpop.f32.mrf.mxu1 }
 0x113   :  { %v6522_v20 = vadd.f32 %v1737_v5, %v1649_v39  ;;  %v1563_v48 = vadd.f32 %v1562_v22, %v1473_v29  ;;  %v5470_v29 = vld [vmem:[%s9808_s1 + $0x3d4] sm:$0xf0] }
 0x114   :  { %1512 = vmatmul.bf16.gmra.mxu0 %v6514_v11  ;;  %1601 = vmatmul.bf16.gmra.mxu1 %v6516_v41 }
 0x115   :  { %1690 = vmatmul.bf16.gmra.mxu2 %v6518_v61 }
 0x116   :  { %1779 = vmatmul.bf16.gmra.mxu3 %v6520_v21 }
 0x118   :  { %v1651_v9 = vpop.f32.mrf.mxu2 }
 0x119   :  { %v1652_v62 = vadd.f32 %v1651_v9, %v1563_v48  ;;  %v1740_v30 = vpop.f32.mrf.mxu3  ;;  %v1475_v4 = vpop.f32.mrf.mxu0  ;;  %v5133_v48 = vld [vmem:[%s9808_s1 + $0x2c8] sm:$0xf] }
 0x11a   :  { %v1564_v8 = vpop.f32.mrf.mxu1  ;;  %v5134_v56 = vor.u32 %v5438_v37, %v5133_v48  ;;  %v5406_v48 = vld [vmem:[%s9808_s1 + $0x1d4] sm:$0xf0] }
 0x11b   :  { %v6528_v6 = vadd.f32 %v1740_v30, %v1652_v62  ;;  %v1565_v43 = vadd.f32 %v1564_v8, %v1475_v4  ;;  %v5262_v62 = vor.u32 %v5470_v29, %v5261_v38 }
 0x11c   :  { %2320 = vmatpush.bf16.msra.mxu2 %v5134_v56 }
 0x11d   :  { %2409 = vmatpush.bf16.msra.mxu3 %v5262_v62 }
 0x120   :  { %v1653_v23 = vpop.f32.mrf.mxu2 }
 0x121   :  { %v1654_v5 = vadd.f32 %v1653_v23, %v1565_v43  ;;  %v1742_v39 = vpop.f32.mrf.mxu3  ;;  %v1478_v22 = vpop.f32.mrf.mxu0 }
 0x122   :  { %v1567_v57 = vpop.f32.mrf.mxu1 }
 0x123   :  { %v6530_v31 = vadd.f32 %v1742_v39, %v1654_v5  ;;  %v1568_v36 = vadd.f32 %v1567_v57, %v1478_v22  ;;  %v4877_v39 = vld [vmem:[%s9808_s1 + $0xc8] sm:$0xf]  ;;  %v5374_v22 = vld [vmem:[%s9808_s1 + $0xd4] sm:$0xf0] }
 0x124   :  { %1793 = vmatmul.bf16.vlgmr.msrb.gmra.mxu0 %v5750_v47  ;;  %1882 = vmatmul.bf16.vlgmr.msrb.gmra.mxu1 %v5758_v51  ;;  %v5005_v57 = vld [vmem:[%s9808_s1 + $0x1c8] sm:$0xf] }
 0x125   :  { %1971 = vmatmul.bf16.vlgmr.msrb.gmra.mxu2 %v5760_v52  ;;  %v5006_v37 = vor.u32 %v5406_v48, %v5005_v57 }
 0x126   :  { %2060 = vmatmul.bf16.vlgmr.msrb.gmra.mxu3 %v5762_v53 }
 0x127   :  { %2231 = vmatpush.bf16.msra.mxu1 %v5006_v37 }
 0x128   :  { %v1656_v9 = vpop.f32.mrf.mxu2 }
 0x129   :  { %v1657_v30 = vadd.f32 %v1656_v9, %v1568_v36  ;;  %v1745_v4 = vpop.f32.mrf.mxu3  ;;  %v1480_v8 = vpop.f32.mrf.mxu0  ;;  %v4878_v36 = vor.u32 %v5374_v22, %v4877_v39 }
 0x12a   :  { %v1569_v43 = vpop.f32.mrf.mxu1 }
 0x12b   :  { %v6548_v23 = vadd.f32 %v1745_v4, %v1657_v30  ;;  %v1570_v5 = vadd.f32 %v1569_v43, %v1480_v8  ;;  %2142 = vmatpush.bf16.msra.mxu0 %v4878_v36 }
 0x130   :  { %v1658_v38 = vpop.f32.mrf.mxu2 }
 0x131   :  { %v1659_v56 = vadd.f32 %v1658_v38, %v1570_v5  ;;  %v1747_v29 = vpop.f32.mrf.mxu3  ;;  %v1483_v9 = vpop.f32.mrf.mxu0 }
 0x132   :  { %v1572_v62 = vpop.f32.mrf.mxu1 }
 0x133   :  { %v6562_v30 = vadd.f32 %v1747_v29, %v1659_v56  ;;  %v1573_v4 = vadd.f32 %v1572_v62, %v1483_v9 }
 0x134   :  { %1798 = vmatmul.bf16.gmra.mxu0 %v5816_v12  ;;  %1887 = vmatmul.bf16.gmra.mxu1 %v5818_v13 }
 0x135   :  { %1976 = vmatmul.bf16.gmra.mxu2 %v5820_v14 }
 0x136   :  { %2065 = vmatmul.bf16.gmra.mxu3 %v5822_v15  ;;  %v5366_v15 = vld [vmem:[%s9808_s1 + $0x94] sm:$0xf0] }
 0x138   :  { %v1661_v8 = vpop.f32.mrf.mxu2 }
 0x139   :  { %v1662_v43 = vadd.f32 %v1661_v8, %v1573_v4  ;;  %v1750_v39 = vpop.f32.mrf.mxu3  ;;  %v1485_v22 = vpop.f32.mrf.mxu0  ;;  %v5117_v4 = vld [vmem:[%s9808_s1 + $0x2a8] sm:$0xf]  ;;  %v5434_v8 = vld [vmem:[%s9808_s1 + $0x2b4] sm:$0xf0] }
 0x13a   :  { %v1574_v5 = vpop.f32.mrf.mxu1 }
 0x13b   :  { %v6568_v57 = vadd.f32 %v1750_v39, %v1662_v43  ;;  %v1575_v36 = vadd.f32 %v1574_v5, %v1485_v22  ;;  %v5245_v43 = vld [vmem:[%s9808_s1 + $0x3a8] sm:$0xf]  ;;  %v5118_v39 = vor.u32 %v5434_v8, %v5117_v4  ;;  %v5466_v22 = vld [vmem:[%s9808_s1 + $0x3b4] sm:$0xf0] }
 0x13c   :  { %v4861_v4 = vld [vmem:[%s9808_s1 + $0xa8] sm:$0xf]  ;;  %v5370_v8 = vld [vmem:[%s9808_s1 + $0xb4] sm:$0xf0] }
 0x13d   :  { %2321 = vmatpush.bf16.msra.mxu2 %v5118_v39  ;;  %v5402_v39 = vld [vmem:[%s9808_s1 + $0x1b4] sm:$0xf0] }
 0x140   :  { %v1663_v48 = vpop.f32.mrf.mxu2 }
 0x141   :  { %v1664_v37 = vadd.f32 %v1663_v48, %v1575_v36  ;;  %v1752_v38 = vpop.f32.mrf.mxu3  ;;  %v1488_v56 = vpop.f32.mrf.mxu0  ;;  %v5246_v36 = vor.u32 %v5466_v22, %v5245_v43  ;;  %v4862_v43 = vor.u32 %v5370_v8, %v4861_v4 }
 0x142   :  { %v1577_v29 = vpop.f32.mrf.mxu1 }
 0x143   :  { %v6570_v9 = vadd.f32 %v1752_v38, %v1664_v37  ;;  %v1578_v62 = vadd.f32 %v1577_v29, %v1488_v56  ;;  %2410 = vmatpush.bf16.msra.mxu3 %v5246_v36  ;;  %2143 = vmatpush.bf16.msra.mxu0 %v4862_v43 }
 0x144   :  { %1803 = vmatmul.bf16.gmra.mxu0 %v5852_v24  ;;  %1892 = vmatmul.bf16.gmra.mxu1 %v5854_v25 }
 0x145   :  { %1981 = vmatmul.bf16.gmra.mxu2 %v5856_v26 }
 0x146   :  { %2070 = vmatmul.bf16.gmra.mxu3 %v5858_v27 }
 0x148   :  { %v1666_v5 = vpop.f32.mrf.mxu2 }
 0x149   :  { %v1667_v48 = vadd.f32 %v1666_v5, %v1578_v62  ;;  %v1755_v37 = vpop.f32.mrf.mxu3  ;;  %v6588_v38 = vpop.f32.mrf.mxu0  ;;  %v4989_v62 = vld [vmem:[%s9808_s1 + $0x1a8] sm:$0xf] }
 0x14a   :  { %v6590_v56 = vpop.f32.mrf.mxu1  ;;  %v4990_v22 = vor.u32 %v5402_v39, %v4989_v62 }
 0x14b   :  { %v6592_v29 = vadd.f32 %v1755_v37, %v1667_v48 }
 0x14c   :  { %2232 = vmatpush.bf16.msra.mxu1 %v4990_v22 }
 0x150   :  { %v6606_v5 = vpop.f32.mrf.mxu2 }
 0x151   :  { %v6608_v36 = vpop.f32.mrf.mxu3  ;;  %v6610_v48 = vpop.f32.mrf.mxu0 }
 0x152   :  { %v6612_v37 = vpop.f32.mrf.mxu1 }
 0x154   :  { %1808 = vmatmul.bf16.gmra.mxu0 %v5912_v49  ;;  %1897 = vmatmul.bf16.gmra.mxu1 %v5914_v50  ;;  %v5101_v50 = vld [vmem:[%s9808_s1 + $0x288] sm:$0xf] }
 0x155   :  { %1986 = vmatmul.bf16.gmra.mxu2 %v5916_v54  ;;  %v5229_v54 = vld [vmem:[%s9808_s1 + $0x388] sm:$0xf] }
 0x156   :  { %2075 = vmatmul.bf16.gmra.mxu3 %v5918_v55  ;;  %v5430_v55 = vld [vmem:[%s9808_s1 + $0x294] sm:$0xf0] }
 0x157   :  { %v5102_v24 = vor.u32 %v5430_v55, %v5101_v50  ;;  %v4845_v55 = vld [vmem:[%s9808_s1 + $0x88] sm:$0xf] }
 0x158   :  { %v6618_v4 = vpop.f32.mrf.mxu2 }
 0x159   :  { %v6620_v8 = vpop.f32.mrf.mxu3  ;;  %v6622_v62 = vpop.f32.mrf.mxu0  ;;  %2322 = vmatpush.bf16.msra.mxu2 %v5102_v24 }
 0x15a   :  { %v6624_v43 = vpop.f32.mrf.mxu1 }
 0x160   :  { %v6626_v39 = vpop.f32.mrf.mxu2 }
 0x161   :  { %v6628_v22 = vpop.f32.mrf.mxu3  ;;  %v6630_v25 = vpop.f32.mrf.mxu0 }
 0x162   :  { %v6632_v49 = vpop.f32.mrf.mxu1 }
 0x164   :  { %1813 = vmatmul.bf16.gmra.mxu0 %v5948_v0  ;;  %1902 = vmatmul.bf16.gmra.mxu1 %v5950_v1  ;;  %v5462_v1 = vld [vmem:[%s9808_s1 + $0x394] sm:$0xf0]  ;;  %v3240_v0 = vadd.f32 %v6210_v7, %v6164_v10 }
 0x165   :  { %1991 = vmatmul.bf16.gmra.mxu2 %v5952_v2  ;;  %v5230_v2 = vor.u32 %v5462_v1, %v5229_v54  ;;  %v4973_v54 = vld [vmem:[%s9808_s1 + $0x188] sm:$0xf]  ;;  %v4846_v1 = vor.u32 %v5366_v15, %v4845_v55 }
 0x166   :  { %2080 = vmatmul.bf16.gmra.mxu3 %v5954_v3  ;;  %v3241_v13 = vadd.f32 %v3240_v0, %v6216_v19  ;;  %v5398_v0 = vld [vmem:[%s9808_s1 + $0x194] sm:$0xf0] }
 0x167   :  { %2411 = vmatpush.bf16.msra.mxu3 %v5230_v2  ;;  %2144 = vmatpush.bf16.msra.mxu0 %v4846_v1 }
 0x168   :  { %v6652_v3 = vpop.f32.mrf.mxu2  ;;  %v3242_v50 = vadd.f32 %v3241_v13, %v6250_v16  ;;  %v4974_v13 = vor.u32 %v5398_v0, %v4973_v54 }
 0x169   :  { %v6654_v27 = vpop.f32.mrf.mxu3  ;;  %v6656_v26 = vpop.f32.mrf.mxu0 }
 0x16a   :  { %v1589_v12 = vpop.f32.mrf.mxu1  ;;  %v3243_v24 = vadd.f32 %v3242_v50, %v6268_v60  ;;  %2233 = vmatpush.bf16.msra.mxu1 %v4974_v13 }
 0x16c   :  { %v3244_v2 = vadd.f32 %v3243_v24, %v6314_v59 }
 0x16e   :  { %v3245_v53 = vadd.f32 %v3244_v2, %v6320_v18 }
 0x170   :  { %v1678_v14 = vpop.f32.mrf.mxu2  ;;  %v3246_v21 = vadd.f32 %v3245_v53, %v6354_v63 }
 0x171   :  { %v6674_v51 = vpop.f32.mrf.mxu3  ;;  %v1503_v47 = vpop.f32.mrf.mxu0 }
 0x172   :  { %v1592_v52 = vpop.f32.mrf.mxu1  ;;  %v3247_v15 = vadd.f32 %v3246_v21, %v6372_v28 }
 0x174   :  { %1818 = vmatmul.bf16.gmra.mxu0 %v6008_v32  ;;  %1907 = vmatmul.bf16.gmra.mxu1 %v6010_v33  ;;  %v3248_v50 = vadd.f32 %v3247_v15, %v6418_v40 }
 0x175   :  { %1996 = vmatmul.bf16.gmra.mxu2 %v6012_v34 }
 0x176   :  { %2085 = vmatmul.bf16.gmra.mxu3 %v6014_v35  ;;  %v3249_v1 = vadd.f32 %v3248_v50, %v6424_v17 }
 0x178   :  { %v1681_v55 = vpop.f32.mrf.mxu2  ;;  %v3250_v53 = vadd.f32 %v3249_v1, %v6458_v42  ;;  %v1580_v1 = vadd.f32 %v6590_v56, %v6588_v38  ;;  %v1588_v38 = vadd.f32 %v6632_v49, %v6630_v25 }
 0x179   :  { %v1770_v54 = vpop.f32.mrf.mxu3  ;;  %v1505_v24 = vpop.f32.mrf.mxu0 }
 0x17a   :  { %v1594_v0 = vpop.f32.mrf.mxu1  ;;  %v3251_v13 = vadd.f32 %v3250_v53, %v6476_v58  ;;  %v1583_v53 = vadd.f32 %v6612_v37, %v6610_v48 }
 0x17c   :  { %v3252_v2 = vadd.f32 %v3251_v13, %v6522_v20  ;;  %v10047_v13 = vld [vmem:[#allocation30_spill] sm:$0xff] }
 0x17e   :  { %v3253_v21 = vadd.f32 %v3252_v2, %v6528_v6 }
 0x180   :  { %v1683_v33 = vpop.f32.mrf.mxu2  ;;  %v3254_v15 = vadd.f32 %v3253_v21, %v6530_v31  ;;  %v1669_v21 = vadd.f32 %v6606_v5, %v1580_v1 }
 0x181   :  { %v1772_v32 = vpop.f32.mrf.mxu3  ;;  %v1508_v34 = vpop.f32.mrf.mxu0 }
 0x182   :  { %v1597_v35 = vpop.f32.mrf.mxu1  ;;  %v3255_v50 = vadd.f32 %v3254_v15, %v6548_v23  ;;  %v1585_v15 = vadd.f32 %v6624_v43, %v6622_v62  ;;  %v6709_v37 = vadd.f32 %v6608_v36, %v1669_v21  ;;  %v1590_v62 = vadd.f32 %v1589_v12, %v6656_v26 }
 0x183   :  { %v1593_v43 = vadd.f32 %v1592_v52, %v1503_v47  ;;  %v10048_v52 = vld [vmem:[#allocation31_spill] sm:$0xff] }
 0x184   :  { %1823 = vmatmul.bf16.gmra.mxu0 %v6044_v44  ;;  %1912 = vmatmul.bf16.gmra.mxu1 %v6046_v45  ;;  %v3256_v2 = vadd.f32 %v3255_v50, %v6562_v30  ;;  %v1674_v5 = vadd.f32 %v6626_v39, %v1585_v15  ;;  %v1679_v36 = vadd.f32 %v1678_v14, %v1590_v62  ;;  %v10049_v14 = vld [vmem:[#allocation32_spill] sm:$0xff] }
 0x185   :  { %2001 = vmatmul.bf16.gmra.mxu2 %v6048_v46  ;;  %v1672_v46 = vadd.f32 %v6618_v4, %v1583_v53  ;;  %v1677_v4 = vadd.f32 %v6652_v3, %v1588_v38  ;;  %v1682_v21 = vadd.f32 %v1681_v55, %v1593_v43  ;;  %v1595_v3 = vadd.f32 %v1594_v0, %v1505_v24  ;;  %v10051_v38 = vld [vmem:[#allocation34_spill] sm:$0xff] }
 0x186   :  { %2090 = vmatmul.bf16.gmra.mxu3 %v10047_v13  ;;  %v3257_v45 = vadd.f32 %v3256_v2, %v6568_v57  ;;  %v6720_v49 = vadd.f32 %v6628_v22, %v1674_v5  ;;  %v1598_v15 = vadd.f32 %v1597_v35, %v1508_v34  ;;  %v6729_v12 = vadd.f32 %v6674_v51, %v1679_v36  ;;  %v10050_v22 = vld [vmem:[#allocation33_spill] sm:$0xff] }
 0x187   :  { %v6714_v1 = vadd.f32 %v6620_v8, %v1672_v46  ;;  %v6724_v2 = vadd.f32 %v6654_v27, %v1677_v4  ;;  %v1684_v26 = vadd.f32 %v1683_v33, %v1595_v3 }
 0x188   :  { %v1686_v61 = vpop.f32.mrf.mxu2  ;;  %v3258_v48 = vadd.f32 %v3257_v45, %v6570_v9 }
 0x189   :  { %v1775_v44 = vpop.f32.mrf.mxu3  ;;  %v1510_v41 = vpop.f32.mrf.mxu0  ;;  %v1687_v55 = vadd.f32 %v1686_v61, %v1598_v15  ;;  %v6738_v5 = vadd.f32 %v1772_v32, %v1684_v26  ;;  %v5490_v61 = vmov 256.0   ;;  %v10052_v15 = vld [vmem:[#allocation35_spill] sm:$0xff]  ;;  %v10054_v26 = vld [vmem:[#allocation37_spill] sm:$0xff] }
 0x18a   :  { %v1599_v56 = vpop.f32.mrf.mxu1  ;;  %v3259_v50 = vadd.f32 %v3258_v48, %v6592_v29  ;;  %v6735_v48 = vadd.f32 %v1770_v54, %v1682_v21  ;;  %5476 = vrcp.f32 %v5490_v61 }
 0x18b   :  { %v1600_v34 = vadd.f32 %v1599_v56, %v1510_v41  ;;  %v6741_v4 = vadd.f32 %v1775_v44, %v1687_v55  ;;  %v10055_v55 = vld [vmem:[#allocation38_spill] sm:$0xff] }
 0x18c   :  { %v3260_v25 = vadd.f32 %v3259_v50, %v6709_v37 }
 0x18e   :  { %v3261_v39 = vadd.f32 %v3260_v25, %v6714_v1 }
 0x190   :  { %v1688_v45 = vpop.f32.mrf.mxu2  ;;  %v3262_v47 = vadd.f32 %v3261_v39, %v6720_v49 }
 0x191   :  { %v1777_v53 = vpop.f32.mrf.mxu3  ;;  %v1513_v46 = vpop.f32.mrf.mxu0  ;;  %v1689_v51 = vadd.f32 %v1688_v45, %v1600_v34 }
 0x192   :  { %v1602_v8 = vpop.f32.mrf.mxu1  ;;  %v3263_v27 = vadd.f32 %v3262_v47, %v6724_v2  ;;  %v10053_v47 = vld [vmem:[#allocation36_spill] sm:$0xff] }
 0x193   :  { %v1603_v35 = vadd.f32 %v1602_v8, %v1513_v46  ;;  %v6744_v36 = vadd.f32 %v1777_v53, %v1689_v51  ;;  %v5477_v8 = vpop.eup %5476 }
 0x194   :  { %1828 = vmatmul.bf16.gmra.mxu0 %v10048_v52  ;;  %1917 = vmatmul.bf16.gmra.mxu1 %v10049_v14  ;;  %v3264_v0 = vadd.f32 %v3263_v27, %v6729_v12  ;;  %v3389_v27 = vmul.f32 256.0, %v5477_v8  ;;  %vm3393_vm0 = vweird.f32 %v5477_v8  ;;  %v10085_v14 = vld [vmem:[#allocation59_spill] sm:$0xff] }
 0x195   :  { %2006 = vmatmul.bf16.gmra.mxu2 %v10050_v22 }
 0x196   :  { %2095 = vmatmul.bf16.gmra.mxu3 %v10051_v38  ;;  %v3265_v50 = vadd.f32 %v3264_v0, %v6735_v48 }
 0x198   :  { %v1691_v24 = vpop.f32.mrf.mxu2  ;;  %v3266_v54 = vadd.f32 %v3265_v50, %v6738_v5 }
 0x199   :  { %v1780_v33 = vpop.f32.mrf.mxu3  ;;  %v1692_v62 = vadd.f32 %v1691_v24, %v1603_v35  ;;  %v1515_v43 = vpop.f32.mrf.mxu0  ;;  %v3390_v24 = vsub.f32 1.0, %v3389_v27 }
 0x19a   :  { %v1604_v25 = vpop.f32.mrf.mxu1  ;;  %v3267_v41 = vadd.f32 %v3266_v54, %v6741_v4  ;;  %v10057_v54 = vld [vmem:[#allocation40_spill] sm:$0xff] }
 0x19b   :  { %v6747_v56 = vadd.f32 %v1780_v33, %v1692_v62  ;;  %v1605_v32 = vadd.f32 %v1604_v25, %v1515_v43  ;;  %v3391_v33 = vmul.f32 %v5477_v8, %v3390_v24  ;;  %v10056_v43 = vld [vmem:[#allocation39_spill] sm:$0xff] }
 0x19c   :  { %v3268_v39 = vadd.f32 %v3267_v41, %v6744_v36  ;;  %v10059_v41 = vld [vmem:[#allocation41_spill] sm:$0xff] }
 0x19d   :  { %v3392_v62 = vadd.f32 %v5477_v8, %v3391_v33  ;;  %v10062_v33 = vld [vmem:[#allocation44_spill] sm:$0xff] }
 0x19e   :  { %v3269_v21 = vadd.f32 %v3268_v39, %v6747_v56 }
 0x19f   :  { %v6760_v61 = vsel %vm3393_vm0, %v5477_v8, %v3392_v62 }
 0x1a0   :  { %v1693_v45 = vpop.f32.mrf.mxu2  ;;  %10058 = vst [vmem:[#allocation67_spill] sm:$0xff] %v6760_v61 }
 0x1a1   :  { %v1694_v46 = vadd.f32 %v1693_v45, %v1605_v32  ;;  %v1782_v44 = vpop.f32.mrf.mxu3  ;;  %v10060_v32 = vld [vmem:[#allocation42_spill] sm:$0xff] }
 0x1a3   :  { %v6751_v3 = vadd.f32 %v1782_v44, %v1694_v46  ;;  %v1794_v44 = vpop.f32.mrf.mxu0 }
 0x1a4   :  { %1833 = vmatmul.bf16.gmra.mxu0 %v10052_v15  ;;  %1922 = vmatmul.bf16.gmra.mxu1 %v10053_v47  ;;  %v10081_v47 = vld [vmem:[#allocation57_spill] sm:$0xff] }
 0x1a5   :  { %v3270_v53 = vadd.f32 %v3269_v21, %v6751_v3  ;;  %2011 = vmatmul.bf16.gmra.mxu2 %v10054_v26  ;;  %v1883_v21 = vpop.f32.mrf.mxu1 }
 0x1a6   :  { %2100 = vmatmul.bf16.gmra.mxu3 %v10055_v55  ;;  %v1884_v24 = vadd.f32 %v1883_v21, %v1794_v44  ;;  %v10080_v55 = vld [vmem:[#allocation56_spill] sm:$0xff] }
 0x1a7   :  { %v3271_v34 = vrot.slane %v3270_v53, 4 }
 0x1a9   :  { %v3272_v35 = vadd.f32 %v3271_v34, %v3270_v53  ;;  %v10061_v34 = vld [vmem:[#allocation43_spill] sm:$0xff] }
 0x1ab   :  { %v3273_v0 = vrot.slane %v3272_v35, 2 }
 0x1ad   :  { %v3274_v51 = vadd.f32 %v3273_v0, %v3272_v35  ;;  %v1972_v0 = vpop.f32.mrf.mxu2 }
 0x1af   :  { %v3275_v50 = vrot.slane %v3274_v51, 1 }
 0x1b1   :  { %v3276_v25 = vadd.f32 %v3275_v50, %v3274_v51  ;;  %v2061_v51 = vpop.f32.mrf.mxu3  ;;  %v10063_v50 = vld [vmem:[#allocation45_spill] sm:$0xff] }
 0x1b3   :  { %v6765_v45 = vmul.f32 %v6760_v61, %v3276_v25  ;;  %v1973_v25 = vadd.f32 %v1972_v0, %v1884_v24 }
 0x1b4   :  { %1838 = vmatmul.bf16.gmra.mxu0 %v10056_v43  ;;  %1927 = vmatmul.bf16.gmra.mxu1 %v10057_v54  ;;  %v10064_v54 = vld [vmem:[#allocation46_spill] sm:$0xff]  ;;  %v10074_v43 = vld [vmem:[#allocation52_spill] sm:$0xff] }
 0x1b5   :  { %2016 = vmatmul.bf16.gmra.mxu2 %v10059_v41  ;;  %v6769_v39 = vsub.f32 %v6164_v10, %v6765_v45  ;;  %v6773_v46 = vsub.f32 %v6210_v7, %v6765_v45  ;;  %v6777_v8 = vsub.f32 %v6216_v19, %v6765_v45  ;;  %v6785_v10 = vsub.f32 %v6250_v16, %v6765_v45  ;;  %v1974_v24 = vpop.f32.mrf.mxu2  ;;  %v10075_v41 = vld [vmem:[#allocation53_spill] sm:$0xff] }
 0x1b6   :  { %2105 = vmatmul.bf16.gmra.mxu3 %v10060_v32  ;;  %v6790_v7 = vsub.f32 %v6268_v60, %v6765_v45  ;;  %v6798_v16 = vsub.f32 %v6314_v59, %v6765_v45  ;;  %v1885_v32 = vpop.f32.mrf.mxu1  ;;  %v6805_v21 = vsub.f32 %v6320_v18, %v6765_v45  ;;  %v6809_v59 = vadd.f32 %v2061_v51, %v1973_v25 }
 0x1b7   :  { %v3527_v53 = vmul.f32 %v6769_v39, %v6769_v39  ;;  %v3531_v27 = vmul.f32 %v6773_v46, %v6773_v46  ;;  %v3535_v19 = vmul.f32 %v6777_v8, %v6777_v8  ;;  %v3539_v62 = vmul.f32 %v6785_v10, %v6785_v10 }
 0x1b8   :  { %10065 = vst [vmem:[#allocation68_spill] sm:$0xff] %v6809_v59  ;;  %v3551_v18 = vmul.f32 %v6805_v21, %v6805_v21  ;;  %v7258_v59 = vld [vmem:[%s9808_s1 + $0x48] sm:$0xf] }
 0x1b9   :  { %v3655_v35 = vadd.f32 %v3531_v27, %v3527_v53  ;;  %v3543_v53 = vmul.f32 %v6790_v7, %v6790_v7  ;;  %v2063_v0 = vpop.f32.mrf.mxu3 }
 0x1bb   :  { %v3656_v60 = vadd.f32 %v3655_v35, %v3535_v19  ;;  %v3547_v19 = vmul.f32 %v6798_v16, %v6798_v16 }
 0x1bd   :  { %v3657_v27 = vadd.f32 %v3656_v60, %v3539_v62  ;;  %v6825_v62 = vsub.f32 %v6418_v40, %v6765_v45  ;;  %v6839_v40 = vsub.f32 %v6458_v42, %v6765_v45 }
 0x1bf   :  { %v3658_v35 = vadd.f32 %v3657_v27, %v3543_v53  ;;  %v1888_v53 = vpop.f32.mrf.mxu1 }
 0x1c4   :  { %1843 = vmatmul.bf16.gmra.mxu0 %v10061_v34  ;;  %1932 = vmatmul.bf16.gmra.mxu1 %v10062_v33  ;;  %v1796_v34 = vpop.f32.mrf.mxu0  ;;  %v6813_v33 = vsub.f32 %v6354_v63, %v6765_v45 }
 0x1c5   :  { %2021 = vmatmul.bf16.gmra.mxu2 %v10063_v50  ;;  %v1886_v44 = vadd.f32 %v1885_v32, %v1796_v34  ;;  %v6819_v32 = vsub.f32 %v6372_v28, %v6765_v45  ;;  %v3659_v34 = vadd.f32 %v3658_v35, %v3547_v19  ;;  %v6833_v28 = vsub.f32 %v6424_v17, %v6765_v45  ;;  %v10069_v50 = vld [vmem:[#allocation49_spill] sm:$0xff] }
 0x1c6   :  { %2110 = vmatmul.bf16.gmra.mxu3 %v10064_v54  ;;  %v3555_v63 = vmul.f32 %v6813_v33, %v6813_v33  ;;  %v3563_v35 = vmul.f32 %v6825_v62, %v6825_v62  ;;  %v10068_v54 = vld [vmem:[#allocation48_spill] sm:$0xff] }
 0x1c7   :  { %v1975_v51 = vadd.f32 %v1974_v24, %v1886_v44  ;;  %v3660_v60 = vadd.f32 %v3659_v34, %v3551_v18  ;;  %v3559_v19 = vmul.f32 %v6819_v32, %v6819_v32  ;;  %v10067_v24 = vld [vmem:[#allocation47_spill] sm:$0xff]  ;;  %v3567_v17 = vmul.f32 %v6833_v28, %v6833_v28 }
 0x1c9   :  { %v6829_v27 = vadd.f32 %v2063_v0, %v1975_v51  ;;  %v3661_v44 = vadd.f32 %v3660_v60, %v3555_v63  ;;  %v6846_v0 = vsub.f32 %v6476_v58, %v6765_v45  ;;  %v1977_v63 = vpop.f32.mrf.mxu2  ;;  %v2066_v60 = vpop.f32.mrf.mxu3 }
 0x1cb   :  { %10066 = vst [vmem:[#allocation69_spill] sm:$0xff] %v6829_v27  ;;  %v3662_v18 = vadd.f32 %v3661_v44, %v3559_v19  ;;  %v1890_v44 = vpop.f32.mrf.mxu1 }
 0x1cc   :  { %v1799_v25 = vpop.f32.mrf.mxu0 }
 0x1cd   :  { %v1889_v34 = vadd.f32 %v1888_v53, %v1799_v25  ;;  %v3663_v51 = vadd.f32 %v3662_v18, %v3563_v35  ;;  %v6854_v25 = vsub.f32 %v6522_v20, %v6765_v45  ;;  %v3571_v53 = vmul.f32 %v6839_v40, %v6839_v40 }
 0x1cf   :  { %v1978_v42 = vadd.f32 %v1977_v63, %v1889_v34  ;;  %v3664_v58 = vadd.f32 %v3663_v51, %v3567_v17  ;;  %v6863_v34 = vsub.f32 %v6528_v6, %v6765_v45  ;;  %v3575_v63 = vmul.f32 %v6846_v0, %v6846_v0 }
 0x1d0   :  { %v3579_v17 = vmul.f32 %v6854_v25, %v6854_v25 }
 0x1d1   :  { %v6859_v35 = vadd.f32 %v2066_v60, %v1978_v42  ;;  %v3665_v20 = vadd.f32 %v3664_v58, %v3571_v53  ;;  %v6875_v60 = vsub.f32 %v6548_v23, %v6765_v45  ;;  %v3583_v6 = vmul.f32 %v6863_v34, %v6863_v34 }
 0x1d2   :  { %v6881_v53 = vsub.f32 %v6562_v30, %v6765_v45  ;;  %v6889_v23 = vsub.f32 %v6568_v57, %v6765_v45  ;;  %v6895_v30 = vsub.f32 %v6570_v9, %v6765_v45 }
 0x1d3   :  { %10071 = vst [vmem:[#allocation70_spill] sm:$0xff] %v6859_v35  ;;  %v3666_v51 = vadd.f32 %v3665_v20, %v3575_v63  ;;  %v1893_v20 = vpop.f32.mrf.mxu1 }
 0x1d4   :  { %1848 = vmatmul.bf16.gmra.mxu0 %v10067_v24  ;;  %1937 = vmatmul.bf16.gmra.mxu1 %v10068_v54  ;;  %v1801_v19 = vpop.f32.mrf.mxu0  ;;  %v10070_v24 = vld [vmem:[#allocation50_spill] sm:$0xff]  ;;  %v6869_v54 = vsub.f32 %v6530_v31, %v6765_v45  ;;  %v3599_v57 = vmul.f32 %v6889_v23, %v6889_v23 }
 0x1d5   :  { %2026 = vmatmul.bf16.gmra.mxu2 %v10069_v50  ;;  %v1891_v18 = vadd.f32 %v1890_v44, %v1801_v19  ;;  %v3667_v42 = vadd.f32 %v3666_v51, %v3579_v17  ;;  %v1979_v19 = vpop.f32.mrf.mxu2  ;;  %v2068_v44 = vpop.f32.mrf.mxu3  ;;  %v3591_v17 = vmul.f32 %v6875_v60, %v6875_v60  ;;  %v3595_v51 = vmul.f32 %v6881_v53, %v6881_v53 }
 0x1d6   :  { %2115 = vmatmul.bf16.gmra.mxu3 %v10070_v24  ;;  %v3587_v31 = vmul.f32 %v6869_v54, %v6869_v54 }
 0x1d7   :  { %v1980_v24 = vadd.f32 %v1979_v19, %v1891_v18  ;;  %v3668_v58 = vadd.f32 %v3667_v42, %v3583_v6  ;;  %v10073_v19 = vld [vmem:[#allocation51_spill] sm:$0xff] }
 0x1d9   :  { %v6885_v50 = vadd.f32 %v2068_v44, %v1980_v24  ;;  %v3669_v18 = vadd.f32 %v3668_v58, %v3587_v31  ;;  %v6902_v24 = vsub.f32 %v6592_v29, %v6765_v45 }
 0x1db   :  { %10072 = vst [vmem:[#allocation71_spill] sm:$0xff] %v6885_v50  ;;  %v3670_v6 = vadd.f32 %v3669_v18, %v3591_v17  ;;  %v1895_v18 = vpop.f32.mrf.mxu1 }
 0x1dc   :  { %v1804_v63 = vpop.f32.mrf.mxu0 }
 0x1dd   :  { %v1894_v42 = vadd.f32 %v1893_v20, %v1804_v63  ;;  %v3671_v44 = vadd.f32 %v3670_v6, %v3595_v51  ;;  %v1982_v31 = vpop.f32.mrf.mxu2  ;;  %v2071_v58 = vpop.f32.mrf.mxu3  ;;  %v6910_v63 = vsub.f32 %v6709_v37, %v6765_v45  ;;  %v3603_v20 = vmul.f32 %v6895_v30, %v6895_v30 }
 0x1df   :  { %v1983_v9 = vadd.f32 %v1982_v31, %v1894_v42  ;;  %v3672_v29 = vadd.f32 %v3671_v44, %v3599_v57  ;;  %v6919_v42 = vsub.f32 %v6714_v1, %v6765_v45  ;;  %v3607_v31 = vmul.f32 %v6902_v24, %v6902_v24 }
 0x1e0   :  { %v3611_v57 = vmul.f32 %v6910_v63, %v6910_v63 }
 0x1e1   :  { %v6915_v51 = vadd.f32 %v2071_v58, %v1983_v9  ;;  %v3673_v37 = vadd.f32 %v3672_v29, %v3603_v20  ;;  %v6931_v58 = vsub.f32 %v6724_v2, %v6765_v45  ;;  %v3615_v1 = vmul.f32 %v6919_v42, %v6919_v42 }
 0x1e2   :  { %v6937_v20 = vsub.f32 %v6729_v12, %v6765_v45  ;;  %v6945_v2 = vsub.f32 %v6735_v48, %v6765_v45  ;;  %v6951_v12 = vsub.f32 %v6738_v5, %v6765_v45 }
 0x1e3   :  { %10077 = vst [vmem:[#allocation72_spill] sm:$0xff] %v6915_v51  ;;  %v3674_v44 = vadd.f32 %v3673_v37, %v3607_v31  ;;  %v1898_v37 = vpop.f32.mrf.mxu1 }
 0x1e4   :  { %1853 = vmatmul.bf16.gmra.mxu0 %v10073_v19  ;;  %1942 = vmatmul.bf16.gmra.mxu1 %v10074_v43  ;;  %v1806_v17 = vpop.f32.mrf.mxu0  ;;  %v10076_v19 = vld [vmem:[#allocation54_spill] sm:$0xff]  ;;  %v6925_v43 = vsub.f32 %v6720_v49, %v6765_v45  ;;  %v3631_v48 = vmul.f32 %v6945_v2, %v6945_v2 }
 0x1e5   :  { %2031 = vmatmul.bf16.gmra.mxu2 %v10075_v41  ;;  %v1896_v6 = vadd.f32 %v1895_v18, %v1806_v17  ;;  %v3675_v9 = vadd.f32 %v3674_v44, %v3611_v57  ;;  %v1984_v17 = vpop.f32.mrf.mxu2  ;;  %v2073_v18 = vpop.f32.mrf.mxu3  ;;  %v3623_v57 = vmul.f32 %v6931_v58, %v6931_v58  ;;  %v3627_v44 = vmul.f32 %v6937_v20, %v6937_v20 }
 0x1e6   :  { %2120 = vmatmul.bf16.gmra.mxu3 %v10076_v19  ;;  %v3619_v49 = vmul.f32 %v6925_v43, %v6925_v43 }
 0x1e7   :  { %v1985_v19 = vadd.f32 %v1984_v17, %v1896_v6  ;;  %v3676_v29 = vadd.f32 %v3675_v9, %v3615_v1  ;;  %v10079_v17 = vld [vmem:[#allocation55_spill] sm:$0xff] }
 0x1e9   :  { %v6941_v41 = vadd.f32 %v2073_v18, %v1985_v19  ;;  %v3677_v6 = vadd.f32 %v3676_v29, %v3619_v49  ;;  %v6958_v19 = vsub.f32 %v6741_v4, %v6765_v45 }
 0x1eb   :  { %10078 = vst [vmem:[#allocation73_spill] sm:$0xff] %v6941_v41  ;;  %v3678_v1 = vadd.f32 %v3677_v6, %v3623_v57  ;;  %v1900_v6 = vpop.f32.mrf.mxu1 }
 0x1ec   :  { %v1809_v31 = vpop.f32.mrf.mxu0 }
 0x1ed   :  { %v1899_v9 = vadd.f32 %v1898_v37, %v1809_v31  ;;  %v3679_v18 = vadd.f32 %v3678_v1, %v3627_v44  ;;  %v1987_v49 = vpop.f32.mrf.mxu2  ;;  %v2076_v29 = vpop.f32.mrf.mxu3  ;;  %v6966_v31 = vsub.f32 %v6744_v36, %v6765_v45  ;;  %v3635_v37 = vmul.f32 %v6951_v12, %v6951_v12 }
 0x1ef   :  { %v1988_v5 = vadd.f32 %v1987_v49, %v1899_v9  ;;  %v3680_v4 = vadd.f32 %v3679_v18, %v3631_v48  ;;  %v6975_v9 = vsub.f32 %v6747_v56, %v6765_v45  ;;  %v3639_v49 = vmul.f32 %v6958_v19, %v6958_v19 }
 0x1f0   :  { %v3643_v48 = vmul.f32 %v6966_v31, %v6966_v31 }
 0x1f1   :  { %v6971_v44 = vadd.f32 %v2076_v29, %v1988_v5  ;;  %v3681_v36 = vadd.f32 %v3680_v4, %v3635_v37  ;;  %v3647_v29 = vmul.f32 %v6975_v9, %v6975_v9 }
 0x1f3   :  { %10083 = vst [vmem:[#allocation74_spill] sm:$0xff] %v6971_v44  ;;  %v3682_v18 = vadd.f32 %v3681_v36, %v3639_v49  ;;  %v1903_v4 = vpop.f32.mrf.mxu1 }
 0x1f4   :  { %1858 = vmatmul.bf16.gmra.mxu0 %v10079_v17  ;;  %1947 = vmatmul.bf16.gmra.mxu1 %v10080_v55  ;;  %v1811_v57 = vpop.f32.mrf.mxu0  ;;  %v10082_v17 = vld [vmem:[#allocation58_spill] sm:$0xff]  ;;  %v6981_v55 = vsub.f32 %v6751_v3, %v6765_v45 }
 0x1f5   :  { %2036 = vmatmul.bf16.gmra.mxu2 %v10081_v47  ;;  %v1901_v1 = vadd.f32 %v1900_v6, %v1811_v57  ;;  %v3683_v5 = vadd.f32 %v3682_v18, %v3643_v48  ;;  %v1989_v57 = vpop.f32.mrf.mxu2  ;;  %v2078_v6 = vpop.f32.mrf.mxu3  ;;  %v10086_v48 = vld [vmem:[#allocation60_spill] sm:$0xff] }
 0x1f6   :  { %2125 = vmatmul.bf16.gmra.mxu3 %v10082_v17  ;;  %v3651_v17 = vmul.f32 %v6981_v55, %v6981_v55 }
 0x1f7   :  { %v1990_v56 = vadd.f32 %v1989_v57, %v1901_v1  ;;  %v3684_v47 = vadd.f32 %v3683_v5, %v3647_v29  ;;  %v10087_v1 = vld [vmem:[#allocation61_spill] sm:$0xff]  ;;  %v10090_v5 = vld [vmem:[#allocation62_spill] sm:$0xff] }
 0x1f9   :  { %v6989_v15 = vadd.f32 %v2078_v6, %v1990_v56  ;;  %v3685_v3 = vadd.f32 %v3684_v47, %v3651_v17 }
 0x1fb   :  { %10084 = vst [vmem:[#allocation75_spill] sm:$0xff] %v6989_v15  ;;  %v3686_v45 = vrot.slane %v3685_v3, 4  ;;  %v6996_v29 = vpop.f32.mrf.mxu1 }
 0x1fc   :  { %v1814_v37 = vpop.f32.mrf.mxu0  ;;  %10089 = vst [vmem:[#allocation77_spill] sm:$0xff] %v6996_v29  ;;  %v4957_v29 = vld [vmem:[%s9808_s1 + $0x168] sm:$0xf] }
 0x1fd   :  { %v1904_v26 = vadd.f32 %v1903_v4, %v1814_v37  ;;  %v3687_v49 = vadd.f32 %v3686_v45, %v3685_v3  ;;  %v1992_v36 = vpop.f32.mrf.mxu2  ;;  %v2081_v52 = vpop.f32.mrf.mxu3 }
 0x1ff   :  { %v1993_v18 = vadd.f32 %v1992_v36, %v1904_v26  ;;  %v3688_v57 = vrot.slane %v3687_v49, 2 }
 0x201   :  { %v6999_v47 = vadd.f32 %v2081_v52, %v1993_v18  ;;  %v3689_v17 = vadd.f32 %v3688_v57, %v3687_v49  ;;  %v10094_v52 = vld [vmem:[#allocation64_spill] sm:$0xff]  ;;  %v10095_v18 = vld [vmem:[#allocation65_spill] sm:$0xff] }
 0x203   :  { %10091 = vst [vmem:[#allocation78_spill] sm:$0xff] %v6999_v47  ;;  %v3690_v6 = vrot.slane %v3689_v17, 1  ;;  %v1908_v45 = vpop.f32.mrf.mxu1 }
 0x204   :  { %1863 = vmatmul.bf16.gmra.mxu0 %v10085_v14  ;;  %1952 = vmatmul.bf16.gmra.mxu1 %v10086_v48  ;;  %v6994_v38 = vpop.f32.mrf.mxu0 }
 0x205   :  { %2041 = vmatmul.bf16.gmra.mxu2 %v10087_v1  ;;  %10088 = vst [vmem:[#allocation76_spill] sm:$0xff] %v6994_v38  ;;  %v3691_v56 = vadd.f32 %v3690_v6, %v3689_v17  ;;  %v7001_v37 = vpop.f32.mrf.mxu2  ;;  %v7003_v4 = vpop.f32.mrf.mxu3  ;;  %v10098_v6 = vld [vmem:[#allocation66_spill] sm:$0xff] }
 0x206   :  { %2130 = vmatmul.bf16.gmra.mxu3 %v10090_v5  ;;  %10092 = vst [vmem:[#allocation79_spill] sm:$0xff] %v7001_v37 }
 0x207   :  { %10093 = vst [vmem:[#allocation80_spill] sm:$0xff] %v7003_v4  ;;  %v3803_v26 = vmul.f32 %v3691_v56, %v6760_v61 }
 0x209   :  { %v3807_v36 = vadd.f32 1e-05, %v3803_v26 }
 0x20b   :  { %5478 = vrsqrt.f32 %v3807_v36  ;;  %v7011_v17 = vpop.f32.mrf.mxu1  ;;  %vm3817_vm2 = vweird.f32 %v3807_v36 }
 0x20c   :  { %v1819_v3 = vpop.f32.mrf.mxu0  ;;  %10097 = vst [vmem:[#allocation82_spill] sm:$0xff] %v7011_v17 }
 0x20d   :  { %v1909_v48 = vadd.f32 %v1908_v45, %v1819_v3  ;;  %v1997_v14 = vpop.f32.mrf.mxu2  ;;  %v2086_v5 = vpop.f32.mrf.mxu3 }
 0x20f   :  { %v1998_v49 = vadd.f32 %v1997_v14, %v1909_v48 }
 0x211   :  { %v7014_v56 = vadd.f32 %v2086_v5, %v1998_v49  ;;  %v5479_v26 = vpop.eup %5478 }
 0x212   :  { %v3812_v1 = vmul.f32 %v5479_v26, %v3807_v36  ;;  %vm3818_vm1 = vweird.f32 %v5479_v26 }
 0x213   :  { %10099 = vst [vmem:[#allocation83_spill] sm:$0xff] %v7014_v56  ;;  %v1913_v14 = vpop.f32.mrf.mxu1  ;;  %vm3819_vm3 = vmor %vm3817_vm2, %vm3818_vm1 }
 0x214   :  { %1868 = vmatmul.bf16.gmra.mxu0 %v6514_v11  ;;  %1957 = vmatmul.bf16.gmra.mxu1 %v10094_v52  ;;  %v7009_v57 = vpop.f32.mrf.mxu0  ;;  %v3813_v3 = vmul.f32 %v5479_v26, %v3812_v1  ;;  %v3979_v1 = vld [vmem:[%s9810_s2] sm:$0xf] }
 0x215   :  { %2046 = vmatmul.bf16.gmra.mxu2 %v10095_v18  ;;  %10096 = vst [vmem:[#allocation81_spill] sm:$0xff] %v7009_v57  ;;  %v7016_v45 = vpop.f32.mrf.mxu2  ;;  %v7018_v61 = vpop.f32.mrf.mxu3 }
 0x216   :  { %2135 = vmatmul.bf16.gmra.mxu3 %v10098_v6  ;;  %10100 = vst [vmem:[#allocation84_spill] sm:$0xff] %v7016_v45  ;;  %v3814_v11 = vmul.f32 0.5, %v3813_v3  ;;  %v4117_v3 = vld [vmem:[%s9811_s3] sm:$0xf] }
 0x217   :  { %10101 = vst [vmem:[#allocation85_spill] sm:$0xff] %v7018_v61  ;;  %v7039_v36 = vperm.slane %v4117_v3, 0 }
 0x218   :  { %v3815_v48 = vsub.f32 1.5, %v3814_v11 }
 0x21a   :  { %v3816_v22 = vmul.f32 %v5479_v26, %v3815_v48  ;;  %v7037_v48 = vperm.slane %v3979_v1, 0 }
 0x21c   :  { %v1824_v52 = vpop.f32.mrf.mxu0  ;;  %v3820_v49 = vsel %vm3819_vm3, %v5479_v26, %v3816_v22  ;;  %10102 = vst [vmem:[#allocation86_spill] sm:$0xff] %v7037_v48 }
 0x21d   :  { %v7020_v18 = vadd.f32 %v1913_v14, %v1824_v52  ;;  %v7022_v13 = vpop.f32.mrf.mxu2  ;;  %v7024_v5 = vpop.f32.mrf.mxu3  ;;  %v3851_v14 = vmul.f32 %v3820_v49, %v6769_v39  ;;  %v3855_v22 = vmul.f32 %v3820_v49, %v6773_v46  ;;  %v3859_v26 = vmul.f32 %v3820_v49, %v6777_v8 }
 0x21e   :  { %v7034_v52 = vpop.f32.mrf.mxu1  ;;  %v3863_v6 = vmul.f32 %v3820_v49, %v6785_v10  ;;  %v3867_v56 = vmul.f32 %v3820_v49, %v6790_v7  ;;  %v3871_v61 = vmul.f32 %v3820_v49, %v6798_v16  ;;  %v3875_v47 = vmul.f32 %v3820_v49, %v6805_v21 }
 0x21f   :  { %v3879_v45 = vmul.f32 %v3820_v49, %v6813_v33  ;;  %v3883_v39 = vmul.f32 %v3820_v49, %v6819_v32  ;;  %v3887_v1 = vmul.f32 %v3820_v49, %v6825_v62  ;;  %v3891_v3 = vmul.f32 %v3820_v49, %v6833_v28 }
 0x220   :  { %v3895_v46 = vmul.f32 %v3820_v49, %v6839_v40  ;;  %v3899_v8 = vmul.f32 %v3820_v49, %v6846_v0  ;;  %v3903_v10 = vmul.f32 %v3820_v49, %v6854_v25  ;;  %v3907_v7 = vmul.f32 %v3820_v49, %v6863_v34 }
 0x221   :  { %v3911_v16 = vmul.f32 %v3820_v49, %v6869_v54  ;;  %v3915_v21 = vmul.f32 %v3820_v49, %v6875_v60  ;;  %v3919_v32 = vmul.f32 %v3820_v49, %v6881_v53  ;;  %v3923_v62 = vmul.f32 %v3820_v49, %v6889_v23 }
 0x222   :  { %v3927_v28 = vmul.f32 %v3820_v49, %v6895_v30  ;;  %v3931_v40 = vmul.f32 %v3820_v49, %v6902_v24  ;;  %v3935_v0 = vmul.f32 %v3820_v49, %v6910_v63  ;;  %v3939_v25 = vmul.f32 %v3820_v49, %v6919_v42 }
 0x223   :  { %v3943_v54 = vmul.f32 %v3820_v49, %v6925_v43  ;;  %v3947_v34 = vmul.f32 %v3820_v49, %v6931_v58  ;;  %v3951_v53 = vmul.f32 %v3820_v49, %v6937_v20  ;;  %v3955_v23 = vmul.f32 %v3820_v49, %v6945_v2 }
 0x224   :  { %v7032_v11 = vpop.f32.mrf.mxu0  ;;  %v3959_v30 = vmul.f32 %v3820_v49, %v6951_v12  ;;  %v3963_v24 = vmul.f32 %v3820_v49, %v6958_v19  ;;  %v3967_v63 = vmul.f32 %v3820_v49, %v6966_v31  ;;  %v3971_v42 = vmul.f32 %v3820_v49, %v6975_v9 }
 0x225   :  { %v7057_v4 = vpop.f32.mrf.mxu2  ;;  %v7059_v33 = vpop.f32.mrf.mxu3  ;;  %v7080_v43 = vmul.f32 %v3820_v49, %v6981_v55  ;;  %v3989_v58 = vmul.f32 %v7037_v48, %v3851_v14  ;;  %v3993_v17 = vmul.f32 %v7037_v48, %v3855_v22  ;;  %v3997_v57 = vmul.f32 %v7037_v48, %v3859_v26 }
 0x226   :  { %v7071_v15 = vpop.f32.mrf.mxu1  ;;  %v4001_v20 = vmul.f32 %v7037_v48, %v3863_v6  ;;  %v4005_v2 = vmul.f32 %v7037_v48, %v3867_v56  ;;  %v4009_v12 = vmul.f32 %v7037_v48, %v3871_v61  ;;  %v4013_v19 = vmul.f32 %v7037_v48, %v3875_v47 }
 0x227   :  { %10103 = vst [vmem:[#allocation87_spill] sm:$0xff] %v7080_v43  ;;  %v4017_v31 = vmul.f32 %v7037_v48, %v3879_v45  ;;  %v4021_v9 = vmul.f32 %v7037_v48, %v3883_v39  ;;  %v4025_v55 = vmul.f32 %v7037_v48, %v3887_v1  ;;  %v4029_v49 = vmul.f32 %v7037_v48, %v3891_v3  ;;  %v7313_v43 = vld [vmem:[%s9808_s1 + $0x28] sm:$0xf] }
 0x228   :  { %v4033_v14 = vmul.f32 %v7037_v48, %v3895_v46  ;;  %v4037_v22 = vmul.f32 %v7037_v48, %v3899_v8  ;;  %v4041_v6 = vmul.f32 %v7037_v48, %v3903_v10  ;;  %v4045_v56 = vmul.f32 %v7037_v48, %v3907_v7 }
 0x229   :  { %v4049_v61 = vmul.f32 %v7037_v48, %v3911_v16  ;;  %v4053_v47 = vmul.f32 %v7037_v48, %v3915_v21  ;;  %v4057_v39 = vmul.f32 %v7037_v48, %v3919_v32  ;;  %v4127_v1 = vadd.f32 %v7039_v36, %v3989_v58 }
 0x22a   :  { %v4131_v3 = vadd.f32 %v7039_v36, %v3993_v17  ;;  %v4135_v46 = vadd.f32 %v7039_v36, %v3997_v57  ;;  %v4061_v8 = vmul.f32 %v7037_v48, %v3923_v62  ;;  %v4065_v10 = vmul.f32 %v7037_v48, %v3927_v28 }
 0x22b   :  { %v4069_v7 = vmul.f32 %v7037_v48, %v3931_v40  ;;  %v4139_v16 = vadd.f32 %v7039_v36, %v4001_v20  ;;  %v4073_v32 = vmul.f32 %v7037_v48, %v3935_v0  ;;  %v4077_v58 = vmul.f32 %v7037_v48, %v3939_v25 }
 0x22c   :  { %v7069_v60 = vpop.f32.mrf.mxu0  ;;  %v7118_v17 = vmul.f32 %v7037_v48, %v3943_v54  ;;  %v4143_v57 = vadd.f32 %v7039_v36, %v4005_v2  ;;  %v7122_v62 = vmul.f32 %v7037_v48, %v3947_v34  ;;  %v7125_v28 = vmul.f32 %v7037_v48, %v3951_v53 }
 0x22d   :  { %v7099_v26 = vpop.f32.mrf.mxu2  ;;  %v7101_v45 = vpop.f32.mrf.mxu3  ;;  %v7128_v40 = vmul.f32 %v7037_v48, %v3955_v23  ;;  %v4147_v20 = vadd.f32 %v7039_v36, %v4009_v12  ;;  %v4151_v0 = vadd.f32 %v7039_v36, %v4013_v19  ;;  %v4255_v37 = vmax.f32 %v4127_v1, 0.0 }
 0x22e   :  { %v7113_v44 = vpop.f32.mrf.mxu1  ;;  %v4259_v25 = vmax.f32 %v4131_v3, 0.0  ;;  %v4263_v41 = vmax.f32 %v4135_v46, 0.0  ;;  %v7133_v54 = vmul.f32 %v7037_v48, %v3959_v30  ;;  %v7136_v2 = vmul.f32 %v7037_v48, %v3963_v24 }
 0x22f   :  { %v7139_v34 = vadd.f32 %v7039_v36, %v4017_v31  ;;  %v4267_v53 = vmax.f32 %v4139_v16, 0.0  ;;  %v7142_v23 = vmul.f32 %v7037_v48, %v3967_v63  ;;  %v7145_v12 = vmul.f32 %v7037_v48, %v3971_v42  ;;  %4383 = vst [vmem:[%s9812_s4] sm:$0xff] %v4255_v37  ;;  %v5085_v42 = vld [vmem:[%s9808_s1 + $0x268] sm:$0xf]  ;;  %v5426_v37 = vld [vmem:[%s9808_s1 + $0x274] sm:$0xf0] }
 0x230   :  { %10104 = vst [vmem:[#allocation88_spill] sm:$0xff] %v7133_v54  ;;  %v7148_v19 = vadd.f32 %v7039_v36, %v4021_v9  ;;  %v4271_v1 = vmax.f32 %v4143_v57, 0.0  ;;  %v7154_v30 = vadd.f32 %v7039_v36, %v4025_v55  ;;  %v7157_v24 = vadd.f32 %v7039_v36, %v4029_v49  ;;  %v5213_v9 = vld [vmem:[%s9808_s1 + $0x368] sm:$0xf]  ;;  %v5458_v55 = vld [vmem:[%s9808_s1 + $0x374] sm:$0xf0] }
 0x231   :  { %10105 = vst [vmem:[#allocation89_spill] sm:$0xff] %v7136_v2  ;;  %v7160_v63 = vadd.f32 %v7039_v36, %v4033_v14  ;;  %v4275_v31 = vmax.f32 %v4147_v20, 0.0  ;;  %v7180_v49 = vld [vmem:[%s9808_s1 + $0x68] sm:$0xf]  ;;  %v5362_v14 = vld [vmem:[%s9808_s1 + $0x74] sm:$0xf0]  ;;  %v7190_v16 = vadd.f32 %v7039_v36, %v4037_v22  ;;  %v7193_v57 = vadd.f32 %v7039_v36, %v4041_v6 }
 0x232   :  { %10106 = vst [vmem:[#allocation90_spill] sm:$0xff] %v7142_v23  ;;  %v7196_v20 = vadd.f32 %v7039_v36, %v4045_v56  ;;  %v5394_v22 = vld [vmem:[%s9808_s1 + $0x174] sm:$0xf0]  ;;  %v7208_v38 = vadd.f32 %v7039_v36, %v4049_v61  ;;  %v7211_v6 = vadd.f32 %v7039_v36, %v4053_v47  ;;  %v7214_v56 = vadd.f32 %v7039_v36, %v4057_v39  ;;  %v7233_v47 = vld [vmem:[%s9808_s1 + $0x348] sm:$0xf] }
 0x233   :  { %10107 = vst [vmem:[#allocation91_spill] sm:$0xff] %v7145_v12  ;;  %v7228_v61 = vld [vmem:[%s9808_s1 + $0x254] sm:$0xf0]  ;;  %v7243_v51 = vadd.f32 %v7039_v36, %v4061_v8  ;;  %v7246_v50 = vadd.f32 %v7039_v36, %v4065_v10  ;;  %v7249_v35 = vadd.f32 %v7039_v36, %v4069_v7  ;;  %v4287_v27 = vmax.f32 %v7148_v19, 0.0  ;;  %v7268_v10 = vld [vmem:[%s9808_s1 + $0x148] sm:$0xf] }
 0x234   :  { %v7111_v21 = vpop.f32.mrf.mxu0  ;;  %4387 = vst [vmem:[%s9812_s4 + $0x20] sm:$0xff] %v4259_v25  ;;  %v4279_v25 = vmax.f32 %v4151_v0, 0.0  ;;  %v4283_v0 = vmax.f32 %v7139_v34, 0.0  ;;  %v7238_v39 = vld [vmem:[%s9808_s1 + $0x354] sm:$0xf0]  ;;  %v7276_v19 = vadd.f32 %v7039_v36, %v4073_v32  ;;  %v4291_v12 = vmax.f32 %v7154_v30, 0.0 }
 0x235   :  { %v7185_v3 = vpop.f32.mrf.mxu2  ;;  %v7187_v46 = vpop.f32.mrf.mxu3  ;;  %4391 = vst [vmem:[%s9812_s4 + $0x40] sm:$0xff] %v4263_v41  ;;  %v7223_v41 = vld [vmem:[%s9808_s1 + $0x248] sm:$0xf]  ;;  %v7263_v8 = vld [vmem:[%s9808_s1 + $0x54] sm:$0xf0]  ;;  %v4295_v23 = vmax.f32 %v7157_v24, 0.0  ;;  %v5086_v30 = vor.u32 %v5426_v37, %v5085_v42  ;;  %v5214_v24 = vor.u32 %v5458_v55, %v5213_v9  ;;  %v4958_v54 = vor.u32 %v5394_v22, %v4957_v29 }
 0x236   :  { %4395 = vst [vmem:[%s9812_s4 + $0x60] sm:$0xff] %v4267_v53  ;;  %v1923_v53 = vpop.f32.mrf.mxu1  ;;  %v7273_v7 = vld [vmem:[%s9808_s1 + $0x154] sm:$0xf0]  ;;  %v7289_v2 = vld [vmem:[%s9808_s1 + $0x228] sm:$0xf]  ;;  %v4299_v42 = vmax.f32 %v7160_v63, 0.0  ;;  %v5070_v63 = vor.u32 %v7228_v61, %v7223_v41 }
 0x237   :  { %4399 = vst [vmem:[%s9812_s4 + $0x80] sm:$0xff] %v4271_v1  ;;  %v7279_v1 = vadd.f32 %v7039_v36, %v4077_v58  ;;  %v7294_v32 = vld [vmem:[%s9808_s1 + $0x234] sm:$0xf0]  ;;  %v7299_v58 = vld [vmem:[%s9808_s1 + $0x328] sm:$0xf]  ;;  %v4303_v37 = vmax.f32 %v7190_v16, 0.0  ;;  %2323 = vmatpush.bf16.msra.mxu2 %v5086_v30  ;;  %2412 = vmatpush.bf16.msra.mxu3 %v5214_v24 }
 0x238   :  { %4403 = vst [vmem:[%s9812_s4 + $0xa0] sm:$0xff] %v4275_v31  ;;  %v4830_v31 = vor.u32 %v5362_v14, %v7180_v49  ;;  %v7308_v48 = vld [vmem:[%s9808_s1 + $0x334] sm:$0xf0]  ;;  %v4307_v29 = vmax.f32 %v7193_v57, 0.0  ;;  %v4311_v55 = vmax.f32 %v7196_v20, 0.0  ;;  %v5198_v49 = vor.u32 %v7238_v39, %v7233_v47  ;;  %2234 = vmatpush.bf16.msra.mxu1 %v4958_v54 }
 0x239   :  { %10108 = vst [vmem:[#allocation92_spill] sm:$0xff] %v7279_v1  ;;  %v7317_v1 = vadd.f32 %v7039_v36, %v7118_v17  ;;  %v7328_v9 = vld [vmem:[%s9808_s1 + $0x34] sm:$0xf0]  ;;  %v4315_v17 = vmax.f32 %v7208_v38, 0.0  ;;  %v7342_v14 = vld [vmem:[%s9808_s1 + $0x128] sm:$0xf]  ;;  %v4942_v57 = vor.u32 %v7273_v7, %v7268_v10  ;;  %v5182_v54 = vor.u32 %v7308_v48, %v7299_v58 }
 0x23a   :  { %4407 = vst [vmem:[%s9812_s4 + $0xc0] sm:$0xff] %v4279_v25  ;;  %v4319_v16 = vmax.f32 %v7211_v6, 0.0  ;;  %v4323_v38 = vmax.f32 %v7214_v56, 0.0  ;;  %2145 = vmatpush.bf16.msra.mxu0 %v4830_v31  ;;  %v5386_v20 = vld [vmem:[%s9808_s1 + $0x134] sm:$0xf0]  ;;  %v1916_v6 = vadd.f32 %v7034_v52, %v7032_v11  ;;  %v4798_v56 = vor.u32 %v7328_v9, %v7313_v43 }
 0x23b   :  { %4411 = vst [vmem:[%s9812_s4 + $0xe0] sm:$0xff] %v4283_v0  ;;  %v7380_v48 = vld [vmem:[%s9808_s1 + $0x214] sm:$0xf0]  ;;  %v1919_v11 = vadd.f32 %v7071_v15, %v7069_v60  ;;  %v1921_v52 = vadd.f32 %v7113_v44, %v7111_v21  ;;  %2324 = vmatpush.bf16.msra.mxu2 %v5070_v63  ;;  %2413 = vmatpush.bf16.msra.mxu3 %v5198_v49  ;;  %v7411_v15 = vld [vmem:[%s9808_s1 + $0x8] sm:$0xf]  ;;  %v4339_v58 = vmax.f32 %v7276_v19, 0.0 }
 0x23c   :  { %v7240_v34 = vpop.f32.mrf.mxu0  ;;  %4415 = vst [vmem:[%s9812_s4 + $0x100] sm:$0xff] %v4287_v27  ;;  %v4814_v27 = vor.u32 %v7263_v8, %v7258_v59  ;;  %v2003_v59 = vadd.f32 %v7022_v13, %v7020_v18  ;;  %v7385_v13 = vld [vmem:[%s9808_s1 + $0x308] sm:$0xf]  ;;  %v7390_v18 = vld [vmem:[%s9808_s1 + $0x314] sm:$0xf0]  ;;  %v4926_v41 = vor.u32 %v5386_v20, %v7342_v14  ;;  %v2005_v60 = vadd.f32 %v7057_v4, %v1916_v6  ;;  %v10110_v14 = vld [vmem:[#allocation87_spill] sm:$0xff] }
 0x23d   :  { %4419 = vst [vmem:[%s9812_s4 + $0x120] sm:$0xff] %v4291_v12  ;;  %v2012_v25 = vpop.f32.mrf.mxu2  ;;  %v2101_v22 = vpop.f32.mrf.mxu3  ;;  %v5054_v12 = vor.u32 %v7294_v32, %v7289_v2  ;;  %v7375_v2 = vld [vmem:[%s9808_s1 + $0x208] sm:$0xf]  ;;  %v1924_v43 = vadd.f32 %v1923_v53, %v7240_v34  ;;  %v5350_v44 = vld [vmem:[%s9808_s1 + $0x14] sm:$0xf0]  ;;  %2235 = vmatpush.bf16.msra.mxu1 %v4942_v57  ;;  %v2008_v47 = vadd.f32 %v7099_v26, %v1919_v11  ;;  %v4327_v8 = vmax.f32 %v7243_v51, 0.0 }
 0x23e   :  { %4423 = vst [vmem:[%s9812_s4 + $0x140] sm:$0xff] %v4295_v23  ;;  %v7399_v0 = vpop.f32.mrf.mxu1  ;;  %v7406_v61 = vadd.f32 %v7024_v5, %v2003_v59  ;;  %2146 = vmatpush.bf16.msra.mxu0 %v4814_v27  ;;  %v4909_v5 = vld [vmem:[%s9808_s1 + $0x108] sm:$0xf]  ;;  %v5382_v21 = vld [vmem:[%s9808_s1 + $0x114] sm:$0xf0]  ;;  %v2010_v39 = vadd.f32 %v7185_v3, %v1921_v52  ;;  %v7430_v4 = vadd.f32 %v7039_v36, %v7122_v62  ;;  %v10113_v57 = vld [vmem:[#allocation89_spill] sm:$0xff] }
 0x23f   :  { %4427 = vst [vmem:[%s9812_s4 + $0x160] sm:$0xff] %v4299_v42  ;;  %v2013_v34 = vadd.f32 %v2012_v25, %v1924_v43  ;;  %v7434_v53 = vadd.f32 %v7039_v36, %v7125_v28  ;;  %v7441_v10 = vadd.f32 %v7059_v33, %v2005_v60  ;;  %v5440_v26 = vld [vmem:[%s9808_s1 + $0x2ec] sm:$0xf]  ;;  %v5151_v62 = vld [vmem:[%s9808_s1 + $0x2f8] sm:$0xf0]  ;;  %v4331_v28 = vmax.f32 %v7246_v50, 0.0  ;;  %2325 = vmatpush.bf16.msra.mxu2 %v5054_v12 }
 0x240   :  { %4431 = vst [vmem:[%s9812_s4 + $0x180] sm:$0xff] %v4303_v37  ;;  %v7454_v51 = vadd.f32 %v7101_v45, %v2008_v47  ;;  %v7457_v33 = vadd.f32 %v7187_v46, %v2010_v39  ;;  %v5472_v3 = vld [vmem:[%s9808_s1 + $0x3ec] sm:$0xf]  ;;  %v5279_v7 = vld [vmem:[%s9808_s1 + $0x3f8] sm:$0xf0]  ;;  %v4335_v50 = vmax.f32 %v7249_v35, 0.0  ;;  %2414 = vmatpush.bf16.msra.mxu3 %v5182_v54  ;;  %v5038_v45 = vor.u32 %v7380_v48, %v7375_v2 }
 0x241   :  { %4435 = vst [vmem:[%s9812_s4 + $0x1a0] sm:$0xff] %v4307_v29  ;;  %v7465_v32 = vadd.f32 %v2101_v22, %v2013_v34  ;;  %v5166_v46 = vor.u32 %v7390_v18, %v7385_v13  ;;  %2236 = vmatpush.bf16.msra.mxu1 %v4926_v41  ;;  %v4782_v35 = vor.u32 %v5350_v44, %v7411_v15  ;;  %v5376_v24 = vld [vmem:[%s9808_s1 + $0xec] sm:$0xf]  ;;  %v4895_v31 = vld [vmem:[%s9808_s1 + $0xf8] sm:$0xf0]  ;;  %v4347_v25 = vmax.f32 %v7317_v1, 0.0 }
 0x242   :  { %4439 = vst [vmem:[%s9812_s4 + $0x1c0] sm:$0xff] %v4311_v55  ;;  %2147 = vmatpush.bf16.msra.mxu0 %v4798_v56  ;;  %v4910_v30 = vor.u32 %v5382_v21, %v4909_v5  ;;  %v4231_v37 = vadd.f32 %v7039_v36, %v7128_v40  ;;  %v10109_v29 = vld [vmem:[#allocation92_spill] sm:$0xff]  ;;  %v5154_v55 = vor.u32 %v5440_v26, %v5151_v62  ;;  %v5023_v49 = vld [vmem:[%s9808_s1 + $0x1f8] sm:$0xf0]  ;;  %v4351_v6 = vmax.f32 %v7430_v4, 0.0  ;;  %v10115_v13 = vld [vmem:[#allocation91_spill] sm:$0xff] }
 0x243   :  { %4443 = vst [vmem:[%s9812_s4 + $0x1e0] sm:$0xff] %v4315_v17  ;;  %v4343_v9 = vmax.f32 %v10109_v29, 0.0  ;;  %v5282_v17 = vor.u32 %v5472_v3, %v5279_v7  ;;  %v5408_v63 = vld [vmem:[%s9808_s1 + $0x1ec] sm:$0xf]  ;;  %v4239_v20 = vadd.f32 %v7039_v36, %v10113_v57  ;;  %v10114_v54 = vld [vmem:[#allocation90_spill] sm:$0xff]  ;;  %2326 = vmatpush.bf16.msra.mxu2 %v5038_v45  ;;  %v4355_v1 = vmax.f32 %v7434_v53, 0.0 }
 0x244   :  { %v7397_v23 = vpop.f32.mrf.mxu0  ;;  %4447 = vst [vmem:[%s9812_s4 + $0x200] sm:$0xff] %v4319_v16  ;;  %v10111_v16 = vld [vmem:[#allocation86_spill] sm:$0xff]  ;;  %v10112_v40 = vld [vmem:[#allocation88_spill] sm:$0xff]  ;;  %v4243_v59 = vadd.f32 %v7039_v36, %v10114_v54  ;;  %2415 = vmatpush.bf16.msra.mxu3 %v5166_v46  ;;  %v4898_v2 = vor.u32 %v5376_v24, %v4895_v31  ;;  %v5026_v48 = vor.u32 %v5408_v63, %v5023_v49  ;;  %v4359_v11 = vmax.f32 %v4231_v37, 0.0  ;;  %v10116_v41 = vld [vmem:[#allocation5_spill] sm:$0xff] }
 0x245   :  { %4451 = vst [vmem:[%s9812_s4 + $0x220] sm:$0xff] %v4323_v38  ;;  %v7486_v42 = vpop.f32.mrf.mxu2  ;;  %v7488_v19 = vpop.f32.mrf.mxu3  ;;  %v4113_v38 = vmul.f32 %v10111_v16, %v10110_v14  ;;  %v4235_v27 = vadd.f32 %v7039_v36, %v10112_v40  ;;  %2237 = vmatpush.bf16.msra.mxu1 %v4910_v30  ;;  %v4247_v18 = vadd.f32 %v7039_v36, %v10115_v13  ;;  %v10117_v15 = vld [vmem:[#allocation6_spill] sm:$0xff]  ;;  %v4367_v44 = vmax.f32 %v4239_v20, 0.0  ;;  %v10118_v60 = vld [vmem:[#allocation3_spill] sm:$0xff]  ;;  %v10119_v5 = vld [vmem:[#allocation4_spill] sm:$0xff] }
 0x246   :  { %4455 = vst [vmem:[%s9812_s4 + $0x240] sm:$0xff] %v4327_v8  ;;  %v1928_v12 = vpop.f32.mrf.mxu1  ;;  %2148 = vmatpush.bf16.msra.mxu0 %v4782_v35  ;;  %2327 = vmatmul.bf16.vlgmr.msra.gmra.mxu2 %v10116_v41  ;;  %v5135_v21 = vld [vmem:[%s9808_s1 + $0x2d8] sm:$0xf0]  ;;  %v4371_v47 = vmax.f32 %v4243_v59, 0.0  ;;  %v5468_v53 = vld [vmem:[%s9808_s1 + $0x3cc] sm:$0xf] }
 0x247   :  { %4459 = vst [vmem:[%s9812_s4 + $0x260] sm:$0xff] %v4331_v28  ;;  %2675 = vmatpush.bf16.msrb.mxu2 %v5154_v55  ;;  %v4251_v52 = vadd.f32 %v7039_v36, %v4113_v38  ;;  %v4363_v43 = vmax.f32 %v4235_v27, 0.0  ;;  %2416 = vmatmul.bf16.vlgmr.msra.gmra.mxu3 %v10117_v15  ;;  %v5436_v36 = vld [vmem:[%s9808_s1 + $0x2cc] sm:$0xf]  ;;  %v5263_v8 = vld [vmem:[%s9808_s1 + $0x3d8] sm:$0xf0] }
 0x248   :  { %4463 = vst [vmem:[%s9812_s4 + $0x280] sm:$0xff] %v4335_v50  ;;  %2764 = vmatpush.bf16.msrb.mxu3 %v5282_v17  ;;  %2238 = vmatmul.bf16.vlgmr.msra.gmra.mxu1 %v10119_v5  ;;  %v5138_v4 = vor.u32 %v5436_v36, %v5135_v21  ;;  %v4375_v26 = vmax.f32 %v4247_v18, 0.0  ;;  %v5266_v28 = vor.u32 %v5468_v53, %v5263_v8  ;;  %v5372_v3 = vld [vmem:[%s9808_s1 + $0xcc] sm:$0xf]  ;;  %v4879_v7 = vld [vmem:[%s9808_s1 + $0xd8] sm:$0xf0] }
 0x249   :  { %4467 = vst [vmem:[%s9812_s4 + $0x2a0] sm:$0xff] %v4339_v58  ;;  %2149 = vmatmul.bf16.vlgmr.msra.gmra.mxu0 %v10118_v60  ;;  %2586 = vmatpush.bf16.msrb.mxu1 %v5026_v48  ;;  %v4379_v50 = vmax.f32 %v4251_v52, 0.0  ;;  %v4882_v58 = vor.u32 %v5372_v3, %v4879_v7  ;;  %v5404_v35 = vld [vmem:[%s9808_s1 + $0x1cc] sm:$0xf]  ;;  %v5007_v30 = vld [vmem:[%s9808_s1 + $0x1d8] sm:$0xf0] }
 0x24a   :  { %4471 = vst [vmem:[%s9812_s4 + $0x2c0] sm:$0xff] %v4343_v9  ;;  %2497 = vmatpush.bf16.msrb.mxu0 %v4898_v2  ;;  %v5010_v31 = vor.u32 %v5404_v35, %v5007_v30  ;;  %v10120_v63 = vld [vmem:[#allocation9_spill] sm:$0xff]  ;;  %v10121_v49 = vld [vmem:[#allocation10_spill] sm:$0xff]  ;;  %v10122_v14 = vld [vmem:[#allocation7_spill] sm:$0xff] }
 0x24b   :  { %4475 = vst [vmem:[%s9812_s4 + $0x2e0] sm:$0xff] %v4347_v25  ;;  %2676 = vmatpush.bf16.msrb.mxu2 %v5138_v4  ;;  %v10123_v16 = vld [vmem:[#allocation8_spill] sm:$0xff]  ;;  %v5119_v13 = vld [vmem:[%s9808_s1 + $0x2b8] sm:$0xf0]  ;;  %v10130_v35 = vld [vmem:[#allocation15_spill] sm:$0xff] }
 0x24c   :  { %v1839_v22 = vpop.f32.mrf.mxu0  ;;  %4479 = vst [vmem:[%s9812_s4 + $0x300] sm:$0xff] %v4351_v6  ;;  %2765 = vmatpush.bf16.msrb.mxu3 %v5266_v28  ;;  %v10124_v6 = vld [vmem:[#allocation13_spill] sm:$0xff]  ;;  %v10127_v2 = vld [vmem:[#allocation12_spill] sm:$0xff]  ;;  %v4863_v21 = vld [vmem:[%s9808_s1 + $0xb8] sm:$0xf0] }
 0x24d   :  { %v1929_v56 = vadd.f32 %v1928_v12, %v1839_v22  ;;  %4483 = vst [vmem:[%s9812_s4 + $0x320] sm:$0xff] %v4355_v1  ;;  %v2017_v39 = vpop.f32.mrf.mxu2  ;;  %v2106_v34 = vpop.f32.mrf.mxu3  ;;  %2587 = vmatpush.bf16.msrb.mxu1 %v5010_v31  ;;  %v10126_v1 = vld [vmem:[#allocation11_spill] sm:$0xff]  ;;  %v5432_v48 = vld [vmem:[%s9808_s1 + $0x2ac] sm:$0xf]  ;;  %v4991_v4 = vld [vmem:[%s9808_s1 + $0x1b8] sm:$0xf0] }
 0x24e   :  { %4487 = vst [vmem:[%s9812_s4 + $0x340] sm:$0xff] %v4359_v11  ;;  %v7567_v46 = vpop.f32.mrf.mxu1  ;;  %2498 = vmatpush.bf16.msrb.mxu0 %v4882_v58  ;;  %v5464_v18 = vld [vmem:[%s9808_s1 + $0x3ac] sm:$0xf]  ;;  %v10129_v58 = vld [vmem:[#allocation18_spill] sm:$0xff] }
 0x24f   :  { %v2018_v62 = vadd.f32 %v2017_v39, %v1929_v56  ;;  %4491 = vst [vmem:[%s9812_s4 + $0x360] sm:$0xff] %v4363_v43  ;;  %v10125_v56 = vld [vmem:[#allocation14_spill] sm:$0xff]  ;;  %v5122_v43 = vor.u32 %v5432_v48, %v5119_v13  ;;  %v5368_v36 = vld [vmem:[%s9808_s1 + $0xac] sm:$0xf] }
 0x250   :  { %4495 = vst [vmem:[%s9812_s4 + $0x380] sm:$0xff] %v4367_v44  ;;  %v5247_v44 = vld [vmem:[%s9808_s1 + $0x3b8] sm:$0xf0]  ;;  %v4866_v39 = vor.u32 %v5368_v36, %v4863_v21  ;;  %v10131_v30 = vld [vmem:[#allocation16_spill] sm:$0xff] }
 0x251   :  { %v7578_v24 = vadd.f32 %v2106_v34, %v2018_v62  ;;  %4499 = vst [vmem:[%s9812_s4 + $0x3a0] sm:$0xff] %v4371_v47  ;;  %v5250_v47 = vor.u32 %v5464_v18, %v5247_v44  ;;  %v5400_v34 = vld [vmem:[%s9808_s1 + $0x1ac] sm:$0xf]  ;;  %2677 = vmatpush.bf16.msrb.mxu2 %v5122_v43  ;;  %v10135_v18 = vld [vmem:[#allocation71_spill] sm:$0xff] }
 0x252   :  { %4503 = vst [vmem:[%s9812_s4 + $0x3c0] sm:$0xff] %v4375_v26  ;;  %v4994_v26 = vor.u32 %v5400_v34, %v4991_v4  ;;  %2499 = vmatpush.bf16.msrb.mxu0 %v4866_v39  ;;  %v10132_v31 = vld [vmem:[#allocation68_spill] sm:$0xff]  ;;  %v10139_v34 = vld [vmem:[#allocation73_spill] sm:$0xff] }
 0x253   :  { %4507 = vst [vmem:[%s9812_s4 + $0x3e0] sm:$0xff] %v4379_v50  ;;  %2766 = vmatpush.bf16.msrb.mxu3 %v5250_v47  ;;  %v10128_v50 = vld [vmem:[#allocation17_spill] sm:$0xff]  ;;  %v10136_v44 = vld [vmem:[#allocation72_spill] sm:$0xff] }
 0x254   :  { %v7565_v45 = vpop.f32.mrf.mxu0  ;;  %2588 = vmatpush.bf16.msrb.mxu1 %v4994_v26  ;;  %v10137_v21 = vld [vmem:[#allocation76_spill] sm:$0xff]  ;;  %v10138_v47 = vld [vmem:[#allocation77_spill] sm:$0xff]  ;;  %v10140_v26 = vld [vmem:[#allocation79_spill] sm:$0xff] }
 0x255   :  { %v7589_v37 = vpop.f32.mrf.mxu2  ;;  %v7591_v29 = vpop.f32.mrf.mxu3  ;;  %v1906_v39 = vadd.f32 %v10138_v47, %v10137_v21  ;;  %v10145_v21 = vld [vmem:[#allocation80_spill] sm:$0xff] }
 0x256   :  { %v1933_v55 = vpop.f32.mrf.mxu1  ;;  %2332 = vmatmul.bf16.gmra.mxu2 %v10120_v63  ;;  %v10150_v63 = vld [vmem:[#allocation22_spill] sm:$0xff] }
 0x257   :  { %2421 = vmatmul.bf16.gmra.mxu3 %v10121_v49  ;;  %v10149_v49 = vld [vmem:[#allocation21_spill] sm:$0xff] }
 0x258   :  { %2243 = vmatmul.bf16.gmra.mxu1 %v10123_v16 }
 0x259   :  { %2154 = vmatmul.bf16.gmra.mxu0 %v10122_v14 }
 0x25c   :  { %v1844_v9 = vpop.f32.mrf.mxu0 }
 0x25d   :  { %v1934_v17 = vadd.f32 %v1933_v55, %v1844_v9  ;;  %v2022_v38 = vpop.f32.mrf.mxu2  ;;  %v2111_v40 = vpop.f32.mrf.mxu3  ;;  %v10133_v9 = vld [vmem:[#allocation69_spill] sm:$0xff] }
 0x25e   :  { %v7599_v20 = vpop.f32.mrf.mxu1  ;;  %v3277_v55 = vadd.f32 %v10133_v9, %v10132_v31 }
 0x25f   :  { %v2023_v27 = vadd.f32 %v2022_v38, %v1934_v17 }
 0x261   :  { %v7601_v25 = vadd.f32 %v2111_v40, %v2023_v27  ;;  %v10134_v40 = vld [vmem:[#allocation70_spill] sm:$0xff] }
 0x262   :  { %v3278_v27 = vadd.f32 %v3277_v55, %v10134_v40  ;;  %v10141_v55 = vld [vmem:[#allocation74_spill] sm:$0xff] }
 0x264   :  { %v7597_v57 = vpop.f32.mrf.mxu0  ;;  %v3279_v43 = vadd.f32 %v3278_v27, %v10135_v18 }
 0x265   :  { %v7603_v22 = vpop.f32.mrf.mxu2  ;;  %v7605_v12 = vpop.f32.mrf.mxu3 }
 0x266   :  { %v7609_v59 = vpop.f32.mrf.mxu1  ;;  %2337 = vmatmul.bf16.gmra.mxu2 %v10124_v6  ;;  %v3280_v36 = vadd.f32 %v3279_v43, %v10136_v44  ;;  %v10144_v43 = vld [vmem:[#allocation75_spill] sm:$0xff] }
 0x267   :  { %2426 = vmatmul.bf16.gmra.mxu3 %v10125_v56 }
 0x268   :  { %2248 = vmatmul.bf16.gmra.mxu1 %v10127_v2  ;;  %v3281_v4 = vadd.f32 %v3280_v36, %v10139_v34  ;;  %v10142_v2 = vld [vmem:[#allocation81_spill] sm:$0xff]  ;;  %v10147_v36 = vld [vmem:[#allocation84_spill] sm:$0xff] }
 0x269   :  { %2159 = vmatmul.bf16.gmra.mxu0 %v10126_v1  ;;  %v10143_v1 = vld [vmem:[#allocation82_spill] sm:$0xff] }
 0x26a   :  { %v1911_v56 = vadd.f32 %v10143_v1, %v10142_v2  ;;  %v10152_v1 = vld [vmem:[#allocation20_spill] sm:$0xff] }
 0x26b   :  { %v5428_v2 = vld [vmem:[%s9808_s1 + $0x28c] sm:$0xf] }
 0x26c   :  { %v7607_v54 = vpop.f32.mrf.mxu0 }
 0x26d   :  { %v7624_v11 = vpop.f32.mrf.mxu2  ;;  %v7626_v52 = vpop.f32.mrf.mxu3 }
 0x26e   :  { %v7645_v8 = vpop.f32.mrf.mxu1 }
 0x274   :  { %v7643_v53 = vpop.f32.mrf.mxu0 }
 0x275   :  { %v7647_v62 = vpop.f32.mrf.mxu2  ;;  %v7649_v28 = vpop.f32.mrf.mxu3 }
 0x276   :  { %v7653_v7 = vpop.f32.mrf.mxu1  ;;  %2342 = vmatmul.bf16.gmra.mxu2 %v10128_v50  ;;  %v3282_v50 = vadd.f32 %v3281_v4, %v10141_v55  ;;  %v10151_v4 = vld [vmem:[#allocation19_spill] sm:$0xff] }
 0x277   :  { %2431 = vmatmul.bf16.gmra.mxu3 %v10129_v58 }
 0x278   :  { %2253 = vmatmul.bf16.gmra.mxu1 %v10131_v30  ;;  %v1995_v30 = vadd.f32 %v10140_v26, %v1906_v39  ;;  %v3283_v16 = vadd.f32 %v3282_v50, %v10144_v43  ;;  %v2000_v39 = vadd.f32 %v10147_v36, %v1911_v56  ;;  %v10148_v26 = vld [vmem:[#allocation78_spill] sm:$0xff] }
 0x279   :  { %2164 = vmatmul.bf16.gmra.mxu0 %v10130_v35  ;;  %v5103_v50 = vld [vmem:[%s9808_s1 + $0x298] sm:$0xf0] }
 0x27a   :  { %v7689_v47 = vadd.f32 %v10145_v21, %v1995_v30  ;;  %v3284_v14 = vadd.f32 %v3283_v16, %v10148_v26  ;;  %v5460_v16 = vld [vmem:[%s9808_s1 + $0x38c] sm:$0xf]  ;;  %v10153_v30 = vld [vmem:[#allocation85_spill] sm:$0xff] }
 0x27b   :  { %v7708_v21 = vadd.f32 %v10153_v30, %v2000_v39  ;;  %v5396_v30 = vld [vmem:[%s9808_s1 + $0x18c] sm:$0xf] }
 0x27c   :  { %v7651_v3 = vpop.f32.mrf.mxu0  ;;  %10146 = vst [vmem:[#allocation92_spill] sm:$0xff] %v7689_v47  ;;  %v3285_v56 = vadd.f32 %v3284_v14, %v7689_v47  ;;  %v4847_v14 = vld [vmem:[%s9808_s1 + $0x98] sm:$0xf0] }
 0x27d   :  { %v7661_v17 = vpop.f32.mrf.mxu2  ;;  %v7663_v38 = vpop.f32.mrf.mxu3 }
 0x27e   :  { %v7668_v13 = vpop.f32.mrf.mxu1 }
 0x284   :  { %v7666_v48 = vpop.f32.mrf.mxu0 }
 0x285   :  { %v7676_v35 = vpop.f32.mrf.mxu2  ;;  %v7678_v58 = vpop.f32.mrf.mxu3 }
 0x286   :  { %v7685_v27 = vpop.f32.mrf.mxu1  ;;  %2347 = vmatmul.bf16.gmra.mxu2 %v10149_v49  ;;  %v5364_v49 = vld [vmem:[%s9808_s1 + $0x8c] sm:$0xf] }
 0x287   :  { %2436 = vmatmul.bf16.gmra.mxu3 %v10150_v63  ;;  %v5231_v63 = vld [vmem:[%s9808_s1 + $0x398] sm:$0xf0]  ;;  %v4850_v39 = vor.u32 %v5364_v49, %v4847_v14  ;;  %v1926_v49 = vadd.f32 %v7399_v0, %v7397_v23 }
 0x288   :  { %2258 = vmatmul.bf16.gmra.mxu1 %v10152_v1  ;;  %v5234_v5 = vor.u32 %v5460_v16, %v5231_v63 }
 0x289   :  { %2169 = vmatmul.bf16.gmra.mxu0 %v10151_v4  ;;  %v5106_v4 = vor.u32 %v5428_v2, %v5103_v50  ;;  %v4975_v2 = vld [vmem:[%s9808_s1 + $0x198] sm:$0xf0]  ;;  %v10154_v50 = vld [vmem:[#allocation83_spill] sm:$0xff]  ;;  %v2015_v14 = vadd.f32 %v7486_v42, %v1926_v49  ;;  %v1936_v42 = vadd.f32 %v7599_v20, %v7597_v57  ;;  %v1944_v49 = vadd.f32 %v7653_v7, %v7651_v3 }
 0x28a   :  { %v3286_v60 = vadd.f32 %v3285_v56, %v10154_v50  ;;  %v4978_v47 = vor.u32 %v5396_v30, %v4975_v2  ;;  %2767 = vmatpush.bf16.msrb.mxu3 %v5234_v5  ;;  %2500 = vmatpush.bf16.msrb.mxu0 %v4850_v39  ;;  %v1931_v5 = vadd.f32 %v7567_v46, %v7565_v45  ;;  %v10155_v30 = vld [vmem:[#allocation25_spill] sm:$0xff]  ;;  %v10156_v45 = vld [vmem:[#allocation26_spill] sm:$0xff]  ;;  %v10157_v46 = vld [vmem:[#allocation23_spill] sm:$0xff] }
 0x28b   :  { %2678 = vmatpush.bf16.msrb.mxu2 %v5106_v4  ;;  %v10158_v2 = vld [vmem:[#allocation24_spill] sm:$0xff] }
 0x28c   :  { %v7683_v6 = vpop.f32.mrf.mxu0  ;;  %v3287_v26 = vadd.f32 %v3286_v60, %v7708_v21  ;;  %2589 = vmatpush.bf16.msrb.mxu1 %v4978_v47  ;;  %v7741_v47 = vadd.f32 %v7488_v19, %v2015_v14  ;;  %v2020_v23 = vadd.f32 %v7589_v37, %v1931_v5 }
 0x28d   :  { %v7710_v36 = vpop.f32.mrf.mxu2  ;;  %v7712_v1 = vpop.f32.mrf.mxu3 }
 0x28e   :  { %v1950_v41 = vpop.f32.mrf.mxu1  ;;  %v3288_v63 = vadd.f32 %v3287_v26, %v7406_v61  ;;  %v1939_v26 = vadd.f32 %v7609_v59, %v7607_v54  ;;  %v7755_v37 = vadd.f32 %v7591_v29, %v2020_v23  ;;  %v1941_v59 = vadd.f32 %v7645_v8, %v7643_v53 }
 0x28f   :  { %v1949_v53 = vadd.f32 %v7685_v27, %v7683_v6  ;;  %v1946_v8 = vadd.f32 %v7668_v13, %v7666_v48 }
 0x290   :  { %v3289_v16 = vadd.f32 %v3288_v63, %v7441_v10  ;;  %v2028_v54 = vadd.f32 %v7624_v11, %v1939_v26  ;;  %v2033_v11 = vadd.f32 %v7661_v17, %v1944_v49 }
 0x291   :  { %v2038_v17 = vadd.f32 %v7710_v36, %v1949_v53  ;;  %v10161_v36 = vld [vmem:[#allocation27_spill] sm:$0xff] }
 0x292   :  { %v3290_v50 = vadd.f32 %v3289_v16, %v7454_v51  ;;  %v7771_v23 = vadd.f32 %v7626_v52, %v2028_v54  ;;  %v10162_v54 = vld [vmem:[#allocation28_spill] sm:$0xff] }
 0x294   :  { %v1861_v15 = vpop.f32.mrf.mxu0  ;;  %v3291_v60 = vadd.f32 %v3290_v50, %v7457_v33  ;;  %v2025_v50 = vadd.f32 %v7603_v22, %v1936_v42  ;;  %v2030_v22 = vadd.f32 %v7647_v62, %v1941_v59  ;;  %v7785_v42 = vadd.f32 %v7663_v38, %v2033_v11  ;;  %v10160_v38 = vld [vmem:[#allocation30_spill] sm:$0xff] }
 0x295   :  { %v2039_v43 = vpop.f32.mrf.mxu2  ;;  %v2128_v56 = vpop.f32.mrf.mxu3  ;;  %v1951_v26 = vadd.f32 %v1950_v41, %v1861_v15 }
 0x296   :  { %v1953_v39 = vpop.f32.mrf.mxu1  ;;  %v3292_v0 = vadd.f32 %v3291_v60, %v7465_v32  ;;  %2352 = vmatmul.bf16.gmra.mxu2 %v10155_v30  ;;  %v7766_v29 = vadd.f32 %v7605_v12, %v2025_v50  ;;  %v7780_v12 = vadd.f32 %v7649_v28, %v2030_v22 }
 0x297   :  { %2441 = vmatmul.bf16.gmra.mxu3 %v10156_v45 }
 0x298   :  { %2263 = vmatmul.bf16.gmra.mxu1 %v10158_v2  ;;  %v3293_v19 = vadd.f32 %v3292_v0, %v7741_v47  ;;  %v2035_v0 = vadd.f32 %v7676_v35, %v1946_v8  ;;  %v7794_v35 = vadd.f32 %v7712_v1, %v2038_v17  ;;  %v10200_v2 = vld [vmem:[#allocation57_spill] sm:$0xff] }
 0x299   :  { %2174 = vmatmul.bf16.gmra.mxu0 %v10157_v46 }
 0x29a   :  { %v3294_v20 = vadd.f32 %v3293_v19, %v7578_v24  ;;  %v7790_v28 = vadd.f32 %v7678_v58, %v2035_v0  ;;  %v2040_v19 = vadd.f32 %v2039_v43, %v1951_v26  ;;  %v10166_v26 = vld [vmem:[#allocation32_spill] sm:$0xff] }
 0x29c   :  { %v1864_v4 = vpop.f32.mrf.mxu0  ;;  %v3295_v5 = vadd.f32 %v3294_v20, %v7755_v37  ;;  %v10159_v20 = vld [vmem:[#allocation29_spill] sm:$0xff]  ;;  %v7801_v59 = vadd.f32 %v2128_v56, %v2040_v19 }
 0x29d   :  { %v2042_v63 = vpop.f32.mrf.mxu2  ;;  %v2131_v57 = vpop.f32.mrf.mxu3  ;;  %v1954_v48 = vadd.f32 %v1953_v39, %v1864_v4 }
 0x29e   :  { %v1955_v14 = vpop.f32.mrf.mxu1  ;;  %v3296_v60 = vadd.f32 %v3295_v5, %v7601_v25 }
 0x29f   :  { %v2043_v41 = vadd.f32 %v2042_v63, %v1954_v48 }
 0x2a0   :  { %v3297_v3 = vadd.f32 %v3296_v60, %v7766_v29 }
 0x2a1   :  { %v7804_v5 = vadd.f32 %v2131_v57, %v2043_v41 }
 0x2a2   :  { %v3298_v52 = vadd.f32 %v3297_v3, %v7771_v23 }
 0x2a4   :  { %v1866_v16 = vpop.f32.mrf.mxu0  ;;  %v3299_v13 = vadd.f32 %v3298_v52, %v7780_v12 }
 0x2a5   :  { %v2044_v7 = vpop.f32.mrf.mxu2  ;;  %v2133_v62 = vpop.f32.mrf.mxu3  ;;  %v1956_v15 = vadd.f32 %v1955_v14, %v1866_v16 }
 0x2a6   :  { %v1958_v27 = vpop.f32.mrf.mxu1  ;;  %v3300_v50 = vadd.f32 %v3299_v13, %v7785_v42  ;;  %2357 = vmatmul.bf16.gmra.mxu2 %v10159_v20 }
 0x2a7   :  { %2446 = vmatmul.bf16.gmra.mxu3 %v10160_v38  ;;  %v2045_v49 = vadd.f32 %v2044_v7, %v1956_v15 }
 0x2a8   :  { %2268 = vmatmul.bf16.gmra.mxu1 %v10162_v54  ;;  %v3301_v43 = vadd.f32 %v3300_v50, %v7790_v28 }
 0x2a9   :  { %2179 = vmatmul.bf16.gmra.mxu0 %v10161_v36  ;;  %v7807_v8 = vadd.f32 %v2133_v62, %v2045_v49  ;;  %v10164_v62 = vld [vmem:[#allocation34_spill] sm:$0xff] }
 0x2aa   :  { %v3302_v1 = vadd.f32 %v3301_v43, %v7794_v35  ;;  %v10170_v43 = vld [vmem:[#allocation67_spill] sm:$0xff] }
 0x2ac   :  { %v1869_v6 = vpop.f32.mrf.mxu0  ;;  %v3303_v53 = vadd.f32 %v3302_v1, %v7801_v59  ;;  %v10171_v1 = vld [vmem:[#allocation38_spill] sm:$0xff] }
 0x2ad   :  { %v1959_v4 = vadd.f32 %v1958_v27, %v1869_v6  ;;  %v2047_v39 = vpop.f32.mrf.mxu2  ;;  %v2136_v58 = vpop.f32.mrf.mxu3  ;;  %v10163_v6 = vld [vmem:[#allocation33_spill] sm:$0xff]  ;;  %v10165_v27 = vld [vmem:[#allocation31_spill] sm:$0xff] }
 0x2ae   :  { %v1960_v11 = vpop.f32.mrf.mxu1  ;;  %v3304_v63 = vadd.f32 %v3303_v53, %v7804_v5 }
 0x2af   :  { %v2048_v22 = vadd.f32 %v2047_v39, %v1959_v4  ;;  %v10167_v4 = vld [vmem:[#allocation37_spill] sm:$0xff]  ;;  %v10168_v39 = vld [vmem:[#allocation35_spill] sm:$0xff] }
 0x2b0   :  { %v3305_v56 = vadd.f32 %v3304_v63, %v7807_v8 }
 0x2b1   :  { %v7810_v16 = vadd.f32 %v2136_v58, %v2048_v22  ;;  %v10169_v58 = vld [vmem:[#allocation36_spill] sm:$0xff] }
 0x2b3   :  { %v3306_v57 = vadd.f32 %v3305_v56, %v7810_v16 }
 0x2b4   :  { %v1871_v60 = vpop.f32.mrf.mxu0 }
 0x2b5   :  { %v1961_v14 = vadd.f32 %v1960_v11, %v1871_v60  ;;  %v2049_v3 = vpop.f32.mrf.mxu2  ;;  %v2138_v0 = vpop.f32.mrf.mxu3 }
 0x2b6   :  { %2362 = vmatmul.bf16.gmra.mxu2 %v10163_v6 }
 0x2b7   :  { %v2050_v7 = vadd.f32 %v2049_v3, %v1961_v14  ;;  %2451 = vmatmul.bf16.gmra.mxu3 %v10164_v62 }
 0x2b8   :  { %2273 = vmatmul.bf16.gmra.mxu1 %v10166_v26 }
 0x2b9   :  { %v7814_v52 = vadd.f32 %v2138_v0, %v2050_v7  ;;  %2184 = vmatmul.bf16.gmra.mxu0 %v10165_v27 }
 0x2bb   :  { %v3307_v17 = vadd.f32 %v3306_v57, %v7814_v52 }
 0x2bd   :  { %v3308_v48 = vrot.slane %v3307_v17, 4 }
 0x2bf   :  { %v3309_v13 = vadd.f32 %v3308_v48, %v3307_v17  ;;  %v10172_v17 = vld [vmem:[#allocation41_spill] sm:$0xff] }
 0x2c1   :  { %v3310_v19 = vrot.slane %v3309_v13, 2 }
 0x2c3   :  { %v3311_v50 = vadd.f32 %v3310_v19, %v3309_v13 }
 0x2c5   :  { %v3312_v41 = vrot.slane %v3311_v50, 1  ;;  %v2239_v53 = vpop.f32.mrf.mxu1 }
 0x2c6   :  { %2367 = vmatmul.bf16.gmra.mxu2 %v10167_v4  ;;  %v2150_v11 = vpop.f32.mrf.mxu0 }
 0x2c7   :  { %v3313_v15 = vadd.f32 %v3312_v41, %v3311_v50  ;;  %2456 = vmatmul.bf16.gmra.mxu3 %v10171_v1  ;;  %v10173_v41 = vld [vmem:[#allocation39_spill] sm:$0xff] }
 0x2c8   :  { %2278 = vmatmul.bf16.gmra.mxu1 %v10169_v58 }
 0x2c9   :  { %2189 = vmatmul.bf16.gmra.mxu0 %v10168_v39  ;;  %v7825_v49 = vmul.f32 %v10170_v43, %v3313_v15  ;;  %v2328_v0 = vpop.f32.mrf.mxu2 }
 0x2ca   :  { %v2417_v57 = vpop.f32.mrf.mxu3 }
 0x2cb   :  { %v7830_v22 = vsub.f32 %v10132_v31, %v7825_v49  ;;  %v7834_v60 = vsub.f32 %v10133_v9, %v7825_v49  ;;  %v7838_v63 = vsub.f32 %v10134_v40, %v7825_v49  ;;  %v7846_v31 = vsub.f32 %v10135_v18, %v7825_v49 }
 0x2cc   :  { %v7850_v9 = vsub.f32 %v10136_v44, %v7825_v49  ;;  %v2240_v40 = vadd.f32 %v2239_v53, %v2150_v11  ;;  %v7857_v48 = vsub.f32 %v10139_v34, %v7825_v49  ;;  %v7865_v11 = vsub.f32 %v10141_v55, %v7825_v49 }
 0x2cd   :  { %v3528_v14 = vmul.f32 %v7830_v22, %v7830_v22  ;;  %v3532_v3 = vmul.f32 %v7834_v60, %v7834_v60  ;;  %v3536_v56 = vmul.f32 %v7838_v63, %v7838_v63  ;;  %v3540_v18 = vmul.f32 %v7846_v31, %v7846_v31  ;;  %v2241_v50 = vpop.f32.mrf.mxu1 }
 0x2ce   :  { %v2329_v19 = vadd.f32 %v2328_v0, %v2240_v40  ;;  %v2152_v44 = vpop.f32.mrf.mxu0  ;;  %v3544_v34 = vmul.f32 %v7850_v9, %v7850_v9  ;;  %v3548_v40 = vmul.f32 %v7857_v48, %v7857_v48 }
 0x2cf   :  { %v3692_v7 = vadd.f32 %v3532_v3, %v3528_v14  ;;  %v2242_v15 = vadd.f32 %v2241_v50, %v2152_v44  ;;  %v10174_v14 = vld [vmem:[#allocation40_spill] sm:$0xff]  ;;  %v10178_v44 = vld [vmem:[#allocation78_spill] sm:$0xff]  ;;  %v3552_v50 = vmul.f32 %v7865_v11, %v7865_v11 }
 0x2d0   :  { %v7869_v3 = vadd.f32 %v2417_v57, %v2329_v19  ;;  %v7880_v55 = vsub.f32 %v10178_v44, %v7825_v49  ;;  %v10181_v44 = vld [vmem:[#allocation83_spill] sm:$0xff] }
 0x2d1   :  { %v3693_v13 = vadd.f32 %v3692_v7, %v3536_v56  ;;  %v10177_v56 = vld [vmem:[#allocation75_spill] sm:$0xff]  ;;  %v2330_v57 = vpop.f32.mrf.mxu2  ;;  %v7894_v58 = vsub.f32 %v10181_v44, %v7825_v49 }
 0x2d2   :  { %10175 = vst [vmem:[#allocation87_spill] sm:$0xff] %v7869_v3  ;;  %v7874_v7 = vsub.f32 %v10177_v56, %v7825_v49  ;;  %v2331_v19 = vadd.f32 %v2330_v57, %v2242_v15  ;;  %v7906_v57 = vsub.f32 %v7406_v61, %v7825_v49  ;;  %v8320_v3 = vld [vmem:[%s9808_s1 + $0x4c] sm:$0xf] }
 0x2d3   :  { %v3694_v53 = vadd.f32 %v3693_v13, %v3540_v18  ;;  %v2419_v13 = vpop.f32.mrf.mxu3 }
 0x2d4   :  { %v3556_v56 = vmul.f32 %v7874_v7, %v7874_v7  ;;  %v7890_v1 = vadd.f32 %v2419_v13, %v2331_v19  ;;  %v3568_v13 = vmul.f32 %v7894_v58, %v7894_v58 }
 0x2d5   :  { %v3695_v0 = vadd.f32 %v3694_v53, %v3544_v34  ;;  %v2244_v53 = vpop.f32.mrf.mxu1 }
 0x2d6   :  { %2372 = vmatmul.bf16.gmra.mxu2 %v10172_v17  ;;  %v10176_v17 = vld [vmem:[#allocation42_spill] sm:$0xff]  ;;  %v2155_v34 = vpop.f32.mrf.mxu0  ;;  %10180 = vst [vmem:[#allocation86_spill] sm:$0xff] %v7890_v1 }
 0x2d7   :  { %2461 = vmatmul.bf16.gmra.mxu3 %v10176_v17  ;;  %v3696_v18 = vadd.f32 %v3695_v0, %v3548_v40  ;;  %v10179_v17 = vld [vmem:[#allocation92_spill] sm:$0xff]  ;;  %v3560_v40 = vmul.f32 %v7880_v55, %v7880_v55 }
 0x2d8   :  { %2283 = vmatmul.bf16.gmra.mxu1 %v10174_v14  ;;  %v7886_v14 = vsub.f32 %v10179_v17, %v7825_v49  ;;  %v7900_v17 = vsub.f32 %v7708_v21, %v7825_v49  ;;  %v7913_v21 = vsub.f32 %v7441_v10, %v7825_v49  ;;  %v3576_v10 = vmul.f32 %v7906_v57, %v7906_v57 }
 0x2d9   :  { %2194 = vmatmul.bf16.gmra.mxu0 %v10173_v41  ;;  %v3697_v41 = vadd.f32 %v3696_v18, %v3552_v50  ;;  %v2245_v18 = vadd.f32 %v2244_v53, %v2155_v34  ;;  %v2333_v44 = vpop.f32.mrf.mxu2 }
 0x2da   :  { %v3564_v0 = vmul.f32 %v7886_v14, %v7886_v14  ;;  %v3572_v34 = vmul.f32 %v7900_v17, %v7900_v17 }
 0x2db   :  { %v3698_v15 = vadd.f32 %v3697_v41, %v3556_v56  ;;  %v2422_v39 = vpop.f32.mrf.mxu3  ;;  %v2334_v41 = vadd.f32 %v2333_v44, %v2245_v18  ;;  %v10182_v56 = vld [vmem:[#allocation45_spill] sm:$0xff]  ;;  %v7923_v18 = vsub.f32 %v7454_v51, %v7825_v49 }
 0x2dd   :  { %v3699_v50 = vadd.f32 %v3698_v15, %v3560_v40  ;;  %v2246_v61 = vpop.f32.mrf.mxu1  ;;  %v10183_v15 = vld [vmem:[#allocation43_spill] sm:$0xff]  ;;  %v7918_v4 = vadd.f32 %v2422_v39, %v2334_v41  ;;  %v3580_v39 = vmul.f32 %v7913_v21, %v7913_v21  ;;  %v7936_v41 = vsub.f32 %v7465_v32, %v7825_v49 }
 0x2de   :  { %v2157_v40 = vpop.f32.mrf.mxu0  ;;  %v3584_v51 = vmul.f32 %v7923_v18, %v7923_v18  ;;  %v7950_v32 = vsub.f32 %v7578_v24, %v7825_v49 }
 0x2df   :  { %v3700_v19 = vadd.f32 %v3699_v50, %v3564_v0  ;;  %10184 = vst [vmem:[#allocation88_spill] sm:$0xff] %v7918_v4  ;;  %v2247_v0 = vadd.f32 %v2246_v61, %v2157_v40  ;;  %v10185_v50 = vld [vmem:[#allocation44_spill] sm:$0xff] }
 0x2e0   :  { %v3600_v24 = vmul.f32 %v7950_v32, %v7950_v32 }
 0x2e1   :  { %v3701_v53 = vadd.f32 %v3700_v19, %v3568_v13  ;;  %v7930_v13 = vsub.f32 %v7457_v33, %v7825_v49  ;;  %v2335_v61 = vpop.f32.mrf.mxu2 }
 0x2e3   :  { %v3702_v44 = vadd.f32 %v3701_v53, %v3572_v34  ;;  %v2424_v34 = vpop.f32.mrf.mxu3  ;;  %v2336_v53 = vadd.f32 %v2335_v61, %v2247_v0  ;;  %v3588_v33 = vmul.f32 %v7930_v13, %v7930_v13  ;;  %v7962_v61 = vsub.f32 %v7601_v25, %v7825_v49 }
 0x2e5   :  { %v3703_v19 = vadd.f32 %v3702_v44, %v3576_v10  ;;  %v2249_v44 = vpop.f32.mrf.mxu1 }
 0x2e6   :  { %2377 = vmatmul.bf16.gmra.mxu2 %v10182_v56  ;;  %v10186_v56 = vld [vmem:[#allocation46_spill] sm:$0xff]  ;;  %v2160_v10 = vpop.f32.mrf.mxu0 }
 0x2e7   :  { %2466 = vmatmul.bf16.gmra.mxu3 %v10186_v56  ;;  %v3704_v40 = vadd.f32 %v3703_v19, %v3580_v39  ;;  %v7942_v56 = vsub.f32 %v7741_v47, %v7825_v49  ;;  %v3592_v39 = vmul.f32 %v7936_v41, %v7936_v41  ;;  %v7956_v47 = vsub.f32 %v7755_v37, %v7825_v49 }
 0x2e8   :  { %2288 = vmatmul.bf16.gmra.mxu1 %v10185_v50  ;;  %v7969_v37 = vsub.f32 %v7766_v29, %v7825_v49  ;;  %v3608_v29 = vmul.f32 %v7962_v61, %v7962_v61 }
 0x2e9   :  { %2199 = vmatmul.bf16.gmra.mxu0 %v10183_v15  ;;  %v3705_v50 = vadd.f32 %v3704_v40, %v3584_v51  ;;  %v7946_v15 = vadd.f32 %v2424_v34, %v2336_v53  ;;  %v3596_v19 = vmul.f32 %v7942_v56, %v7942_v56  ;;  %v2250_v40 = vadd.f32 %v2249_v44, %v2160_v10  ;;  %v2338_v53 = vpop.f32.mrf.mxu2 }
 0x2ea   :  { %v3604_v10 = vmul.f32 %v7956_v47, %v7956_v47 }
 0x2eb   :  { %10187 = vst [vmem:[#allocation89_spill] sm:$0xff] %v7946_v15  ;;  %v3706_v0 = vadd.f32 %v3705_v50, %v3588_v33  ;;  %v2427_v26 = vpop.f32.mrf.mxu3  ;;  %v2339_v50 = vadd.f32 %v2338_v53, %v2250_v40  ;;  %v10188_v33 = vld [vmem:[#allocation49_spill] sm:$0xff]  ;;  %v7979_v40 = vsub.f32 %v7771_v23, %v7825_v49 }
 0x2ed   :  { %v3707_v51 = vadd.f32 %v3706_v0, %v3592_v39  ;;  %v2251_v25 = vpop.f32.mrf.mxu1  ;;  %v10189_v0 = vld [vmem:[#allocation47_spill] sm:$0xff]  ;;  %v7974_v27 = vadd.f32 %v2427_v26, %v2339_v50  ;;  %v3612_v26 = vmul.f32 %v7969_v37, %v7969_v37  ;;  %v7992_v50 = vsub.f32 %v7785_v42, %v7825_v49 }
 0x2ee   :  { %v2162_v39 = vpop.f32.mrf.mxu0  ;;  %v3616_v23 = vmul.f32 %v7979_v40, %v7979_v40  ;;  %v8006_v42 = vsub.f32 %v7794_v35, %v7825_v49 }
 0x2ef   :  { %v3708_v34 = vadd.f32 %v3707_v51, %v3596_v19  ;;  %10190 = vst [vmem:[#allocation90_spill] sm:$0xff] %v7974_v27  ;;  %v2252_v19 = vadd.f32 %v2251_v25, %v2162_v39  ;;  %v10191_v51 = vld [vmem:[#allocation48_spill] sm:$0xff] }
 0x2f0   :  { %v3632_v35 = vmul.f32 %v8006_v42, %v8006_v42 }
 0x2f1   :  { %v3709_v44 = vadd.f32 %v3708_v34, %v3600_v24  ;;  %v7986_v24 = vsub.f32 %v7780_v12, %v7825_v49  ;;  %v2340_v25 = vpop.f32.mrf.mxu2 }
 0x2f3   :  { %v3710_v53 = vadd.f32 %v3709_v44, %v3604_v10  ;;  %v2429_v10 = vpop.f32.mrf.mxu3  ;;  %v2341_v44 = vadd.f32 %v2340_v25, %v2252_v19  ;;  %v3620_v12 = vmul.f32 %v7986_v24, %v7986_v24  ;;  %v8018_v25 = vsub.f32 %v7804_v5, %v7825_v49 }
 0x2f5   :  { %v3711_v34 = vadd.f32 %v3710_v53, %v3608_v29  ;;  %v2254_v53 = vpop.f32.mrf.mxu1 }
 0x2f6   :  { %2382 = vmatmul.bf16.gmra.mxu2 %v10188_v33  ;;  %v10192_v33 = vld [vmem:[#allocation50_spill] sm:$0xff]  ;;  %v2165_v29 = vpop.f32.mrf.mxu0 }
 0x2f7   :  { %2471 = vmatmul.bf16.gmra.mxu3 %v10192_v33  ;;  %v3712_v39 = vadd.f32 %v3711_v34, %v3612_v26  ;;  %v7998_v33 = vsub.f32 %v7790_v28, %v7825_v49  ;;  %v3624_v26 = vmul.f32 %v7992_v50, %v7992_v50  ;;  %v8012_v28 = vsub.f32 %v7801_v59, %v7825_v49 }
 0x2f8   :  { %2293 = vmatmul.bf16.gmra.mxu1 %v10191_v51  ;;  %v8025_v59 = vsub.f32 %v7807_v8, %v7825_v49  ;;  %v3640_v8 = vmul.f32 %v8018_v25, %v8018_v25 }
 0x2f9   :  { %2204 = vmatmul.bf16.gmra.mxu0 %v10189_v0  ;;  %v3713_v51 = vadd.f32 %v3712_v39, %v3616_v23  ;;  %v8002_v0 = vadd.f32 %v2429_v10, %v2341_v44  ;;  %v3628_v34 = vmul.f32 %v7998_v33, %v7998_v33  ;;  %v2255_v39 = vadd.f32 %v2254_v53, %v2165_v29  ;;  %v2343_v44 = vpop.f32.mrf.mxu2 }
 0x2fa   :  { %v3636_v29 = vmul.f32 %v8012_v28, %v8012_v28 }
 0x2fb   :  { %10193 = vst [vmem:[#allocation91_spill] sm:$0xff] %v8002_v0  ;;  %v3714_v19 = vadd.f32 %v3713_v51, %v3620_v12  ;;  %v2432_v62 = vpop.f32.mrf.mxu3  ;;  %v2344_v51 = vadd.f32 %v2343_v44, %v2255_v39  ;;  %v10194_v12 = vld [vmem:[#allocation53_spill] sm:$0xff]  ;;  %v8035_v39 = vsub.f32 %v7810_v16, %v7825_v49 }
 0x2fd   :  { %v3715_v23 = vadd.f32 %v3714_v19, %v3624_v26  ;;  %v2256_v5 = vpop.f32.mrf.mxu1  ;;  %v10195_v19 = vld [vmem:[#allocation51_spill] sm:$0xff]  ;;  %v8030_v6 = vadd.f32 %v2432_v62, %v2344_v51  ;;  %v3644_v62 = vmul.f32 %v8025_v59, %v8025_v59  ;;  %v3648_v51 = vmul.f32 %v8035_v39, %v8035_v39 }
 0x2fe   :  { %v2167_v26 = vpop.f32.mrf.mxu0 }
 0x2ff   :  { %v3716_v10 = vadd.f32 %v3715_v23, %v3628_v34  ;;  %10196 = vst [vmem:[#allocation68_spill] sm:$0xff] %v8030_v6  ;;  %v2257_v34 = vadd.f32 %v2256_v5, %v2167_v26  ;;  %v10197_v23 = vld [vmem:[#allocation52_spill] sm:$0xff] }
 0x301   :  { %v3717_v53 = vadd.f32 %v3716_v10, %v3632_v35  ;;  %v8042_v35 = vsub.f32 %v7814_v52, %v7825_v49  ;;  %v2345_v16 = vpop.f32.mrf.mxu2 }
 0x303   :  { %v3718_v44 = vadd.f32 %v3717_v53, %v3636_v29  ;;  %v2434_v5 = vpop.f32.mrf.mxu3  ;;  %v3652_v29 = vmul.f32 %v8042_v35, %v8042_v35 }
 0x305   :  { %v3719_v10 = vadd.f32 %v3718_v44, %v3640_v8 }
 0x306   :  { %2387 = vmatmul.bf16.gmra.mxu2 %v10194_v12  ;;  %v10198_v12 = vld [vmem:[#allocation54_spill] sm:$0xff] }
 0x307   :  { %2476 = vmatmul.bf16.gmra.mxu3 %v10198_v12  ;;  %v3720_v26 = vadd.f32 %v3719_v10, %v3644_v62  ;;  %v2170_v12 = vpop.f32.mrf.mxu0 }
 0x308   :  { %2298 = vmatmul.bf16.gmra.mxu1 %v10197_v23  ;;  %v2346_v23 = vadd.f32 %v2345_v16, %v2257_v34  ;;  %v10203_v16 = vld [vmem:[#allocation55_spill] sm:$0xff] }
 0x309   :  { %2209 = vmatmul.bf16.gmra.mxu0 %v10195_v19  ;;  %v3721_v53 = vadd.f32 %v3720_v26, %v3648_v51  ;;  %v2259_v19 = vpop.f32.mrf.mxu1  ;;  %v2348_v8 = vpop.f32.mrf.mxu2 }
 0x30a   :  { %v8050_v54 = vadd.f32 %v2434_v5, %v2346_v23  ;;  %v2260_v36 = vadd.f32 %v2259_v19, %v2170_v12  ;;  %v10205_v23 = vld [vmem:[#allocation56_spill] sm:$0xff]  ;;  %v10206_v5 = vld [vmem:[#allocation58_spill] sm:$0xff] }
 0x30b   :  { %v3722_v52 = vadd.f32 %v3721_v53, %v3652_v29  ;;  %v2437_v44 = vpop.f32.mrf.mxu3 }
 0x30c   :  { %10199 = vst [vmem:[#allocation69_spill] sm:$0xff] %v8050_v54  ;;  %v2349_v20 = vadd.f32 %v2348_v8, %v2260_v36 }
 0x30d   :  { %v3723_v49 = vrot.slane %v3722_v52, 4 }
 0x30e   :  { %v8058_v51 = vadd.f32 %v2437_v44, %v2349_v20 }
 0x30f   :  { %v3724_v38 = vadd.f32 %v3723_v49, %v3722_v52  ;;  %v8053_v10 = vpop.f32.mrf.mxu0 }
 0x310   :  { %10201 = vst [vmem:[#allocation70_spill] sm:$0xff] %v8053_v10 }
 0x311   :  { %v3725_v62 = vrot.slane %v3724_v38, 2  ;;  %v8055_v34 = vpop.f32.mrf.mxu1  ;;  %10204 = vst [vmem:[#allocation72_spill] sm:$0xff] %v8058_v51  ;;  %v8062_v29 = vpop.f32.mrf.mxu2 }
 0x312   :  { %10202 = vst [vmem:[#allocation71_spill] sm:$0xff] %v8055_v34  ;;  %v5392_v34 = vld [vmem:[%s9808_s1 + $0x16c] sm:$0xf] }
 0x313   :  { %v3726_v26 = vadd.f32 %v3725_v62, %v3724_v38  ;;  %10207 = vst [vmem:[#allocation76_spill] sm:$0xff] %v8062_v29  ;;  %v8064_v36 = vpop.f32.mrf.mxu3 }
 0x314   :  { %10208 = vst [vmem:[#allocation77_spill] sm:$0xff] %v8064_v36 }
 0x315   :  { %v3727_v12 = vrot.slane %v3726_v26, 1 }
 0x316   :  { %2392 = vmatmul.bf16.gmra.mxu2 %v10200_v2 }
 0x317   :  { %2481 = vmatmul.bf16.gmra.mxu3 %v10206_v5  ;;  %v3728_v19 = vadd.f32 %v3727_v12, %v3726_v26  ;;  %v2175_v52 = vpop.f32.mrf.mxu0  ;;  %v10212_v26 = vld [vmem:[#allocation59_spill] sm:$0xff]  ;;  %v10214_v5 = vld [vmem:[#allocation60_spill] sm:$0xff] }
 0x318   :  { %2303 = vmatmul.bf16.gmra.mxu1 %v10205_v23  ;;  %v10209_v23 = vld [vmem:[#allocation61_spill] sm:$0xff] }
 0x319   :  { %2214 = vmatmul.bf16.gmra.mxu0 %v10203_v16  ;;  %v3804_v53 = vmul.f32 %v3728_v19, %v10170_v43  ;;  %v2264_v49 = vpop.f32.mrf.mxu1  ;;  %v2353_v20 = vpop.f32.mrf.mxu2  ;;  %v10215_v43 = vld [vmem:[#allocation62_spill] sm:$0xff] }
 0x31a   :  { %v2265_v16 = vadd.f32 %v2264_v49, %v2175_v52 }
 0x31b   :  { %v3808_v8 = vadd.f32 1e-05, %v3804_v53  ;;  %v2442_v44 = vpop.f32.mrf.mxu3 }
 0x31c   :  { %v2354_v2 = vadd.f32 %v2353_v20, %v2265_v16 }
 0x31d   :  { %5480 = vrsqrt.f32 %v3808_v8  ;;  %vm3827_vm5 = vweird.f32 %v3808_v8 }
 0x31e   :  { %v8073_v12 = vadd.f32 %v2442_v44, %v2354_v2  ;;  %v10218_v44 = vld [vmem:[#allocation65_spill] sm:$0xff] }
 0x31f   :  { %v8068_v38 = vpop.f32.mrf.mxu0 }
 0x320   :  { %10210 = vst [vmem:[#allocation73_spill] sm:$0xff] %v8068_v38 }
 0x321   :  { %v8070_v62 = vpop.f32.mrf.mxu1  ;;  %10213 = vst [vmem:[#allocation74_spill] sm:$0xff] %v8073_v12  ;;  %v8077_v49 = vpop.f32.mrf.mxu2 }
 0x322   :  { %10211 = vst [vmem:[#allocation79_spill] sm:$0xff] %v8070_v62 }
 0x323   :  { %v5481_v19 = vpop.eup %5480  ;;  %10216 = vst [vmem:[#allocation81_spill] sm:$0xff] %v8077_v49  ;;  %v8079_v20 = vpop.f32.mrf.mxu3 }
 0x324   :  { %v3822_v53 = vmul.f32 %v5481_v19, %v3808_v8  ;;  %10217 = vst [vmem:[#allocation82_spill] sm:$0xff] %v8079_v20  ;;  %vm3828_vm4 = vweird.f32 %v5481_v19  ;;  %v5487_v8 = vld [vmem:[%s9811_s3] sm:$0xf] }
 0x325   :  { %vm3829_vm6 = vmor %vm3827_vm5, %vm3828_vm4 }
 0x326   :  { %2397 = vmatmul.bf16.gmra.mxu2 %v10209_v23  ;;  %v3823_v52 = vmul.f32 %v5481_v19, %v3822_v53 }
 0x327   :  { %2486 = vmatmul.bf16.gmra.mxu3 %v10215_v43  ;;  %v2180_v23 = vpop.f32.mrf.mxu0  ;;  %v10220_v43 = vld [vmem:[#allocation64_spill] sm:$0xff] }
 0x328   :  { %2308 = vmatmul.bf16.gmra.mxu1 %v10214_v5  ;;  %v3824_v16 = vmul.f32 0.5, %v3823_v52  ;;  %v10219_v5 = vld [vmem:[#allocation63_spill] sm:$0xff]  ;;  %v10221_v52 = vld [vmem:[#allocation66_spill] sm:$0xff] }
 0x329   :  { %2219 = vmatmul.bf16.gmra.mxu0 %v10212_v26  ;;  %v2269_v46 = vpop.f32.mrf.mxu1  ;;  %v8083_v2 = vpop.f32.mrf.mxu2 }
 0x32a   :  { %v3825_v45 = vsub.f32 1.5, %v3824_v16  ;;  %v8081_v30 = vadd.f32 %v2269_v46, %v2180_v23 }
 0x32b   :  { %v8087_v53 = vpop.f32.mrf.mxu3 }
 0x32c   :  { %v3826_v26 = vmul.f32 %v5481_v19, %v3825_v45  ;;  %v5486_v45 = vld [vmem:[%s9810_s2] sm:$0xf] }
 0x32d   :  { %v8098_v23 = vperm.slane %v5486_v45, 1 }
 0x32e   :  { %v3830_v12 = vsel %vm3829_vm6, %v5481_v19, %v3826_v26 }
 0x32f   :  { %v8091_v16 = vpop.f32.mrf.mxu0  ;;  %10222 = vst [vmem:[#allocation80_spill] sm:$0xff] %v8098_v23  ;;  %v3856_v26 = vmul.f32 %v3830_v12, %v7834_v60  ;;  %v3860_v19 = vmul.f32 %v3830_v12, %v7838_v63  ;;  %v3872_v20 = vmul.f32 %v3830_v12, %v7857_v48  ;;  %v3876_v45 = vmul.f32 %v3830_v12, %v7865_v11 }
 0x330   :  { %v3880_v51 = vmul.f32 %v3830_v12, %v7874_v7  ;;  %v3884_v49 = vmul.f32 %v3830_v12, %v7880_v55  ;;  %v3896_v60 = vmul.f32 %v3830_v12, %v7900_v17  ;;  %v3900_v63 = vmul.f32 %v3830_v12, %v7906_v57 }
 0x331   :  { %v8093_v46 = vpop.f32.mrf.mxu1  ;;  %v3912_v48 = vmul.f32 %v3830_v12, %v7930_v13  ;;  %v8121_v36 = vpop.f32.mrf.mxu2  ;;  %v3916_v7 = vmul.f32 %v3830_v12, %v7936_v41  ;;  %v3928_v55 = vmul.f32 %v3830_v12, %v7956_v47  ;;  %v3932_v17 = vmul.f32 %v3830_v12, %v7962_v61 }
 0x332   :  { %v3936_v57 = vmul.f32 %v3830_v12, %v7969_v37  ;;  %v3948_v41 = vmul.f32 %v3830_v12, %v7992_v50  ;;  %v3960_v47 = vmul.f32 %v3830_v12, %v8012_v28  ;;  %v3964_v61 = vmul.f32 %v3830_v12, %v8018_v25 }
 0x333   :  { %v8123_v11 = vpop.f32.mrf.mxu3  ;;  %v3968_v37 = vmul.f32 %v3830_v12, %v8025_v59  ;;  %v3994_v50 = vmul.f32 %v8098_v23, %v3856_v26  ;;  %v4010_v25 = vmul.f32 %v8098_v23, %v3872_v20  ;;  %v4014_v59 = vmul.f32 %v8098_v23, %v3876_v45 }
 0x334   :  { %v4022_v38 = vmul.f32 %v8098_v23, %v3884_v49  ;;  %v4038_v26 = vmul.f32 %v8098_v23, %v3900_v63  ;;  %v4050_v20 = vmul.f32 %v8098_v23, %v3912_v48 }
 0x336   :  { %2402 = vmatmul.bf16.gmra.mxu2 %v10218_v44  ;;  %v3868_v44 = vmul.f32 %v3830_v12, %v7850_v9  ;;  %v3908_v9 = vmul.f32 %v3830_v12, %v7923_v18  ;;  %v3944_v18 = vmul.f32 %v3830_v12, %v7986_v24  ;;  %v8147_v24 = vmul.f32 %v3830_v12, %v8042_v35 }
 0x337   :  { %2491 = vmatmul.bf16.gmra.mxu3 %v10221_v52  ;;  %v3864_v52 = vmul.f32 %v3830_v12, %v7846_v31  ;;  %v3904_v31 = vmul.f32 %v3830_v12, %v7913_v21  ;;  %v3940_v21 = vmul.f32 %v3830_v12, %v7979_v40  ;;  %v8133_v13 = vpop.f32.mrf.mxu0  ;;  %v8144_v40 = vmul.f32 %v3830_v12, %v8035_v39 }
 0x338   :  { %2313 = vmatmul.bf16.gmra.mxu1 %v10220_v43  ;;  %v3852_v43 = vmul.f32 %v3830_v12, %v7830_v22  ;;  %v3892_v22 = vmul.f32 %v3830_v12, %v7894_v58  ;;  %v3924_v58 = vmul.f32 %v3830_v12, %v7950_v32  ;;  %v3956_v32 = vmul.f32 %v3830_v12, %v8006_v42 }
 0x339   :  { %2224 = vmatmul.bf16.gmra.mxu0 %v10219_v5  ;;  %v8103_v5 = vperm.slane %v5487_v8, 1  ;;  %v3888_v8 = vmul.f32 %v3830_v12, %v7886_v14  ;;  %v3920_v14 = vmul.f32 %v3830_v12, %v7942_v56  ;;  %v8135_v54 = vpop.f32.mrf.mxu1  ;;  %v3952_v56 = vmul.f32 %v3830_v12, %v7998_v33  ;;  %10223 = vst [vmem:[#allocation84_spill] sm:$0xff] %v8147_v24 }
 0x33a   :  { %v3990_v62 = vmul.f32 %v8098_v23, %v3852_v43  ;;  %v3998_v33 = vmul.f32 %v8098_v23, %v3860_v19  ;;  %v4002_v42 = vmul.f32 %v8098_v23, %v3864_v52  ;;  %v4006_v28 = vmul.f32 %v8098_v23, %v3868_v44  ;;  %v8165_v19 = vpop.f32.mrf.mxu2 }
 0x33b   :  { %v4018_v39 = vmul.f32 %v8098_v23, %v3880_v51  ;;  %v4026_v35 = vmul.f32 %v8098_v23, %v3888_v8  ;;  %v4030_v43 = vmul.f32 %v8098_v23, %v3892_v22  ;;  %v4034_v12 = vmul.f32 %v8098_v23, %v3896_v60  ;;  %v8167_v45 = vpop.f32.mrf.mxu3 }
 0x33c   :  { %v4042_v52 = vmul.f32 %v8098_v23, %v3904_v31  ;;  %v4046_v44 = vmul.f32 %v8098_v23, %v3908_v9  ;;  %v4054_v51 = vmul.f32 %v8098_v23, %v3916_v7  ;;  %v4128_v49 = vadd.f32 %v8103_v5, %v3990_v62 }
 0x33d   :  { %v4132_v8 = vadd.f32 %v8103_v5, %v3994_v50  ;;  %v4136_v22 = vadd.f32 %v8103_v5, %v3998_v33  ;;  %v4058_v60 = vmul.f32 %v8098_v23, %v3920_v14  ;;  %v4062_v63 = vmul.f32 %v8098_v23, %v3924_v58 }
 0x33e   :  { %v4066_v31 = vmul.f32 %v8098_v23, %v3928_v55  ;;  %v4140_v9 = vadd.f32 %v8103_v5, %v4002_v42  ;;  %v4070_v7 = vmul.f32 %v8098_v23, %v3932_v17  ;;  %v4074_v62 = vmul.f32 %v8098_v23, %v3936_v57 }
 0x33f   :  { %v8177_v48 = vpop.f32.mrf.mxu0  ;;  %v4078_v50 = vmul.f32 %v8098_v23, %v3940_v21  ;;  %v4144_v33 = vadd.f32 %v8103_v5, %v4006_v28  ;;  %v8186_v14 = vmul.f32 %v8098_v23, %v3944_v18  ;;  %v8189_v58 = vmul.f32 %v8098_v23, %v3948_v41 }
 0x340   :  { %v8192_v55 = vmul.f32 %v8098_v23, %v3952_v56  ;;  %v4148_v42 = vadd.f32 %v8103_v5, %v4010_v25  ;;  %v4152_v29 = vadd.f32 %v8103_v5, %v4014_v59  ;;  %v4256_v17 = vmax.f32 %v4128_v49, 0.0 }
 0x341   :  { %v8179_v6 = vpop.f32.mrf.mxu1  ;;  %v4260_v0 = vmax.f32 %v4132_v8, 0.0  ;;  %v4264_v57 = vmax.f32 %v4136_v22, 0.0  ;;  %v8197_v21 = vmul.f32 %v8098_v23, %v3956_v32  ;;  %v8200_v28 = vmul.f32 %v8098_v23, %v3960_v47 }
 0x342   :  { %v8203_v18 = vadd.f32 %v8103_v5, %v4018_v39  ;;  %v4268_v41 = vmax.f32 %v4140_v9, 0.0  ;;  %v8206_v56 = vmul.f32 %v8098_v23, %v3964_v61  ;;  %v8209_v25 = vmul.f32 %v8098_v23, %v3968_v37  ;;  %4384 = vst [vmem:[%s9812_s4 + $0x8] sm:$0xff] %v4256_v17  ;;  %v5087_v37 = vld [vmem:[%s9808_s1 + $0x278] sm:$0xf0]  ;;  %v8249_v8 = vpop.f32.mrf.mxu2 }
 0x343   :  { %10224 = vst [vmem:[#allocation85_spill] sm:$0xff] %v8197_v21  ;;  %v8212_v59 = vadd.f32 %v8103_v5, %v4022_v38  ;;  %v4272_v49 = vmax.f32 %v4144_v33, 0.0  ;;  %v8218_v32 = vadd.f32 %v8103_v5, %v4026_v35  ;;  %v8221_v47 = vadd.f32 %v8103_v5, %v4030_v43  ;;  %v5424_v38 = vld [vmem:[%s9808_s1 + $0x26c] sm:$0xf]  ;;  %v5215_v43 = vld [vmem:[%s9808_s1 + $0x378] sm:$0xf0]  ;;  %v8251_v22 = vpop.f32.mrf.mxu3 }
 0x344   :  { %10225 = vst [vmem:[#allocation75_spill] sm:$0xff] %v8200_v28  ;;  %v8224_v61 = vadd.f32 %v8103_v5, %v4034_v12  ;;  %v4276_v39 = vmax.f32 %v4148_v42, 0.0  ;;  %v5456_v35 = vld [vmem:[%s9808_s1 + $0x36c] sm:$0xf]  ;;  %v4831_v12 = vld [vmem:[%s9808_s1 + $0x78] sm:$0xf0]  ;;  %v8254_v9 = vadd.f32 %v8103_v5, %v4038_v26  ;;  %v8257_v33 = vadd.f32 %v8103_v5, %v4042_v52 }
 0x345   :  { %10226 = vst [vmem:[#allocation78_spill] sm:$0xff] %v8206_v56  ;;  %v8260_v42 = vadd.f32 %v8103_v5, %v4046_v44  ;;  %v4280_v17 = vmax.f32 %v4152_v29, 0.0  ;;  %v4959_v26 = vld [vmem:[%s9808_s1 + $0x178] sm:$0xf0]  ;;  %v8272_v10 = vadd.f32 %v8103_v5, %v4050_v20  ;;  %v8275_v52 = vadd.f32 %v8103_v5, %v4054_v51  ;;  %v8297_v51 = vld [vmem:[%s9808_s1 + $0x34c] sm:$0xf] }
 0x346   :  { %10227 = vst [vmem:[#allocation92_spill] sm:$0xff] %v8209_v25  ;;  %v8278_v29 = vadd.f32 %v8103_v5, %v4058_v60  ;;  %v4284_v44 = vmax.f32 %v8203_v18, 0.0  ;;  %v8292_v20 = vld [vmem:[%s9808_s1 + $0x258] sm:$0xf0]  ;;  %v8305_v27 = vadd.f32 %v8103_v5, %v4062_v63  ;;  %v8308_v15 = vadd.f32 %v8103_v5, %v4066_v31  ;;  %v8330_v31 = vld [vmem:[%s9808_s1 + $0x14c] sm:$0xf] }
 0x347   :  { %4388 = vst [vmem:[%s9812_s4 + $0x28] sm:$0xff] %v4260_v0  ;;  %v8244_v0 = vld [vmem:[%s9808_s1 + $0x6c] sm:$0xf]  ;;  %v8302_v60 = vld [vmem:[%s9808_s1 + $0x358] sm:$0xf0]  ;;  %v2190_v18 = vpop.f32.mrf.mxu0  ;;  %v8311_v4 = vadd.f32 %v8103_v5, %v4070_v7  ;;  %v4288_v1 = vmax.f32 %v8212_v59, 0.0  ;;  %v8338_v59 = vadd.f32 %v8103_v5, %v4074_v62  ;;  %v4962_v24 = vor.u32 %v5392_v34, %v4959_v26 }
 0x348   :  { %4392 = vst [vmem:[%s9812_s4 + $0x48] sm:$0xff] %v4264_v57  ;;  %v8287_v57 = vld [vmem:[%s9808_s1 + $0x24c] sm:$0xf]  ;;  %v8325_v63 = vld [vmem:[%s9808_s1 + $0x58] sm:$0xf0]  ;;  %v4292_v25 = vmax.f32 %v8218_v32, 0.0  ;;  %v5090_v32 = vor.u32 %v5424_v38, %v5087_v37  ;;  %v8379_v23 = vadd.f32 %v8103_v5, %v8186_v14 }
 0x349   :  { %4396 = vst [vmem:[%s9812_s4 + $0x68] sm:$0xff] %v4268_v41  ;;  %v2279_v41 = vpop.f32.mrf.mxu1  ;;  %v8335_v7 = vld [vmem:[%s9808_s1 + $0x158] sm:$0xf0]  ;;  %v4296_v56 = vmax.f32 %v8221_v47, 0.0  ;;  %v8351_v28 = vld [vmem:[%s9808_s1 + $0x22c] sm:$0xf]  ;;  %v5218_v47 = vor.u32 %v5456_v35, %v5215_v43  ;;  %2590 = vmatpush.bf16.msrb.mxu1 %v4962_v24 }
 0x34a   :  { %4400 = vst [vmem:[%s9812_s4 + $0x88] sm:$0xff] %v4272_v49  ;;  %v8341_v49 = vadd.f32 %v8103_v5, %v4078_v50  ;;  %v8356_v62 = vld [vmem:[%s9808_s1 + $0x238] sm:$0xf0]  ;;  %v8361_v50 = vld [vmem:[%s9808_s1 + $0x32c] sm:$0xf]  ;;  %v4300_v38 = vmax.f32 %v8224_v61, 0.0  ;;  %2679 = vmatpush.bf16.msrb.mxu2 %v5090_v32  ;;  %v5074_v61 = vor.u32 %v8287_v57, %v8292_v20 }
 0x34b   :  { %4404 = vst [vmem:[%s9812_s4 + $0xa8] sm:$0xff] %v4276_v39  ;;  %v4834_v39 = vor.u32 %v8244_v0, %v4831_v12  ;;  %v8375_v21 = vld [vmem:[%s9808_s1 + $0x2c] sm:$0xf]  ;;  %v4304_v37 = vmax.f32 %v8254_v9, 0.0  ;;  %v4308_v34 = vmax.f32 %v8257_v33, 0.0  ;;  %v4312_v43 = vmax.f32 %v8260_v42, 0.0  ;;  %2768 = vmatpush.bf16.msrb.mxu3 %v5218_v47  ;;  %v2457_v26 = vpop.f32.mrf.mxu3 }
 0x34c   :  { %10228 = vst [vmem:[#allocation83_spill] sm:$0xff] %v8341_v49  ;;  %v8370_v49 = vld [vmem:[%s9808_s1 + $0x338] sm:$0xf0]  ;;  %v4316_v14 = vmax.f32 %v8272_v10, 0.0  ;;  %v5202_v0 = vor.u32 %v8297_v51, %v8302_v60  ;;  %v5384_v12 = vld [vmem:[%s9808_s1 + $0x12c] sm:$0xf]  ;;  %v4946_v33 = vor.u32 %v8330_v31, %v8335_v7 }
 0x34d   :  { %4408 = vst [vmem:[%s9812_s4 + $0xc8] sm:$0xff] %v4280_v17  ;;  %v8390_v35 = vld [vmem:[%s9808_s1 + $0x38] sm:$0xf0]  ;;  %v4320_v9 = vmax.f32 %v8275_v52, 0.0  ;;  %v4324_v10 = vmax.f32 %v8278_v29, 0.0  ;;  %2501 = vmatpush.bf16.msrb.mxu0 %v4834_v39  ;;  %v2368_v17 = vpop.f32.mrf.mxu2  ;;  %v5186_v24 = vor.u32 %v8361_v50, %v8370_v49  ;;  %v2272_v52 = vadd.f32 %v8093_v46, %v8091_v16  ;;  %v10229_v50 = vld [vmem:[#allocation80_spill] sm:$0xff] }
 0x34e   :  { %4412 = vst [vmem:[%s9812_s4 + $0xe8] sm:$0xff] %v4284_v44  ;;  %v4927_v42 = vld [vmem:[%s9808_s1 + $0x138] sm:$0xf0]  ;;  %v4802_v29 = vor.u32 %v8375_v21, %v8390_v35  ;;  %v2280_v16 = vadd.f32 %v2279_v41, %v2190_v18  ;;  %2680 = vmatpush.bf16.msrb.mxu2 %v5074_v61  ;;  %v5444_v57 = vld [vmem:[%s9808_s1 + $0x30c] sm:$0xf]  ;;  %2591 = vmatpush.bf16.msrb.mxu1 %v4946_v33  ;;  %v4328_v41 = vmax.f32 %v8305_v27, 0.0 }
 0x34f   :  { %4416 = vst [vmem:[%s9812_s4 + $0x108] sm:$0xff] %v4288_v1  ;;  %v4818_v1 = vor.u32 %v8320_v3, %v8325_v63  ;;  %v2359_v3 = vadd.f32 %v8083_v2, %v8081_v30  ;;  %v2275_v30 = vadd.f32 %v8135_v54, %v8133_v13  ;;  %v2277_v2 = vadd.f32 %v8179_v6, %v8177_v48  ;;  %v8442_v46 = vpop.f32.mrf.mxu0  ;;  %v5167_v54 = vld [vmem:[%s9808_s1 + $0x318] sm:$0xf0]  ;;  %v5348_v48 = vld [vmem:[%s9808_s1 + $0xc] sm:$0xf]  ;;  %v10230_v47 = vld [vmem:[#allocation85_spill] sm:$0xff] }
 0x350   :  { %4420 = vst [vmem:[%s9812_s4 + $0x128] sm:$0xff] %v4292_v25  ;;  %v5058_v25 = vor.u32 %v8351_v28, %v8356_v62  ;;  %v5412_v28 = vld [vmem:[%s9808_s1 + $0x20c] sm:$0xf]  ;;  %2769 = vmatpush.bf16.msrb.mxu3 %v5202_v0  ;;  %v4930_v21 = vor.u32 %v5384_v12, %v4927_v42  ;;  %v2361_v13 = vadd.f32 %v8121_v36, %v2272_v52  ;;  %v4783_v20 = vld [vmem:[%s9808_s1 + $0x18] sm:$0xf0]  ;;  %v4336_v7 = vmax.f32 %v8311_v4, 0.0 }
 0x351   :  { %4424 = vst [vmem:[%s9812_s4 + $0x148] sm:$0xff] %v4296_v56  ;;  %v5039_v56 = vld [vmem:[%s9808_s1 + $0x218] sm:$0xf0]  ;;  %v8444_v44 = vpop.f32.mrf.mxu1  ;;  %v8456_v6 = vadd.f32 %v8087_v53, %v2359_v3  ;;  %2502 = vmatpush.bf16.msrb.mxu0 %v4818_v1  ;;  %v2364_v51 = vadd.f32 %v8165_v19, %v2275_v30  ;;  %v2366_v53 = vadd.f32 %v8249_v8, %v2277_v2  ;;  %v5380_v63 = vld [vmem:[%s9808_s1 + $0x10c] sm:$0xf]  ;;  %v4340_v49 = vmax.f32 %v8338_v59, 0.0 }
 0x352   :  { %4428 = vst [vmem:[%s9812_s4 + $0x168] sm:$0xff] %v4300_v38  ;;  %v2369_v60 = vadd.f32 %v2368_v17, %v2280_v16  ;;  %v4224_v36 = vadd.f32 %v8103_v5, %v8189_v58  ;;  %v4228_v18 = vadd.f32 %v8103_v5, %v8192_v55  ;;  %v4911_v19 = vld [vmem:[%s9808_s1 + $0x118] sm:$0xf0]  ;;  %v8485_v8 = vadd.f32 %v8123_v11, %v2361_v13  ;;  %v10233_v35 = vld [vmem:[#allocation75_spill] sm:$0xff]  ;;  %v10235_v1 = vld [vmem:[#allocation92_spill] sm:$0xff] }
 0x353   :  { %4432 = vst [vmem:[%s9812_s4 + $0x188] sm:$0xff] %v4304_v37  ;;  %v4332_v58 = vmax.f32 %v8308_v15, 0.0  ;;  %v8492_v27 = vadd.f32 %v8167_v45, %v2364_v51  ;;  %v8495_v55 = vadd.f32 %v8251_v22, %v2366_v53  ;;  %2681 = vmatpush.bf16.msrb.mxu2 %v5058_v25  ;;  %v5042_v15 = vor.u32 %v5412_v28, %v5039_v56  ;;  %v8509_v4 = vpop.f32.mrf.mxu3  ;;  %v10231_v38 = vld [vmem:[#allocation83_spill] sm:$0xff]  ;;  %v10232_v37 = vld [vmem:[#allocation84_spill] sm:$0xff]  ;;  %v10234_v0 = vld [vmem:[#allocation78_spill] sm:$0xff] }
 0x354   :  { %4436 = vst [vmem:[%s9812_s4 + $0x1a8] sm:$0xff] %v4308_v34  ;;  %v8497_v31 = vadd.f32 %v2457_v26, %v2369_v60  ;;  %2770 = vmatpush.bf16.msrb.mxu3 %v5186_v24  ;;  %v5170_v11 = vor.u32 %v5444_v57, %v5167_v54  ;;  %2592 = vmatpush.bf16.msrb.mxu1 %v4930_v21  ;;  %v4344_v59 = vmax.f32 %v10231_v38, 0.0  ;;  %v4356_v33 = vmax.f32 %v4228_v18, 0.0  ;;  %v10236_v24 = vld [vmem:[#allocation5_spill] sm:$0xff]  ;;  %v10237_v3 = vld [vmem:[#allocation6_spill] sm:$0xff]  ;;  %v10239_v28 = vld [vmem:[#allocation4_spill] sm:$0xff] }
 0x355   :  { %4440 = vst [vmem:[%s9812_s4 + $0x1c8] sm:$0xff] %v4312_v43  ;;  %2503 = vmatpush.bf16.msrb.mxu0 %v4802_v29  ;;  %v4786_v45 = vor.u32 %v5348_v48, %v4783_v20  ;;  %v4914_v22 = vor.u32 %v5380_v63, %v4911_v19  ;;  %v8507_v62 = vpop.f32.mrf.mxu2  ;;  %v4110_v32 = vmul.f32 %v10229_v50, %v8144_v40  ;;  %v10238_v29 = vld [vmem:[#allocation3_spill] sm:$0xff]  ;;  %v10241_v18 = vld [vmem:[#allocation10_spill] sm:$0xff]  ;;  %v10243_v63 = vld [vmem:[#allocation8_spill] sm:$0xff] }
 0x356   :  { %4444 = vst [vmem:[%s9812_s4 + $0x1e8] sm:$0xff] %v4316_v14  ;;  %v4232_v39 = vadd.f32 %v8103_v5, %v10230_v47  ;;  %v4114_v34 = vmul.f32 %v10229_v50, %v10232_v37  ;;  %v4236_v43 = vadd.f32 %v8103_v5, %v10233_v35  ;;  %v4348_v14 = vmax.f32 %v8379_v23, 0.0  ;;  %v10244_v47 = vld [vmem:[#allocation13_spill] sm:$0xff]  ;;  %v10246_v38 = vld [vmem:[#allocation11_spill] sm:$0xff] }
 0x357   :  { %4448 = vst [vmem:[%s9812_s4 + $0x208] sm:$0xff] %v4320_v9  ;;  %v2195_v40 = vpop.f32.mrf.mxu0  ;;  %v4240_v12 = vadd.f32 %v8103_v5, %v10234_v0  ;;  %v4352_v9 = vmax.f32 %v4224_v36, 0.0  ;;  %2682 = vmatpush.bf16.msrb.mxu2 %v5042_v15  ;;  %v4244_v23 = vadd.f32 %v8103_v5, %v10235_v1  ;;  %v4248_v42 = vadd.f32 %v8103_v5, %v4110_v32  ;;  %v10240_v36 = vld [vmem:[#allocation9_spill] sm:$0xff]  ;;  %v10251_v1 = vld [vmem:[#allocation16_spill] sm:$0xff] }
 0x358   :  { %4452 = vst [vmem:[%s9812_s4 + $0x228] sm:$0xff] %v4324_v10  ;;  %2771 = vmatpush.bf16.msrb.mxu3 %v5170_v11  ;;  %2593 = vmatpush.bf16.msrb.mxu1 %v4914_v22  ;;  %v4360_v17 = vmax.f32 %v4232_v39, 0.0  ;;  %v4252_v26 = vadd.f32 %v8103_v5, %v4114_v34  ;;  %v4364_v25 = vmax.f32 %v4236_v43, 0.0  ;;  %v10245_v39 = vld [vmem:[#allocation14_spill] sm:$0xff] }
 0x359   :  { %4456 = vst [vmem:[%s9812_s4 + $0x248] sm:$0xff] %v4328_v41  ;;  %v2284_v61 = vpop.f32.mrf.mxu1  ;;  %2504 = vmatpush.bf16.msrb.mxu0 %v4786_v45  ;;  %v4368_v52 = vmax.f32 %v4240_v12, 0.0  ;;  %v4372_v56 = vmax.f32 %v4244_v23, 0.0  ;;  %v4376_v2 = vmax.f32 %v4248_v42, 0.0  ;;  %v10242_v41 = vld [vmem:[#allocation7_spill] sm:$0xff]  ;;  %v10248_v12 = vld [vmem:[#allocation17_spill] sm:$0xff] }
 0x35a   :  { %4460 = vst [vmem:[%s9812_s4 + $0x268] sm:$0xff] %v4332_v58  ;;  %v2285_v10 = vadd.f32 %v2284_v61, %v2195_v40  ;;  %2683 = vmatmul.bf16.vlgmr.msrb.gmra.mxu2 %v10236_v24  ;;  %v4380_v21 = vmax.f32 %v4252_v26, 0.0  ;;  %v10252_v23 = vld [vmem:[#allocation87_spill] sm:$0xff] }
 0x35b   :  { %4464 = vst [vmem:[%s9812_s4 + $0x288] sm:$0xff] %v4336_v7  ;;  %2772 = vmatmul.bf16.vlgmr.msrb.gmra.mxu3 %v10237_v3  ;;  %2594 = vmatmul.bf16.vlgmr.msrb.gmra.mxu1 %v10239_v28  ;;  %v2462_v30 = vpop.f32.mrf.mxu3 }
 0x35c   :  { %4468 = vst [vmem:[%s9812_s4 + $0x2a8] sm:$0xff] %v4340_v49  ;;  %2505 = vmatmul.bf16.vlgmr.msrb.gmra.mxu0 %v10238_v29  ;;  %v10255_v29 = vld [vmem:[#allocation89_spill] sm:$0xff] }
 0x35d   :  { %4472 = vst [vmem:[%s9812_s4 + $0x2c8] sm:$0xff] %v4344_v59  ;;  %v2373_v5 = vpop.f32.mrf.mxu2  ;;  %v10247_v59 = vld [vmem:[#allocation12_spill] sm:$0xff] }
 0x35e   :  { %4476 = vst [vmem:[%s9812_s4 + $0x2e8] sm:$0xff] %v4348_v14  ;;  %v2374_v16 = vadd.f32 %v2373_v5, %v2285_v10  ;;  %v10250_v10 = vld [vmem:[#allocation15_spill] sm:$0xff] }
 0x35f   :  { %4480 = vst [vmem:[%s9812_s4 + $0x308] sm:$0xff] %v4352_v9  ;;  %v8561_v57 = vpop.f32.mrf.mxu0  ;;  %v10249_v9 = vld [vmem:[#allocation18_spill] sm:$0xff] }
 0x360   :  { %4484 = vst [vmem:[%s9812_s4 + $0x328] sm:$0xff] %v4356_v33  ;;  %v8568_v13 = vadd.f32 %v2462_v30, %v2374_v16  ;;  %v10253_v33 = vld [vmem:[#allocation86_spill] sm:$0xff] }
 0x361   :  { %4488 = vst [vmem:[%s9812_s4 + $0x348] sm:$0xff] %v4360_v17  ;;  %v8563_v54 = vpop.f32.mrf.mxu1  ;;  %v3314_v42 = vadd.f32 %v10253_v33, %v10252_v23  ;;  %v10257_v30 = vld [vmem:[#allocation70_spill] sm:$0xff] }
 0x362   :  { %4492 = vst [vmem:[%s9812_s4 + $0x368] sm:$0xff] %v4364_v25  ;;  %v10254_v25 = vld [vmem:[#allocation88_spill] sm:$0xff] }
 0x363   :  { %4496 = vst [vmem:[%s9812_s4 + $0x388] sm:$0xff] %v4368_v52  ;;  %v8581_v20 = vpop.f32.mrf.mxu3  ;;  %v3315_v24 = vadd.f32 %v3314_v42, %v10254_v25  ;;  %v10267_v42 = vld [vmem:[#allocation72_spill] sm:$0xff] }
 0x364   :  { %4500 = vst [vmem:[%s9812_s4 + $0x3a8] sm:$0xff] %v4372_v56  ;;  %v10256_v56 = vld [vmem:[#allocation90_spill] sm:$0xff] }
 0x365   :  { %4504 = vst [vmem:[%s9812_s4 + $0x3c8] sm:$0xff] %v4376_v2  ;;  %v8579_v48 = vpop.f32.mrf.mxu2  ;;  %v3316_v28 = vadd.f32 %v3315_v24, %v10255_v29  ;;  %v10258_v2 = vld [vmem:[#allocation71_spill] sm:$0xff] }
 0x366   :  { %4508 = vst [vmem:[%s9812_s4 + $0x3e8] sm:$0xff] %v4380_v21  ;;  %v2262_v16 = vadd.f32 %v10258_v2, %v10257_v30  ;;  %v10259_v21 = vld [vmem:[#allocation91_spill] sm:$0xff]  ;;  %v10271_v2 = vld [vmem:[#allocation20_spill] sm:$0xff] }
 0x367   :  { %v2200_v51 = vpop.f32.mrf.mxu0  ;;  %v3317_v5 = vadd.f32 %v3316_v28, %v10256_v56  ;;  %v10268_v28 = vld [vmem:[#allocation21_spill] sm:$0xff]  ;;  %v10270_v30 = vld [vmem:[#allocation19_spill] sm:$0xff] }
 0x369   :  { %v2289_v53 = vpop.f32.mrf.mxu1 }
 0x36a   :  { %v2290_v60 = vadd.f32 %v2289_v53, %v2200_v51  ;;  %2688 = vmatmul.bf16.gmra.mxu2 %v10240_v36  ;;  %v3318_v51 = vadd.f32 %v3317_v5, %v10259_v21  ;;  %v10260_v53 = vld [vmem:[#allocation76_spill] sm:$0xff]  ;;  %v10269_v5 = vld [vmem:[#allocation22_spill] sm:$0xff] }
 0x36b   :  { %2777 = vmatmul.bf16.gmra.mxu3 %v10241_v18  ;;  %2599 = vmatmul.bf16.gmra.mxu1 %v10243_v63  ;;  %v2467_v58 = vpop.f32.mrf.mxu3 }
 0x36c   :  { %2510 = vmatmul.bf16.gmra.mxu0 %v10242_v41  ;;  %v10261_v41 = vld [vmem:[#allocation68_spill] sm:$0xff] }
 0x36d   :  { %v2378_v19 = vpop.f32.mrf.mxu2  ;;  %v3319_v63 = vadd.f32 %v3318_v51, %v10261_v41  ;;  %v10272_v51 = vld [vmem:[#allocation82_spill] sm:$0xff] }
 0x36e   :  { %v2379_v7 = vadd.f32 %v2378_v19, %v2290_v60  ;;  %v2351_v60 = vadd.f32 %v10260_v53, %v2262_v16  ;;  %v10262_v19 = vld [vmem:[#allocation73_spill] sm:$0xff] }
 0x36f   :  { %v8587_v15 = vpop.f32.mrf.mxu0 }
 0x370   :  { %v8591_v49 = vadd.f32 %v2467_v58, %v2379_v7  ;;  %v10263_v58 = vld [vmem:[#allocation79_spill] sm:$0xff] }
 0x371   :  { %v8589_v11 = vpop.f32.mrf.mxu1  ;;  %v2267_v7 = vadd.f32 %v10263_v58, %v10262_v19  ;;  %v10273_v19 = vld [vmem:[#allocation74_spill] sm:$0xff] }
 0x373   :  { %v8595_v22 = vpop.f32.mrf.mxu3 }
 0x375   :  { %v8593_v45 = vpop.f32.mrf.mxu2 }
 0x377   :  { %v8597_v50 = vpop.f32.mrf.mxu0 }
 0x379   :  { %v8599_v32 = vpop.f32.mrf.mxu1 }
 0x37a   :  { %2693 = vmatmul.bf16.gmra.mxu2 %v10244_v47 }
 0x37b   :  { %2782 = vmatmul.bf16.gmra.mxu3 %v10245_v39  ;;  %2604 = vmatmul.bf16.gmra.mxu1 %v10247_v59  ;;  %v8607_v34 = vpop.f32.mrf.mxu3 }
 0x37c   :  { %2515 = vmatmul.bf16.gmra.mxu0 %v10246_v38  ;;  %v10264_v38 = vld [vmem:[#allocation69_spill] sm:$0xff] }
 0x37d   :  { %v8605_v37 = vpop.f32.mrf.mxu2  ;;  %v3320_v59 = vadd.f32 %v3319_v63, %v10264_v38 }
 0x37f   :  { %v8609_v35 = vpop.f32.mrf.mxu0  ;;  %v3321_v24 = vadd.f32 %v3320_v59, %v10267_v42 }
 0x381   :  { %v8611_v43 = vpop.f32.mrf.mxu1 }
 0x383   :  { %v8615_v40 = vpop.f32.mrf.mxu3 }
 0x385   :  { %v8613_v14 = vpop.f32.mrf.mxu2 }
 0x387   :  { %v8617_v61 = vpop.f32.mrf.mxu0 }
 0x389   :  { %v8619_v0 = vpop.f32.mrf.mxu1 }
 0x38a   :  { %2698 = vmatmul.bf16.gmra.mxu2 %v10248_v12  ;;  %v10265_v12 = vld [vmem:[#allocation77_spill] sm:$0xff] }
 0x38b   :  { %2787 = vmatmul.bf16.gmra.mxu3 %v10249_v9  ;;  %2609 = vmatmul.bf16.gmra.mxu1 %v10251_v1  ;;  %v8629_v26 = vpop.f32.mrf.mxu3  ;;  %v8651_v9 = vadd.f32 %v10265_v12, %v2351_v60 }
 0x38c   :  { %2520 = vmatmul.bf16.gmra.mxu0 %v10250_v10  ;;  %v10266_v10 = vld [vmem:[#allocation81_spill] sm:$0xff] }
 0x38d   :  { %v8627_v17 = vpop.f32.mrf.mxu2  ;;  %v2356_v1 = vadd.f32 %v10266_v10, %v2267_v7  ;;  %v3322_v16 = vadd.f32 %v3321_v24, %v8651_v9 }
 0x38f   :  { %v8632_v3 = vpop.f32.mrf.mxu0  ;;  %v8661_v53 = vadd.f32 %v10272_v51, %v2356_v1  ;;  %v3323_v58 = vadd.f32 %v3322_v16, %v10273_v19  ;;  %v2287_v16 = vadd.f32 %v8563_v54, %v8561_v57  ;;  %v10275_v57 = vld [vmem:[#allocation26_spill] sm:$0xff]  ;;  %v10276_v54 = vld [vmem:[#allocation23_spill] sm:$0xff] }
 0x391   :  { %v8634_v52 = vpop.f32.mrf.mxu1  ;;  %v3324_v59 = vadd.f32 %v3323_v58, %v8661_v53 }
 0x393   :  { %v8644_v18 = vpop.f32.mrf.mxu3  ;;  %v3325_v10 = vadd.f32 %v3324_v59, %v8456_v6 }
 0x395   :  { %v8642_v36 = vpop.f32.mrf.mxu2 }
 0x397   :  { %v2215_v47 = vpop.f32.mrf.mxu0 }
 0x399   :  { %v2304_v39 = vpop.f32.mrf.mxu1 }
 0x39a   :  { %2703 = vmatmul.bf16.gmra.mxu2 %v10268_v28  ;;  %v2282_v28 = vadd.f32 %v8444_v44, %v8442_v46  ;;  %v2376_v46 = vadd.f32 %v8579_v48, %v2287_v16  ;;  %v2300_v16 = vadd.f32 %v8619_v0, %v8617_v61 }
 0x39b   :  { %2792 = vmatmul.bf16.gmra.mxu3 %v10269_v5  ;;  %2614 = vmatmul.bf16.gmra.mxu1 %v10271_v2  ;;  %v2482_v60 = vpop.f32.mrf.mxu3  ;;  %v3326_v5 = vadd.f32 %v3325_v10, %v8485_v8  ;;  %v2295_v10 = vadd.f32 %v8599_v32, %v8597_v50  ;;  %v2297_v32 = vadd.f32 %v8611_v43, %v8609_v35 }
 0x39c   :  { %2525 = vmatmul.bf16.gmra.mxu0 %v10270_v30  ;;  %v2371_v24 = vadd.f32 %v8507_v62, %v2282_v28  ;;  %v2292_v62 = vadd.f32 %v8589_v11, %v8587_v15  ;;  %v10274_v28 = vld [vmem:[#allocation25_spill] sm:$0xff]  ;;  %v8689_v48 = vadd.f32 %v8581_v20, %v2376_v46  ;;  %v2305_v35 = vadd.f32 %v2304_v39, %v2215_v47 }
 0x39d   :  { %v2393_v63 = vpop.f32.mrf.mxu2  ;;  %v3327_v2 = vadd.f32 %v3326_v5, %v8492_v27  ;;  %v10277_v5 = vld [vmem:[#allocation24_spill] sm:$0xff]  ;;  %v2384_v50 = vadd.f32 %v8605_v37, %v2295_v10  ;;  %v2389_v37 = vadd.f32 %v8627_v17, %v2300_v16  ;;  %v2302_v43 = vadd.f32 %v8634_v52, %v8632_v3 }
 0x39e   :  { %v8675_v59 = vadd.f32 %v8509_v4, %v2371_v24  ;;  %v2381_v24 = vadd.f32 %v8593_v45, %v2292_v62  ;;  %v2386_v45 = vadd.f32 %v8613_v14, %v2297_v32 }
 0x39f   :  { %v2217_v7 = vpop.f32.mrf.mxu0  ;;  %v3328_v58 = vadd.f32 %v3327_v2, %v8495_v55  ;;  %v8705_v62 = vadd.f32 %v8607_v34, %v2384_v50  ;;  %v2391_v14 = vadd.f32 %v8642_v36, %v2302_v43  ;;  %v8717_v34 = vadd.f32 %v8629_v26, %v2389_v37  ;;  %v10278_v36 = vld [vmem:[#allocation29_spill] sm:$0xff]  ;;  %v10280_v26 = vld [vmem:[#allocation27_spill] sm:$0xff] }
 0x3a0   :  { %v8700_v20 = vadd.f32 %v8595_v22, %v2381_v24  ;;  %v8712_v0 = vadd.f32 %v8615_v40, %v2386_v45 }
 0x3a1   :  { %v2306_v12 = vpop.f32.mrf.mxu1  ;;  %v3329_v44 = vadd.f32 %v3328_v58, %v8497_v31  ;;  %v8721_v52 = vadd.f32 %v8644_v18, %v2391_v14 }
 0x3a2   :  { %v2307_v39 = vadd.f32 %v2306_v12, %v2217_v7 }
 0x3a3   :  { %v2484_v1 = vpop.f32.mrf.mxu3  ;;  %v3330_v4 = vadd.f32 %v3329_v44, %v8675_v59 }
 0x3a5   :  { %v2395_v30 = vpop.f32.mrf.mxu2  ;;  %v3331_v11 = vadd.f32 %v3330_v4, %v8568_v13 }
 0x3a6   :  { %v2396_v40 = vadd.f32 %v2395_v30, %v2307_v39 }
 0x3a7   :  { %v2220_v51 = vpop.f32.mrf.mxu0  ;;  %v3332_v44 = vadd.f32 %v3331_v11, %v8689_v48  ;;  %v10279_v11 = vld [vmem:[#allocation30_spill] sm:$0xff] }
 0x3a8   :  { %v8731_v30 = vadd.f32 %v2484_v1, %v2396_v40 }
 0x3a9   :  { %v2309_v19 = vpop.f32.mrf.mxu1  ;;  %v3333_v46 = vadd.f32 %v3332_v44, %v8591_v49 }
 0x3aa   :  { %2708 = vmatmul.bf16.gmra.mxu2 %v10274_v28 }
 0x3ab   :  { %2797 = vmatmul.bf16.gmra.mxu3 %v10275_v57  ;;  %2619 = vmatmul.bf16.gmra.mxu1 %v10277_v5  ;;  %v2487_v15 = vpop.f32.mrf.mxu3  ;;  %v3334_v61 = vadd.f32 %v3333_v46, %v8700_v20  ;;  %v2310_v5 = vadd.f32 %v2309_v19, %v2220_v51 }
 0x3ac   :  { %2530 = vmatmul.bf16.gmra.mxu0 %v10276_v54  ;;  %v2394_v54 = vadd.f32 %v2393_v63, %v2305_v35  ;;  %v10281_v63 = vld [vmem:[#allocation28_spill] sm:$0xff] }
 0x3ad   :  { %v2398_v2 = vpop.f32.mrf.mxu2  ;;  %v3335_v57 = vadd.f32 %v3334_v61, %v8705_v62 }
 0x3ae   :  { %v8724_v24 = vadd.f32 %v2482_v60, %v2394_v54  ;;  %v2399_v7 = vadd.f32 %v2398_v2, %v2310_v5  ;;  %v10282_v54 = vld [vmem:[#allocation33_spill] sm:$0xff] }
 0x3af   :  { %v2222_v58 = vpop.f32.mrf.mxu0  ;;  %v3336_v3 = vadd.f32 %v3335_v57, %v8712_v0 }
 0x3b0   :  { %v8734_v16 = vadd.f32 %v2487_v15, %v2399_v7  ;;  %v10289_v7 = vld [vmem:[#allocation67_spill] sm:$0xff] }
 0x3b1   :  { %v2311_v28 = vpop.f32.mrf.mxu1  ;;  %v3337_v4 = vadd.f32 %v3336_v3, %v8717_v34 }
 0x3b2   :  { %v2312_v19 = vadd.f32 %v2311_v28, %v2222_v58 }
 0x3b3   :  { %v2489_v10 = vpop.f32.mrf.mxu3  ;;  %v3338_v18 = vadd.f32 %v3337_v4, %v8721_v52 }
 0x3b5   :  { %v2400_v22 = vpop.f32.mrf.mxu2  ;;  %v3339_v60 = vadd.f32 %v3338_v18, %v8724_v24 }
 0x3b6   :  { %v2401_v32 = vadd.f32 %v2400_v22, %v2312_v19 }
 0x3b7   :  { %v2225_v17 = vpop.f32.mrf.mxu0  ;;  %v3340_v37 = vadd.f32 %v3339_v60, %v8731_v30 }
 0x3b8   :  { %v8737_v35 = vadd.f32 %v2489_v10, %v2401_v32  ;;  %v10283_v10 = vld [vmem:[#allocation34_spill] sm:$0xff] }
 0x3b9   :  { %v2314_v47 = vpop.f32.mrf.mxu1  ;;  %v3341_v2 = vadd.f32 %v3340_v37, %v8734_v16 }
 0x3ba   :  { %2713 = vmatmul.bf16.gmra.mxu2 %v10278_v36  ;;  %v2315_v12 = vadd.f32 %v2314_v47, %v2225_v17  ;;  %v10284_v17 = vld [vmem:[#allocation31_spill] sm:$0xff]  ;;  %v10285_v47 = vld [vmem:[#allocation32_spill] sm:$0xff] }
 0x3bb   :  { %2802 = vmatmul.bf16.gmra.mxu3 %v10279_v11  ;;  %2624 = vmatmul.bf16.gmra.mxu1 %v10281_v63  ;;  %v2492_v50 = vpop.f32.mrf.mxu3  ;;  %v3342_v1 = vadd.f32 %v3341_v2, %v8737_v35  ;;  %v10286_v11 = vld [vmem:[#allocation37_spill] sm:$0xff]  ;;  %v10288_v63 = vld [vmem:[#allocation36_spill] sm:$0xff] }
 0x3bc   :  { %2535 = vmatmul.bf16.gmra.mxu0 %v10280_v26  ;;  %v10287_v26 = vld [vmem:[#allocation35_spill] sm:$0xff] }
 0x3bd   :  { %v2403_v51 = vpop.f32.mrf.mxu2 }
 0x3be   :  { %v2404_v44 = vadd.f32 %v2403_v51, %v2315_v12  ;;  %v10290_v12 = vld [vmem:[#allocation38_spill] sm:$0xff] }
 0x3bf   :  { %v2227_v45 = vpop.f32.mrf.mxu0 }
 0x3c0   :  { %v8740_v58 = vadd.f32 %v2492_v50, %v2404_v44 }
 0x3c1   :  { %v2316_v46 = vpop.f32.mrf.mxu1 }
 0x3c2   :  { %v2317_v28 = vadd.f32 %v2316_v46, %v2227_v45  ;;  %v3343_v15 = vadd.f32 %v3342_v1, %v8740_v58 }
 0x3c3   :  { %v2494_v22 = vpop.f32.mrf.mxu3 }
 0x3c5   :  { %v2405_v43 = vpop.f32.mrf.mxu2 }
 0x3c6   :  { %v2406_v61 = vadd.f32 %v2405_v43, %v2317_v28  ;;  %v10291_v43 = vld [vmem:[#allocation41_spill] sm:$0xff] }
 0x3c8   :  { %v8744_v14 = vadd.f32 %v2494_v22, %v2406_v61 }
 0x3ca   :  { %v3344_v57 = vadd.f32 %v3343_v15, %v8744_v14  ;;  %2718 = vmatmul.bf16.gmra.mxu2 %v10282_v54 }
 0x3cb   :  { %2807 = vmatmul.bf16.gmra.mxu3 %v10283_v10  ;;  %2629 = vmatmul.bf16.gmra.mxu1 %v10285_v47  ;;  %v10293_v10 = vld [vmem:[#allocation40_spill] sm:$0xff] }
 0x3cc   :  { %2540 = vmatmul.bf16.gmra.mxu0 %v10284_v17  ;;  %v3345_v39 = vrot.slane %v3344_v57, 4 }
 0x3ce   :  { %v3346_v5 = vadd.f32 %v3345_v39, %v3344_v57  ;;  %v10292_v57 = vld [vmem:[#allocation39_spill] sm:$0xff] }
 0x3d0   :  { %v3347_v3 = vrot.slane %v3346_v5, 2 }
 0x3d2   :  { %v3348_v40 = vadd.f32 %v3347_v3, %v3346_v5  ;;  %v10294_v5 = vld [vmem:[#allocation42_spill] sm:$0xff] }
 0x3d4   :  { %v3349_v4 = vrot.slane %v3348_v40, 1 }
 0x3d6   :  { %v3350_v36 = vadd.f32 %v3349_v4, %v3348_v40 }
 0x3d8   :  { %v8755_v19 = vmul.f32 %v10289_v7, %v3350_v36  ;;  %v2595_v32 = vpop.f32.mrf.mxu1 }
 0x3d9   :  { %v2506_v18 = vpop.f32.mrf.mxu0 }
 0x3da   :  { %2723 = vmatmul.bf16.gmra.mxu2 %v10286_v11  ;;  %v8760_v51 = vsub.f32 %v10252_v23, %v8755_v19  ;;  %v8764_v50 = vsub.f32 %v10253_v33, %v8755_v19  ;;  %v8768_v60 = vsub.f32 %v10254_v25, %v8755_v19  ;;  %v8776_v23 = vsub.f32 %v10255_v29, %v8755_v19 }
 0x3db   :  { %2634 = vmatmul.bf16.gmra.mxu1 %v10288_v63  ;;  %2812 = vmatmul.bf16.gmra.mxu3 %v10290_v12  ;;  %v8780_v33 = vsub.f32 %v10256_v56, %v8755_v19  ;;  %v2596_v25 = vadd.f32 %v2595_v32, %v2506_v18  ;;  %v8787_v1 = vsub.f32 %v10259_v21, %v8755_v19 }
 0x3dc   :  { %2545 = vmatmul.bf16.gmra.mxu0 %v10287_v26  ;;  %v3529_v44 = vmul.f32 %v8760_v51, %v8760_v51  ;;  %v3533_v45 = vmul.f32 %v8764_v50, %v8764_v50  ;;  %v3537_v46 = vmul.f32 %v8768_v60, %v8768_v60  ;;  %v3541_v29 = vmul.f32 %v8776_v23, %v8776_v23 }
 0x3dd   :  { %v2684_v2 = vpop.f32.mrf.mxu2  ;;  %v8795_v17 = vsub.f32 %v10261_v41, %v8755_v19  ;;  %v3545_v21 = vmul.f32 %v8780_v33, %v8780_v33  ;;  %v8804_v3 = vsub.f32 %v10264_v38, %v8755_v19  ;;  %v3549_v40 = vmul.f32 %v8787_v1, %v8787_v1 }
 0x3de   :  { %v3729_v37 = vadd.f32 %v3533_v45, %v3529_v44  ;;  %v2773_v28 = vpop.f32.mrf.mxu3  ;;  %v2685_v22 = vadd.f32 %v2684_v2, %v2596_v25  ;;  %v8810_v41 = vsub.f32 %v10267_v42, %v8755_v19  ;;  %v8816_v18 = vsub.f32 %v8651_v9, %v8755_v19  ;;  %v10295_v42 = vld [vmem:[#allocation74_spill] sm:$0xff] }
 0x3df   :  { %v3553_v36 = vmul.f32 %v8795_v17, %v8795_v17  ;;  %v3557_v38 = vmul.f32 %v8804_v3, %v8804_v3  ;;  %v8830_v9 = vsub.f32 %v8661_v53, %v8755_v19  ;;  %v8843_v53 = vsub.f32 %v8485_v8, %v8755_v19 }
 0x3e0   :  { %v3730_v61 = vadd.f32 %v3729_v37, %v3537_v46  ;;  %v2597_v15 = vpop.f32.mrf.mxu1  ;;  %v8799_v39 = vadd.f32 %v2773_v28, %v2685_v22  ;;  %v8824_v37 = vsub.f32 %v10295_v42, %v8755_v19  ;;  %v3561_v25 = vmul.f32 %v8810_v41, %v8810_v41 }
 0x3e1   :  { %v2508_v56 = vpop.f32.mrf.mxu0  ;;  %v3565_v28 = vmul.f32 %v8816_v18, %v8816_v18 }
 0x3e2   :  { %v2598_v54 = vadd.f32 %v2597_v15, %v2508_v56  ;;  %v3731_v47 = vadd.f32 %v3730_v61, %v3541_v29  ;;  %v8836_v61 = vsub.f32 %v8456_v6, %v8755_v19  ;;  %v3569_v22 = vmul.f32 %v8824_v37, %v8824_v37 }
 0x3e4   :  { %v3732_v4 = vadd.f32 %v3731_v47, %v3545_v21  ;;  %v3573_v21 = vmul.f32 %v8830_v9, %v8830_v9  ;;  %v3577_v8 = vmul.f32 %v8836_v61, %v8836_v61 }
 0x3e5   :  { %v2686_v26 = vpop.f32.mrf.mxu2 }
 0x3e6   :  { %v3733_v11 = vadd.f32 %v3732_v4, %v3549_v40  ;;  %v2775_v63 = vpop.f32.mrf.mxu3  ;;  %v2687_v12 = vadd.f32 %v2686_v26, %v2598_v54  ;;  %v10297_v40 = vld [vmem:[#allocation43_spill] sm:$0xff]  ;;  %v8853_v26 = vsub.f32 %v8492_v27, %v8755_v19 }
 0x3e8   :  { %v3734_v32 = vadd.f32 %v3733_v11, %v3553_v36  ;;  %v2600_v45 = vpop.f32.mrf.mxu1  ;;  %v8820_v46 = vadd.f32 %v2775_v63, %v2687_v12  ;;  %v10298_v11 = vld [vmem:[#allocation44_spill] sm:$0xff]  ;;  %v10299_v12 = vld [vmem:[#allocation46_spill] sm:$0xff]  ;;  %v3585_v27 = vmul.f32 %v8853_v26, %v8853_v26 }
 0x3e9   :  { %v2511_v44 = vpop.f32.mrf.mxu0 }
 0x3ea   :  { %2728 = vmatmul.bf16.gmra.mxu2 %v10291_v43  ;;  %v3735_v2 = vadd.f32 %v3734_v32, %v3557_v38  ;;  %v2601_v29 = vadd.f32 %v2600_v45, %v2511_v44  ;;  %v8860_v38 = vsub.f32 %v8495_v55, %v8755_v19  ;;  %v3581_v32 = vmul.f32 %v8843_v53, %v8843_v53 }
 0x3eb   :  { %2639 = vmatmul.bf16.gmra.mxu1 %v10293_v10  ;;  %2817 = vmatmul.bf16.gmra.mxu3 %v10294_v5  ;;  %v10296_v10 = vld [vmem:[#allocation45_spill] sm:$0xff]  ;;  %v8866_v45 = vsub.f32 %v8497_v31, %v8755_v19  ;;  %v8880_v31 = vsub.f32 %v8568_v13, %v8755_v19 }
 0x3ec   :  { %2550 = vmatmul.bf16.gmra.mxu0 %v10292_v57  ;;  %v3736_v43 = vadd.f32 %v3735_v2, %v3561_v25  ;;  %v3589_v55 = vmul.f32 %v8860_v38, %v8860_v38 }
 0x3ed   :  { %v2689_v15 = vpop.f32.mrf.mxu2  ;;  %v3601_v13 = vmul.f32 %v8880_v31, %v8880_v31 }
 0x3ee   :  { %v3737_v56 = vadd.f32 %v3736_v43, %v3565_v28  ;;  %v2778_v57 = vpop.f32.mrf.mxu3  ;;  %v2690_v54 = vadd.f32 %v2689_v15, %v2601_v29  ;;  %v8872_v43 = vsub.f32 %v8675_v59, %v8755_v19  ;;  %v8886_v59 = vsub.f32 %v8689_v48, %v8755_v19 }
 0x3ef   :  { %v8899_v48 = vsub.f32 %v8700_v20, %v8755_v19 }
 0x3f0   :  { %v3738_v47 = vadd.f32 %v3737_v56, %v3569_v22  ;;  %v2602_v6 = vpop.f32.mrf.mxu1  ;;  %v8848_v4 = vadd.f32 %v2778_v57, %v2690_v54  ;;  %v3593_v57 = vmul.f32 %v8866_v45, %v8866_v45 }
 0x3f1   :  { %v2513_v5 = vpop.f32.mrf.mxu0 }
 0x3f2   :  { %v2603_v36 = vadd.f32 %v2602_v6, %v2513_v5  ;;  %v3739_v63 = vadd.f32 %v3738_v47, %v3573_v21  ;;  %v8892_v5 = vsub.f32 %v8591_v49, %v8755_v19 }
 0x3f4   :  { %v3740_v44 = vadd.f32 %v3739_v63, %v3577_v8  ;;  %v10301_v8 = vld [vmem:[#allocation49_spill] sm:$0xff]  ;;  %v3605_v63 = vmul.f32 %v8886_v59, %v8886_v59  ;;  %v3609_v20 = vmul.f32 %v8892_v5, %v8892_v5 }
 0x3f5   :  { %v2691_v25 = vpop.f32.mrf.mxu2 }
 0x3f6   :  { %v3741_v42 = vadd.f32 %v3740_v44, %v3581_v32  ;;  %v2780_v2 = vpop.f32.mrf.mxu3  ;;  %v2692_v28 = vadd.f32 %v2691_v25, %v2603_v36  ;;  %v10302_v44 = vld [vmem:[#allocation47_spill] sm:$0xff]  ;;  %v10304_v25 = vld [vmem:[#allocation48_spill] sm:$0xff] }
 0x3f8   :  { %v3742_v29 = vadd.f32 %v3741_v42, %v3585_v27  ;;  %v2605_v56 = vpop.f32.mrf.mxu1  ;;  %v8876_v15 = vadd.f32 %v2780_v2, %v2692_v28  ;;  %v8909_v2 = vsub.f32 %v8705_v62, %v8755_v19 }
 0x3f9   :  { %v2516_v22 = vpop.f32.mrf.mxu0 }
 0x3fa   :  { %2733 = vmatmul.bf16.gmra.mxu2 %v10296_v10  ;;  %10300 = vst [vmem:[#allocation80_spill] sm:$0xff] %v8876_v15  ;;  %v3743_v54 = vadd.f32 %v3742_v29, %v3589_v55  ;;  %v3597_v10 = vmul.f32 %v8872_v43, %v8872_v43  ;;  %v2606_v47 = vadd.f32 %v2605_v56, %v2516_v22  ;;  %v10305_v55 = vld [vmem:[#allocation50_spill] sm:$0xff] }
 0x3fb   :  { %2644 = vmatmul.bf16.gmra.mxu1 %v10298_v11  ;;  %2822 = vmatmul.bf16.gmra.mxu3 %v10299_v12  ;;  %v8916_v29 = vsub.f32 %v8712_v0, %v8755_v19  ;;  %v3613_v22 = vmul.f32 %v8899_v48, %v8899_v48  ;;  %v3617_v62 = vmul.f32 %v8909_v2, %v8909_v2 }
 0x3fc   :  { %2555 = vmatmul.bf16.gmra.mxu0 %v10297_v40  ;;  %v3744_v21 = vadd.f32 %v3743_v54, %v3593_v57  ;;  %v8922_v57 = vsub.f32 %v8717_v34, %v8755_v19  ;;  %v8936_v34 = vsub.f32 %v8724_v24, %v8755_v19 }
 0x3fd   :  { %v2694_v40 = vpop.f32.mrf.mxu2  ;;  %v3621_v0 = vmul.f32 %v8916_v29, %v8916_v29 }
 0x3fe   :  { %v3745_v6 = vadd.f32 %v3744_v21, %v3597_v10  ;;  %v2783_v36 = vpop.f32.mrf.mxu3  ;;  %v2695_v11 = vadd.f32 %v2694_v40, %v2606_v47  ;;  %v3633_v24 = vmul.f32 %v8936_v34, %v8936_v34 }
 0x400   :  { %v3746_v12 = vadd.f32 %v3745_v6, %v3601_v13  ;;  %v2607_v49 = vpop.f32.mrf.mxu1  ;;  %v8904_v27 = vadd.f32 %v2783_v36, %v2695_v11  ;;  %v8928_v13 = vsub.f32 %v8721_v52, %v8755_v19  ;;  %v8942_v52 = vsub.f32 %v8731_v30, %v8755_v19 }
 0x401   :  { %v2518_v32 = vpop.f32.mrf.mxu0  ;;  %v8955_v30 = vsub.f32 %v8737_v35, %v8755_v19 }
 0x402   :  { %10303 = vst [vmem:[#allocation85_spill] sm:$0xff] %v8904_v27  ;;  %v2608_v42 = vadd.f32 %v2607_v49, %v2518_v32  ;;  %v3747_v28 = vadd.f32 %v3746_v12, %v3605_v63  ;;  %v3629_v12 = vmul.f32 %v8928_v13, %v8928_v13 }
 0x404   :  { %v3748_v56 = vadd.f32 %v3747_v28, %v3609_v20 }
 0x405   :  { %v2696_v10 = vpop.f32.mrf.mxu2 }
 0x406   :  { %v3749_v54 = vadd.f32 %v3748_v56, %v3613_v22  ;;  %v2785_v21 = vpop.f32.mrf.mxu3  ;;  %v2697_v47 = vadd.f32 %v2696_v10, %v2608_v42  ;;  %v3637_v22 = vmul.f32 %v8942_v52, %v8942_v52 }
 0x408   :  { %v3750_v6 = vadd.f32 %v3749_v54, %v3617_v62  ;;  %v2610_v36 = vpop.f32.mrf.mxu1  ;;  %v8932_v11 = vadd.f32 %v2785_v21, %v2697_v47  ;;  %v10308_v54 = vld [vmem:[#allocation51_spill] sm:$0xff]  ;;  %v10310_v47 = vld [vmem:[#allocation52_spill] sm:$0xff] }
 0x409   :  { %v2521_v40 = vpop.f32.mrf.mxu0 }
 0x40a   :  { %2738 = vmatmul.bf16.gmra.mxu2 %v10301_v8  ;;  %10306 = vst [vmem:[#allocation83_spill] sm:$0xff] %v8932_v11  ;;  %v3625_v8 = vmul.f32 %v8922_v57, %v8922_v57  ;;  %v3751_v63 = vadd.f32 %v3750_v6, %v3621_v0  ;;  %v2611_v49 = vadd.f32 %v2610_v36, %v2521_v40  ;;  %v10311_v40 = vld [vmem:[#allocation54_spill] sm:$0xff] }
 0x40b   :  { %2649 = vmatmul.bf16.gmra.mxu1 %v10304_v25  ;;  %2827 = vmatmul.bf16.gmra.mxu3 %v10305_v55  ;;  %v10307_v55 = vld [vmem:[#allocation53_spill] sm:$0xff]  ;;  %v8965_v0 = vsub.f32 %v8740_v58, %v8755_v19  ;;  %v8972_v36 = vsub.f32 %v8744_v14, %v8755_v19 }
 0x40c   :  { %2560 = vmatmul.bf16.gmra.mxu0 %v10302_v44  ;;  %v3752_v32 = vadd.f32 %v3751_v63, %v3625_v8  ;;  %v8948_v44 = vsub.f32 %v8734_v16, %v8755_v19  ;;  %v3645_v8 = vmul.f32 %v8955_v30, %v8955_v30 }
 0x40d   :  { %v2699_v25 = vpop.f32.mrf.mxu2 }
 0x40e   :  { %v3753_v42 = vadd.f32 %v3752_v32, %v3629_v12  ;;  %v2788_v20 = vpop.f32.mrf.mxu3  ;;  %v2700_v28 = vadd.f32 %v2699_v25, %v2611_v49  ;;  %v3641_v35 = vmul.f32 %v8948_v44, %v8948_v44  ;;  %v3649_v12 = vmul.f32 %v8965_v0, %v8965_v0 }
 0x410   :  { %v3754_v56 = vadd.f32 %v3753_v42, %v3633_v24  ;;  %v2612_v16 = vpop.f32.mrf.mxu1  ;;  %v8960_v10 = vadd.f32 %v2788_v20, %v2700_v28  ;;  %v3653_v42 = vmul.f32 %v8972_v36, %v8972_v36 }
 0x411   :  { %v2523_v62 = vpop.f32.mrf.mxu0 }
 0x412   :  { %10309 = vst [vmem:[#allocation84_spill] sm:$0xff] %v8960_v10  ;;  %v2613_v21 = vadd.f32 %v2612_v16, %v2523_v62  ;;  %v3755_v6 = vadd.f32 %v3754_v56, %v3637_v22 }
 0x414   :  { %v3756_v63 = vadd.f32 %v3755_v6, %v3641_v35 }
 0x415   :  { %v2701_v58 = vpop.f32.mrf.mxu2 }
 0x416   :  { %v3757_v32 = vadd.f32 %v3756_v63, %v3645_v8  ;;  %v2790_v49 = vpop.f32.mrf.mxu3  ;;  %v2702_v24 = vadd.f32 %v2701_v58, %v2613_v21  ;;  %v10317_v58 = vld [vmem:[#allocation58_spill] sm:$0xff] }
 0x418   :  { %v3758_v25 = vadd.f32 %v3757_v32, %v3649_v12  ;;  %v2615_v28 = vpop.f32.mrf.mxu1  ;;  %v10316_v12 = vld [vmem:[#allocation56_spill] sm:$0xff] }
 0x419   :  { %v2526_v20 = vpop.f32.mrf.mxu0 }
 0x41a   :  { %2743 = vmatmul.bf16.gmra.mxu2 %v10307_v55  ;;  %v8980_v55 = vadd.f32 %v2790_v49, %v2702_v24  ;;  %v3759_v14 = vadd.f32 %v3758_v25, %v3653_v42  ;;  %v2616_v22 = vadd.f32 %v2615_v28, %v2526_v20 }
 0x41b   :  { %2654 = vmatmul.bf16.gmra.mxu1 %v10310_v47  ;;  %2832 = vmatmul.bf16.gmra.mxu3 %v10311_v40  ;;  %v10313_v47 = vld [vmem:[#allocation57_spill] sm:$0xff]  ;;  %v10314_v40 = vld [vmem:[#allocation55_spill] sm:$0xff] }
 0x41c   :  { %2565 = vmatmul.bf16.gmra.mxu0 %v10308_v54  ;;  %10312 = vst [vmem:[#allocation75_spill] sm:$0xff] %v8980_v55  ;;  %v3760_v19 = vrot.slane %v3759_v14, 4 }
 0x41d   :  { %v2704_v62 = vpop.f32.mrf.mxu2 }
 0x41e   :  { %v3761_v56 = vadd.f32 %v3760_v19, %v3759_v14  ;;  %v2793_v16 = vpop.f32.mrf.mxu3  ;;  %v2705_v54 = vadd.f32 %v2704_v62, %v2616_v22 }
 0x420   :  { %v3762_v35 = vrot.slane %v3761_v56, 2  ;;  %v2617_v21 = vpop.f32.mrf.mxu1  ;;  %v8984_v8 = vadd.f32 %v2793_v16, %v2705_v54 }
 0x421   :  { %v2528_v6 = vpop.f32.mrf.mxu0 }
 0x422   :  { %10315 = vst [vmem:[#allocation78_spill] sm:$0xff] %v8984_v8  ;;  %v2618_v63 = vadd.f32 %v2617_v21, %v2528_v6  ;;  %v3763_v32 = vadd.f32 %v3762_v35, %v3761_v56  ;;  %v10319_v56 = vld [vmem:[#allocation61_spill] sm:$0xff] }
 0x424   :  { %v3764_v49 = vrot.slane %v3763_v32, 1 }
 0x425   :  { %v2706_v42 = vpop.f32.mrf.mxu2 }
 0x426   :  { %v3765_v24 = vadd.f32 %v3764_v49, %v3763_v32  ;;  %v2795_v25 = vpop.f32.mrf.mxu3  ;;  %v2707_v20 = vadd.f32 %v2706_v42, %v2618_v63  ;;  %v10322_v32 = vld [vmem:[#allocation60_spill] sm:$0xff]  ;;  %v10323_v49 = vld [vmem:[#allocation62_spill] sm:$0xff] }
 0x428   :  { %v3805_v28 = vmul.f32 %v3765_v24, %v10289_v7  ;;  %v2620_v19 = vpop.f32.mrf.mxu1  ;;  %v8989_v22 = vadd.f32 %v2795_v25, %v2707_v20 }
 0x429   :  { %v2531_v14 = vpop.f32.mrf.mxu0 }
 0x42a   :  { %2748 = vmatmul.bf16.gmra.mxu2 %v10313_v47  ;;  %10318 = vst [vmem:[#allocation92_spill] sm:$0xff] %v8989_v22  ;;  %v3809_v62 = vadd.f32 1e-05, %v3805_v28  ;;  %v2621_v16 = vadd.f32 %v2620_v19, %v2531_v14 }
 0x42b   :  { %2659 = vmatmul.bf16.gmra.mxu1 %v10316_v12  ;;  %2837 = vmatmul.bf16.gmra.mxu3 %v10317_v58 }
 0x42c   :  { %2570 = vmatmul.bf16.gmra.mxu0 %v10314_v40  ;;  %5482 = vrsqrt.f32 %v3809_v62  ;;  %v10320_v40 = vld [vmem:[#allocation59_spill] sm:$0xff]  ;;  %vm3837_vm8 = vweird.f32 %v3809_v62 }
 0x42d   :  { %v2709_v54 = vpop.f32.mrf.mxu2 }
 0x42e   :  { %v2798_v47 = vpop.f32.mrf.mxu3  ;;  %v2710_v6 = vadd.f32 %v2709_v54, %v2621_v16 }
 0x430   :  { %v2622_v21 = vpop.f32.mrf.mxu1  ;;  %v8993_v12 = vadd.f32 %v2798_v47, %v2710_v6 }
 0x431   :  { %v2533_v35 = vpop.f32.mrf.mxu0 }
 0x432   :  { %10321 = vst [vmem:[#allocation5_spill] sm:$0xff] %v8993_v12  ;;  %v2623_v63 = vadd.f32 %v2622_v21, %v2533_v35  ;;  %v5483_v58 = vpop.eup %5482  ;;  %v10325_v21 = vld [vmem:[#allocation65_spill] sm:$0xff] }
 0x433   :  { %v3832_v24 = vmul.f32 %v5483_v58, %v3809_v62  ;;  %vm3838_vm7 = vweird.f32 %v5483_v58  ;;  %v9034_v62 = vld [vmem:[%s9811_s3] sm:$0xf] }
 0x434   :  { %vm3839_vm9 = vmor %vm3837_vm8, %vm3838_vm7  ;;  %10330 = vst [vmem:[#allocation4_spill] sm:$0xff] %v9034_v62 }
 0x435   :  { %v2711_v42 = vpop.f32.mrf.mxu2  ;;  %v3833_v20 = vmul.f32 %v5483_v58, %v3832_v24  ;;  %v10328_v24 = vld [vmem:[#allocation66_spill] sm:$0xff] }
 0x436   :  { %v2800_v25 = vpop.f32.mrf.mxu3  ;;  %v2712_v28 = vadd.f32 %v2711_v42, %v2623_v63  ;;  %v10327_v63 = vld [vmem:[#allocation64_spill] sm:$0xff] }
 0x437   :  { %v3834_v54 = vmul.f32 0.5, %v3833_v20 }
 0x438   :  { %v2625_v19 = vpop.f32.mrf.mxu1  ;;  %v8997_v16 = vadd.f32 %v2800_v25, %v2712_v28 }
 0x439   :  { %v2536_v14 = vpop.f32.mrf.mxu0  ;;  %v3835_v35 = vsub.f32 1.5, %v3834_v54  ;;  %v9026_v54 = vld [vmem:[%s9810_s2] sm:$0xf] }
 0x43a   :  { %2753 = vmatmul.bf16.gmra.mxu2 %v10319_v56  ;;  %10324 = vst [vmem:[#allocation6_spill] sm:$0xff] %v8997_v16  ;;  %v8999_v56 = vadd.f32 %v2625_v19, %v2536_v14 }
 0x43b   :  { %2664 = vmatmul.bf16.gmra.mxu1 %v10322_v32  ;;  %2842 = vmatmul.bf16.gmra.mxu3 %v10323_v49  ;;  %v10326_v49 = vld [vmem:[#allocation63_spill] sm:$0xff]  ;;  %v3836_v42 = vmul.f32 %v5483_v58, %v3835_v35  ;;  %10329 = vst [vmem:[#allocation3_spill] sm:$0xff] %v9026_v54  ;;  %v9029_v35 = vperm.slane %v9026_v54, 2 }
 0x43c   :  { %2575 = vmatmul.bf16.gmra.mxu0 %v10320_v40 }
 0x43d   :  { %v9001_v47 = vpop.f32.mrf.mxu2  ;;  %v9017_v28 = vsel %vm3839_vm9, %v5483_v58, %v3836_v42  ;;  %v9037_v58 = vperm.slane %v9034_v62, 2 }
 0x43e   :  { %v9003_v6 = vpop.f32.mrf.mxu3  ;;  %v3869_v42 = vmul.f32 %v9017_v28, %v8780_v33  ;;  %v3873_v54 = vmul.f32 %v9017_v28, %v8787_v1  ;;  %v3877_v62 = vmul.f32 %v9017_v28, %v8795_v17  ;;  %v3897_v33 = vmul.f32 %v9017_v28, %v8830_v9 }
 0x43f   :  { %v3901_v1 = vmul.f32 %v9017_v28, %v8836_v61  ;;  %v3905_v17 = vmul.f32 %v9017_v28, %v8843_v53  ;;  %v3921_v53 = vmul.f32 %v9017_v28, %v8872_v43 }
 0x440   :  { %v9008_v32 = vpop.f32.mrf.mxu1  ;;  %v4007_v12 = vmul.f32 %v9029_v35, %v3869_v42  ;;  %v4035_v55 = vmul.f32 %v9029_v35, %v3897_v33 }
 0x441   :  { %v9006_v40 = vpop.f32.mrf.mxu0 }
 0x445   :  { %v9013_v25 = vpop.f32.mrf.mxu2 }
 0x446   :  { %v9015_v20 = vpop.f32.mrf.mxu3 }
 0x448   :  { %v9021_v19 = vpop.f32.mrf.mxu1 }
 0x449   :  { %v9019_v14 = vpop.f32.mrf.mxu0 }
 0x44a   :  { %2758 = vmatmul.bf16.gmra.mxu2 %v10325_v21  ;;  %v3853_v21 = vmul.f32 %v9017_v28, %v8760_v51  ;;  %v3881_v51 = vmul.f32 %v9017_v28, %v8804_v3  ;;  %v3909_v3 = vmul.f32 %v9017_v28, %v8853_v26  ;;  %v3925_v26 = vmul.f32 %v9017_v28, %v8880_v31 }
 0x44b   :  { %2669 = vmatmul.bf16.gmra.mxu1 %v10327_v63  ;;  %2847 = vmatmul.bf16.gmra.mxu3 %v10328_v24  ;;  %v3861_v63 = vmul.f32 %v9017_v28, %v8768_v60  ;;  %v3865_v24 = vmul.f32 %v9017_v28, %v8776_v23  ;;  %v3889_v60 = vmul.f32 %v9017_v28, %v8816_v18 }
 0x44c   :  { %2580 = vmatmul.bf16.gmra.mxu0 %v10326_v49  ;;  %v3857_v49 = vmul.f32 %v9017_v28, %v8764_v50  ;;  %v3885_v50 = vmul.f32 %v9017_v28, %v8810_v41  ;;  %v3893_v23 = vmul.f32 %v9017_v28, %v8824_v37  ;;  %v3913_v41 = vmul.f32 %v9017_v28, %v8860_v38 }
 0x44d   :  { %v3917_v18 = vmul.f32 %v9017_v28, %v8866_v45  ;;  %v3991_v37 = vmul.f32 %v9029_v35, %v3853_v21  ;;  %v3999_v9 = vmul.f32 %v9029_v35, %v3861_v63  ;;  %v9076_v16 = vpop.f32.mrf.mxu2  ;;  %v3929_v38 = vmul.f32 %v9017_v28, %v8886_v59 }
 0x44e   :  { %v3995_v7 = vmul.f32 %v9029_v35, %v3857_v49  ;;  %v9078_v61 = vpop.f32.mrf.mxu3  ;;  %v4003_v45 = vmul.f32 %v9029_v35, %v3865_v24  ;;  %v3933_v21 = vmul.f32 %v9017_v28, %v8892_v5  ;;  %v3937_v49 = vmul.f32 %v9017_v28, %v8899_v48 }
 0x44f   :  { %v3941_v63 = vmul.f32 %v9017_v28, %v8909_v2  ;;  %v9100_v31 = vmul.f32 %v9017_v28, %v8916_v29  ;;  %v9104_v59 = vmul.f32 %v9017_v28, %v8922_v57  ;;  %v9108_v5 = vmul.f32 %v9017_v28, %v8928_v13 }
 0x450   :  { %v9096_v22 = vpop.f32.mrf.mxu1  ;;  %v4011_v48 = vmul.f32 %v9029_v35, %v3873_v54  ;;  %v4015_v2 = vmul.f32 %v9029_v35, %v3877_v62  ;;  %v4129_v24 = vadd.f32 %v9037_v58, %v3991_v37  ;;  %v4133_v42 = vadd.f32 %v9037_v58, %v3995_v7 }
 0x451   :  { %v9094_v43 = vpop.f32.mrf.mxu0  ;;  %v4137_v8 = vadd.f32 %v9037_v58, %v3999_v9  ;;  %v9117_v29 = vmul.f32 %v9017_v28, %v8936_v34  ;;  %v9121_v57 = vmul.f32 %v9017_v28, %v8942_v52  ;;  %v4019_v13 = vmul.f32 %v9029_v35, %v3881_v51 }
 0x452   :  { %v4141_v54 = vadd.f32 %v9037_v58, %v4003_v45  ;;  %v9127_v62 = vmul.f32 %v9017_v28, %v8948_v44  ;;  %v4023_v7 = vmul.f32 %v9029_v35, %v3885_v50  ;;  %v4027_v37 = vmul.f32 %v9029_v35, %v3889_v60 }
 0x453   :  { %v4145_v9 = vadd.f32 %v9037_v58, %v4007_v12  ;;  %v4031_v34 = vmul.f32 %v9029_v35, %v3893_v23  ;;  %v4039_v52 = vmul.f32 %v9029_v35, %v3901_v1  ;;  %v4149_v51 = vadd.f32 %v9037_v58, %v4011_v48 }
 0x454   :  { %v4153_v45 = vadd.f32 %v9037_v58, %v4015_v2  ;;  %v4257_v10 = vmax.f32 %v4129_v24, 0.0  ;;  %v4261_v11 = vmax.f32 %v4133_v42, 0.0  ;;  %v4265_v44 = vmax.f32 %v4137_v8, 0.0 }
 0x455   :  { %v2721_v27 = vpop.f32.mrf.mxu2  ;;  %v4043_v50 = vmul.f32 %v9029_v35, %v3905_v17  ;;  %v4047_v12 = vmul.f32 %v9029_v35, %v3909_v3  ;;  %v4157_v60 = vadd.f32 %v9037_v58, %v4019_v13  ;;  %v4269_v23 = vmax.f32 %v4141_v54, 0.0 }
 0x456   :  { %v9137_v15 = vpop.f32.mrf.mxu3  ;;  %v4051_v33 = vmul.f32 %v9029_v35, %v3913_v41  ;;  %v4055_v1 = vmul.f32 %v9029_v35, %v3917_v18  ;;  %v4161_v48 = vadd.f32 %v9037_v58, %v4023_v7  ;;  %v4273_v2 = vmax.f32 %v4145_v9, 0.0  ;;  %4385 = vst [vmem:[%s9812_s4 + $0x10] sm:$0xff] %v4257_v10 }
 0x457   :  { %v4059_v17 = vmul.f32 %v9029_v35, %v3921_v53  ;;  %v4165_v3 = vadd.f32 %v9037_v58, %v4027_v37  ;;  %v4169_v42 = vadd.f32 %v9037_v58, %v4031_v34  ;;  %v4277_v13 = vmax.f32 %v4149_v51, 0.0  ;;  %4389 = vst [vmem:[%s9812_s4 + $0x30] sm:$0xff] %v4261_v11 }
 0x458   :  { %v2635_v24 = vpop.f32.mrf.mxu1  ;;  %v4063_v41 = vmul.f32 %v9029_v35, %v3925_v26  ;;  %v4067_v18 = vmul.f32 %v9029_v35, %v3929_v38  ;;  %v4071_v54 = vmul.f32 %v9029_v35, %v3933_v21  ;;  %v4281_v10 = vmax.f32 %v4153_v45, 0.0  ;;  %4393 = vst [vmem:[%s9812_s4 + $0x50] sm:$0xff] %v4265_v44 }
 0x459   :  { %v2546_v8 = vpop.f32.mrf.mxu0  ;;  %v4075_v53 = vmul.f32 %v9029_v35, %v3937_v49  ;;  %v4173_v7 = vadd.f32 %v9037_v58, %v4035_v55  ;;  %v4177_v37 = vadd.f32 %v9037_v58, %v4039_v52  ;;  %v4285_v9 = vmax.f32 %v4157_v60, 0.0  ;;  %4397 = vst [vmem:[%s9812_s4 + $0x70] sm:$0xff] %v4269_v23 }
 0x45a   :  { %v4079_v11 = vmul.f32 %v9029_v35, %v3941_v63  ;;  %v4181_v26 = vadd.f32 %v9037_v58, %v4043_v50  ;;  %v4185_v38 = vadd.f32 %v9037_v58, %v4047_v12  ;;  %v4289_v21 = vmax.f32 %v4161_v48, 0.0  ;;  %4401 = vst [vmem:[%s9812_s4 + $0x90] sm:$0xff] %v4273_v2 }
 0x45b   :  { %v4189_v55 = vadd.f32 %v9037_v58, %v4051_v33  ;;  %v9174_v49 = vadd.f32 %v9037_v58, %v4055_v1  ;;  %v4293_v34 = vmax.f32 %v4165_v3, 0.0  ;;  %v4297_v52 = vmax.f32 %v4169_v42, 0.0  ;;  %4405 = vst [vmem:[%s9812_s4 + $0xb0] sm:$0xff] %v4277_v13 }
 0x45c   :  { %4409 = vst [vmem:[%s9812_s4 + $0xd0] sm:$0xff] %v4281_v10  ;;  %v2715_v63 = vadd.f32 %v9001_v47, %v8999_v56  ;;  %v2628_v51 = vadd.f32 %v9008_v32, %v9006_v40  ;;  %v2631_v45 = vadd.f32 %v9021_v19, %v9019_v14  ;;  %v2633_v44 = vadd.f32 %v9096_v22, %v9094_v43 }
 0x45d   :  { %v2724_v50 = vpop.f32.mrf.mxu2  ;;  %v4197_v60 = vadd.f32 %v9037_v58, %v4059_v17  ;;  %v4301_v23 = vmax.f32 %v4173_v7, 0.0  ;;  %v4305_v33 = vmax.f32 %v4177_v37, 0.0  ;;  %4413 = vst [vmem:[%s9812_s4 + $0xf0] sm:$0xff] %v4285_v9  ;;  %v2636_v56 = vadd.f32 %v2635_v24, %v2546_v8 }
 0x45e   :  { %v2813_v12 = vpop.f32.mrf.mxu3  ;;  %4417 = vst [vmem:[%s9812_s4 + $0x110] sm:$0xff] %v4289_v21  ;;  %v9198_v47 = vadd.f32 %v9003_v6, %v2715_v63  ;;  %v2717_v22 = vadd.f32 %v9013_v25, %v2628_v51  ;;  %v2720_v40 = vadd.f32 %v9076_v16, %v2631_v45  ;;  %v2722_v32 = vadd.f32 %v2721_v27, %v2633_v44 }
 0x45f   :  { %v4201_v43 = vadd.f32 %v9037_v58, %v4063_v41  ;;  %v4309_v1 = vmax.f32 %v4181_v26, 0.0  ;;  %4421 = vst [vmem:[%s9812_s4 + $0x130] sm:$0xff] %v4293_v34  ;;  %v2725_v48 = vadd.f32 %v2724_v50, %v2636_v56  ;;  %v4313_v8 = vmax.f32 %v4185_v38, 0.0 }
 0x460   :  { %10331 = vst [vmem:[#allocation9_spill] sm:$0xff] %v9198_v47  ;;  %v2637_v19 = vpop.f32.mrf.mxu1  ;;  %v9210_v6 = vadd.f32 %v9015_v20, %v2717_v22  ;;  %v9213_v27 = vadd.f32 %v9078_v61, %v2720_v40  ;;  %v9216_v16 = vadd.f32 %v9137_v15, %v2722_v32  ;;  %v4083_v25 = vmul.f32 %v9029_v35, %v9100_v31 }
 0x461   :  { %v2548_v14 = vpop.f32.mrf.mxu0  ;;  %4425 = vst [vmem:[%s9812_s4 + $0x150] sm:$0xff] %v4297_v52  ;;  %v4205_v24 = vadd.f32 %v9037_v58, %v4067_v18  ;;  %v4317_v17 = vmax.f32 %v4189_v55, 0.0  ;;  %v9224_v3 = vadd.f32 %v2813_v12, %v2725_v48  ;;  %v3969_v20 = vmul.f32 %v9017_v28, %v8955_v30 }
 0x462   :  { %v2638_v2 = vadd.f32 %v2637_v19, %v2548_v14  ;;  %10332 = vst [vmem:[#allocation10_spill] sm:$0xff] %v9210_v6  ;;  %v4087_v61 = vmul.f32 %v9029_v35, %v9104_v59  ;;  %v4209_v15 = vadd.f32 %v9037_v58, %v4071_v54  ;;  %v4321_v42 = vmax.f32 %v9174_v49, 0.0 }
 0x463   :  { %10333 = vst [vmem:[#allocation7_spill] sm:$0xff] %v9213_v27  ;;  %v3973_v31 = vmul.f32 %v9017_v28, %v8965_v0  ;;  %v4091_v13 = vmul.f32 %v9029_v35, %v9108_v5  ;;  %v4213_v41 = vadd.f32 %v9037_v58, %v4075_v53  ;;  %v4325_v30 = vmax.f32 %v4197_v60, 0.0 }
 0x464   :  { %4429 = vst [vmem:[%s9812_s4 + $0x170] sm:$0xff] %v4301_v23  ;;  %v3977_v59 = vmul.f32 %v9017_v28, %v8972_v36  ;;  %v4095_v18 = vmul.f32 %v9029_v35, %v9117_v29  ;;  %v4217_v54 = vadd.f32 %v9037_v58, %v4079_v11  ;;  %v4329_v10 = vmax.f32 %v4201_v43, 0.0 }
 0x465   :  { %4433 = vst [vmem:[%s9812_s4 + $0x190] sm:$0xff] %v4305_v33  ;;  %v2726_v0 = vpop.f32.mrf.mxu2  ;;  %v4099_v53 = vmul.f32 %v9029_v35, %v9121_v57  ;;  %v4221_v7 = vadd.f32 %v9037_v58, %v4083_v25  ;;  %v4333_v37 = vmax.f32 %v4205_v24, 0.0  ;;  %v4103_v28 = vmul.f32 %v9029_v35, %v9127_v62 }
 0x466   :  { %4437 = vst [vmem:[%s9812_s4 + $0x1b0] sm:$0xff] %v4309_v1  ;;  %v2815_v5 = vpop.f32.mrf.mxu3  ;;  %v2727_v36 = vadd.f32 %v2726_v0, %v2638_v2  ;;  %v4107_v29 = vmul.f32 %v9029_v35, %v3969_v20  ;;  %v4225_v9 = vadd.f32 %v9037_v58, %v4087_v61  ;;  %v4337_v11 = vmax.f32 %v4209_v15, 0.0 }
 0x467   :  { %4441 = vst [vmem:[%s9812_s4 + $0x1d0] sm:$0xff] %v4313_v8  ;;  %v4229_v38 = vadd.f32 %v9037_v58, %v4091_v13  ;;  %v4341_v21 = vmax.f32 %v4213_v41, 0.0  ;;  %v4111_v49 = vmul.f32 %v9029_v35, %v3973_v31  ;;  %v4233_v34 = vadd.f32 %v9037_v58, %v4095_v18 }
 0x468   :  { %4445 = vst [vmem:[%s9812_s4 + $0x1f0] sm:$0xff] %v4317_v17  ;;  %v2640_v26 = vpop.f32.mrf.mxu1  ;;  %v9268_v55 = vadd.f32 %v2815_v5, %v2727_v36  ;;  %v4345_v52 = vmax.f32 %v4217_v54, 0.0  ;;  %v4115_v63 = vmul.f32 %v9029_v35, %v3977_v59  ;;  %v4237_v51 = vadd.f32 %v9037_v58, %v4099_v53 }
 0x469   :  { %4449 = vst [vmem:[%s9812_s4 + $0x210] sm:$0xff] %v4321_v42  ;;  %v2551_v57 = vpop.f32.mrf.mxu0  ;;  %v4349_v45 = vmax.f32 %v4221_v7, 0.0  ;;  %v4241_v44 = vadd.f32 %v9037_v58, %v4103_v28  ;;  %v4353_v50 = vmax.f32 %v4225_v9, 0.0  ;;  %v4245_v12 = vadd.f32 %v9037_v58, %v4107_v29 }
 0x46a   :  { %4453 = vst [vmem:[%s9812_s4 + $0x230] sm:$0xff] %v4325_v30  ;;  %v2641_v62 = vadd.f32 %v2640_v26, %v2551_v57  ;;  %v4357_v60 = vmax.f32 %v4229_v38, 0.0  ;;  %v4249_v35 = vadd.f32 %v9037_v58, %v4111_v49  ;;  %v4361_v23 = vmax.f32 %v4233_v34, 0.0  ;;  %v10334_v34 = vld [vmem:[#allocation80_spill] sm:$0xff] }
 0x46b   :  { %4457 = vst [vmem:[%s9812_s4 + $0x250] sm:$0xff] %v4329_v10  ;;  %v4253_v22 = vadd.f32 %v9037_v58, %v4115_v63  ;;  %v4365_v40 = vmax.f32 %v4237_v51, 0.0  ;;  %v4369_v14 = vmax.f32 %v4241_v44, 0.0  ;;  %v4373_v1 = vmax.f32 %v4245_v12, 0.0  ;;  %v10335_v63 = vld [vmem:[#allocation85_spill] sm:$0xff] }
 0x46c   :  { %4461 = vst [vmem:[%s9812_s4 + $0x270] sm:$0xff] %v4333_v37  ;;  %v4377_v2 = vmax.f32 %v4249_v35, 0.0  ;;  %v3351_v57 = vadd.f32 %v8820_v46, %v8799_v39 }
 0x46d   :  { %4465 = vst [vmem:[%s9812_s4 + $0x290] sm:$0xff] %v4337_v11  ;;  %v2729_v33 = vpop.f32.mrf.mxu2  ;;  %v4381_v8 = vmax.f32 %v4253_v22, 0.0 }
 0x46e   :  { %4469 = vst [vmem:[%s9812_s4 + $0x2b0] sm:$0xff] %v4341_v21  ;;  %v2818_v56 = vpop.f32.mrf.mxu3  ;;  %v2730_v32 = vadd.f32 %v2729_v33, %v2641_v62  ;;  %v3352_v21 = vadd.f32 %v3351_v57, %v8848_v4 }
 0x46f   :  { %4473 = vst [vmem:[%s9812_s4 + $0x2d0] sm:$0xff] %v4345_v52 }
 0x470   :  { %4477 = vst [vmem:[%s9812_s4 + $0x2f0] sm:$0xff] %v4349_v45  ;;  %v2642_v43 = vpop.f32.mrf.mxu1  ;;  %v9302_v48 = vadd.f32 %v2818_v56, %v2730_v32  ;;  %v3353_v52 = vadd.f32 %v3352_v21, %v10334_v34  ;;  %v10336_v45 = vld [vmem:[#allocation83_spill] sm:$0xff] }
 0x471   :  { %4481 = vst [vmem:[%s9812_s4 + $0x310] sm:$0xff] %v4353_v50  ;;  %v2553_v19 = vpop.f32.mrf.mxu0  ;;  %v10338_v56 = vld [vmem:[#allocation75_spill] sm:$0xff] }
 0x472   :  { %4485 = vst [vmem:[%s9812_s4 + $0x330] sm:$0xff] %v4357_v60  ;;  %v2643_v58 = vadd.f32 %v2642_v43, %v2553_v19  ;;  %v3354_v51 = vadd.f32 %v3353_v52, %v10335_v63  ;;  %v10337_v60 = vld [vmem:[#allocation84_spill] sm:$0xff] }
 0x473   :  { %4489 = vst [vmem:[%s9812_s4 + $0x350] sm:$0xff] %v4361_v23 }
 0x474   :  { %4493 = vst [vmem:[%s9812_s4 + $0x370] sm:$0xff] %v4365_v40  ;;  %v3355_v44 = vadd.f32 %v3354_v51, %v10336_v45  ;;  %v10339_v40 = vld [vmem:[#allocation78_spill] sm:$0xff] }
 0x475   :  { %4497 = vst [vmem:[%s9812_s4 + $0x390] sm:$0xff] %v4369_v14  ;;  %v2731_v25 = vpop.f32.mrf.mxu2  ;;  %v10340_v14 = vld [vmem:[#allocation92_spill] sm:$0xff] }
 0x476   :  { %4501 = vst [vmem:[%s9812_s4 + $0x3b0] sm:$0xff] %v4373_v1  ;;  %v2820_v24 = vpop.f32.mrf.mxu3  ;;  %v2732_v17 = vadd.f32 %v2731_v25, %v2643_v58  ;;  %v3356_v35 = vadd.f32 %v3355_v44, %v10337_v60  ;;  %v10341_v58 = vld [vmem:[#allocation5_spill] sm:$0xff] }
 0x477   :  { %4505 = vst [vmem:[%s9812_s4 + $0x3d0] sm:$0xff] %v4377_v2 }
 0x478   :  { %4509 = vst [vmem:[%s9812_s4 + $0x3f0] sm:$0xff] %v4381_v8  ;;  %v2645_v61 = vpop.f32.mrf.mxu1  ;;  %v9322_v15 = vadd.f32 %v2820_v24, %v2732_v17  ;;  %v3357_v22 = vadd.f32 %v3356_v35, %v10338_v56  ;;  %v10342_v24 = vld [vmem:[#allocation6_spill] sm:$0xff] }
 0x479   :  { %v2556_v20 = vpop.f32.mrf.mxu0 }
 0x47a   :  { %v2646_v42 = vadd.f32 %v2645_v61, %v2556_v20  ;;  %v3358_v32 = vadd.f32 %v3357_v22, %v10339_v40 }
 0x47c   :  { %v3359_v19 = vadd.f32 %v3358_v32, %v10340_v14 }
 0x47d   :  { %v2734_v31 = vpop.f32.mrf.mxu2 }
 0x47e   :  { %v2823_v13 = vpop.f32.mrf.mxu3  ;;  %v2735_v41 = vadd.f32 %v2734_v31, %v2646_v42  ;;  %v3360_v2 = vadd.f32 %v3359_v19, %v10341_v58 }
 0x480   :  { %v2647_v59 = vpop.f32.mrf.mxu1  ;;  %v9324_v18 = vadd.f32 %v2823_v13, %v2735_v41  ;;  %v3361_v17 = vadd.f32 %v3360_v2, %v10342_v24 }
 0x481   :  { %v2558_v30 = vpop.f32.mrf.mxu0 }
 0x482   :  { %v3362_v20 = vadd.f32 %v3361_v17, %v9198_v47  ;;  %v2648_v51 = vadd.f32 %v2647_v59, %v2558_v30 }
 0x484   :  { %v3363_v61 = vadd.f32 %v3362_v20, %v9210_v6 }
 0x485   :  { %v2736_v54 = vpop.f32.mrf.mxu2 }
 0x486   :  { %v2825_v10 = vpop.f32.mrf.mxu3  ;;  %v3364_v13 = vadd.f32 %v3363_v61, %v9213_v27  ;;  %v2737_v22 = vadd.f32 %v2736_v54, %v2648_v51 }
 0x488   :  { %v2650_v5 = vpop.f32.mrf.mxu1  ;;  %v3365_v21 = vadd.f32 %v3364_v13, %v9216_v16  ;;  %v9346_v24 = vadd.f32 %v2825_v10, %v2737_v22 }
 0x489   :  { %v2561_v0 = vpop.f32.mrf.mxu0 }
 0x48a   :  { %v3366_v52 = vadd.f32 %v3365_v21, %v9224_v3  ;;  %v2651_v44 = vadd.f32 %v2650_v5, %v2561_v0 }
 0x48c   :  { %v3367_v35 = vadd.f32 %v3366_v52, %v9268_v55 }
 0x48d   :  { %v2739_v53 = vpop.f32.mrf.mxu2 }
 0x48e   :  { %v2828_v7 = vpop.f32.mrf.mxu3  ;;  %v3368_v2 = vadd.f32 %v3367_v35, %v9302_v48  ;;  %v2740_v17 = vadd.f32 %v2739_v53, %v2651_v44 }
 0x490   :  { %v2652_v36 = vpop.f32.mrf.mxu1  ;;  %v3369_v27 = vadd.f32 %v3368_v2, %v9322_v15  ;;  %v9349_v59 = vadd.f32 %v2828_v7, %v2740_v17 }
 0x491   :  { %v2563_v37 = vpop.f32.mrf.mxu0 }
 0x492   :  { %v2653_v20 = vadd.f32 %v2652_v36, %v2563_v37  ;;  %v3370_v30 = vadd.f32 %v3369_v27, %v9324_v18 }
 0x494   :  { %v3371_v21 = vadd.f32 %v3370_v30, %v9346_v24 }
 0x495   :  { %v2741_v28 = vpop.f32.mrf.mxu2 }
 0x496   :  { %v2830_v29 = vpop.f32.mrf.mxu3  ;;  %v2742_v13 = vadd.f32 %v2741_v28, %v2653_v20 }
 0x498   :  { %v2655_v11 = vpop.f32.mrf.mxu1  ;;  %v9352_v52 = vadd.f32 %v2830_v29, %v2742_v13 }
 0x499   :  { %v2566_v9 = vpop.f32.mrf.mxu0 }
 0x49a   :  { %v2656_v6 = vadd.f32 %v2655_v11, %v2566_v9  ;;  %v3372_v9 = vadd.f32 %v3371_v21, %v9349_v59 }
 0x49d   :  { %v2744_v26 = vpop.f32.mrf.mxu2 }
 0x49e   :  { %v2833_v38 = vpop.f32.mrf.mxu3  ;;  %v2745_v0 = vadd.f32 %v2744_v26, %v2656_v6  ;;  %v3373_v6 = vadd.f32 %v3372_v9, %v9352_v52 }
 0x4a0   :  { %v2657_v49 = vpop.f32.mrf.mxu1  ;;  %v9355_v11 = vadd.f32 %v2833_v38, %v2745_v0 }
 0x4a1   :  { %v2568_v62 = vpop.f32.mrf.mxu0 }
 0x4a2   :  { %v2658_v54 = vadd.f32 %v2657_v49, %v2568_v62  ;;  %v3374_v29 = vadd.f32 %v3373_v6, %v9355_v11 }
 0x4a5   :  { %v2746_v50 = vpop.f32.mrf.mxu2 }
 0x4a6   :  { %v2835_v12 = vpop.f32.mrf.mxu3  ;;  %v2747_v36 = vadd.f32 %v2746_v50, %v2658_v54 }
 0x4a8   :  { %v2660_v33 = vpop.f32.mrf.mxu1  ;;  %v9358_v26 = vadd.f32 %v2835_v12, %v2747_v36  ;;  %v10343_v36 = vld [vmem:[#allocation67_spill] sm:$0xff] }
 0x4a9   :  { %v2571_v23 = vpop.f32.mrf.mxu0 }
 0x4aa   :  { %v2661_v5 = vadd.f32 %v2660_v33, %v2571_v23  ;;  %v3375_v35 = vadd.f32 %v3374_v29, %v9358_v26 }
 0x4ad   :  { %v2749_v43 = vpop.f32.mrf.mxu2 }
 0x4ae   :  { %v2838_v1 = vpop.f32.mrf.mxu3  ;;  %v2750_v51 = vadd.f32 %v2749_v43, %v2661_v5 }
 0x4b0   :  { %v2662_v25 = vpop.f32.mrf.mxu1  ;;  %v9361_v49 = vadd.f32 %v2838_v1, %v2750_v51 }
 0x4b1   :  { %v2573_v8 = vpop.f32.mrf.mxu0 }
 0x4b2   :  { %v2663_v27 = vadd.f32 %v2662_v25, %v2573_v8  ;;  %v3376_v8 = vadd.f32 %v3375_v35, %v9361_v49 }
 0x4b5   :  { %v2751_v42 = vpop.f32.mrf.mxu2 }
 0x4b6   :  { %v2840_v31 = vpop.f32.mrf.mxu3  ;;  %v2752_v62 = vadd.f32 %v2751_v42, %v2663_v27 }
 0x4b8   :  { %v2665_v57 = vpop.f32.mrf.mxu1  ;;  %v9364_v22 = vadd.f32 %v2840_v31, %v2752_v62 }
 0x4b9   :  { %v2576_v41 = vpop.f32.mrf.mxu0 }
 0x4ba   :  { %v2666_v7 = vadd.f32 %v2665_v57, %v2576_v41  ;;  %v3377_v1 = vadd.f32 %v3376_v8, %v9364_v22 }
 0x4bd   :  { %v2754_v32 = vpop.f32.mrf.mxu2 }
 0x4be   :  { %v2843_v19 = vpop.f32.mrf.mxu3  ;;  %v2755_v23 = vadd.f32 %v2754_v32, %v2666_v7 }
 0x4c0   :  { %v2667_v61 = vpop.f32.mrf.mxu1  ;;  %v9367_v25 = vadd.f32 %v2843_v19, %v2755_v23 }
 0x4c1   :  { %v2578_v47 = vpop.f32.mrf.mxu0 }
 0x4c2   :  { %v2668_v50 = vadd.f32 %v2667_v61, %v2578_v47  ;;  %v3378_v47 = vadd.f32 %v3377_v1, %v9367_v25 }
 0x4c5   :  { %v2756_v53 = vpop.f32.mrf.mxu2 }
 0x4c6   :  { %v2845_v37 = vpop.f32.mrf.mxu3  ;;  %v2757_v43 = vadd.f32 %v2756_v53, %v2668_v50 }
 0x4c8   :  { %v2670_v28 = vpop.f32.mrf.mxu1  ;;  %v9370_v57 = vadd.f32 %v2845_v37, %v2757_v43 }
 0x4c9   :  { %v2581_v10 = vpop.f32.mrf.mxu0 }
 0x4ca   :  { %v2671_v33 = vadd.f32 %v2670_v28, %v2581_v10  ;;  %v3379_v31 = vadd.f32 %v3378_v47, %v9370_v57 }
 0x4cd   :  { %v2759_v44 = vpop.f32.mrf.mxu2 }
 0x4ce   :  { %v2848_v38 = vpop.f32.mrf.mxu3  ;;  %v2760_v12 = vadd.f32 %v2759_v44, %v2671_v33 }
 0x4d0   :  { %v2672_v41 = vpop.f32.mrf.mxu1  ;;  %v9373_v32 = vadd.f32 %v2848_v38, %v2760_v12 }
 0x4d1   :  { %v2583_v42 = vpop.f32.mrf.mxu0 }
 0x4d2   :  { %v2673_v2 = vadd.f32 %v2672_v41, %v2583_v42  ;;  %v3380_v19 = vadd.f32 %v3379_v31, %v9373_v32  ;;  %v10344_v41 = vld [vmem:[#allocation6_spill] sm:$0xff] }
 0x4d5   :  { %v2761_v17 = vpop.f32.mrf.mxu2 }
 0x4d6   :  { %v2762_v20 = vadd.f32 %v2761_v17, %v2673_v2  ;;  %v2850_v61 = vpop.f32.mrf.mxu3  ;;  %v10345_v2 = vld [vmem:[#allocation9_spill] sm:$0xff] }
 0x4d8   :  { %v9377_v13 = vadd.f32 %v2850_v61, %v2762_v20  ;;  %v10346_v20 = vld [vmem:[#allocation10_spill] sm:$0xff] }
 0x4da   :  { %v3381_v30 = vadd.f32 %v3380_v19, %v9377_v13 }
 0x4dc   :  { %v3382_v0 = vrot.slane %v3381_v30, 4 }
 0x4de   :  { %v3383_v54 = vadd.f32 %v3382_v0, %v3381_v30  ;;  %v10347_v0 = vld [vmem:[#allocation7_spill] sm:$0xff] }
 0x4e0   :  { %v3384_v5 = vrot.slane %v3383_v54, 2 }
 0x4e2   :  { %v3385_v21 = vadd.f32 %v3384_v5, %v3383_v54 }
 0x4e4   :  { %v3386_v53 = vrot.slane %v3385_v21, 1 }
 0x4e6   :  { %v3387_v37 = vadd.f32 %v3386_v53, %v3385_v21 }
 0x4e8   :  { %v9381_v9 = vmul.f32 %v10343_v36, %v3387_v37 }
 0x4ea   :  { %v9385_v10 = vsub.f32 %v8799_v39, %v9381_v9  ;;  %v9389_v28 = vsub.f32 %v8820_v46, %v9381_v9  ;;  %v9393_v51 = vsub.f32 %v8848_v4, %v9381_v9  ;;  %v9401_v6 = vsub.f32 %v10334_v34, %v9381_v9 }
 0x4eb   :  { %v9405_v39 = vsub.f32 %v10335_v63, %v9381_v9  ;;  %v9411_v4 = vsub.f32 %v10336_v45, %v9381_v9  ;;  %v9417_v34 = vsub.f32 %v10337_v60, %v9381_v9  ;;  %v9423_v33 = vsub.f32 %v10338_v56, %v9381_v9 }
 0x4ec   :  { %v3530_v27 = vmul.f32 %v9385_v10, %v9385_v10  ;;  %v3534_v7 = vmul.f32 %v9389_v28, %v9389_v28  ;;  %v3538_v46 = vmul.f32 %v9393_v51, %v9393_v51  ;;  %v3542_v29 = vmul.f32 %v9401_v6, %v9401_v6 }
 0x4ed   :  { %v3546_v63 = vmul.f32 %v9405_v39, %v9405_v39  ;;  %v3550_v45 = vmul.f32 %v9411_v4, %v9411_v4  ;;  %v9429_v38 = vsub.f32 %v10339_v40, %v9381_v9  ;;  %v3554_v60 = vmul.f32 %v9417_v34, %v9417_v34 }
 0x4ee   :  { %v3766_v62 = vadd.f32 %v3534_v7, %v3530_v27  ;;  %v9435_v43 = vsub.f32 %v10340_v14, %v9381_v9  ;;  %v3558_v56 = vmul.f32 %v9423_v33, %v9423_v33  ;;  %v9441_v12 = vsub.f32 %v10341_v58, %v9381_v9 }
 0x4ef   :  { %v3562_v40 = vmul.f32 %v9429_v38, %v9429_v38  ;;  %v9447_v1 = vsub.f32 %v10344_v41, %v9381_v9  ;;  %v9453_v17 = vsub.f32 %v10345_v2, %v9381_v9  ;;  %v9459_v61 = vsub.f32 %v10346_v20, %v9381_v9 }
 0x4f0   :  { %v3767_v23 = vadd.f32 %v3766_v62, %v3538_v46  ;;  %v3566_v14 = vmul.f32 %v9435_v43, %v9435_v43  ;;  %v3570_v58 = vmul.f32 %v9441_v12, %v9441_v12  ;;  %v9465_v54 = vsub.f32 %v10347_v0, %v9381_v9 }
 0x4f1   :  { %v3574_v19 = vmul.f32 %v9447_v1, %v9447_v1  ;;  %v3578_v5 = vmul.f32 %v9453_v17, %v9453_v17  ;;  %v9471_v53 = vsub.f32 %v9216_v16, %v9381_v9  ;;  %v3582_v37 = vmul.f32 %v9459_v61, %v9459_v61 }
 0x4f2   :  { %v3768_v50 = vadd.f32 %v3767_v23, %v3542_v29  ;;  %v9477_v7 = vsub.f32 %v9224_v3, %v9381_v9  ;;  %v3586_v46 = vmul.f32 %v9465_v54, %v9465_v54  ;;  %v9483_v29 = vsub.f32 %v9268_v55, %v9381_v9 }
 0x4f3   :  { %v3590_v16 = vmul.f32 %v9471_v53, %v9471_v53  ;;  %v9519_v41 = vsub.f32 %v9352_v52, %v9381_v9  ;;  %v9537_v20 = vsub.f32 %v9361_v49, %v9381_v9 }
 0x4f4   :  { %v3769_v44 = vadd.f32 %v3768_v50, %v3546_v63  ;;  %v9489_v63 = vsub.f32 %v9302_v48, %v9381_v9  ;;  %v3594_v3 = vmul.f32 %v9477_v7, %v9477_v7  ;;  %v3598_v55 = vmul.f32 %v9483_v29, %v9483_v29 }
 0x4f5   :  { %v3622_v52 = vmul.f32 %v9519_v41, %v9519_v41  ;;  %v3634_v49 = vmul.f32 %v9537_v20, %v9537_v20 }
 0x4f6   :  { %v3770_v35 = vadd.f32 %v3769_v44, %v3550_v45  ;;  %v9495_v45 = vsub.f32 %v9322_v15, %v9381_v9  ;;  %v3602_v48 = vmul.f32 %v9489_v63, %v9489_v63 }
 0x4f8   :  { %v3771_v8 = vadd.f32 %v3770_v35, %v3554_v60  ;;  %v9501_v60 = vsub.f32 %v9324_v18, %v9381_v9  ;;  %v3606_v15 = vmul.f32 %v9495_v45, %v9495_v45 }
 0x4fa   :  { %v3772_v42 = vadd.f32 %v3771_v8, %v3558_v56  ;;  %v9507_v56 = vsub.f32 %v9346_v24, %v9381_v9  ;;  %v3610_v18 = vmul.f32 %v9501_v60, %v9501_v60 }
 0x4fc   :  { %v3773_v47 = vadd.f32 %v3772_v42, %v3562_v40  ;;  %v9513_v40 = vsub.f32 %v9349_v59, %v9381_v9  ;;  %v3614_v24 = vmul.f32 %v9507_v56, %v9507_v56 }
 0x4fe   :  { %v3774_v31 = vadd.f32 %v3773_v47, %v3566_v14  ;;  %v9525_v47 = vsub.f32 %v9355_v11, %v9381_v9  ;;  %v3618_v59 = vmul.f32 %v9513_v40, %v9513_v40 }
 0x500   :  { %v3775_v30 = vadd.f32 %v3774_v31, %v3570_v58  ;;  %v9531_v58 = vsub.f32 %v9358_v26, %v9381_v9  ;;  %v3626_v11 = vmul.f32 %v9525_v47, %v9525_v47 }
 0x502   :  { %v3776_v21 = vadd.f32 %v3775_v30, %v3574_v19  ;;  %v9543_v30 = vsub.f32 %v9364_v22, %v9381_v9  ;;  %v3630_v26 = vmul.f32 %v9531_v58, %v9531_v58 }
 0x504   :  { %v3777_v27 = vadd.f32 %v3776_v21, %v3578_v5  ;;  %v9549_v5 = vsub.f32 %v9367_v25, %v9381_v9  ;;  %v3638_v22 = vmul.f32 %v9543_v30, %v9543_v30 }
 0x506   :  { %v3778_v62 = vadd.f32 %v3777_v27, %v3582_v37  ;;  %v9555_v37 = vsub.f32 %v9370_v57, %v9381_v9  ;;  %v3642_v25 = vmul.f32 %v9549_v5, %v9549_v5 }
 0x508   :  { %v3779_v23 = vadd.f32 %v3778_v62, %v3586_v46  ;;  %v9561_v46 = vsub.f32 %v9373_v32, %v9381_v9  ;;  %v3646_v57 = vmul.f32 %v9555_v37, %v9555_v37 }
 0x50a   :  { %v3780_v50 = vadd.f32 %v3779_v23, %v3590_v16  ;;  %v9567_v16 = vsub.f32 %v9377_v13, %v9381_v9 }
 0x50c   :  { %v3781_v44 = vadd.f32 %v3780_v50, %v3594_v3  ;;  %v3650_v3 = vmul.f32 %v9561_v46, %v9561_v46  ;;  %v3654_v32 = vmul.f32 %v9567_v16, %v9567_v16 }
 0x50e   :  { %v3782_v35 = vadd.f32 %v3781_v44, %v3598_v55 }
 0x510   :  { %v3783_v8 = vadd.f32 %v3782_v35, %v3602_v48 }
 0x512   :  { %v3784_v42 = vadd.f32 %v3783_v8, %v3606_v15 }
 0x514   :  { %v3785_v14 = vadd.f32 %v3784_v42, %v3610_v18 }
 0x516   :  { %v3786_v2 = vadd.f32 %v3785_v14, %v3614_v24 }
 0x518   :  { %v3787_v31 = vadd.f32 %v3786_v2, %v3618_v59 }
 0x51a   :  { %v3788_v19 = vadd.f32 %v3787_v31, %v3622_v52 }
 0x51c   :  { %v3789_v0 = vadd.f32 %v3788_v19, %v3626_v11 }
 0x51e   :  { %v3790_v21 = vadd.f32 %v3789_v0, %v3630_v26  ;;  %v10348_v0 = vld [vmem:[#allocation3_spill] sm:$0xff] }
 0x520   :  { %v3791_v27 = vadd.f32 %v3790_v21, %v3634_v49  ;;  %v9585_v49 = vperm.slane %v10348_v0, 3 }
 0x522   :  { %v3792_v62 = vadd.f32 %v3791_v27, %v3638_v22 }
 0x524   :  { %v3793_v23 = vadd.f32 %v3792_v62, %v3642_v25  ;;  %v10349_v25 = vld [vmem:[#allocation4_spill] sm:$0xff] }
 0x526   :  { %v3794_v50 = vadd.f32 %v3793_v23, %v3646_v57 }
 0x528   :  { %v3795_v55 = vadd.f32 %v3794_v50, %v3650_v3 }
 0x52a   :  { %v3796_v44 = vadd.f32 %v3795_v55, %v3654_v32 }
 0x52c   :  { %v3797_v48 = vrot.slane %v3796_v44, 4 }
 0x52e   :  { %v3798_v35 = vadd.f32 %v3797_v48, %v3796_v44 }
 0x530   :  { %v3799_v15 = vrot.slane %v3798_v35, 2 }
 0x532   :  { %v3800_v8 = vadd.f32 %v3799_v15, %v3798_v35 }
 0x534   :  { %v3801_v18 = vrot.slane %v3800_v8, 1 }
 0x536   :  { %v3802_v13 = vadd.f32 %v3801_v18, %v3800_v8 }
 0x538   :  { %v3806_v9 = vmul.f32 %v3802_v13, %v10343_v36 }
 0x53a   :  { %v3810_v42 = vadd.f32 1e-05, %v3806_v9 }
 0x53c   :  { %5484 = vrsqrt.f32 %v3810_v42  ;;  %vm3847_vm11 = vweird.f32 %v3810_v42 }
 0x542   :  { %v5485_v24 = vpop.eup %5484 }
 0x543   :  { %v3842_v14 = vmul.f32 %v5485_v24, %v3810_v42  ;;  %vm3848_vm10 = vweird.f32 %v5485_v24 }
 0x544   :  { %vm3849_vm12 = vmor %vm3847_vm11, %vm3848_vm10 }
 0x545   :  { %v3843_v59 = vmul.f32 %v5485_v24, %v3842_v14 }
 0x547   :  { %v3844_v2 = vmul.f32 0.5, %v3843_v59 }
 0x549   :  { %v3845_v52 = vsub.f32 1.5, %v3844_v2 }
 0x54b   :  { %v3846_v31 = vmul.f32 %v5485_v24, %v3845_v52 }
 0x54d   :  { %v9576_v11 = vsel %vm3849_vm12, %v5485_v24, %v3846_v31 }
 0x54e   :  { %v3854_v19 = vmul.f32 %v9576_v11, %v9385_v10  ;;  %v3858_v26 = vmul.f32 %v9576_v11, %v9389_v28  ;;  %v3862_v36 = vmul.f32 %v9576_v11, %v9393_v51  ;;  %v3866_v21 = vmul.f32 %v9576_v11, %v9401_v6 }
 0x54f   :  { %v3870_v22 = vmul.f32 %v9576_v11, %v9405_v39  ;;  %v3874_v27 = vmul.f32 %v9576_v11, %v9411_v4  ;;  %v9594_v10 = vperm.slane %v10349_v25, 3  ;;  %v3878_v28 = vmul.f32 %v9576_v11, %v9417_v34 }
 0x550   :  { %v3992_v51 = vmul.f32 %v9585_v49, %v3854_v19  ;;  %v3996_v62 = vmul.f32 %v9585_v49, %v3858_v26  ;;  %v4000_v57 = vmul.f32 %v9585_v49, %v3862_v36  ;;  %v3882_v6 = vmul.f32 %v9576_v11, %v9423_v33 }
 0x551   :  { %v4004_v39 = vmul.f32 %v9585_v49, %v3866_v21  ;;  %v3886_v4 = vmul.f32 %v9576_v11, %v9429_v38  ;;  %v4008_v23 = vmul.f32 %v9585_v49, %v3870_v22  ;;  %v3890_v3 = vmul.f32 %v9576_v11, %v9435_v43 }
 0x552   :  { %v3894_v34 = vmul.f32 %v9576_v11, %v9441_v12  ;;  %v4012_v50 = vmul.f32 %v9585_v49, %v3874_v27  ;;  %v4016_v32 = vmul.f32 %v9585_v49, %v3878_v28  ;;  %v4130_v55 = vadd.f32 %v9594_v10, %v3992_v51 }
 0x553   :  { %v4134_v33 = vadd.f32 %v9594_v10, %v3996_v62  ;;  %v4138_v44 = vadd.f32 %v9594_v10, %v4000_v57  ;;  %v3898_v38 = vmul.f32 %v9576_v11, %v9447_v1  ;;  %v4020_v48 = vmul.f32 %v9585_v49, %v3882_v6 }
 0x554   :  { %v4142_v43 = vadd.f32 %v9594_v10, %v4004_v39  ;;  %v3902_v12 = vmul.f32 %v9576_v11, %v9453_v17  ;;  %v3906_v35 = vmul.f32 %v9576_v11, %v9459_v61  ;;  %v4024_v15 = vmul.f32 %v9585_v49, %v3886_v4 }
 0x555   :  { %v4146_v8 = vadd.f32 %v9594_v10, %v4008_v23  ;;  %v3910_v18 = vmul.f32 %v9576_v11, %v9465_v54  ;;  %v4028_v13 = vmul.f32 %v9585_v49, %v3890_v3  ;;  %v4032_v1 = vmul.f32 %v9585_v49, %v3894_v34 }
 0x556   :  { %v4150_v9 = vadd.f32 %v9594_v10, %v4012_v50  ;;  %v4154_v42 = vadd.f32 %v9594_v10, %v4016_v32  ;;  %v4258_v24 = vmax.f32 %v4130_v55, 0.0  ;;  %v4262_v17 = vmax.f32 %v4134_v33, 0.0 }
 0x557   :  { %v4266_v14 = vmax.f32 %v4138_v44, 0.0  ;;  %v3914_v61 = vmul.f32 %v9576_v11, %v9471_v53  ;;  %v4036_v59 = vmul.f32 %v9585_v49, %v3898_v38  ;;  %v4158_v2 = vadd.f32 %v9594_v10, %v4020_v48 }
 0x558   :  { %v4270_v52 = vmax.f32 %v4142_v43, 0.0  ;;  %v3918_v54 = vmul.f32 %v9576_v11, %v9477_v7  ;;  %v4040_v31 = vmul.f32 %v9585_v49, %v3902_v12  ;;  %v4162_v19 = vadd.f32 %v9594_v10, %v4024_v15  ;;  %4386 = vst [vmem:[%s9812_s4 + $0x18] sm:$0xff] %v4258_v24 }
 0x559   :  { %v4274_v26 = vmax.f32 %v4146_v8, 0.0  ;;  %v3922_v53 = vmul.f32 %v9576_v11, %v9483_v29  ;;  %v4044_v36 = vmul.f32 %v9585_v49, %v3906_v35  ;;  %v4166_v0 = vadd.f32 %v9594_v10, %v4028_v13  ;;  %4390 = vst [vmem:[%s9812_s4 + $0x38] sm:$0xff] %v4262_v17 }
 0x55a   :  { %v4278_v21 = vmax.f32 %v4150_v9, 0.0  ;;  %v3926_v7 = vmul.f32 %v9576_v11, %v9489_v63  ;;  %v4048_v22 = vmul.f32 %v9585_v49, %v3910_v18  ;;  %v4170_v27 = vadd.f32 %v9594_v10, %v4032_v1  ;;  %4394 = vst [vmem:[%s9812_s4 + $0x58] sm:$0xff] %v4266_v14 }
 0x55b   :  { %v4282_v25 = vmax.f32 %v4154_v42, 0.0  ;;  %v3930_v29 = vmul.f32 %v9576_v11, %v9495_v45  ;;  %v4052_v28 = vmul.f32 %v9585_v49, %v3914_v61  ;;  %v4174_v51 = vadd.f32 %v9594_v10, %v4036_v59  ;;  %4398 = vst [vmem:[%s9812_s4 + $0x78] sm:$0xff] %v4270_v52 }
 0x55c   :  { %v4286_v62 = vmax.f32 %v4158_v2, 0.0  ;;  %v3934_v63 = vmul.f32 %v9576_v11, %v9501_v60  ;;  %v4056_v57 = vmul.f32 %v9585_v49, %v3918_v54  ;;  %v4178_v6 = vadd.f32 %v9594_v10, %v4040_v31  ;;  %4402 = vst [vmem:[%s9812_s4 + $0x98] sm:$0xff] %v4274_v26 }
 0x55d   :  { %v4290_v39 = vmax.f32 %v4162_v19, 0.0  ;;  %v3938_v45 = vmul.f32 %v9576_v11, %v9507_v56  ;;  %v4060_v4 = vmul.f32 %v9585_v49, %v3922_v53  ;;  %v4182_v23 = vadd.f32 %v9594_v10, %v4044_v36  ;;  %4406 = vst [vmem:[%s9812_s4 + $0xb8] sm:$0xff] %v4278_v21 }
 0x55e   :  { %v4294_v3 = vmax.f32 %v4166_v0, 0.0  ;;  %v3942_v60 = vmul.f32 %v9576_v11, %v9513_v40  ;;  %v4064_v34 = vmul.f32 %v9585_v49, %v3926_v7  ;;  %v4186_v50 = vadd.f32 %v9594_v10, %v4048_v22  ;;  %4410 = vst [vmem:[%s9812_s4 + $0xd8] sm:$0xff] %v4282_v25 }
 0x55f   :  { %v4298_v32 = vmax.f32 %v4170_v27, 0.0  ;;  %v3946_v56 = vmul.f32 %v9576_v11, %v9519_v41  ;;  %v4068_v55 = vmul.f32 %v9585_v49, %v3930_v29  ;;  %v4190_v33 = vadd.f32 %v9594_v10, %v4052_v28  ;;  %4414 = vst [vmem:[%s9812_s4 + $0xf8] sm:$0xff] %v4286_v62 }
 0x560   :  { %v4302_v44 = vmax.f32 %v4174_v51, 0.0  ;;  %v3950_v40 = vmul.f32 %v9576_v11, %v9525_v47  ;;  %v4072_v38 = vmul.f32 %v9585_v49, %v3934_v63  ;;  %v4194_v48 = vadd.f32 %v9594_v10, %v4056_v57  ;;  %4418 = vst [vmem:[%s9812_s4 + $0x118] sm:$0xff] %v4290_v39 }
 0x561   :  { %v4306_v43 = vmax.f32 %v4178_v6, 0.0  ;;  %v3954_v41 = vmul.f32 %v9576_v11, %v9531_v58  ;;  %v4076_v12 = vmul.f32 %v9585_v49, %v3938_v45  ;;  %v4198_v35 = vadd.f32 %v9594_v10, %v4060_v4  ;;  %4422 = vst [vmem:[%s9812_s4 + $0x138] sm:$0xff] %v4294_v3 }
 0x562   :  { %v4310_v15 = vmax.f32 %v4182_v23, 0.0  ;;  %v3958_v47 = vmul.f32 %v9576_v11, %v9537_v20  ;;  %v4080_v8 = vmul.f32 %v9585_v49, %v3942_v60  ;;  %v4202_v18 = vadd.f32 %v9594_v10, %v4064_v34  ;;  %4426 = vst [vmem:[%s9812_s4 + $0x158] sm:$0xff] %v4298_v32 }
 0x563   :  { %v4314_v13 = vmax.f32 %v4186_v50, 0.0  ;;  %v3962_v58 = vmul.f32 %v9576_v11, %v9543_v30  ;;  %v4084_v1 = vmul.f32 %v9585_v49, %v3946_v56  ;;  %v4206_v9 = vadd.f32 %v9594_v10, %v4068_v55  ;;  %4430 = vst [vmem:[%s9812_s4 + $0x178] sm:$0xff] %v4302_v44 }
 0x564   :  { %v4318_v42 = vmax.f32 %v4190_v33, 0.0  ;;  %v3966_v20 = vmul.f32 %v9576_v11, %v9549_v5  ;;  %v4088_v24 = vmul.f32 %v9585_v49, %v3950_v40  ;;  %v4210_v17 = vadd.f32 %v9594_v10, %v4072_v38  ;;  %4434 = vst [vmem:[%s9812_s4 + $0x198] sm:$0xff] %v4306_v43 }
 0x565   :  { %v4322_v14 = vmax.f32 %v4194_v48, 0.0  ;;  %v3970_v30 = vmul.f32 %v9576_v11, %v9555_v37  ;;  %v4092_v61 = vmul.f32 %v9585_v49, %v3954_v41  ;;  %v4214_v59 = vadd.f32 %v9594_v10, %v4076_v12  ;;  %4438 = vst [vmem:[%s9812_s4 + $0x1b8] sm:$0xff] %v4310_v15 }
 0x566   :  { %v4326_v2 = vmax.f32 %v4198_v35, 0.0  ;;  %v3974_v5 = vmul.f32 %v9576_v11, %v9561_v46  ;;  %v4096_v52 = vmul.f32 %v9585_v49, %v3958_v47  ;;  %v4218_v54 = vadd.f32 %v9594_v10, %v4080_v8  ;;  %4442 = vst [vmem:[%s9812_s4 + $0x1d8] sm:$0xff] %v4314_v13 }
 0x567   :  { %v4330_v31 = vmax.f32 %v4202_v18, 0.0  ;;  %v3978_v37 = vmul.f32 %v9576_v11, %v9567_v16  ;;  %v4100_v19 = vmul.f32 %v9585_v49, %v3962_v58  ;;  %v4222_v26 = vadd.f32 %v9594_v10, %v4084_v1  ;;  %4446 = vst [vmem:[%s9812_s4 + $0x1f8] sm:$0xff] %v4318_v42 }
 0x568   :  { %v4334_v53 = vmax.f32 %v4206_v9, 0.0  ;;  %v4104_v46 = vmul.f32 %v9585_v49, %v3966_v20  ;;  %v4226_v36 = vadd.f32 %v9594_v10, %v4088_v24  ;;  %v4338_v0 = vmax.f32 %v4210_v17, 0.0  ;;  %4450 = vst [vmem:[%s9812_s4 + $0x218] sm:$0xff] %v4322_v14 }
 0x569   :  { %v4108_v16 = vmul.f32 %v9585_v49, %v3970_v30  ;;  %v4230_v11 = vadd.f32 %v9594_v10, %v4092_v61  ;;  %v4342_v21 = vmax.f32 %v4214_v59, 0.0  ;;  %4454 = vst [vmem:[%s9812_s4 + $0x238] sm:$0xff] %v4326_v2  ;;  %v4112_v7 = vmul.f32 %v9585_v49, %v3974_v5 }
 0x56a   :  { %v4234_v22 = vadd.f32 %v9594_v10, %v4096_v52  ;;  %v4346_v27 = vmax.f32 %v4218_v54, 0.0  ;;  %4458 = vst [vmem:[%s9812_s4 + $0x258] sm:$0xff] %v4330_v31  ;;  %v4116_v25 = vmul.f32 %v9585_v49, %v3978_v37  ;;  %v4238_v29 = vadd.f32 %v9594_v10, %v4100_v19 }
 0x56b   :  { %v4350_v28 = vmax.f32 %v4222_v26, 0.0  ;;  %4462 = vst [vmem:[%s9812_s4 + $0x278] sm:$0xff] %v4334_v53  ;;  %v4242_v51 = vadd.f32 %v9594_v10, %v4104_v46  ;;  %v4354_v62 = vmax.f32 %v4226_v36, 0.0  ;;  %v4246_v63 = vadd.f32 %v9594_v10, %v4108_v16 }
 0x56c   :  { %4466 = vst [vmem:[%s9812_s4 + $0x298] sm:$0xff] %v4338_v0  ;;  %v4358_v57 = vmax.f32 %v4230_v11, 0.0  ;;  %v4250_v49 = vadd.f32 %v9594_v10, %v4112_v7  ;;  %v4362_v6 = vmax.f32 %v4234_v22, 0.0  ;;  %v4254_v39 = vadd.f32 %v9594_v10, %v4116_v25 }
 0x56d   :  { %4470 = vst [vmem:[%s9812_s4 + $0x2b8] sm:$0xff] %v4342_v21  ;;  %v4366_v45 = vmax.f32 %v4238_v29, 0.0  ;;  %v4370_v4 = vmax.f32 %v4242_v51, 0.0  ;;  %v4374_v23 = vmax.f32 %v4246_v63, 0.0 }
 0x56e   :  { %4474 = vst [vmem:[%s9812_s4 + $0x2d8] sm:$0xff] %v4346_v27  ;;  %v4378_v3 = vmax.f32 %v4250_v49, 0.0  ;;  %v4382_v10 = vmax.f32 %v4254_v39, 0.0 }
 0x56f   :  { %4478 = vst [vmem:[%s9812_s4 + $0x2f8] sm:$0xff] %v4350_v28 }
 0x570   :  { %4482 = vst [vmem:[%s9812_s4 + $0x318] sm:$0xff] %v4354_v62 }
 0x571   :  { %4486 = vst [vmem:[%s9812_s4 + $0x338] sm:$0xff] %v4358_v57 }
 0x572   :  { %4490 = vst [vmem:[%s9812_s4 + $0x358] sm:$0xff] %v4362_v6 }
 0x573   :  { %4494 = vst [vmem:[%s9812_s4 + $0x378] sm:$0xff] %v4366_v45 }
 0x574   :  { %4498 = vst [vmem:[%s9812_s4 + $0x398] sm:$0xff] %v4370_v4 }
 0x575   :  { %4502 = vst [vmem:[%s9812_s4 + $0x3b8] sm:$0xff] %v4374_v23 }
 0x576   :  { %4506 = vst [vmem:[%s9812_s4 + $0x3d8] sm:$0xff] %v4378_v3 }
 0x577   :  { %4510 = vst [vmem:[%s9812_s4 + $0x3f8] sm:$0xff] %v4382_v10 }

</bundles_post_ra>
